<compile_context>
chip_gen: v6e
topology: v6e:2x2x1
jax: 0.10.0
libtpu: 0.0.40
codegen_flags: <defaults>
</compile_context>

<pallas_src>
import functools

import jax
import jax.numpy as jnp
from jax.experimental import pallas as pl
from jax.experimental.pallas import tpu as pltpu


# ---------------------------------------------------------------------------
# Pallas kernel: fused sum_p(x_p @ w_p) + shift, optional ReLU
# ---------------------------------------------------------------------------
def _fused_matmul_kernel(*refs, n_pairs, relu):
    o_ref = refs[-1]
    shift_ref = refs[-2]
    y = jnp.dot(refs[0][...], refs[1][...], preferred_element_type=jnp.float32)
    for p in range(1, n_pairs):
        y = y + jnp.dot(refs[2 * p][...], refs[2 * p + 1][...],
                        preferred_element_type=jnp.float32)
    y = y + shift_ref[...]                      # (1, Ncp) broadcast over rows
    if relu:
        y = jnp.maximum(y, 0.0)
    o_ref[...] = y.astype(o_ref.dtype)


def _round_up(x, m):
    return ((x + m - 1) // m) * m


def _pick_tm(m, tm_max=512):
    """Row tile: large tiles (low per-step overhead); >=2 blocks on big layers
    so both v7x TensorCores get work; tiny layers use one full block."""
    m8 = _round_up(max(m, 1), 8)
    if m8 <= 256:
        return m8
    if m8 <= 2 * tm_max:
        return _round_up(-(-m8 // 2), 16)
    return tm_max


def fused_matmul(pairs, shift, *, relu, out_dtype=jnp.bfloat16, tm_max=512):
    """out[m, n] = act( sum_p x_p[m, :] @ w_p[:, n] + shift[n] ).

    pairs: list of (x2d (M, K_p), w2d (K_p, Nc)).  Operands are cast to bf16
    (f32 MXU accumulation); Nc is padded to a multiple of 128 so the output
    store is lane-dense; padding is sliced off before returning.
    """
    M = pairs[0][0].shape[0]
    Nc = pairs[0][1].shape[1]
    Ncp = _round_up(Nc, 128)
    tm = _pick_tm(M, tm_max)
    Mp = _round_up(M, tm)

    ins, in_specs, ks = [], [], []
    for x2d, w2d in pairs:
        K = x2d.shape[1]
        assert x2d.shape[0] == M and w2d.shape == (K, Nc)
        x2d = x2d.astype(jnp.bfloat16)
        if Mp != M:
            x2d = jnp.pad(x2d, ((0, Mp - M), (0, 0)))
        w2d = w2d.astype(jnp.bfloat16)
        if Ncp != Nc:
            w2d = jnp.pad(w2d, ((0, 0), (0, Ncp - Nc)))
        ins += [x2d, w2d]
        in_specs += [pl.BlockSpec((tm, K), lambda i: (i, 0)),
                     pl.BlockSpec((K, Ncp), lambda i: (0, 0))]
        ks.append(K)

    shift2 = shift.astype(jnp.float32).reshape(Nc)
    if Ncp != Nc:
        shift2 = jnp.pad(shift2, (0, Ncp - Nc))
    ins.append(shift2.reshape(1, Ncp))
    in_specs.append(pl.BlockSpec((1, Ncp), lambda i: (0, 0)))

    # Scoped-VMEM budget: double-buffered inputs/outputs + headroom, clamped
    # to v7x's 64 MiB physical VMEM.
    out_isz = jnp.dtype(out_dtype).itemsize
    vmem = 2 * tm * Ncp * out_isz + 2 * Ncp * 4
    for K in ks:
        vmem += 2 * 2 * (tm * K + K * Ncp)
    vmem_limit = int(min(64 * 1024 * 1024, max(2 * vmem, 16 * 1024 * 1024)))

    out = pl.pallas_call(
        functools.partial(_fused_matmul_kernel, n_pairs=len(pairs), relu=relu),
        grid=(Mp // tm,),
        in_specs=in_specs,
        out_specs=pl.BlockSpec((tm, Ncp), lambda i: (i, 0)),
        out_shape=jax.ShapeDtypeStruct((Mp, Ncp), out_dtype),
        compiler_params=pltpu.CompilerParams(
            dimension_semantics=("parallel",),
            vmem_limit_bytes=vmem_limit),
    )(*ins)
    return out[:M, :Nc]


# ---------------------------------------------------------------------------
# im2col glue + conv wrappers (conv / transposed conv share the Pallas kernel)
# ---------------------------------------------------------------------------
def _im2col(x, kh, kw, stride=1, pad=0):
    """x: (N,H,W,C) -> patches (N,Ho,Wo, kh*kw*C); feature order (ky, kx, c)."""
    N, H, W, C = x.shape
    if pad > 0:
        x = jnp.pad(x, ((0, 0), (pad, pad), (pad, pad), (0, 0)))
    Hp, Wp = H + 2 * pad, W + 2 * pad
    Ho = (Hp - kh) // stride + 1
    Wo = (Wp - kw) // stride + 1
    cols = []
    for i in range(kh):
        for j in range(kw):
            cols.append(x[:, i:i + stride * (Ho - 1) + 1:stride,
                             j:j + stride * (Wo - 1) + 1:stride, :])
    return jnp.concatenate(cols, axis=-1), Ho, Wo


def conv2d(x, w, shift, *, scale=None, stride=1, pad=0, relu=True,
           skip=None, out_dtype=jnp.bfloat16):
    """x NHWC; w torch layout (Cout, Cin_total, KH, KW).

    Optional BN scale is folded into w.  If `skip` is given, this computes
    conv(concat([x, skip], channel)) with the concat fused as a second
    (patches, weight-slice) matmul operand inside the kernel.
    """
    Cout, Cin_total, KH, KW = w.shape
    if scale is not None:
        w = w * scale[:, None, None, None]
    parts = [x] if skip is None else [x, skip]
    pairs, c0 = [], 0
    Ho = Wo = None
    for t in parts:
        C = t.shape[-1]
        patches, Ho, Wo = _im2col(t, KH, KW, stride=stride, pad=pad)
        wmat = jnp.transpose(w[:, c0:c0 + C], (2, 3, 1, 0)).reshape(KH * KW * C, Cout)
        pairs.append((patches.reshape(-1, KH * KW * C), wmat))
        c0 += C
    assert c0 == Cin_total
    y = fused_matmul(pairs, shift, relu=relu, out_dtype=out_dtype)
    return y.reshape(x.shape[0], Ho, Wo, Cout)


# Sub-pixel taps: for output phase a (row parity), window-row ty of the 3x3
# window over the 1-padded input maps to transposed-kernel row kh:
#   a=0: (ty=0 -> kh=3), (ty=1 -> kh=1);   a=1: (ty=1 -> kh=2), (ty=2 -> kh=0)
_CONVT_TAPS = {0: ((0, 3), (1, 1)), 1: ((1, 2), (2, 0))}


def conv_transpose2d_s2k4p1(x, wt, scale, shift, *, relu=True,
                            out_dtype=jnp.bfloat16):
    """PyTorch ConvTranspose2d(kernel=4, stride=2, padding=1); wt (Cin,Cout,4,4).

    Sub-pixel decomposition: output pixel (2i+a, 2j+b) is a 2x2 stride-1 conv
    of x.  All four (a, b) phases are produced by ONE matmul over 3x3 windows
    of the 1-padded input against a tap-scattered (9*Cin, 4*Cout) weight, then
    depth-to-space interleaved — no zero-dilated patches.
    """
    Cin, Cout, _, _ = wt.shape
    N, H, W, _ = x.shape

    rhs = jnp.zeros((3, 3, Cin, 2, 2, Cout), jnp.float32)
    for a in (0, 1):
        for b in (0, 1):
            for ty, kh in _CONVT_TAPS[a]:
                for tx, kw_ in _CONVT_TAPS[b]:
                    rhs = rhs.at[ty, tx, :, a, b, :].set(wt[:, :, kh, kw_])
    if scale is not None:
        rhs = rhs * scale[None, None, None, None, None, :]
    rhs = rhs.reshape(9 * Cin, 4 * Cout)
    shift4 = jnp.tile(shift.reshape(1, Cout).astype(jnp.float32), (4, 1)).reshape(-1)

    patches, _, _ = _im2col(x, 3, 3, stride=1, pad=1)       # (N, H, W, 9*Cin)
    y = fused_matmul([(patches.reshape(-1, 9 * Cin), rhs)], shift4,
                     relu=relu, out_dtype=out_dtype)
    y = y.reshape(N, H, W, 2, 2, Cout)
    y = jnp.transpose(y, (0, 1, 3, 2, 4, 5)).reshape(N, 2 * H, 2 * W, Cout)
    return y


def _bn_fold(bn, eps=1e-5):
    scale = bn["gamma"] / jnp.sqrt(bn["var"] + eps)
    shift = bn["beta"] - bn["mean"] * scale
    return scale, shift


# ---------------------------------------------------------------------------
# Scaled-down SegmentNet configuration (same topology, small channel counts)
# ---------------------------------------------------------------------------
SHORTCUT_CHS = [0, 8, 16, 32, 64]      # [None, relu0, db1, db2, db3]
BB_STAGE_CHS = [3, 8, 16, 32, 64, 96]  # synthetic encoder stage channels
BB_OUT_CHS = BB_STAGE_CHS[-1]
DECODER_FILTERS = (32, 16, 16, 8, 8)   # scaled-down (256,128,64,32,16)
CLASSES = 19


def _init_conv(key, cout, cin, kh, kw):
    return 0.05 * jax.random.normal(key, (cout, cin, kh, kw), jnp.float32)


def _init_convT(key, cin, cout, kh, kw):
    return 0.05 * jax.random.normal(key, (cin, cout, kh, kw), jnp.float32)


def _init_bn(key, c):
    k1, k2, k3, k4 = jax.random.split(key, 4)
    return dict(
        gamma=1.0 + 0.1 * jax.random.normal(k1, (c,), jnp.float32),
        beta=0.1 * jax.random.normal(k2, (c,), jnp.float32),
        mean=0.05 * jax.random.normal(k3, (c,), jnp.float32),
        var=1.0 + 0.1 * jax.random.uniform(k4, (c,), jnp.float32),
    )


def init_params(key):
    keys = jax.random.split(key, 64)
    ki = iter(range(64))
    params = {}

    # synthetic encoder: 5 stride-2 3x3 conv+bias+relu stages (DenseNet169 skip topology)
    bb = []
    for s in range(5):
        bb.append(dict(
            w=_init_conv(keys[next(ki)], BB_STAGE_CHS[s + 1], BB_STAGE_CHS[s], 3, 3),
            b=0.02 * jax.random.normal(keys[next(ki)], (BB_STAGE_CHS[s + 1],), jnp.float32),
        ))
    params["backbone"] = bb

    # decoder: parametric UpsampleBlocks (convT 4x4 s2 + BN + ReLU, concat skip, conv 3x3 + BN + ReLU)
    dec_in = [BB_OUT_CHS] + list(DECODER_FILTERS[:-1])
    num_blocks = len(DECODER_FILTERS)
    blocks = []
    for i, (cin, cout) in enumerate(zip(dec_in, DECODER_FILTERS)):
        skip_in = SHORTCUT_CHS[num_blocks - i - 1]
        blocks.append(dict(
            up_w=_init_convT(keys[next(ki)], cin, cout, 4, 4),
            bn1=_init_bn(keys[next(ki)], cout),
            conv2_w=_init_conv(keys[next(ki)], cout, cout + skip_in, 3, 3),
            bn2=_init_bn(keys[next(ki)], cout),
        ))
    params["decoder"] = blocks

    params["final_w"] = _init_conv(keys[next(ki)], CLASSES, DECODER_FILTERS[-1], 1, 1)
    params["final_b"] = 0.02 * jax.random.normal(keys[next(ki)], (CLASSES,), jnp.float32)
    return params


def segment_net_forward(params, x_nchw):
    x = jnp.transpose(x_nchw, (0, 2, 3, 1)).astype(jnp.bfloat16)  # NCHW -> NHWC

    # ---- encoder (synthetic stand-in; skips ordered [None, relu0, db1, db2, db3]) ----
    skips = [None]
    for s, p in enumerate(params["backbone"]):
        x = conv2d(x, p["w"], p["b"], stride=2, pad=1, relu=True)
        if s < 4:
            skips.append(x)
    # x is now the bottleneck ("denseblock4") feature map.

    # ---- decoder: iterate shortcut_features reversed (db3, db2, db1, relu0, None) ----
    nb = len(params["decoder"])
    for i, blk in enumerate(params["decoder"]):
        skip = skips[nb - i - 1]
        s1, b1 = _bn_fold(blk["bn1"])
        x = conv_transpose2d_s2k4p1(x, blk["up_w"], s1, b1, relu=True)
        s2, b2 = _bn_fold(blk["bn2"])
        # skip concat (torch dim=1) is fused into the conv2 matmul
        x = conv2d(x, blk["conv2_w"], b2, scale=s2, stride=1, pad=1,
                   relu=True, skip=skip)

    # ---- final 1x1 conv (bias, no BN, no ReLU), f32 logits ----
    x = conv2d(x, params["final_w"], params["final_b"], stride=1, pad=0,
               relu=False, out_dtype=jnp.float32)
    return jnp.transpose(x, (0, 3, 1, 2))  # NHWC -> NCHW


if __name__ == "__main__":
    key = jax.random.PRNGKey(0)
    pkey, xkey = jax.random.split(key)
    params = init_params(pkey)
    x = jax.random.normal(xkey, (2, 3, 64, 64), jnp.float32)

    fwd = jax.jit(segment_net_forward)
    out = fwd(params, x)
    jax.block_until_ready(out)

    assert out.shape == (2, CLASSES, 64, 64), out.shape
    assert bool(jnp.all(jnp.isfinite(out)))
    print("KERNEL_OK")
</pallas_src>

<mosaic_0001>
module attributes {stable_mosaic.version = 11 : i64} {
  func.func @_fused_matmul_kernel(%arg0: i32, %arg1: memref<512x27xbf16, #tpu.memory_space<vmem>>, %arg2: memref<27x128xbf16, #tpu.memory_space<vmem>>, %arg3: memref<1x128xf32, #tpu.memory_space<vmem>>, %arg4: memref<512x128xbf16, #tpu.memory_space<vmem>>) attributes {dimension_semantics = [#tpu.dimension_semantics<parallel>], iteration_bounds = array<i64: 4>, scalar_prefetch = 0 : i64, scratch_operands = 0 : i64, tpu.core_type = #tpu.core_type<tc>, window_params = [{transform_indices = @transform_0, window_bounds = array<i64: 512, 27>}, {pipeline_mode = #tpu.pipeline_mode<synchronous>, transform_indices = @transform_1, window_bounds = array<i64: 27, 128>}, {pipeline_mode = #tpu.pipeline_mode<synchronous>, transform_indices = @transform_2, window_bounds = array<i64: 1, 128>}, {transform_indices = @transform_3, window_bounds = array<i64: 512, 128>}]} {
    %c0 = arith.constant 0 : index
    %c0_0 = arith.constant 0 : index
    %0 = vector.load %arg1[%c0, %c0_0] : memref<512x27xbf16, #tpu.memory_space<vmem>>, vector<512x27xbf16>
    %c0_1 = arith.constant 0 : index
    %c0_2 = arith.constant 0 : index
    %1 = vector.load %arg2[%c0_1, %c0_2] : memref<27x128xbf16, #tpu.memory_space<vmem>>, vector<27x128xbf16>
    %cst = arith.constant dense<0.000000e+00> : vector<512x128xf32>
    %2 = tpu.matmul %0, %1, %cst {dimension_numbers = #tpu.dot_dimension_numbers<[1], [0], [0], [1], [0, 0, 1, 1], [], []>} : vector<512x27xbf16>, vector<27x128xbf16>, vector<512x128xf32> -> vector<512x128xf32>
    %c0_3 = arith.constant 0 : index
    %c0_4 = arith.constant 0 : index
    %3 = vector.load %arg3[%c0_3, %c0_4] : memref<1x128xf32, #tpu.memory_space<vmem>>, vector<1x128xf32>
    %4 = vector.broadcast %3 : vector<1x128xf32> to vector<512x128xf32>
    %5 = arith.addf %2, %4 : vector<512x128xf32>
    %cst_5 = arith.constant 0.000000e+00 : f32
    %6 = vector.broadcast %cst_5 : f32 to vector<512x128xf32>
    %7 = arith.maximumf %5, %6 : vector<512x128xf32>
    %8 = arith.truncf %7 : vector<512x128xf32> to vector<512x128xbf16>
    %c0_6 = arith.constant 0 : index
    %c0_7 = arith.constant 0 : index
    %9 = vector.load %arg4[%c0_6, %c0_7] : memref<512x128xbf16, #tpu.memory_space<vmem>>, vector<512x128xbf16>
    tpu.vector_store %arg4[%c0_6, %c0_7], %8 {strides = array<i32>} : memref<512x128xbf16, #tpu.memory_space<vmem>>, vector<512x128xbf16>,
    return
  }
  func.func @transform_0(%arg0: i32) -> (i32, i32) {
    %c0_i32 = arith.constant 0 : i32
    %c0_i32_0 = arith.constant 0 : i32
    return %arg0, %c0_i32 : i32, i32
  }
  func.func @transform_1(%arg0: i32) -> (i32, i32) {
    %c0_i32 = arith.constant 0 : i32
    %c0_i32_0 = arith.constant 0 : i32
    %c0_i32_1 = arith.constant 0 : i32
    return %c0_i32, %c0_i32_0 : i32, i32
  }
  func.func @transform_2(%arg0: i32) -> (i32, i32) {
    %c0_i32 = arith.constant 0 : i32
    %c0_i32_0 = arith.constant 0 : i32
    %c0_i32_1 = arith.constant 0 : i32
    return %c0_i32, %c0_i32_0 : i32, i32
  }
  func.func @transform_3(%arg0: i32) -> (i32, i32) {
    %c0_i32 = arith.constant 0 : i32
    %c0_i32_0 = arith.constant 0 : i32
    return %arg0, %c0_i32 : i32, i32
  }
}

module attributes {stable_mosaic.version = 11 : i64} {
  func.func @_fused_matmul_kernel(%arg0: i32, %arg1: memref<256x72xbf16, #tpu.memory_space<vmem>>, %arg2: memref<72x128xbf16, #tpu.memory_space<vmem>>, %arg3: memref<1x128xf32, #tpu.memory_space<vmem>>, %arg4: memref<256x128xbf16, #tpu.memory_space<vmem>>) attributes {dimension_semantics = [#tpu.dimension_semantics<parallel>], iteration_bounds = array<i64: 2>, scalar_prefetch = 0 : i64, scratch_operands = 0 : i64, tpu.core_type = #tpu.core_type<tc>, window_params = [{transform_indices = @transform_0, window_bounds = array<i64: 256, 72>}, {pipeline_mode = #tpu.pipeline_mode<synchronous>, transform_indices = @transform_1, window_bounds = array<i64: 72, 128>}, {pipeline_mode = #tpu.pipeline_mode<synchronous>, transform_indices = @transform_2, window_bounds = array<i64: 1, 128>}, {transform_indices = @transform_3, window_bounds = array<i64: 256, 128>}]} {
    %c0 = arith.constant 0 : index
    %c0_0 = arith.constant 0 : index
    %0 = vector.load %arg1[%c0, %c0_0] : memref<256x72xbf16, #tpu.memory_space<vmem>>, vector<256x72xbf16>
    %c0_1 = arith.constant 0 : index
    %c0_2 = arith.constant 0 : index
    %1 = vector.load %arg2[%c0_1, %c0_2] : memref<72x128xbf16, #tpu.memory_space<vmem>>, vector<72x128xbf16>
    %cst = arith.constant dense<0.000000e+00> : vector<256x128xf32>
    %2 = tpu.matmul %0, %1, %cst {dimension_numbers = #tpu.dot_dimension_numbers<[1], [0], [0], [1], [0, 0, 1, 1], [], []>} : vector<256x72xbf16>, vector<72x128xbf16>, vector<256x128xf32> -> vector<256x128xf32>
    %c0_3 = arith.constant 0 : index
    %c0_4 = arith.constant 0 : index
    %3 = vector.load %arg3[%c0_3, %c0_4] : memref<1x128xf32, #tpu.memory_space<vmem>>, vector<1x128xf32>
    %4 = vector.broadcast %3 : vector<1x128xf32> to vector<256x128xf32>
    %5 = arith.addf %2, %4 : vector<256x128xf32>
    %cst_5 = arith.constant 0.000000e+00 : f32
    %6 = vector.broadcast %cst_5 : f32 to vector<256x128xf32>
    %7 = arith.maximumf %5, %6 : vector<256x128xf32>
    %8 = arith.truncf %7 : vector<256x128xf32> to vector<256x128xbf16>
    %c0_6 = arith.constant 0 : index
    %c0_7 = arith.constant 0 : index
    %9 = vector.load %arg4[%c0_6, %c0_7] : memref<256x128xbf16, #tpu.memory_space<vmem>>, vector<256x128xbf16>
    tpu.vector_store %arg4[%c0_6, %c0_7], %8 {strides = array<i32>} : memref<256x128xbf16, #tpu.memory_space<vmem>>, vector<256x128xbf16>,
    return
  }
  func.func @transform_0(%arg0: i32) -> (i32, i32) {
    %c0_i32 = arith.constant 0 : i32
    %c0_i32_0 = arith.constant 0 : i32
    return %arg0, %c0_i32 : i32, i32
  }
  func.func @transform_1(%arg0: i32) -> (i32, i32) {
    %c0_i32 = arith.constant 0 : i32
    %c0_i32_0 = arith.constant 0 : i32
    %c0_i32_1 = arith.constant 0 : i32
    return %c0_i32, %c0_i32_0 : i32, i32
  }
  func.func @transform_2(%arg0: i32) -> (i32, i32) {
    %c0_i32 = arith.constant 0 : i32
    %c0_i32_0 = arith.constant 0 : i32
    %c0_i32_1 = arith.constant 0 : i32
    return %c0_i32, %c0_i32_0 : i32, i32
  }
  func.func @transform_3(%arg0: i32) -> (i32, i32) {
    %c0_i32 = arith.constant 0 : i32
    %c0_i32_0 = arith.constant 0 : i32
    return %arg0, %c0_i32 : i32, i32
  }
}

module attributes {stable_mosaic.version = 11 : i64} {
  func.func @_fused_matmul_kernel(%arg0: i32, %arg1: memref<128x144xbf16, #tpu.memory_space<vmem>>, %arg2: memref<144x128xbf16, #tpu.memory_space<vmem>>, %arg3: memref<1x128xf32, #tpu.memory_space<vmem>>, %arg4: memref<128x128xbf16, #tpu.memory_space<vmem>>) attributes {dimension_semantics = [#tpu.dimension_semantics<parallel>], iteration_bounds = array<i64: 1>, scalar_prefetch = 0 : i64, scratch_operands = 0 : i64, tpu.core_type = #tpu.core_type<tc>, window_params = [{transform_indices = @transform_0, window_bounds = array<i64: 128, 144>}, {pipeline_mode = #tpu.pipeline_mode<synchronous>, transform_indices = @transform_1, window_bounds = array<i64: 144, 128>}, {pipeline_mode = #tpu.pipeline_mode<synchronous>, transform_indices = @transform_2, window_bounds = array<i64: 1, 128>}, {transform_indices = @transform_3, window_bounds = array<i64: 128, 128>}]} {
    %c0 = arith.constant 0 : index
    %c0_0 = arith.constant 0 : index
    %0 = vector.load %arg1[%c0, %c0_0] : memref<128x144xbf16, #tpu.memory_space<vmem>>, vector<128x144xbf16>
    %c0_1 = arith.constant 0 : index
    %c0_2 = arith.constant 0 : index
    %1 = vector.load %arg2[%c0_1, %c0_2] : memref<144x128xbf16, #tpu.memory_space<vmem>>, vector<144x128xbf16>
    %cst = arith.constant dense<0.000000e+00> : vector<128x128xf32>
    %2 = tpu.matmul %0, %1, %cst {dimension_numbers = #tpu.dot_dimension_numbers<[1], [0], [0], [1], [0, 0, 1, 1], [], []>} : vector<128x144xbf16>, vector<144x128xbf16>, vector<128x128xf32> -> vector<128x128xf32>
    %c0_3 = arith.constant 0 : index
    %c0_4 = arith.constant 0 : index
    %3 = vector.load %arg3[%c0_3, %c0_4] : memref<1x128xf32, #tpu.memory_space<vmem>>, vector<1x128xf32>
    %4 = vector.broadcast %3 : vector<1x128xf32> to vector<128x128xf32>
    %5 = arith.addf %2, %4 : vector<128x128xf32>
    %cst_5 = arith.constant 0.000000e+00 : f32
    %6 = vector.broadcast %cst_5 : f32 to vector<128x128xf32>
    %7 = arith.maximumf %5, %6 : vector<128x128xf32>
    %8 = arith.truncf %7 : vector<128x128xf32> to vector<128x128xbf16>
    %c0_6 = arith.constant 0 : index
    %c0_7 = arith.constant 0 : index
    %9 = vector.load %arg4[%c0_6, %c0_7] : memref<128x128xbf16, #tpu.memory_space<vmem>>, vector<128x128xbf16>
    tpu.vector_store %arg4[%c0_6, %c0_7], %8 {strides = array<i32>} : memref<128x128xbf16, #tpu.memory_space<vmem>>, vector<128x128xbf16>,
    return
  }
  func.func @transform_0(%arg0: i32) -> (i32, i32) {
    %c0_i32 = arith.constant 0 : i32
    %c0_i32_0 = arith.constant 0 : i32
    return %arg0, %c0_i32 : i32, i32
  }
  func.func @transform_1(%arg0: i32) -> (i32, i32) {
    %c0_i32 = arith.constant 0 : i32
    %c0_i32_0 = arith.constant 0 : i32
    %c0_i32_1 = arith.constant 0 : i32
    return %c0_i32, %c0_i32_0 : i32, i32
  }
  func.func @transform_2(%arg0: i32) -> (i32, i32) {
    %c0_i32 = arith.constant 0 : i32
    %c0_i32_0 = arith.constant 0 : i32
    %c0_i32_1 = arith.constant 0 : i32
    return %c0_i32, %c0_i32_0 : i32, i32
  }
  func.func @transform_3(%arg0: i32) -> (i32, i32) {
    %c0_i32 = arith.constant 0 : i32
    %c0_i32_0 = arith.constant 0 : i32
    return %arg0, %c0_i32 : i32, i32
  }
}

module attributes {stable_mosaic.version = 11 : i64} {
  func.func @_fused_matmul_kernel(%arg0: i32, %arg1: memref<32x288xbf16, #tpu.memory_space<vmem>>, %arg2: memref<288x128xbf16, #tpu.memory_space<vmem>>, %arg3: memref<1x128xf32, #tpu.memory_space<vmem>>, %arg4: memref<32x128xbf16, #tpu.memory_space<vmem>>) attributes {dimension_semantics = [#tpu.dimension_semantics<parallel>], iteration_bounds = array<i64: 1>, scalar_prefetch = 0 : i64, scratch_operands = 0 : i64, tpu.core_type = #tpu.core_type<tc>, window_params = [{transform_indices = @transform_0, window_bounds = array<i64: 32, 288>}, {pipeline_mode = #tpu.pipeline_mode<synchronous>, transform_indices = @transform_1, window_bounds = array<i64: 288, 128>}, {pipeline_mode = #tpu.pipeline_mode<synchronous>, transform_indices = @transform_2, window_bounds = array<i64: 1, 128>}, {transform_indices = @transform_3, window_bounds = array<i64: 32, 128>}]} {
    %c0 = arith.constant 0 : index
    %c0_0 = arith.constant 0 : index
    %0 = vector.load %arg1[%c0, %c0_0] : memref<32x288xbf16, #tpu.memory_space<vmem>>, vector<32x288xbf16>
    %c0_1 = arith.constant 0 : index
    %c0_2 = arith.constant 0 : index
    %1 = vector.load %arg2[%c0_1, %c0_2] : memref<288x128xbf16, #tpu.memory_space<vmem>>, vector<288x128xbf16>
    %cst = arith.constant dense<0.000000e+00> : vector<32x128xf32>
    %2 = tpu.matmul %0, %1, %cst {dimension_numbers = #tpu.dot_dimension_numbers<[1], [0], [0], [1], [0, 0, 1, 1], [], []>} : vector<32x288xbf16>, vector<288x128xbf16>, vector<32x128xf32> -> vector<32x128xf32>
    %c0_3 = arith.constant 0 : index
    %c0_4 = arith.constant 0 : index
    %3 = vector.load %arg3[%c0_3, %c0_4] : memref<1x128xf32, #tpu.memory_space<vmem>>, vector<1x128xf32>
    %4 = vector.broadcast %3 : vector<1x128xf32> to vector<32x128xf32>
    %5 = arith.addf %2, %4 : vector<32x128xf32>
    %cst_5 = arith.constant 0.000000e+00 : f32
    %6 = vector.broadcast %cst_5 : f32 to vector<32x128xf32>
    %7 = arith.maximumf %5, %6 : vector<32x128xf32>
    %8 = arith.truncf %7 : vector<32x128xf32> to vector<32x128xbf16>
    %c0_6 = arith.constant 0 : index
    %c0_7 = arith.constant 0 : index
    %9 = vector.load %arg4[%c0_6, %c0_7] : memref<32x128xbf16, #tpu.memory_space<vmem>>, vector<32x128xbf16>
    tpu.vector_store %arg4[%c0_6, %c0_7], %8 {strides = array<i32>} : memref<32x128xbf16, #tpu.memory_space<vmem>>, vector<32x128xbf16>,
    return
  }
  func.func @transform_0(%arg0: i32) -> (i32, i32) {
    %c0_i32 = arith.constant 0 : i32
    %c0_i32_0 = arith.constant 0 : i32
    return %arg0, %c0_i32 : i32, i32
  }
  func.func @transform_1(%arg0: i32) -> (i32, i32) {
    %c0_i32 = arith.constant 0 : i32
    %c0_i32_0 = arith.constant 0 : i32
    %c0_i32_1 = arith.constant 0 : i32
    return %c0_i32, %c0_i32_0 : i32, i32
  }
  func.func @transform_2(%arg0: i32) -> (i32, i32) {
    %c0_i32 = arith.constant 0 : i32
    %c0_i32_0 = arith.constant 0 : i32
    %c0_i32_1 = arith.constant 0 : i32
    return %c0_i32, %c0_i32_0 : i32, i32
  }
  func.func @transform_3(%arg0: i32) -> (i32, i32) {
    %c0_i32 = arith.constant 0 : i32
    %c0_i32_0 = arith.constant 0 : i32
    return %arg0, %c0_i32 : i32, i32
  }
}

module attributes {stable_mosaic.version = 11 : i64} {
  func.func @_fused_matmul_kernel(%arg0: i32, %arg1: memref<8x576xbf16, #tpu.memory_space<vmem>>, %arg2: memref<576x128xbf16, #tpu.memory_space<vmem>>, %arg3: memref<1x128xf32, #tpu.memory_space<vmem>>, %arg4: memref<8x128xbf16, #tpu.memory_space<vmem>>) attributes {dimension_semantics = [#tpu.dimension_semantics<parallel>], iteration_bounds = array<i64: 1>, scalar_prefetch = 0 : i64, scratch_operands = 0 : i64, tpu.core_type = #tpu.core_type<tc>, window_params = [{transform_indices = @transform_0, window_bounds = array<i64: 8, 576>}, {pipeline_mode = #tpu.pipeline_mode<synchronous>, transform_indices = @transform_1, window_bounds = array<i64: 576, 128>}, {pipeline_mode = #tpu.pipeline_mode<synchronous>, transform_indices = @transform_2, window_bounds = array<i64: 1, 128>}, {transform_indices = @transform_3, window_bounds = array<i64: 8, 128>}]} {
    %c0 = arith.constant 0 : index
    %c0_0 = arith.constant 0 : index
    %0 = vector.load %arg1[%c0, %c0_0] : memref<8x576xbf16, #tpu.memory_space<vmem>>, vector<8x576xbf16>
    %c0_1 = arith.constant 0 : index
    %c0_2 = arith.constant 0 : index
    %1 = vector.load %arg2[%c0_1, %c0_2] : memref<576x128xbf16, #tpu.memory_space<vmem>>, vector<576x128xbf16>
    %cst = arith.constant dense<0.000000e+00> : vector<8x128xf32>
    %2 = tpu.matmul %0, %1, %cst {dimension_numbers = #tpu.dot_dimension_numbers<[1], [0], [0], [1], [0, 0, 1, 1], [], []>} : vector<8x576xbf16>, vector<576x128xbf16>, vector<8x128xf32> -> vector<8x128xf32>
    %c0_3 = arith.constant 0 : index
    %c0_4 = arith.constant 0 : index
    %3 = vector.load %arg3[%c0_3, %c0_4] : memref<1x128xf32, #tpu.memory_space<vmem>>, vector<1x128xf32>
    %4 = vector.broadcast %3 : vector<1x128xf32> to vector<8x128xf32>
    %5 = arith.addf %2, %4 : vector<8x128xf32>
    %cst_5 = arith.constant 0.000000e+00 : f32
    %6 = vector.broadcast %cst_5 : f32 to vector<8x128xf32>
    %7 = arith.maximumf %5, %6 : vector<8x128xf32>
    %8 = arith.truncf %7 : vector<8x128xf32> to vector<8x128xbf16>
    %c0_6 = arith.constant 0 : index
    %c0_7 = arith.constant 0 : index
    %9 = vector.load %arg4[%c0_6, %c0_7] : memref<8x128xbf16, #tpu.memory_space<vmem>>, vector<8x128xbf16>
    tpu.vector_store %arg4[%c0_6, %c0_7], %8 {strides = array<i32>} : memref<8x128xbf16, #tpu.memory_space<vmem>>, vector<8x128xbf16>,
    return
  }
  func.func @transform_0(%arg0: i32) -> (i32, i32) {
    %c0_i32 = arith.constant 0 : i32
    %c0_i32_0 = arith.constant 0 : i32
    return %arg0, %c0_i32 : i32, i32
  }
  func.func @transform_1(%arg0: i32) -> (i32, i32) {
    %c0_i32 = arith.constant 0 : i32
    %c0_i32_0 = arith.constant 0 : i32
    %c0_i32_1 = arith.constant 0 : i32
    return %c0_i32, %c0_i32_0 : i32, i32
  }
  func.func @transform_2(%arg0: i32) -> (i32, i32) {
    %c0_i32 = arith.constant 0 : i32
    %c0_i32_0 = arith.constant 0 : i32
    %c0_i32_1 = arith.constant 0 : i32
    return %c0_i32, %c0_i32_0 : i32, i32
  }
  func.func @transform_3(%arg0: i32) -> (i32, i32) {
    %c0_i32 = arith.constant 0 : i32
    %c0_i32_0 = arith.constant 0 : i32
    return %arg0, %c0_i32 : i32, i32
  }
}

module attributes {stable_mosaic.version = 11 : i64} {
  func.func @_fused_matmul_kernel(%arg0: i32, %arg1: memref<8x864xbf16, #tpu.memory_space<vmem>>, %arg2: memref<864x128xbf16, #tpu.memory_space<vmem>>, %arg3: memref<1x128xf32, #tpu.memory_space<vmem>>, %arg4: memref<8x128xbf16, #tpu.memory_space<vmem>>) attributes {dimension_semantics = [#tpu.dimension_semantics<parallel>], iteration_bounds = array<i64: 1>, scalar_prefetch = 0 : i64, scratch_operands = 0 : i64, tpu.core_type = #tpu.core_type<tc>, window_params = [{transform_indices = @transform_0, window_bounds = array<i64: 8, 864>}, {pipeline_mode = #tpu.pipeline_mode<synchronous>, transform_indices = @transform_1, window_bounds = array<i64: 864, 128>}, {pipeline_mode = #tpu.pipeline_mode<synchronous>, transform_indices = @transform_2, window_bounds = array<i64: 1, 128>}, {transform_indices = @transform_3, window_bounds = array<i64: 8, 128>}]} {
    %c0 = arith.constant 0 : index
    %c0_0 = arith.constant 0 : index
    %0 = vector.load %arg1[%c0, %c0_0] : memref<8x864xbf16, #tpu.memory_space<vmem>>, vector<8x864xbf16>
    %c0_1 = arith.constant 0 : index
    %c0_2 = arith.constant 0 : index
    %1 = vector.load %arg2[%c0_1, %c0_2] : memref<864x128xbf16, #tpu.memory_space<vmem>>, vector<864x128xbf16>
    %cst = arith.constant dense<0.000000e+00> : vector<8x128xf32>
    %2 = tpu.matmul %0, %1, %cst {dimension_numbers = #tpu.dot_dimension_numbers<[1], [0], [0], [1], [0, 0, 1, 1], [], []>} : vector<8x864xbf16>, vector<864x128xbf16>, vector<8x128xf32> -> vector<8x128xf32>
    %c0_3 = arith.constant 0 : index
    %c0_4 = arith.constant 0 : index
    %3 = vector.load %arg3[%c0_3, %c0_4] : memref<1x128xf32, #tpu.memory_space<vmem>>, vector<1x128xf32>
    %4 = vector.broadcast %3 : vector<1x128xf32> to vector<8x128xf32>
    %5 = arith.addf %2, %4 : vector<8x128xf32>
    %cst_5 = arith.constant 0.000000e+00 : f32
    %6 = vector.broadcast %cst_5 : f32 to vector<8x128xf32>
    %7 = arith.maximumf %5, %6 : vector<8x128xf32>
    %8 = arith.truncf %7 : vector<8x128xf32> to vector<8x128xbf16>
    %c0_6 = arith.constant 0 : index
    %c0_7 = arith.constant 0 : index
    %9 = vector.load %arg4[%c0_6, %c0_7] : memref<8x128xbf16, #tpu.memory_space<vmem>>, vector<8x128xbf16>
    tpu.vector_store %arg4[%c0_6, %c0_7], %8 {strides = array<i32>} : memref<8x128xbf16, #tpu.memory_space<vmem>>, vector<8x128xbf16>,
    return
  }
  func.func @transform_0(%arg0: i32) -> (i32, i32) {
    %c0_i32 = arith.constant 0 : i32
    %c0_i32_0 = arith.constant 0 : i32
    return %arg0, %c0_i32 : i32, i32
  }
  func.func @transform_1(%arg0: i32) -> (i32, i32) {
    %c0_i32 = arith.constant 0 : i32
    %c0_i32_0 = arith.constant 0 : i32
    %c0_i32_1 = arith.constant 0 : i32
    return %c0_i32, %c0_i32_0 : i32, i32
  }
  func.func @transform_2(%arg0: i32) -> (i32, i32) {
    %c0_i32 = arith.constant 0 : i32
    %c0_i32_0 = arith.constant 0 : i32
    %c0_i32_1 = arith.constant 0 : i32
    return %c0_i32, %c0_i32_0 : i32, i32
  }
  func.func @transform_3(%arg0: i32) -> (i32, i32) {
    %c0_i32 = arith.constant 0 : i32
    %c0_i32_0 = arith.constant 0 : i32
    return %arg0, %c0_i32 : i32, i32
  }
}

module attributes {stable_mosaic.version = 11 : i64} {
  func.func @_fused_matmul_kernel(%arg0: i32, %arg1: memref<32x288xbf16, #tpu.memory_space<vmem>>, %arg2: memref<288x128xbf16, #tpu.memory_space<vmem>>, %arg3: memref<32x576xbf16, #tpu.memory_space<vmem>>, %arg4: memref<576x128xbf16, #tpu.memory_space<vmem>>, %arg5: memref<1x128xf32, #tpu.memory_space<vmem>>, %arg6: memref<32x128xbf16, #tpu.memory_space<vmem>>) attributes {dimension_semantics = [#tpu.dimension_semantics<parallel>], iteration_bounds = array<i64: 1>, scalar_prefetch = 0 : i64, scratch_operands = 0 : i64, tpu.core_type = #tpu.core_type<tc>, window_params = [{transform_indices = @transform_0, window_bounds = array<i64: 32, 288>}, {pipeline_mode = #tpu.pipeline_mode<synchronous>, transform_indices = @transform_1, window_bounds = array<i64: 288, 128>}, {transform_indices = @transform_2, window_bounds = array<i64: 32, 576>}, {pipeline_mode = #tpu.pipeline_mode<synchronous>, transform_indices = @transform_3, window_bounds = array<i64: 576, 128>}, {pipeline_mode = #tpu.pipeline_mode<synchronous>, transform_indices = @transform_4, window_bounds = array<i64: 1, 128>}, {transform_indices = @transform_5, window_bounds = array<i64: 32, 128>}]} {
    %c0 = arith.constant 0 : index
    %c0_0 = arith.constant 0 : index
    %0 = vector.load %arg1[%c0, %c0_0] : memref<32x288xbf16, #tpu.memory_space<vmem>>, vector<32x288xbf16>
    %c0_1 = arith.constant 0 : index
    %c0_2 = arith.constant 0 : index
    %1 = vector.load %arg2[%c0_1, %c0_2] : memref<288x128xbf16, #tpu.memory_space<vmem>>, vector<288x128xbf16>
    %cst = arith.constant dense<0.000000e+00> : vector<32x128xf32>
    %2 = tpu.matmul %0, %1, %cst {dimension_numbers = #tpu.dot_dimension_numbers<[1], [0], [0], [1], [0, 0, 1, 1], [], []>} : vector<32x288xbf16>, vector<288x128xbf16>, vector<32x128xf32> -> vector<32x128xf32>
    %c0_3 = arith.constant 0 : index
    %c0_4 = arith.constant 0 : index
    %3 = vector.load %arg3[%c0_3, %c0_4] : memref<32x576xbf16, #tpu.memory_space<vmem>>, vector<32x576xbf16>
    %c0_5 = arith.constant 0 : index
    %c0_6 = arith.constant 0 : index
    %4 = vector.load %arg4[%c0_5, %c0_6] : memref<576x128xbf16, #tpu.memory_space<vmem>>, vector<576x128xbf16>
    %cst_7 = arith.constant dense<0.000000e+00> : vector<32x128xf32>
    %5 = tpu.matmul %3, %4, %cst_7 {dimension_numbers = #tpu.dot_dimension_numbers<[1], [0], [0], [1], [0, 0, 1, 1], [], []>} : vector<32x576xbf16>, vector<576x128xbf16>, vector<32x128xf32> -> vector<32x128xf32>
    %6 = arith.addf %2, %5 : vector<32x128xf32>
    %c0_8 = arith.constant 0 : index
    %c0_9 = arith.constant 0 : index
    %7 = vector.load %arg5[%c0_8, %c0_9] : memref<1x128xf32, #tpu.memory_space<vmem>>, vector<1x128xf32>
    %8 = vector.broadcast %7 : vector<1x128xf32> to vector<32x128xf32>
    %9 = arith.addf %6, %8 : vector<32x128xf32>
    %cst_10 = arith.constant 0.000000e+00 : f32
    %10 = vector.broadcast %cst_10 : f32 to vector<32x128xf32>
    %11 = arith.maximumf %9, %10 : vector<32x128xf32>
    %12 = arith.truncf %11 : vector<32x128xf32> to vector<32x128xbf16>
    %c0_11 = arith.constant 0 : index
    %c0_12 = arith.constant 0 : index
    %13 = vector.load %arg6[%c0_11, %c0_12] : memref<32x128xbf16, #tpu.memory_space<vmem>>, vector<32x128xbf16>
    tpu.vector_store %arg6[%c0_11, %c0_12], %12 {strides = array<i32>} : memref<32x128xbf16, #tpu.memory_space<vmem>>, vector<32x128xbf16>,
    return
  }
  func.func @transform_0(%arg0: i32) -> (i32, i32) {
    %c0_i32 = arith.constant 0 : i32
    %c0_i32_0 = arith.constant 0 : i32
    return %arg0, %c0_i32 : i32, i32
  }
  func.func @transform_1(%arg0: i32) -> (i32, i32) {
    %c0_i32 = arith.constant 0 : i32
    %c0_i32_0 = arith.constant 0 : i32
    %c0_i32_1 = arith.constant 0 : i32
    return %c0_i32, %c0_i32_0 : i32, i32
  }
  func.func @transform_2(%arg0: i32) -> (i32, i32) {
    %c0_i32 = arith.constant 0 : i32
    %c0_i32_0 = arith.constant 0 : i32
    return %arg0, %c0_i32 : i32, i32
  }
  func.func @transform_3(%arg0: i32) -> (i32, i32) {
    %c0_i32 = arith.constant 0 : i32
    %c0_i32_0 = arith.constant 0 : i32
    %c0_i32_1 = arith.constant 0 : i32
    return %c0_i32, %c0_i32_0 : i32, i32
  }
  func.func @transform_4(%arg0: i32) -> (i32, i32) {
    %c0_i32 = arith.constant 0 : i32
    %c0_i32_0 = arith.constant 0 : i32
    %c0_i32_1 = arith.constant 0 : i32
    return %c0_i32, %c0_i32_0 : i32, i32
  }
  func.func @transform_5(%arg0: i32) -> (i32, i32) {
    %c0_i32 = arith.constant 0 : i32
    %c0_i32_0 = arith.constant 0 : i32
    return %arg0, %c0_i32 : i32, i32
  }
}

module attributes {stable_mosaic.version = 11 : i64} {
  func.func @_fused_matmul_kernel(%arg0: i32, %arg1: memref<128x144xbf16, #tpu.memory_space<vmem>>, %arg2: memref<144x128xbf16, #tpu.memory_space<vmem>>, %arg3: memref<128x288xbf16, #tpu.memory_space<vmem>>, %arg4: memref<288x128xbf16, #tpu.memory_space<vmem>>, %arg5: memref<1x128xf32, #tpu.memory_space<vmem>>, %arg6: memref<128x128xbf16, #tpu.memory_space<vmem>>) attributes {dimension_semantics = [#tpu.dimension_semantics<parallel>], iteration_bounds = array<i64: 1>, scalar_prefetch = 0 : i64, scratch_operands = 0 : i64, tpu.core_type = #tpu.core_type<tc>, window_params = [{transform_indices = @transform_0, window_bounds = array<i64: 128, 144>}, {pipeline_mode = #tpu.pipeline_mode<synchronous>, transform_indices = @transform_1, window_bounds = array<i64: 144, 128>}, {transform_indices = @transform_2, window_bounds = array<i64: 128, 288>}, {pipeline_mode = #tpu.pipeline_mode<synchronous>, transform_indices = @transform_3, window_bounds = array<i64: 288, 128>}, {pipeline_mode = #tpu.pipeline_mode<synchronous>, transform_indices = @transform_4, window_bounds = array<i64: 1, 128>}, {transform_indices = @transform_5, window_bounds = array<i64: 128, 128>}]} {
    %c0 = arith.constant 0 : index
    %c0_0 = arith.constant 0 : index
    %0 = vector.load %arg1[%c0, %c0_0] : memref<128x144xbf16, #tpu.memory_space<vmem>>, vector<128x144xbf16>
    %c0_1 = arith.constant 0 : index
    %c0_2 = arith.constant 0 : index
    %1 = vector.load %arg2[%c0_1, %c0_2] : memref<144x128xbf16, #tpu.memory_space<vmem>>, vector<144x128xbf16>
    %cst = arith.constant dense<0.000000e+00> : vector<128x128xf32>
    %2 = tpu.matmul %0, %1, %cst {dimension_numbers = #tpu.dot_dimension_numbers<[1], [0], [0], [1], [0, 0, 1, 1], [], []>} : vector<128x144xbf16>, vector<144x128xbf16>, vector<128x128xf32> -> vector<128x128xf32>
    %c0_3 = arith.constant 0 : index
    %c0_4 = arith.constant 0 : index
    %3 = vector.load %arg3[%c0_3, %c0_4] : memref<128x288xbf16, #tpu.memory_space<vmem>>, vector<128x288xbf16>
    %c0_5 = arith.constant 0 : index
    %c0_6 = arith.constant 0 : index
    %4 = vector.load %arg4[%c0_5, %c0_6] : memref<288x128xbf16, #tpu.memory_space<vmem>>, vector<288x128xbf16>
    %cst_7 = arith.constant dense<0.000000e+00> : vector<128x128xf32>
    %5 = tpu.matmul %3, %4, %cst_7 {dimension_numbers = #tpu.dot_dimension_numbers<[1], [0], [0], [1], [0, 0, 1, 1], [], []>} : vector<128x288xbf16>, vector<288x128xbf16>, vector<128x128xf32> -> vector<128x128xf32>
    %6 = arith.addf %2, %5 : vector<128x128xf32>
    %c0_8 = arith.constant 0 : index
    %c0_9 = arith.constant 0 : index
    %7 = vector.load %arg5[%c0_8, %c0_9] : memref<1x128xf32, #tpu.memory_space<vmem>>, vector<1x128xf32>
    %8 = vector.broadcast %7 : vector<1x128xf32> to vector<128x128xf32>
    %9 = arith.addf %6, %8 : vector<128x128xf32>
    %cst_10 = arith.constant 0.000000e+00 : f32
    %10 = vector.broadcast %cst_10 : f32 to vector<128x128xf32>
    %11 = arith.maximumf %9, %10 : vector<128x128xf32>
    %12 = arith.truncf %11 : vector<128x128xf32> to vector<128x128xbf16>
    %c0_11 = arith.constant 0 : index
    %c0_12 = arith.constant 0 : index
    %13 = vector.load %arg6[%c0_11, %c0_12] : memref<128x128xbf16, #tpu.memory_space<vmem>>, vector<128x128xbf16>
    tpu.vector_store %arg6[%c0_11, %c0_12], %12 {strides = array<i32>} : memref<128x128xbf16, #tpu.memory_space<vmem>>, vector<128x128xbf16>,
    return
  }
  func.func @transform_0(%arg0: i32) -> (i32, i32) {
    %c0_i32 = arith.constant 0 : i32
    %c0_i32_0 = arith.constant 0 : i32
    return %arg0, %c0_i32 : i32, i32
  }
  func.func @transform_1(%arg0: i32) -> (i32, i32) {
    %c0_i32 = arith.constant 0 : i32
    %c0_i32_0 = arith.constant 0 : i32
    %c0_i32_1 = arith.constant 0 : i32
    return %c0_i32, %c0_i32_0 : i32, i32
  }
  func.func @transform_2(%arg0: i32) -> (i32, i32) {
    %c0_i32 = arith.constant 0 : i32
    %c0_i32_0 = arith.constant 0 : i32
    return %arg0, %c0_i32 : i32, i32
  }
  func.func @transform_3(%arg0: i32) -> (i32, i32) {
    %c0_i32 = arith.constant 0 : i32
    %c0_i32_0 = arith.constant 0 : i32
    %c0_i32_1 = arith.constant 0 : i32
    return %c0_i32, %c0_i32_0 : i32, i32
  }
  func.func @transform_4(%arg0: i32) -> (i32, i32) {
    %c0_i32 = arith.constant 0 : i32
    %c0_i32_0 = arith.constant 0 : i32
    %c0_i32_1 = arith.constant 0 : i32
    return %c0_i32, %c0_i32_0 : i32, i32
  }
  func.func @transform_5(%arg0: i32) -> (i32, i32) {
    %c0_i32 = arith.constant 0 : i32
    %c0_i32_0 = arith.constant 0 : i32
    return %arg0, %c0_i32 : i32, i32
  }
}

module attributes {stable_mosaic.version = 11 : i64} {
  func.func @_fused_matmul_kernel(%arg0: i32, %arg1: memref<256x144xbf16, #tpu.memory_space<vmem>>, %arg2: memref<144x128xbf16, #tpu.memory_space<vmem>>, %arg3: memref<256x144xbf16, #tpu.memory_space<vmem>>, %arg4: memref<144x128xbf16, #tpu.memory_space<vmem>>, %arg5: memref<1x128xf32, #tpu.memory_space<vmem>>, %arg6: memref<256x128xbf16, #tpu.memory_space<vmem>>) attributes {dimension_semantics = [#tpu.dimension_semantics<parallel>], iteration_bounds = array<i64: 2>, scalar_prefetch = 0 : i64, scratch_operands = 0 : i64, tpu.core_type = #tpu.core_type<tc>, window_params = [{transform_indices = @transform_0, window_bounds = array<i64: 256, 144>}, {pipeline_mode = #tpu.pipeline_mode<synchronous>, transform_indices = @transform_1, window_bounds = array<i64: 144, 128>}, {transform_indices = @transform_2, window_bounds = array<i64: 256, 144>}, {pipeline_mode = #tpu.pipeline_mode<synchronous>, transform_indices = @transform_3, window_bounds = array<i64: 144, 128>}, {pipeline_mode = #tpu.pipeline_mode<synchronous>, transform_indices = @transform_4, window_bounds = array<i64: 1, 128>}, {transform_indices = @transform_5, window_bounds = array<i64: 256, 128>}]} {
    %c0 = arith.constant 0 : index
    %c0_0 = arith.constant 0 : index
    %0 = vector.load %arg1[%c0, %c0_0] : memref<256x144xbf16, #tpu.memory_space<vmem>>, vector<256x144xbf16>
    %c0_1 = arith.constant 0 : index
    %c0_2 = arith.constant 0 : index
    %1 = vector.load %arg2[%c0_1, %c0_2] : memref<144x128xbf16, #tpu.memory_space<vmem>>, vector<144x128xbf16>
    %cst = arith.constant dense<0.000000e+00> : vector<256x128xf32>
    %2 = tpu.matmul %0, %1, %cst {dimension_numbers = #tpu.dot_dimension_numbers<[1], [0], [0], [1], [0, 0, 1, 1], [], []>} : vector<256x144xbf16>, vector<144x128xbf16>, vector<256x128xf32> -> vector<256x128xf32>
    %c0_3 = arith.constant 0 : index
    %c0_4 = arith.constant 0 : index
    %3 = vector.load %arg3[%c0_3, %c0_4] : memref<256x144xbf16, #tpu.memory_space<vmem>>, vector<256x144xbf16>
    %c0_5 = arith.constant 0 : index
    %c0_6 = arith.constant 0 : index
    %4 = vector.load %arg4[%c0_5, %c0_6] : memref<144x128xbf16, #tpu.memory_space<vmem>>, vector<144x128xbf16>
    %cst_7 = arith.constant dense<0.000000e+00> : vector<256x128xf32>
    %5 = tpu.matmul %3, %4, %cst_7 {dimension_numbers = #tpu.dot_dimension_numbers<[1], [0], [0], [1], [0, 0, 1, 1], [], []>} : vector<256x144xbf16>, vector<144x128xbf16>, vector<256x128xf32> -> vector<256x128xf32>
    %6 = arith.addf %2, %5 : vector<256x128xf32>
    %c0_8 = arith.constant 0 : index
    %c0_9 = arith.constant 0 : index
    %7 = vector.load %arg5[%c0_8, %c0_9] : memref<1x128xf32, #tpu.memory_space<vmem>>, vector<1x128xf32>
    %8 = vector.broadcast %7 : vector<1x128xf32> to vector<256x128xf32>
    %9 = arith.addf %6, %8 : vector<256x128xf32>
    %cst_10 = arith.constant 0.000000e+00 : f32
    %10 = vector.broadcast %cst_10 : f32 to vector<256x128xf32>
    %11 = arith.maximumf %9, %10 : vector<256x128xf32>
    %12 = arith.truncf %11 : vector<256x128xf32> to vector<256x128xbf16>
    %c0_11 = arith.constant 0 : index
    %c0_12 = arith.constant 0 : index
    %13 = vector.load %arg6[%c0_11, %c0_12] : memref<256x128xbf16, #tpu.memory_space<vmem>>, vector<256x128xbf16>
    tpu.vector_store %arg6[%c0_11, %c0_12], %12 {strides = array<i32>} : memref<256x128xbf16, #tpu.memory_space<vmem>>, vector<256x128xbf16>,
    return
  }
  func.func @transform_0(%arg0: i32) -> (i32, i32) {
    %c0_i32 = arith.constant 0 : i32
    %c0_i32_0 = arith.constant 0 : i32
    return %arg0, %c0_i32 : i32, i32
  }
  func.func @transform_1(%arg0: i32) -> (i32, i32) {
    %c0_i32 = arith.constant 0 : i32
    %c0_i32_0 = arith.constant 0 : i32
    %c0_i32_1 = arith.constant 0 : i32
    return %c0_i32, %c0_i32_0 : i32, i32
  }
  func.func @transform_2(%arg0: i32) -> (i32, i32) {
    %c0_i32 = arith.constant 0 : i32
    %c0_i32_0 = arith.constant 0 : i32
    return %arg0, %c0_i32 : i32, i32
  }
  func.func @transform_3(%arg0: i32) -> (i32, i32) {
    %c0_i32 = arith.constant 0 : i32
    %c0_i32_0 = arith.constant 0 : i32
    %c0_i32_1 = arith.constant 0 : i32
    return %c0_i32, %c0_i32_0 : i32, i32
  }
  func.func @transform_4(%arg0: i32) -> (i32, i32) {
    %c0_i32 = arith.constant 0 : i32
    %c0_i32_0 = arith.constant 0 : i32
    %c0_i32_1 = arith.constant 0 : i32
    return %c0_i32, %c0_i32_0 : i32, i32
  }
  func.func @transform_5(%arg0: i32) -> (i32, i32) {
    %c0_i32 = arith.constant 0 : i32
    %c0_i32_0 = arith.constant 0 : i32
    return %arg0, %c0_i32 : i32, i32
  }
}

module attributes {stable_mosaic.version = 11 : i64} {
  func.func @_fused_matmul_kernel(%arg0: i32, %arg1: memref<256x144xbf16, #tpu.memory_space<vmem>>, %arg2: memref<144x128xbf16, #tpu.memory_space<vmem>>, %arg3: memref<1x128xf32, #tpu.memory_space<vmem>>, %arg4: memref<256x128xbf16, #tpu.memory_space<vmem>>) attributes {dimension_semantics = [#tpu.dimension_semantics<parallel>], iteration_bounds = array<i64: 2>, scalar_prefetch = 0 : i64, scratch_operands = 0 : i64, tpu.core_type = #tpu.core_type<tc>, window_params = [{transform_indices = @transform_0, window_bounds = array<i64: 256, 144>}, {pipeline_mode = #tpu.pipeline_mode<synchronous>, transform_indices = @transform_1, window_bounds = array<i64: 144, 128>}, {pipeline_mode = #tpu.pipeline_mode<synchronous>, transform_indices = @transform_2, window_bounds = array<i64: 1, 128>}, {transform_indices = @transform_3, window_bounds = array<i64: 256, 128>}]} {
    %c0 = arith.constant 0 : index
    %c0_0 = arith.constant 0 : index
    %0 = vector.load %arg1[%c0, %c0_0] : memref<256x144xbf16, #tpu.memory_space<vmem>>, vector<256x144xbf16>
    %c0_1 = arith.constant 0 : index
    %c0_2 = arith.constant 0 : index
    %1 = vector.load %arg2[%c0_1, %c0_2] : memref<144x128xbf16, #tpu.memory_space<vmem>>, vector<144x128xbf16>
    %cst = arith.constant dense<0.000000e+00> : vector<256x128xf32>
    %2 = tpu.matmul %0, %1, %cst {dimension_numbers = #tpu.dot_dimension_numbers<[1], [0], [0], [1], [0, 0, 1, 1], [], []>} : vector<256x144xbf16>, vector<144x128xbf16>, vector<256x128xf32> -> vector<256x128xf32>
    %c0_3 = arith.constant 0 : index
    %c0_4 = arith.constant 0 : index
    %3 = vector.load %arg3[%c0_3, %c0_4] : memref<1x128xf32, #tpu.memory_space<vmem>>, vector<1x128xf32>
    %4 = vector.broadcast %3 : vector<1x128xf32> to vector<256x128xf32>
    %5 = arith.addf %2, %4 : vector<256x128xf32>
    %cst_5 = arith.constant 0.000000e+00 : f32
    %6 = vector.broadcast %cst_5 : f32 to vector<256x128xf32>
    %7 = arith.maximumf %5, %6 : vector<256x128xf32>
    %8 = arith.truncf %7 : vector<256x128xf32> to vector<256x128xbf16>
    %c0_6 = arith.constant 0 : index
    %c0_7 = arith.constant 0 : index
    %9 = vector.load %arg4[%c0_6, %c0_7] : memref<256x128xbf16, #tpu.memory_space<vmem>>, vector<256x128xbf16>
    tpu.vector_store %arg4[%c0_6, %c0_7], %8 {strides = array<i32>} : memref<256x128xbf16, #tpu.memory_space<vmem>>, vector<256x128xbf16>,
    return
  }
  func.func @transform_0(%arg0: i32) -> (i32, i32) {
    %c0_i32 = arith.constant 0 : i32
    %c0_i32_0 = arith.constant 0 : i32
    return %arg0, %c0_i32 : i32, i32
  }
  func.func @transform_1(%arg0: i32) -> (i32, i32) {
    %c0_i32 = arith.constant 0 : i32
    %c0_i32_0 = arith.constant 0 : i32
    %c0_i32_1 = arith.constant 0 : i32
    return %c0_i32, %c0_i32_0 : i32, i32
  }
  func.func @transform_2(%arg0: i32) -> (i32, i32) {
    %c0_i32 = arith.constant 0 : i32
    %c0_i32_0 = arith.constant 0 : i32
    %c0_i32_1 = arith.constant 0 : i32
    return %c0_i32, %c0_i32_0 : i32, i32
  }
  func.func @transform_3(%arg0: i32) -> (i32, i32) {
    %c0_i32 = arith.constant 0 : i32
    %c0_i32_0 = arith.constant 0 : i32
    return %arg0, %c0_i32 : i32, i32
  }
}

module attributes {stable_mosaic.version = 11 : i64} {
  func.func @_fused_matmul_kernel(%arg0: i32, %arg1: memref<512x72xbf16, #tpu.memory_space<vmem>>, %arg2: memref<72x128xbf16, #tpu.memory_space<vmem>>, %arg3: memref<512x72xbf16, #tpu.memory_space<vmem>>, %arg4: memref<72x128xbf16, #tpu.memory_space<vmem>>, %arg5: memref<1x128xf32, #tpu.memory_space<vmem>>, %arg6: memref<512x128xbf16, #tpu.memory_space<vmem>>) attributes {dimension_semantics = [#tpu.dimension_semantics<parallel>], iteration_bounds = array<i64: 4>, scalar_prefetch = 0 : i64, scratch_operands = 0 : i64, tpu.core_type = #tpu.core_type<tc>, window_params = [{transform_indices = @transform_0, window_bounds = array<i64: 512, 72>}, {pipeline_mode = #tpu.pipeline_mode<synchronous>, transform_indices = @transform_1, window_bounds = array<i64: 72, 128>}, {transform_indices = @transform_2, window_bounds = array<i64: 512, 72>}, {pipeline_mode = #tpu.pipeline_mode<synchronous>, transform_indices = @transform_3, window_bounds = array<i64: 72, 128>}, {pipeline_mode = #tpu.pipeline_mode<synchronous>, transform_indices = @transform_4, window_bounds = array<i64: 1, 128>}, {transform_indices = @transform_5, window_bounds = array<i64: 512, 128>}]} {
    %c0 = arith.constant 0 : index
    %c0_0 = arith.constant 0 : index
    %0 = vector.load %arg1[%c0, %c0_0] : memref<512x72xbf16, #tpu.memory_space<vmem>>, vector<512x72xbf16>
    %c0_1 = arith.constant 0 : index
    %c0_2 = arith.constant 0 : index
    %1 = vector.load %arg2[%c0_1, %c0_2] : memref<72x128xbf16, #tpu.memory_space<vmem>>, vector<72x128xbf16>
    %cst = arith.constant dense<0.000000e+00> : vector<512x128xf32>
    %2 = tpu.matmul %0, %1, %cst {dimension_numbers = #tpu.dot_dimension_numbers<[1], [0], [0], [1], [0, 0, 1, 1], [], []>} : vector<512x72xbf16>, vector<72x128xbf16>, vector<512x128xf32> -> vector<512x128xf32>
    %c0_3 = arith.constant 0 : index
    %c0_4 = arith.constant 0 : index
    %3 = vector.load %arg3[%c0_3, %c0_4] : memref<512x72xbf16, #tpu.memory_space<vmem>>, vector<512x72xbf16>
    %c0_5 = arith.constant 0 : index
    %c0_6 = arith.constant 0 : index
    %4 = vector.load %arg4[%c0_5, %c0_6] : memref<72x128xbf16, #tpu.memory_space<vmem>>, vector<72x128xbf16>
    %cst_7 = arith.constant dense<0.000000e+00> : vector<512x128xf32>
    %5 = tpu.matmul %3, %4, %cst_7 {dimension_numbers = #tpu.dot_dimension_numbers<[1], [0], [0], [1], [0, 0, 1, 1], [], []>} : vector<512x72xbf16>, vector<72x128xbf16>, vector<512x128xf32> -> vector<512x128xf32>
    %6 = arith.addf %2, %5 : vector<512x128xf32>
    %c0_8 = arith.constant 0 : index
    %c0_9 = arith.constant 0 : index
    %7 = vector.load %arg5[%c0_8, %c0_9] : memref<1x128xf32, #tpu.memory_space<vmem>>, vector<1x128xf32>
    %8 = vector.broadcast %7 : vector<1x128xf32> to vector<512x128xf32>
    %9 = arith.addf %6, %8 : vector<512x128xf32>
    %cst_10 = arith.constant 0.000000e+00 : f32
    %10 = vector.broadcast %cst_10 : f32 to vector<512x128xf32>
    %11 = arith.maximumf %9, %10 : vector<512x128xf32>
    %12 = arith.truncf %11 : vector<512x128xf32> to vector<512x128xbf16>
    %c0_11 = arith.constant 0 : index
    %c0_12 = arith.constant 0 : index
    %13 = vector.load %arg6[%c0_11, %c0_12] : memref<512x128xbf16, #tpu.memory_space<vmem>>, vector<512x128xbf16>
    tpu.vector_store %arg6[%c0_11, %c0_12], %12 {strides = array<i32>} : memref<512x128xbf16, #tpu.memory_space<vmem>>, vector<512x128xbf16>,
    return
  }
  func.func @transform_0(%arg0: i32) -> (i32, i32) {
    %c0_i32 = arith.constant 0 : i32
    %c0_i32_0 = arith.constant 0 : i32
    return %arg0, %c0_i32 : i32, i32
  }
  func.func @transform_1(%arg0: i32) -> (i32, i32) {
    %c0_i32 = arith.constant 0 : i32
    %c0_i32_0 = arith.constant 0 : i32
    %c0_i32_1 = arith.constant 0 : i32
    return %c0_i32, %c0_i32_0 : i32, i32
  }
  func.func @transform_2(%arg0: i32) -> (i32, i32) {
    %c0_i32 = arith.constant 0 : i32
    %c0_i32_0 = arith.constant 0 : i32
    return %arg0, %c0_i32 : i32, i32
  }
  func.func @transform_3(%arg0: i32) -> (i32, i32) {
    %c0_i32 = arith.constant 0 : i32
    %c0_i32_0 = arith.constant 0 : i32
    %c0_i32_1 = arith.constant 0 : i32
    return %c0_i32, %c0_i32_0 : i32, i32
  }
  func.func @transform_4(%arg0: i32) -> (i32, i32) {
    %c0_i32 = arith.constant 0 : i32
    %c0_i32_0 = arith.constant 0 : i32
    %c0_i32_1 = arith.constant 0 : i32
    return %c0_i32, %c0_i32_0 : i32, i32
  }
  func.func @transform_5(%arg0: i32) -> (i32, i32) {
    %c0_i32 = arith.constant 0 : i32
    %c0_i32_0 = arith.constant 0 : i32
    return %arg0, %c0_i32 : i32, i32
  }
}

module attributes {stable_mosaic.version = 11 : i64} {
  func.func @_fused_matmul_kernel(%arg0: i32, %arg1: memref<512x72xbf16, #tpu.memory_space<vmem>>, %arg2: memref<72x128xbf16, #tpu.memory_space<vmem>>, %arg3: memref<1x128xf32, #tpu.memory_space<vmem>>, %arg4: memref<512x128xbf16, #tpu.memory_space<vmem>>) attributes {dimension_semantics = [#tpu.dimension_semantics<parallel>], iteration_bounds = array<i64: 4>, scalar_prefetch = 0 : i64, scratch_operands = 0 : i64, tpu.core_type = #tpu.core_type<tc>, window_params = [{transform_indices = @transform_0, window_bounds = array<i64: 512, 72>}, {pipeline_mode = #tpu.pipeline_mode<synchronous>, transform_indices = @transform_1, window_bounds = array<i64: 72, 128>}, {pipeline_mode = #tpu.pipeline_mode<synchronous>, transform_indices = @transform_2, window_bounds = array<i64: 1, 128>}, {transform_indices = @transform_3, window_bounds = array<i64: 512, 128>}]} {
    %c0 = arith.constant 0 : index
    %c0_0 = arith.constant 0 : index
    %0 = vector.load %arg1[%c0, %c0_0] : memref<512x72xbf16, #tpu.memory_space<vmem>>, vector<512x72xbf16>
    %c0_1 = arith.constant 0 : index
    %c0_2 = arith.constant 0 : index
    %1 = vector.load %arg2[%c0_1, %c0_2] : memref<72x128xbf16, #tpu.memory_space<vmem>>, vector<72x128xbf16>
    %cst = arith.constant dense<0.000000e+00> : vector<512x128xf32>
    %2 = tpu.matmul %0, %1, %cst {dimension_numbers = #tpu.dot_dimension_numbers<[1], [0], [0], [1], [0, 0, 1, 1], [], []>} : vector<512x72xbf16>, vector<72x128xbf16>, vector<512x128xf32> -> vector<512x128xf32>
    %c0_3 = arith.constant 0 : index
    %c0_4 = arith.constant 0 : index
    %3 = vector.load %arg3[%c0_3, %c0_4] : memref<1x128xf32, #tpu.memory_space<vmem>>, vector<1x128xf32>
    %4 = vector.broadcast %3 : vector<1x128xf32> to vector<512x128xf32>
    %5 = arith.addf %2, %4 : vector<512x128xf32>
    %cst_5 = arith.constant 0.000000e+00 : f32
    %6 = vector.broadcast %cst_5 : f32 to vector<512x128xf32>
    %7 = arith.maximumf %5, %6 : vector<512x128xf32>
    %8 = arith.truncf %7 : vector<512x128xf32> to vector<512x128xbf16>
    %c0_6 = arith.constant 0 : index
    %c0_7 = arith.constant 0 : index
    %9 = vector.load %arg4[%c0_6, %c0_7] : memref<512x128xbf16, #tpu.memory_space<vmem>>, vector<512x128xbf16>
    tpu.vector_store %arg4[%c0_6, %c0_7], %8 {strides = array<i32>} : memref<512x128xbf16, #tpu.memory_space<vmem>>, vector<512x128xbf16>,
    return
  }
  func.func @transform_0(%arg0: i32) -> (i32, i32) {
    %c0_i32 = arith.constant 0 : i32
    %c0_i32_0 = arith.constant 0 : i32
    return %arg0, %c0_i32 : i32, i32
  }
  func.func @transform_1(%arg0: i32) -> (i32, i32) {
    %c0_i32 = arith.constant 0 : i32
    %c0_i32_0 = arith.constant 0 : i32
    %c0_i32_1 = arith.constant 0 : i32
    return %c0_i32, %c0_i32_0 : i32, i32
  }
  func.func @transform_2(%arg0: i32) -> (i32, i32) {
    %c0_i32 = arith.constant 0 : i32
    %c0_i32_0 = arith.constant 0 : i32
    %c0_i32_1 = arith.constant 0 : i32
    return %c0_i32, %c0_i32_0 : i32, i32
  }
  func.func @transform_3(%arg0: i32) -> (i32, i32) {
    %c0_i32 = arith.constant 0 : i32
    %c0_i32_0 = arith.constant 0 : i32
    return %arg0, %c0_i32 : i32, i32
  }
}

module attributes {stable_mosaic.version = 11 : i64} {
  func.func @_fused_matmul_kernel(%arg0: i32, %arg1: memref<512x72xbf16, #tpu.memory_space<vmem>>, %arg2: memref<72x128xbf16, #tpu.memory_space<vmem>>, %arg3: memref<1x128xf32, #tpu.memory_space<vmem>>, %arg4: memref<512x128xbf16, #tpu.memory_space<vmem>>) attributes {dimension_semantics = [#tpu.dimension_semantics<parallel>], iteration_bounds = array<i64: 16>, scalar_prefetch = 0 : i64, scratch_operands = 0 : i64, tpu.core_type = #tpu.core_type<tc>, window_params = [{transform_indices = @transform_0, window_bounds = array<i64: 512, 72>}, {pipeline_mode = #tpu.pipeline_mode<synchronous>, transform_indices = @transform_1, window_bounds = array<i64: 72, 128>}, {pipeline_mode = #tpu.pipeline_mode<synchronous>, transform_indices = @transform_2, window_bounds = array<i64: 1, 128>}, {transform_indices = @transform_3, window_bounds = array<i64: 512, 128>}]} {
    %c0 = arith.constant 0 : index
    %c0_0 = arith.constant 0 : index
    %0 = vector.load %arg1[%c0, %c0_0] : memref<512x72xbf16, #tpu.memory_space<vmem>>, vector<512x72xbf16>
    %c0_1 = arith.constant 0 : index
    %c0_2 = arith.constant 0 : index
    %1 = vector.load %arg2[%c0_1, %c0_2] : memref<72x128xbf16, #tpu.memory_space<vmem>>, vector<72x128xbf16>
    %cst = arith.constant dense<0.000000e+00> : vector<512x128xf32>
    %2 = tpu.matmul %0, %1, %cst {dimension_numbers = #tpu.dot_dimension_numbers<[1], [0], [0], [1], [0, 0, 1, 1], [], []>} : vector<512x72xbf16>, vector<72x128xbf16>, vector<512x128xf32> -> vector<512x128xf32>
    %c0_3 = arith.constant 0 : index
    %c0_4 = arith.constant 0 : index
    %3 = vector.load %arg3[%c0_3, %c0_4] : memref<1x128xf32, #tpu.memory_space<vmem>>, vector<1x128xf32>
    %4 = vector.broadcast %3 : vector<1x128xf32> to vector<512x128xf32>
    %5 = arith.addf %2, %4 : vector<512x128xf32>
    %cst_5 = arith.constant 0.000000e+00 : f32
    %6 = vector.broadcast %cst_5 : f32 to vector<512x128xf32>
    %7 = arith.maximumf %5, %6 : vector<512x128xf32>
    %8 = arith.truncf %7 : vector<512x128xf32> to vector<512x128xbf16>
    %c0_6 = arith.constant 0 : index
    %c0_7 = arith.constant 0 : index
    %9 = vector.load %arg4[%c0_6, %c0_7] : memref<512x128xbf16, #tpu.memory_space<vmem>>, vector<512x128xbf16>
    tpu.vector_store %arg4[%c0_6, %c0_7], %8 {strides = array<i32>} : memref<512x128xbf16, #tpu.memory_space<vmem>>, vector<512x128xbf16>,
    return
  }
  func.func @transform_0(%arg0: i32) -> (i32, i32) {
    %c0_i32 = arith.constant 0 : i32
    %c0_i32_0 = arith.constant 0 : i32
    return %arg0, %c0_i32 : i32, i32
  }
  func.func @transform_1(%arg0: i32) -> (i32, i32) {
    %c0_i32 = arith.constant 0 : i32
    %c0_i32_0 = arith.constant 0 : i32
    %c0_i32_1 = arith.constant 0 : i32
    return %c0_i32, %c0_i32_0 : i32, i32
  }
  func.func @transform_2(%arg0: i32) -> (i32, i32) {
    %c0_i32 = arith.constant 0 : i32
    %c0_i32_0 = arith.constant 0 : i32
    %c0_i32_1 = arith.constant 0 : i32
    return %c0_i32, %c0_i32_0 : i32, i32
  }
  func.func @transform_3(%arg0: i32) -> (i32, i32) {
    %c0_i32 = arith.constant 0 : i32
    %c0_i32_0 = arith.constant 0 : i32
    return %arg0, %c0_i32 : i32, i32
  }
}

module attributes {stable_mosaic.version = 11 : i64} {
  func.func @_fused_matmul_kernel(%arg0: i32, %arg1: memref<512x8xbf16, #tpu.memory_space<vmem>>, %arg2: memref<8x128xbf16, #tpu.memory_space<vmem>>, %arg3: memref<1x128xf32, #tpu.memory_space<vmem>>, %arg4: memref<512x128xf32, #tpu.memory_space<vmem>>) attributes {dimension_semantics = [#tpu.dimension_semantics<parallel>], iteration_bounds = array<i64: 16>, scalar_prefetch = 0 : i64, scratch_operands = 0 : i64, tpu.core_type = #tpu.core_type<tc>, window_params = [{transform_indices = @transform_0, window_bounds = array<i64: 512, 8>}, {pipeline_mode = #tpu.pipeline_mode<synchronous>, transform_indices = @transform_1, window_bounds = array<i64: 8, 128>}, {pipeline_mode = #tpu.pipeline_mode<synchronous>, transform_indices = @transform_2, window_bounds = array<i64: 1, 128>}, {transform_indices = @transform_3, window_bounds = array<i64: 512, 128>}]} {
    %c0 = arith.constant 0 : index
    %c0_0 = arith.constant 0 : index
    %0 = vector.load %arg1[%c0, %c0_0] : memref<512x8xbf16, #tpu.memory_space<vmem>>, vector<512x8xbf16>
    %c0_1 = arith.constant 0 : index
    %c0_2 = arith.constant 0 : index
    %1 = vector.load %arg2[%c0_1, %c0_2] : memref<8x128xbf16, #tpu.memory_space<vmem>>, vector<8x128xbf16>
    %cst = arith.constant dense<0.000000e+00> : vector<512x128xf32>
    %2 = tpu.matmul %0, %1, %cst {dimension_numbers = #tpu.dot_dimension_numbers<[1], [0], [0], [1], [0, 0, 1, 1], [], []>} : vector<512x8xbf16>, vector<8x128xbf16>, vector<512x128xf32> -> vector<512x128xf32>
    %c0_3 = arith.constant 0 : index
    %c0_4 = arith.constant 0 : index
    %3 = vector.load %arg3[%c0_3, %c0_4] : memref<1x128xf32, #tpu.memory_space<vmem>>, vector<1x128xf32>
    %4 = vector.broadcast %3 : vector<1x128xf32> to vector<512x128xf32>
    %5 = arith.addf %2, %4 : vector<512x128xf32>
    %c0_5 = arith.constant 0 : index
    %c0_6 = arith.constant 0 : index
    %6 = vector.load %arg4[%c0_5, %c0_6] : memref<512x128xf32, #tpu.memory_space<vmem>>, vector<512x128xf32>
    tpu.vector_store %arg4[%c0_5, %c0_6], %5 {strides = array<i32>} : memref<512x128xf32, #tpu.memory_space<vmem>>, vector<512x128xf32>,
    return
  }
  func.func @transform_0(%arg0: i32) -> (i32, i32) {
    %c0_i32 = arith.constant 0 : i32
    %c0_i32_0 = arith.constant 0 : i32
    return %arg0, %c0_i32 : i32, i32
  }
  func.func @transform_1(%arg0: i32) -> (i32, i32) {
    %c0_i32 = arith.constant 0 : i32
    %c0_i32_0 = arith.constant 0 : i32
    %c0_i32_1 = arith.constant 0 : i32
    return %c0_i32, %c0_i32_0 : i32, i32
  }
  func.func @transform_2(%arg0: i32) -> (i32, i32) {
    %c0_i32 = arith.constant 0 : i32
    %c0_i32_0 = arith.constant 0 : i32
    %c0_i32_1 = arith.constant 0 : i32
    return %c0_i32, %c0_i32_0 : i32, i32
  }
  func.func @transform_3(%arg0: i32) -> (i32, i32) {
    %c0_i32 = arith.constant 0 : i32
    %c0_i32_0 = arith.constant 0 : i32
    return %arg0, %c0_i32 : i32, i32
  }
}

</mosaic_0001>

<bundles_post_ra>
// kernel: segment_net_forward.16
= control target key start
LH: loop header
LB: loop body
LE: loop exit
PB: predicated region body
PF: predicated region fallthrough
CT: control target
= control target key end

     0   :  { %s1829_s12 = smov 0   ;;  %s2028_s0 = inlined_call_operand.vmem [shape: bf16[2048,27], index: 0, kind: input, shape index: {}]   ;;  %s2029_s1 = inlined_call_operand.vmem [shape: bf16[27,128], index: 1, kind: input, shape index: {}]   ;;  %s2030_s2 = inlined_call_operand.vmem [shape: f32[1,128], index: 2, kind: input, shape index: {}]   ;;  %s2031_s3 = inlined_call_operand.vmem [shape: bf16[2048,128], index: 3, kind: output, shape index: {}]  }
   0x1 LB: > { %s1254_s13 = sadd.s32 4294967295, %s1806_s12   ;;  %p1258_p0 = scmp.ge.s32.totalorder %s1806_s12, 1  ;;  %s1806_s12 = sphi %s1829_s12, %s13_s12  }
   0x2   : > { %p138_p1 = scmp.lt.s32.totalorder %s1806_s12, 5 }
   0x4   : > { %p139_p2 = pnand %p1258_p0, %p138_p1 }
   0x5   : > { %s1259_s16 = sshll.u32 (!%p139_p2), %s1254_s13, 6 }
   0x6   : > { %142 = sbr.rel (%p139_p2) target bundleno = 286 (0x11e), region = 32  ;;  %p163_p3 = scmp.lt.s32.totalorder (!%p139_p2), %s1259_s16, 255 }
   0xb   : > { %v1766_v0 = vld [vmem:[%s2029_s1 + $0x8] sm:$0x3f]   ;;  %vm518_vm0 = vcmask 1044480   ;;  %vm519_vm1 = vcmask 1045504   ;;  %v1808_v1 = vmov 65535   ;;  %v1767_v5 = vld [vmem:[%s2029_s1] sm:$0xff]  }
   0xc   : > { %v520_v2 = vsel %vm518_vm0, 4294967295, %v1808_v1  ;;  %s2033_s16 = smov (!%p163_p3, %s1259_s16), 255  ;;  %vm421_vm2 = vcmask 220160   ;;  %v1920_v38 = vld [vmem:[%s2030_s2] ss:$0 sm:$0xff] }
   0xd   : > { %v521_v3 = vsel %vm519_vm1, %v520_v2, 0  ;;  %s1260_s19 = sshll.u32 %s2033_s16, 2 }
   0xe   : > { %v523_v4 = vand.u32 %v1766_v0, %v521_v3  ;;  %s1851_s22 = scalar_lea.vmem %s2028_s0, %s1260_s19  ;;  %s1935_s27 = scalar_lea.vmem %s2031_s3, %s1260_s19 }
   0xf   : > { %v1768_v6 = vld [vmem:[%s1851_s22] sm:$0xff]   ;;  %v1770_v8 = vld [vmem:[%s1851_s22 + $0x8] sm:$0xff]   ;;  %v1772_v10 = vld [vmem:[%s1851_s22 + $0x10] sm:$0xff]  }
  0x10   : > { %1685 = vmatprep.subr.bf16.mxu0 %v523_v4  ;;  %1753 = vmatprep.subr.bf16.mxu1 %v523_v4  ;;  %v1769_v7 = vld [vmem:[%s1851_s22 + $0x80] sm:$0xff]   ;;  %v1771_v9 = vld [vmem:[%s1851_s22 + $0x88] sm:$0xff]   ;;  %v1773_v11 = vld [vmem:[%s1851_s22 + $0x90] sm:$0xff]  }
  0x11   : > { %1686 = vmatpush3.bf16.msra.mxu0 %v523_v4  ;;  %1755 = vmatpush3.bf16.msra.mxu1 %v523_v4  ;;  %v1774_v12 = vld [vmem:[%s1851_s22 + $0x18] sm:$0xff]   ;;  %v1776_v14 = vld [vmem:[%s1851_s22 + $0x20] sm:$0xff]   ;;  %v1778_v16 = vld [vmem:[%s1851_s22 + $0x28] sm:$0xff]  }
  0x12   : > { %1687 = vmatprep.subr.bf16.mxu0 %v1767_v5  ;;  %1754 = vmatprep.subr.bf16.mxu1 %v1767_v5  ;;  %v1775_v13 = vld [vmem:[%s1851_s22 + $0x98] sm:$0xff]   ;;  %v1777_v15 = vld [vmem:[%s1851_s22 + $0xa0] sm:$0xff]   ;;  %v1779_v17 = vld [vmem:[%s1851_s22 + $0xa8] sm:$0xff]  }
  0x13   : > { %1689 = vmatprep.mubr.msk.bf16.mxu0 %vm421_vm2, %v1768_v6  ;;  %1721 = vmatprep.mubr.msk.bf16.mxu1 %vm421_vm2, %v1769_v7  ;;  %v1780_v18 = vld [vmem:[%s1851_s22 + $0x30] sm:$0xff]   ;;  %v1782_v20 = vld [vmem:[%s1851_s22 + $0x38] sm:$0xff]   ;;  %v1784_v22 = vld [vmem:[%s1851_s22 + $0x40] sm:$0xff]  }
  0x14   : > { %v1781_v19 = vld [vmem:[%s1851_s22 + $0xb0] sm:$0xff]   ;;  %v1783_v21 = vld [vmem:[%s1851_s22 + $0xb8] sm:$0xff]   ;;  %v1785_v23 = vld [vmem:[%s1851_s22 + $0xc0] sm:$0xff]  }
  0x15   : > { %1688 = vmatpush3.bf16.msra.mxu0 %v1767_v5  ;;  %1756 = vmatpush3.bf16.msra.mxu1 %v1767_v5  ;;  %v1786_v24 = vld [vmem:[%s1851_s22 + $0x48] sm:$0xff]   ;;  %v1788_v26 = vld [vmem:[%s1851_s22 + $0x50] sm:$0xff]   ;;  %v1790_v28 = vld [vmem:[%s1851_s22 + $0x58] sm:$0xff]  }
  0x16   : > { %v1787_v25 = vld [vmem:[%s1851_s22 + $0xc8] sm:$0xff]   ;;  %v1789_v27 = vld [vmem:[%s1851_s22 + $0xd0] sm:$0xff]   ;;  %v1791_v29 = vld [vmem:[%s1851_s22 + $0xd8] sm:$0xff]  }
  0x17   : > { %v1792_v30 = vld [vmem:[%s1851_s22 + $0x60] sm:$0xff]   ;;  %v1794_v32 = vld [vmem:[%s1851_s22 + $0x68] sm:$0xff]   ;;  %v1796_v34 = vld [vmem:[%s1851_s22 + $0x70] sm:$0xff]  }
  0x18   : > { %1690 = vmatmul.mubr.msk.bf16.vlgmr.msra.gmra.mxu0 %vm421_vm2, %v1770_v8  ;;  %1722 = vmatmul.mubr.msk.bf16.vlgmr.msra.gmra.mxu1 %vm421_vm2, %v1771_v9  ;;  %v1793_v31 = vld [vmem:[%s1851_s22 + $0xe0] sm:$0xff]   ;;  %v1795_v33 = vld [vmem:[%s1851_s22 + $0xe8] sm:$0xff]   ;;  %v1797_v35 = vld [vmem:[%s1851_s22 + $0xf0] sm:$0xff]  }
  0x19   : > { %1693 = vmatprep.mubr.msk.bf16.mxu0 %vm421_vm2, %v1772_v10  ;;  %1725 = vmatprep.mubr.msk.bf16.mxu1 %vm421_vm2, %v1773_v11  ;;  %v1798_v36 = vld [vmem:[%s1851_s22 + $0x78] sm:$0xff]  }
  0x1a   : > { %v1799_v37 = vld [vmem:[%s1851_s22 + $0xf8] sm:$0xff]  }
  0x20   : > { %1694 = vmatmul.mubr.msk.bf16.gmra.mxu0 %vm421_vm2, %v1774_v12  ;;  %1726 = vmatmul.mubr.msk.bf16.gmra.mxu1 %vm421_vm2, %v1775_v13 }
  0x21   : > { %1697 = vmatprep.mubr.msk.bf16.mxu0 %vm421_vm2, %v1776_v14  ;;  %1729 = vmatprep.mubr.msk.bf16.mxu1 %vm421_vm2, %v1777_v15 }
  0x28   : > { %1698 = vmatmul.mubr.msk.bf16.gmra.mxu0 %vm421_vm2, %v1778_v16  ;;  %1730 = vmatmul.mubr.msk.bf16.gmra.mxu1 %vm421_vm2, %v1779_v17 }
  0x29   : > { %1701 = vmatprep.mubr.msk.bf16.mxu0 %vm421_vm2, %v1780_v18  ;;  %1733 = vmatprep.mubr.msk.bf16.mxu1 %vm421_vm2, %v1781_v19 }
  0x30   : > { %1702 = vmatmul.mubr.msk.bf16.gmra.mxu0 %vm421_vm2, %v1782_v20  ;;  %1734 = vmatmul.mubr.msk.bf16.gmra.mxu1 %vm421_vm2, %v1783_v21 }
  0x31   : > { %1705 = vmatprep.mubr.msk.bf16.mxu0 %vm421_vm2, %v1784_v22  ;;  %1737 = vmatprep.mubr.msk.bf16.mxu1 %vm421_vm2, %v1785_v23 }
  0x38   : > { %1706 = vmatmul.mubr.msk.bf16.gmra.mxu0 %vm421_vm2, %v1786_v24  ;;  %1738 = vmatmul.mubr.msk.bf16.gmra.mxu1 %vm421_vm2, %v1787_v25 }
  0x39   : > { %1709 = vmatprep.mubr.msk.bf16.mxu0 %vm421_vm2, %v1788_v26  ;;  %1741 = vmatprep.mubr.msk.bf16.mxu1 %vm421_vm2, %v1789_v27 }
  0x40   : > { %1710 = vmatmul.mubr.msk.bf16.gmra.mxu0 %vm421_vm2, %v1790_v28  ;;  %1742 = vmatmul.mubr.msk.bf16.gmra.mxu1 %vm421_vm2, %v1791_v29 }
  0x41   : > { %1713 = vmatprep.mubr.msk.bf16.mxu0 %vm421_vm2, %v1792_v30  ;;  %1745 = vmatprep.mubr.msk.bf16.mxu1 %vm421_vm2, %v1793_v31 }
  0x48   : > { %1714 = vmatmul.mubr.msk.bf16.gmra.mxu0 %vm421_vm2, %v1794_v32  ;;  %1746 = vmatmul.mubr.msk.bf16.gmra.mxu1 %vm421_vm2, %v1795_v33 }
  0x49   : > { %1717 = vmatprep.mubr.msk.bf16.mxu0 %vm421_vm2, %v1796_v34  ;;  %1749 = vmatprep.mubr.msk.bf16.mxu1 %vm421_vm2, %v1797_v35 }
  0x50   : > { %1718 = vmatmul.mubr.msk.bf16.gmra.mxu0 %vm421_vm2, %v1798_v36  ;;  %1750 = vmatmul.mubr.msk.bf16.gmra.mxu1 %vm421_vm2, %v1799_v37 }
  0xd8   : > { %v1691_v39 = vpop.f32.mrf.mxu0  ;;  %v1723_v40 = vpop.f32.mrf.mxu1 }
  0xd9   : > { %v568_v41 = vadd.f32 %v1691_v39, %v1920_v38  ;;  %v696_v42 = vadd.f32 %v1723_v40, %v1920_v38 }
  0xda   : > { %v559_v43 = vpop.f32.mrf.mxu0  ;;  %v687_v44 = vpop.f32.mrf.mxu1 }
  0xdb   : > { %v560_v45 = vadd.f32 %v1920_v38, %v559_v43  ;;  %v688_v46 = vadd.f32 %v1920_v38, %v687_v44  ;;  %v816_v51 = vmax.f32 %v568_v41, 0.0  ;;  %v848_v52 = vmax.f32 %v696_v42, 0.0 }
  0xdc   : > { %v1692_v47 = vpop.f32.mrf.mxu0  ;;  %v1724_v48 = vpop.f32.mrf.mxu1 }
  0xdd   : > { %v571_v49 = vadd.f32 %v1692_v47, %v1920_v38  ;;  %v699_v50 = vadd.f32 %v1724_v48, %v1920_v38  ;;  %v814_v59 = vmax.f32 %v560_v45, 0.0  ;;  %v846_v60 = vmax.f32 %v688_v46, 0.0 }
  0xde   : > { %v562_v53 = vpop.f32.mrf.mxu0  ;;  %v690_v54 = vpop.f32.mrf.mxu1 }
  0xdf   : > { %v817_v55 = vmax.f32 %v571_v49, 0.0  ;;  %v849_v56 = vmax.f32 %v699_v50, 0.0  ;;  %v563_v57 = vadd.f32 %v1920_v38, %v562_v53  ;;  %v691_v58 = vadd.f32 %v1920_v38, %v690_v54 }
  0xe0   : > { %v1695_v61 = vpop.f32.mrf.mxu0  ;;  %v1727_v62 = vpop.f32.mrf.mxu1 }
  0xe1   : > { %v1468_v63 = vpack.c.bf16 %v817_v55, %v816_v51  ;;  %v1548_v0 = vpack.c.bf16 %v849_v56, %v848_v52  ;;  %v815_v1 = vmax.f32 %v563_v57, 0.0  ;;  %v847_v2 = vmax.f32 %v691_v58, 0.0 }
  0xe2   : > { %v584_v3 = vadd.f32 %v1695_v61, %v1920_v38  ;;  %v712_v4 = vadd.f32 %v1727_v62, %v1920_v38  ;;  %v575_v5 = vpop.f32.mrf.mxu0  ;;  %v703_v6 = vpop.f32.mrf.mxu1 }
  0xe3   : > { %1620 = vst [vmem:[%s1935_s27 + $0x8] sm:$0xff] %v1468_v63   ;;  %1636 = vst [vmem:[%s1935_s27 + $0x88] sm:$0xff] %v1548_v0   ;;  %v1463_v7 = vpack.c.bf16 %v815_v1, %v814_v59  ;;  %v1543_v8 = vpack.c.bf16 %v847_v2, %v846_v60  ;;  %v576_v9 = vadd.f32 %v1920_v38, %v575_v5 }
  0xe4   : > { %v704_v10 = vadd.f32 %v1920_v38, %v703_v6  ;;  %v1696_v11 = vpop.f32.mrf.mxu0  ;;  %v1728_v12 = vpop.f32.mrf.mxu1  ;;  %v820_v15 = vmax.f32 %v584_v3, 0.0  ;;  %v852_v16 = vmax.f32 %v712_v4, 0.0 }
  0xe5   : > { %1464 = vst [vmem:[%s1935_s27] sm:$0xff] %v1463_v7   ;;  %1635 = vst [vmem:[%s1935_s27 + $0x80] sm:$0xff] %v1543_v8   ;;  %v587_v13 = vadd.f32 %v1696_v11, %v1920_v38  ;;  %v715_v14 = vadd.f32 %v1728_v12, %v1920_v38  ;;  %v818_v23 = vmax.f32 %v576_v9, 0.0 }
  0xe6   : > { %v578_v17 = vpop.f32.mrf.mxu0  ;;  %v706_v18 = vpop.f32.mrf.mxu1  ;;  %v850_v24 = vmax.f32 %v704_v10, 0.0 }
  0xe7   : > { %v821_v19 = vmax.f32 %v587_v13, 0.0  ;;  %v853_v20 = vmax.f32 %v715_v14, 0.0  ;;  %v579_v21 = vadd.f32 %v1920_v38, %v578_v17  ;;  %v707_v22 = vadd.f32 %v1920_v38, %v706_v18 }
  0xe8   : > { %v1699_v25 = vpop.f32.mrf.mxu0  ;;  %v1731_v26 = vpop.f32.mrf.mxu1 }
  0xe9   : > { %v1478_v27 = vpack.c.bf16 %v821_v19, %v820_v15  ;;  %v1558_v28 = vpack.c.bf16 %v853_v20, %v852_v16  ;;  %v819_v29 = vmax.f32 %v579_v21, 0.0  ;;  %v851_v30 = vmax.f32 %v707_v22, 0.0 }
  0xea   : > { %v600_v31 = vadd.f32 %v1699_v25, %v1920_v38  ;;  %v728_v32 = vadd.f32 %v1731_v26, %v1920_v38  ;;  %v591_v33 = vpop.f32.mrf.mxu0  ;;  %v719_v34 = vpop.f32.mrf.mxu1 }
  0xeb   : > { %1622 = vst [vmem:[%s1935_s27 + $0x18] sm:$0xff] %v1478_v27   ;;  %1638 = vst [vmem:[%s1935_s27 + $0x98] sm:$0xff] %v1558_v28   ;;  %v1473_v35 = vpack.c.bf16 %v819_v29, %v818_v23  ;;  %v1553_v36 = vpack.c.bf16 %v851_v30, %v850_v24  ;;  %v592_v37 = vadd.f32 %v1920_v38, %v591_v33 }
  0xec   : > { %v720_v39 = vadd.f32 %v1920_v38, %v719_v34  ;;  %v1700_v40 = vpop.f32.mrf.mxu0  ;;  %v1732_v41 = vpop.f32.mrf.mxu1  ;;  %v824_v44 = vmax.f32 %v600_v31, 0.0  ;;  %v856_v45 = vmax.f32 %v728_v32, 0.0 }
  0xed   : > { %1621 = vst [vmem:[%s1935_s27 + $0x10] sm:$0xff] %v1473_v35   ;;  %1637 = vst [vmem:[%s1935_s27 + $0x90] sm:$0xff] %v1553_v36   ;;  %v603_v42 = vadd.f32 %v1700_v40, %v1920_v38  ;;  %v731_v43 = vadd.f32 %v1732_v41, %v1920_v38  ;;  %v822_v52 = vmax.f32 %v592_v37, 0.0 }
  0xee   : > { %v594_v46 = vpop.f32.mrf.mxu0  ;;  %v722_v47 = vpop.f32.mrf.mxu1  ;;  %v854_v53 = vmax.f32 %v720_v39, 0.0 }
  0xef   : > { %v825_v48 = vmax.f32 %v603_v42, 0.0  ;;  %v857_v49 = vmax.f32 %v731_v43, 0.0  ;;  %v595_v50 = vadd.f32 %v1920_v38, %v594_v46  ;;  %v723_v51 = vadd.f32 %v1920_v38, %v722_v47 }
  0xf0   : > { %v1703_v54 = vpop.f32.mrf.mxu0  ;;  %v1735_v55 = vpop.f32.mrf.mxu1 }
  0xf1   : > { %v1488_v56 = vpack.c.bf16 %v825_v48, %v824_v44  ;;  %v1568_v57 = vpack.c.bf16 %v857_v49, %v856_v45  ;;  %v823_v58 = vmax.f32 %v595_v50, 0.0  ;;  %v855_v59 = vmax.f32 %v723_v51, 0.0 }
  0xf2   : > { %v616_v60 = vadd.f32 %v1703_v54, %v1920_v38  ;;  %v744_v61 = vadd.f32 %v1735_v55, %v1920_v38  ;;  %v607_v62 = vpop.f32.mrf.mxu0  ;;  %v735_v63 = vpop.f32.mrf.mxu1 }
  0xf3   : > { %1624 = vst [vmem:[%s1935_s27 + $0x28] sm:$0xff] %v1488_v56   ;;  %1640 = vst [vmem:[%s1935_s27 + $0xa8] sm:$0xff] %v1568_v57   ;;  %v1483_v0 = vpack.c.bf16 %v823_v58, %v822_v52  ;;  %v1563_v1 = vpack.c.bf16 %v855_v59, %v854_v53  ;;  %v608_v2 = vadd.f32 %v1920_v38, %v607_v62 }
  0xf4   : > { %v736_v3 = vadd.f32 %v1920_v38, %v735_v63  ;;  %v1704_v4 = vpop.f32.mrf.mxu0  ;;  %v1736_v5 = vpop.f32.mrf.mxu1  ;;  %v828_v8 = vmax.f32 %v616_v60, 0.0  ;;  %v860_v9 = vmax.f32 %v744_v61, 0.0 }
  0xf5   : > { %1623 = vst [vmem:[%s1935_s27 + $0x20] sm:$0xff] %v1483_v0   ;;  %1639 = vst [vmem:[%s1935_s27 + $0xa0] sm:$0xff] %v1563_v1   ;;  %v619_v6 = vadd.f32 %v1704_v4, %v1920_v38  ;;  %v747_v7 = vadd.f32 %v1736_v5, %v1920_v38  ;;  %v826_v16 = vmax.f32 %v608_v2, 0.0 }
  0xf6   : > { %v610_v10 = vpop.f32.mrf.mxu0  ;;  %v738_v11 = vpop.f32.mrf.mxu1  ;;  %v858_v17 = vmax.f32 %v736_v3, 0.0 }
  0xf7   : > { %v829_v12 = vmax.f32 %v619_v6, 0.0  ;;  %v861_v13 = vmax.f32 %v747_v7, 0.0  ;;  %v611_v14 = vadd.f32 %v1920_v38, %v610_v10  ;;  %v739_v15 = vadd.f32 %v1920_v38, %v738_v11 }
  0xf8   : > { %v1707_v18 = vpop.f32.mrf.mxu0  ;;  %v1739_v19 = vpop.f32.mrf.mxu1 }
  0xf9   : > { %v1498_v20 = vpack.c.bf16 %v829_v12, %v828_v8  ;;  %v1578_v21 = vpack.c.bf16 %v861_v13, %v860_v9  ;;  %v827_v22 = vmax.f32 %v611_v14, 0.0  ;;  %v859_v23 = vmax.f32 %v739_v15, 0.0 }
  0xfa   : > { %v632_v24 = vadd.f32 %v1707_v18, %v1920_v38  ;;  %v760_v25 = vadd.f32 %v1739_v19, %v1920_v38  ;;  %v623_v26 = vpop.f32.mrf.mxu0  ;;  %v751_v27 = vpop.f32.mrf.mxu1 }
  0xfb   : > { %1626 = vst [vmem:[%s1935_s27 + $0x38] sm:$0xff] %v1498_v20   ;;  %1642 = vst [vmem:[%s1935_s27 + $0xb8] sm:$0xff] %v1578_v21   ;;  %v1493_v28 = vpack.c.bf16 %v827_v22, %v826_v16  ;;  %v1573_v29 = vpack.c.bf16 %v859_v23, %v858_v17  ;;  %v624_v30 = vadd.f32 %v1920_v38, %v623_v26 }
  0xfc   : > { %v752_v31 = vadd.f32 %v1920_v38, %v751_v27  ;;  %v1708_v32 = vpop.f32.mrf.mxu0  ;;  %v1740_v33 = vpop.f32.mrf.mxu1  ;;  %v832_v36 = vmax.f32 %v632_v24, 0.0  ;;  %v864_v37 = vmax.f32 %v760_v25, 0.0 }
  0xfd   : > { %1625 = vst [vmem:[%s1935_s27 + $0x30] sm:$0xff] %v1493_v28   ;;  %1641 = vst [vmem:[%s1935_s27 + $0xb0] sm:$0xff] %v1573_v29   ;;  %v635_v34 = vadd.f32 %v1708_v32, %v1920_v38  ;;  %v763_v35 = vadd.f32 %v1740_v33, %v1920_v38  ;;  %v830_v45 = vmax.f32 %v624_v30, 0.0 }
  0xfe   : > { %v626_v39 = vpop.f32.mrf.mxu0  ;;  %v754_v40 = vpop.f32.mrf.mxu1  ;;  %v862_v46 = vmax.f32 %v752_v31, 0.0 }
  0xff   : > { %v833_v41 = vmax.f32 %v635_v34, 0.0  ;;  %v865_v42 = vmax.f32 %v763_v35, 0.0  ;;  %v627_v43 = vadd.f32 %v1920_v38, %v626_v39  ;;  %v755_v44 = vadd.f32 %v1920_v38, %v754_v40 }
 0x100   : > { %v1711_v47 = vpop.f32.mrf.mxu0  ;;  %v1743_v48 = vpop.f32.mrf.mxu1 }
 0x101   : > { %v1508_v49 = vpack.c.bf16 %v833_v41, %v832_v36  ;;  %v1588_v50 = vpack.c.bf16 %v865_v42, %v864_v37  ;;  %v831_v51 = vmax.f32 %v627_v43, 0.0  ;;  %v863_v52 = vmax.f32 %v755_v44, 0.0 }
 0x102   : > { %v648_v53 = vadd.f32 %v1711_v47, %v1920_v38  ;;  %v776_v54 = vadd.f32 %v1743_v48, %v1920_v38  ;;  %v639_v55 = vpop.f32.mrf.mxu0  ;;  %v767_v56 = vpop.f32.mrf.mxu1 }
 0x103   : > { %1628 = vst [vmem:[%s1935_s27 + $0x48] sm:$0xff] %v1508_v49   ;;  %1644 = vst [vmem:[%s1935_s27 + $0xc8] sm:$0xff] %v1588_v50   ;;  %v1503_v57 = vpack.c.bf16 %v831_v51, %v830_v45  ;;  %v1583_v58 = vpack.c.bf16 %v863_v52, %v862_v46  ;;  %v640_v59 = vadd.f32 %v1920_v38, %v639_v55 }
 0x104   : > { %v768_v60 = vadd.f32 %v1920_v38, %v767_v56  ;;  %v1712_v61 = vpop.f32.mrf.mxu0  ;;  %v1744_v62 = vpop.f32.mrf.mxu1  ;;  %v836_v1 = vmax.f32 %v648_v53, 0.0  ;;  %v868_v2 = vmax.f32 %v776_v54, 0.0 }
 0x105   : > { %1627 = vst [vmem:[%s1935_s27 + $0x40] sm:$0xff] %v1503_v57   ;;  %1643 = vst [vmem:[%s1935_s27 + $0xc0] sm:$0xff] %v1583_v58   ;;  %v651_v63 = vadd.f32 %v1712_v61, %v1920_v38  ;;  %v779_v0 = vadd.f32 %v1744_v62, %v1920_v38  ;;  %v834_v9 = vmax.f32 %v640_v59, 0.0 }
 0x106   : > { %v642_v3 = vpop.f32.mrf.mxu0  ;;  %v770_v4 = vpop.f32.mrf.mxu1  ;;  %v866_v10 = vmax.f32 %v768_v60, 0.0 }
 0x107   : > { %v837_v5 = vmax.f32 %v651_v63, 0.0  ;;  %v869_v6 = vmax.f32 %v779_v0, 0.0  ;;  %v643_v7 = vadd.f32 %v1920_v38, %v642_v3  ;;  %v771_v8 = vadd.f32 %v1920_v38, %v770_v4 }
 0x108   : > { %v1715_v11 = vpop.f32.mrf.mxu0  ;;  %v1747_v12 = vpop.f32.mrf.mxu1 }
 0x109   : > { %v1518_v13 = vpack.c.bf16 %v837_v5, %v836_v1  ;;  %v1598_v14 = vpack.c.bf16 %v869_v6, %v868_v2  ;;  %v835_v15 = vmax.f32 %v643_v7, 0.0  ;;  %v867_v16 = vmax.f32 %v771_v8, 0.0 }
 0x10a   : > { %v664_v17 = vadd.f32 %v1715_v11, %v1920_v38  ;;  %v792_v18 = vadd.f32 %v1747_v12, %v1920_v38  ;;  %v655_v19 = vpop.f32.mrf.mxu0  ;;  %v783_v20 = vpop.f32.mrf.mxu1 }
 0x10b   : > { %1630 = vst [vmem:[%s1935_s27 + $0x58] sm:$0xff] %v1518_v13   ;;  %1646 = vst [vmem:[%s1935_s27 + $0xd8] sm:$0xff] %v1598_v14   ;;  %v1513_v21 = vpack.c.bf16 %v835_v15, %v834_v9  ;;  %v1593_v22 = vpack.c.bf16 %v867_v16, %v866_v10  ;;  %v656_v23 = vadd.f32 %v1920_v38, %v655_v19 }
 0x10c   : > { %v784_v24 = vadd.f32 %v1920_v38, %v783_v20  ;;  %v1716_v25 = vpop.f32.mrf.mxu0  ;;  %v1748_v26 = vpop.f32.mrf.mxu1  ;;  %v840_v29 = vmax.f32 %v664_v17, 0.0  ;;  %v872_v30 = vmax.f32 %v792_v18, 0.0 }
 0x10d   : > { %1629 = vst [vmem:[%s1935_s27 + $0x50] sm:$0xff] %v1513_v21   ;;  %1645 = vst [vmem:[%s1935_s27 + $0xd0] sm:$0xff] %v1593_v22   ;;  %v667_v27 = vadd.f32 %v1716_v25, %v1920_v38  ;;  %v795_v28 = vadd.f32 %v1748_v26, %v1920_v38  ;;  %v838_v37 = vmax.f32 %v656_v23, 0.0 }
 0x10e   : > { %v658_v31 = vpop.f32.mrf.mxu0  ;;  %v786_v32 = vpop.f32.mrf.mxu1  ;;  %v870_v39 = vmax.f32 %v784_v24, 0.0 }
 0x10f   : > { %v841_v33 = vmax.f32 %v667_v27, 0.0  ;;  %v873_v34 = vmax.f32 %v795_v28, 0.0  ;;  %v659_v35 = vadd.f32 %v1920_v38, %v658_v31  ;;  %v787_v36 = vadd.f32 %v1920_v38, %v786_v32 }
 0x110   : > { %v1719_v40 = vpop.f32.mrf.mxu0  ;;  %v1751_v41 = vpop.f32.mrf.mxu1 }
 0x111   : > { %v1528_v42 = vpack.c.bf16 %v841_v33, %v840_v29  ;;  %v1608_v43 = vpack.c.bf16 %v873_v34, %v872_v30  ;;  %v839_v44 = vmax.f32 %v659_v35, 0.0  ;;  %v871_v45 = vmax.f32 %v787_v36, 0.0 }
 0x112   : > { %v680_v46 = vadd.f32 %v1719_v40, %v1920_v38  ;;  %v808_v47 = vadd.f32 %v1751_v41, %v1920_v38  ;;  %v671_v48 = vpop.f32.mrf.mxu0  ;;  %v799_v49 = vpop.f32.mrf.mxu1 }
 0x113   : > { %1632 = vst [vmem:[%s1935_s27 + $0x68] sm:$0xff] %v1528_v42   ;;  %1648 = vst [vmem:[%s1935_s27 + $0xe8] sm:$0xff] %v1608_v43   ;;  %v1523_v50 = vpack.c.bf16 %v839_v44, %v838_v37  ;;  %v1603_v51 = vpack.c.bf16 %v871_v45, %v870_v39  ;;  %v672_v52 = vadd.f32 %v1920_v38, %v671_v48 }
 0x114   : > { %v800_v53 = vadd.f32 %v1920_v38, %v799_v49  ;;  %v1720_v54 = vpop.f32.mrf.mxu0  ;;  %v1752_v55 = vpop.f32.mrf.mxu1  ;;  %v844_v58 = vmax.f32 %v680_v46, 0.0  ;;  %v876_v59 = vmax.f32 %v808_v47, 0.0 }
 0x115   : > { %1631 = vst [vmem:[%s1935_s27 + $0x60] sm:$0xff] %v1523_v50   ;;  %1647 = vst [vmem:[%s1935_s27 + $0xe0] sm:$0xff] %v1603_v51   ;;  %v683_v56 = vadd.f32 %v1720_v54, %v1920_v38  ;;  %v811_v57 = vadd.f32 %v1752_v55, %v1920_v38  ;;  %v842_v2 = vmax.f32 %v672_v52, 0.0 }
 0x116   : > { %v674_v60 = vpop.f32.mrf.mxu0  ;;  %v802_v61 = vpop.f32.mrf.mxu1  ;;  %v874_v3 = vmax.f32 %v800_v53, 0.0 }
 0x117   : > { %v845_v62 = vmax.f32 %v683_v56, 0.0  ;;  %v877_v63 = vmax.f32 %v811_v57, 0.0  ;;  %v675_v0 = vadd.f32 %v1920_v38, %v674_v60  ;;  %v803_v1 = vadd.f32 %v1920_v38, %v802_v61 }
 0x119   : > { %v1538_v4 = vpack.c.bf16 %v845_v62, %v844_v58  ;;  %v1618_v5 = vpack.c.bf16 %v877_v63, %v876_v59  ;;  %v843_v6 = vmax.f32 %v675_v0, 0.0  ;;  %v875_v7 = vmax.f32 %v803_v1, 0.0 }
 0x11b   : > { %1634 = vst [vmem:[%s1935_s27 + $0x78] sm:$0xff] %v1538_v4   ;;  %1650 = vst [vmem:[%s1935_s27 + $0xf8] sm:$0xff] %v1618_v5   ;;  %v1533_v8 = vpack.c.bf16 %v843_v6, %v842_v2  ;;  %v1613_v9 = vpack.c.bf16 %v875_v7, %v874_v3 }
 0x11d   : > { %1633 = vst [vmem:[%s1935_s27 + $0x70] sm:$0xff] %v1533_v8   ;;  %1649 = vst [vmem:[%s1935_s27 + $0xf0] sm:$0xff] %v1613_v9  }
 0x11e PF: > { %s13_s12 = sadd.s32 1, %s1806_s12  }
 0x11f   : > { %p10_p4 = scmp.ge.s32.totalorder %s13_s12, 6  }
 0x121   :  { %12 = sbr.rel (!%p10_p4) target bundleno = 1 (0x1), region = 62 }

// kernel: segment_net_forward.17
= control target key start
LH: loop header
LB: loop body
LE: loop exit
PB: predicated region body
PF: predicated region fallthrough
CT: control target
= control target key end

     0   :  { %s1132_s12 = smov 0   ;;  %s1260_s0 = inlined_call_operand.vmem [shape: bf16[512,72], index: 0, kind: input, shape index: {}]   ;;  %s1261_s1 = inlined_call_operand.vmem [shape: bf16[72,128], index: 1, kind: input, shape index: {}]   ;;  %s1262_s2 = inlined_call_operand.vmem [shape: f32[1,128], index: 2, kind: input, shape index: {}]   ;;  %s1263_s3 = inlined_call_operand.vmem [shape: bf16[512,128], index: 3, kind: output, shape index: {}]  }
   0x1 LB: > { %s792_s13 = sadd.s32 4294967295, %s1110_s12   ;;  %p796_p0 = scmp.ge.s32.totalorder %s1110_s12, 1  ;;  %s1110_s12 = sphi %s1132_s12, %s13_s12  }
   0x2   : > { %p138_p1 = scmp.lt.s32.totalorder %s1110_s12, 3 }
   0x4   : > { %p139_p2 = pnand %p796_p0, %p138_p1 }
   0x5   : > { %s797_s18 = sshll.u32 (!%p139_p2), %s792_s13, 5 }
   0x6   : > { %142 = sbr.rel (%p139_p2) target bundleno = 262 (0x106), region = 32  ;;  %p163_p3 = scmp.lt.s32.totalorder (!%p139_p2), %s797_s18, 63 }
   0xb   : > { %v1083_v0 = vld [vmem:[%s1261_s1 + $0x20] ss:$0 sps:$4 sm:$0xff]   ;;  %vm379_vm0 = vcmask 1043456   ;;  %v1084_v1 = vld [vmem:[%s1261_s1 + $0x18] sm:$0xff]   ;;  %v1085_v3 = vld [vmem:[%s1261_s1 + $0x10] sm:$0xff]   ;;  %s1265_s18 = smov (!%p163_p3, %s797_s18), 63 }
   0xc   : > { %1073 = vmatprep.subr.msk.bf16.mxu0 %vm379_vm0, %v1083_v0  ;;  %1074 = vmatprep.subr.msk.bf16.mxu1 %vm379_vm0, %v1083_v0  ;;  %v381_v2 = vsel %vm379_vm0, %v1083_v0, 0  ;;  %v1086_v4 = vld [vmem:[%s1261_s1 + $0x8] sm:$0xff]   ;;  %s798_s23 = sshll.u32 %s1265_s18, 2  ;;  %vm330_vm1 = vcmask 588800   ;;  %v1087_v7 = vld [vmem:[%s1261_s1] sm:$0xff]  }
   0xd   : > { %1022 = vmatpush3.bf16.msra.mxu0 %v381_v2  ;;  %1068 = vmatpush3.bf16.msra.mxu1 %v381_v2  ;;  %s1160_s26 = scalar_lea.vmem %s1260_s0, %s798_s23  ;;  %v1200_v22 = vld [vmem:[%s1262_s2] ss:$0 sm:$0xff]  ;;  %s1215_s6 = scalar_lea.vmem %s1263_s3, %s798_s23 }
   0xe   : > { %1023 = vmatprep.subr.bf16.mxu0 %v1084_v1  ;;  %1064 = vmatprep.subr.bf16.mxu1 %v1084_v1  ;;  %v1088_v5 = vld [vmem:[%s1160_s26] sm:$0xff]   ;;  %v1090_v8 = vld [vmem:[%s1160_s26 + $0x8] sm:$0xff]   ;;  %v1092_v10 = vld [vmem:[%s1160_s26 + $0x10] sm:$0xff]  }
   0xf   : > { %v1089_v6 = vld [vmem:[%s1160_s26 + $0x40] sm:$0xff]   ;;  %1031 = vmatprep.mubr.msk.bf16.mxu0 %vm330_vm1, %v1088_v5  ;;  %v1091_v9 = vld [vmem:[%s1160_s26 + $0x48] sm:$0xff]   ;;  %v1093_v11 = vld [vmem:[%s1160_s26 + $0x50] sm:$0xff]  }
  0x10   : > { %1047 = vmatprep.mubr.msk.bf16.mxu1 %vm330_vm1, %v1089_v6  ;;  %v1094_v12 = vld [vmem:[%s1160_s26 + $0x18] sm:$0xff]   ;;  %v1096_v14 = vld [vmem:[%s1160_s26 + $0x20] sm:$0xff]   ;;  %v1098_v16 = vld [vmem:[%s1160_s26 + $0x28] sm:$0xff]  }
  0x11   : > { %1024 = vmatpush3.bf16.msra.mxu0 %v1084_v1  ;;  %1069 = vmatpush3.bf16.msra.mxu1 %v1084_v1  ;;  %v1095_v13 = vld [vmem:[%s1160_s26 + $0x58] sm:$0xff]   ;;  %v1097_v15 = vld [vmem:[%s1160_s26 + $0x60] sm:$0xff]   ;;  %v1099_v17 = vld [vmem:[%s1160_s26 + $0x68] sm:$0xff]  }
  0x12   : > { %1025 = vmatprep.subr.bf16.mxu0 %v1085_v3  ;;  %1065 = vmatprep.subr.bf16.mxu1 %v1085_v3  ;;  %v1100_v18 = vld [vmem:[%s1160_s26 + $0x30] sm:$0xff]   ;;  %v1102_v20 = vld [vmem:[%s1160_s26 + $0x38] sm:$0xff]  }
  0x13   : > { %v1101_v19 = vld [vmem:[%s1160_s26 + $0x70] sm:$0xff]   ;;  %v1103_v21 = vld [vmem:[%s1160_s26 + $0x78] sm:$0xff]  }
  0x15   : > { %1026 = vmatpush3.bf16.msra.mxu0 %v1085_v3  ;;  %1070 = vmatpush3.bf16.msra.mxu1 %v1085_v3 }
  0x16   : > { %1027 = vmatprep.subr.bf16.mxu0 %v1086_v4  ;;  %1066 = vmatprep.subr.bf16.mxu1 %v1086_v4 }
  0x19   : > { %1028 = vmatpush3.bf16.msra.mxu0 %v1086_v4  ;;  %1071 = vmatpush3.bf16.msra.mxu1 %v1086_v4 }
  0x1a   : > { %1029 = vmatprep.subr.bf16.mxu0 %v1087_v7  ;;  %1067 = vmatprep.subr.bf16.mxu1 %v1087_v7 }
  0x1d   : > { %1030 = vmatpush3.bf16.msra.mxu0 %v1087_v7  ;;  %1072 = vmatpush3.bf16.msra.mxu1 %v1087_v7 }
  0x20   : > { %1032 = vmatmul.mubr.msk.bf16.vlgmr.msra.gmra.mxu0 %vm330_vm1, %v1090_v8  ;;  %1048 = vmatmul.mubr.msk.bf16.vlgmr.msra.gmra.mxu1 %vm330_vm1, %v1091_v9 }
  0x21   : > { %1035 = vmatprep.mubr.msk.bf16.mxu0 %vm330_vm1, %v1092_v10  ;;  %1051 = vmatprep.mubr.msk.bf16.mxu1 %vm330_vm1, %v1093_v11 }
  0x28   : > { %1036 = vmatmul.mubr.msk.bf16.gmra.mxu0 %vm330_vm1, %v1094_v12  ;;  %1052 = vmatmul.mubr.msk.bf16.gmra.mxu1 %vm330_vm1, %v1095_v13 }
  0x29   : > { %1039 = vmatprep.mubr.msk.bf16.mxu0 %vm330_vm1, %v1096_v14  ;;  %1055 = vmatprep.mubr.msk.bf16.mxu1 %vm330_vm1, %v1097_v15 }
  0x30   : > { %1040 = vmatmul.mubr.msk.bf16.gmra.mxu0 %vm330_vm1, %v1098_v16  ;;  %1056 = vmatmul.mubr.msk.bf16.gmra.mxu1 %vm330_vm1, %v1099_v17 }
  0x31   : > { %1043 = vmatprep.mubr.msk.bf16.mxu0 %vm330_vm1, %v1100_v18  ;;  %1059 = vmatprep.mubr.msk.bf16.mxu1 %vm330_vm1, %v1101_v19 }
  0x38   : > { %1044 = vmatmul.mubr.msk.bf16.gmra.mxu0 %vm330_vm1, %v1102_v20  ;;  %1060 = vmatmul.mubr.msk.bf16.gmra.mxu1 %vm330_vm1, %v1103_v21 }
  0xe0   : > { %v1033_v23 = vpop.f32.mrf.mxu0  ;;  %v1049_v24 = vpop.f32.mrf.mxu1 }
  0xe1   : > { %v426_v25 = vadd.f32 %v1033_v23, %v1200_v22  ;;  %v490_v26 = vadd.f32 %v1049_v24, %v1200_v22 }
  0xe2   : > { %v417_v27 = vpop.f32.mrf.mxu0  ;;  %v481_v28 = vpop.f32.mrf.mxu1 }
  0xe3   : > { %v418_v29 = vadd.f32 %v1200_v22, %v417_v27  ;;  %v482_v30 = vadd.f32 %v1200_v22, %v481_v28  ;;  %v546_v35 = vmax.f32 %v426_v25, 0.0  ;;  %v562_v36 = vmax.f32 %v490_v26, 0.0 }
  0xe4   : > { %v1034_v31 = vpop.f32.mrf.mxu0  ;;  %v1050_v32 = vpop.f32.mrf.mxu1 }
  0xe5   : > { %v429_v33 = vadd.f32 %v1034_v31, %v1200_v22  ;;  %v493_v34 = vadd.f32 %v1050_v32, %v1200_v22  ;;  %v544_v43 = vmax.f32 %v418_v29, 0.0  ;;  %v560_v44 = vmax.f32 %v482_v30, 0.0 }
  0xe6   : > { %v420_v37 = vpop.f32.mrf.mxu0  ;;  %v484_v38 = vpop.f32.mrf.mxu1 }
  0xe7   : > { %v547_v39 = vmax.f32 %v429_v33, 0.0  ;;  %v563_v40 = vmax.f32 %v493_v34, 0.0  ;;  %v421_v41 = vadd.f32 %v1200_v22, %v420_v37  ;;  %v485_v42 = vadd.f32 %v1200_v22, %v484_v38 }
  0xe8   : > { %v1037_v45 = vpop.f32.mrf.mxu0  ;;  %v1053_v46 = vpop.f32.mrf.mxu1 }
  0xe9   : > { %v913_v47 = vpack.c.bf16 %v547_v39, %v546_v35  ;;  %v953_v48 = vpack.c.bf16 %v563_v40, %v562_v36  ;;  %v545_v49 = vmax.f32 %v421_v41, 0.0  ;;  %v561_v50 = vmax.f32 %v485_v42, 0.0 }
  0xea   : > { %v442_v51 = vadd.f32 %v1037_v45, %v1200_v22  ;;  %v506_v52 = vadd.f32 %v1053_v46, %v1200_v22  ;;  %v433_v53 = vpop.f32.mrf.mxu0  ;;  %v497_v54 = vpop.f32.mrf.mxu1 }
  0xeb   : > { %985 = vst [vmem:[%s1215_s6 + $0x8] sm:$0xff] %v913_v47   ;;  %993 = vst [vmem:[%s1215_s6 + $0x48] sm:$0xff] %v953_v48   ;;  %v908_v55 = vpack.c.bf16 %v545_v49, %v544_v43  ;;  %v948_v56 = vpack.c.bf16 %v561_v50, %v560_v44  ;;  %v434_v57 = vadd.f32 %v1200_v22, %v433_v53 }
  0xec   : > { %v498_v58 = vadd.f32 %v1200_v22, %v497_v54  ;;  %v1038_v59 = vpop.f32.mrf.mxu0  ;;  %v1054_v60 = vpop.f32.mrf.mxu1  ;;  %v550_v63 = vmax.f32 %v442_v51, 0.0  ;;  %v566_v0 = vmax.f32 %v506_v52, 0.0 }
  0xed   : > { %909 = vst [vmem:[%s1215_s6] sm:$0xff] %v908_v55   ;;  %992 = vst [vmem:[%s1215_s6 + $0x40] sm:$0xff] %v948_v56   ;;  %v445_v61 = vadd.f32 %v1038_v59, %v1200_v22  ;;  %v509_v62 = vadd.f32 %v1054_v60, %v1200_v22  ;;  %v548_v7 = vmax.f32 %v434_v57, 0.0 }
  0xee   : > { %v436_v1 = vpop.f32.mrf.mxu0  ;;  %v500_v2 = vpop.f32.mrf.mxu1  ;;  %v564_v8 = vmax.f32 %v498_v58, 0.0 }
  0xef   : > { %v551_v3 = vmax.f32 %v445_v61, 0.0  ;;  %v567_v4 = vmax.f32 %v509_v62, 0.0  ;;  %v437_v5 = vadd.f32 %v1200_v22, %v436_v1  ;;  %v501_v6 = vadd.f32 %v1200_v22, %v500_v2 }
  0xf0   : > { %v1041_v9 = vpop.f32.mrf.mxu0  ;;  %v1057_v10 = vpop.f32.mrf.mxu1 }
  0xf1   : > { %v923_v11 = vpack.c.bf16 %v551_v3, %v550_v63  ;;  %v963_v12 = vpack.c.bf16 %v567_v4, %v566_v0  ;;  %v549_v13 = vmax.f32 %v437_v5, 0.0  ;;  %v565_v14 = vmax.f32 %v501_v6, 0.0 }
  0xf2   : > { %v458_v15 = vadd.f32 %v1041_v9, %v1200_v22  ;;  %v522_v16 = vadd.f32 %v1057_v10, %v1200_v22  ;;  %v449_v17 = vpop.f32.mrf.mxu0  ;;  %v513_v18 = vpop.f32.mrf.mxu1 }
  0xf3   : > { %987 = vst [vmem:[%s1215_s6 + $0x18] sm:$0xff] %v923_v11   ;;  %995 = vst [vmem:[%s1215_s6 + $0x58] sm:$0xff] %v963_v12   ;;  %v918_v19 = vpack.c.bf16 %v549_v13, %v548_v7  ;;  %v958_v20 = vpack.c.bf16 %v565_v14, %v564_v8  ;;  %v450_v21 = vadd.f32 %v1200_v22, %v449_v17 }
  0xf4   : > { %v514_v23 = vadd.f32 %v1200_v22, %v513_v18  ;;  %v1042_v24 = vpop.f32.mrf.mxu0  ;;  %v1058_v25 = vpop.f32.mrf.mxu1  ;;  %v554_v28 = vmax.f32 %v458_v15, 0.0  ;;  %v570_v29 = vmax.f32 %v522_v16, 0.0 }
  0xf5   : > { %986 = vst [vmem:[%s1215_s6 + $0x10] sm:$0xff] %v918_v19   ;;  %994 = vst [vmem:[%s1215_s6 + $0x50] sm:$0xff] %v958_v20   ;;  %v461_v26 = vadd.f32 %v1042_v24, %v1200_v22  ;;  %v525_v27 = vadd.f32 %v1058_v25, %v1200_v22  ;;  %v552_v36 = vmax.f32 %v450_v21, 0.0 }
  0xf6   : > { %v452_v30 = vpop.f32.mrf.mxu0  ;;  %v516_v31 = vpop.f32.mrf.mxu1  ;;  %v568_v37 = vmax.f32 %v514_v23, 0.0 }
  0xf7   : > { %v555_v32 = vmax.f32 %v461_v26, 0.0  ;;  %v571_v33 = vmax.f32 %v525_v27, 0.0  ;;  %v453_v34 = vadd.f32 %v1200_v22, %v452_v30  ;;  %v517_v35 = vadd.f32 %v1200_v22, %v516_v31 }
  0xf8   : > { %v1045_v38 = vpop.f32.mrf.mxu0  ;;  %v1061_v39 = vpop.f32.mrf.mxu1 }
  0xf9   : > { %v933_v40 = vpack.c.bf16 %v555_v32, %v554_v28  ;;  %v973_v41 = vpack.c.bf16 %v571_v33, %v570_v29  ;;  %v553_v42 = vmax.f32 %v453_v34, 0.0  ;;  %v569_v43 = vmax.f32 %v517_v35, 0.0 }
  0xfa   : > { %v474_v44 = vadd.f32 %v1045_v38, %v1200_v22  ;;  %v538_v45 = vadd.f32 %v1061_v39, %v1200_v22  ;;  %v465_v46 = vpop.f32.mrf.mxu0  ;;  %v529_v47 = vpop.f32.mrf.mxu1 }
  0xfb   : > { %989 = vst [vmem:[%s1215_s6 + $0x28] sm:$0xff] %v933_v40   ;;  %997 = vst [vmem:[%s1215_s6 + $0x68] sm:$0xff] %v973_v41   ;;  %v928_v48 = vpack.c.bf16 %v553_v42, %v552_v36  ;;  %v968_v49 = vpack.c.bf16 %v569_v43, %v568_v37  ;;  %v466_v50 = vadd.f32 %v1200_v22, %v465_v46 }
  0xfc   : > { %v530_v51 = vadd.f32 %v1200_v22, %v529_v47  ;;  %v1046_v52 = vpop.f32.mrf.mxu0  ;;  %v1062_v53 = vpop.f32.mrf.mxu1  ;;  %v558_v56 = vmax.f32 %v474_v44, 0.0  ;;  %v574_v57 = vmax.f32 %v538_v45, 0.0 }
  0xfd   : > { %988 = vst [vmem:[%s1215_s6 + $0x20] sm:$0xff] %v928_v48   ;;  %996 = vst [vmem:[%s1215_s6 + $0x60] sm:$0xff] %v968_v49   ;;  %v477_v54 = vadd.f32 %v1046_v52, %v1200_v22  ;;  %v541_v55 = vadd.f32 %v1062_v53, %v1200_v22  ;;  %v556_v0 = vmax.f32 %v466_v50, 0.0 }
  0xfe   : > { %v468_v58 = vpop.f32.mrf.mxu0  ;;  %v532_v59 = vpop.f32.mrf.mxu1  ;;  %v572_v1 = vmax.f32 %v530_v51, 0.0 }
  0xff   : > { %v559_v60 = vmax.f32 %v477_v54, 0.0  ;;  %v575_v61 = vmax.f32 %v541_v55, 0.0  ;;  %v469_v62 = vadd.f32 %v1200_v22, %v468_v58  ;;  %v533_v63 = vadd.f32 %v1200_v22, %v532_v59 }
 0x101   : > { %v943_v2 = vpack.c.bf16 %v559_v60, %v558_v56  ;;  %v983_v3 = vpack.c.bf16 %v575_v61, %v574_v57  ;;  %v557_v4 = vmax.f32 %v469_v62, 0.0  ;;  %v573_v5 = vmax.f32 %v533_v63, 0.0 }
 0x103   : > { %991 = vst [vmem:[%s1215_s6 + $0x38] sm:$0xff] %v943_v2   ;;  %999 = vst [vmem:[%s1215_s6 + $0x78] sm:$0xff] %v983_v3   ;;  %v938_v6 = vpack.c.bf16 %v557_v4, %v556_v0  ;;  %v978_v7 = vpack.c.bf16 %v573_v5, %v572_v1 }
 0x105   : > { %990 = vst [vmem:[%s1215_s6 + $0x30] sm:$0xff] %v938_v6   ;;  %998 = vst [vmem:[%s1215_s6 + $0x70] sm:$0xff] %v978_v7  }
 0x106 PF: > { %s13_s12 = sadd.s32 1, %s1110_s12  }
 0x107   : > { %p10_p4 = scmp.ge.s32.totalorder %s13_s12, 4  }
 0x109   :  { %12 = sbr.rel (!%p10_p4) target bundleno = 1 (0x1), region = 62 }

// kernel: segment_net_forward.18
= control target key start
LH: loop header
LB: loop body
LE: loop exit
PB: predicated region body
PF: predicated region fallthrough
CT: control target
= control target key end

     0   :  { %v569_v0 = vmov 0   ;;  %vm182_vm0 = vcmask 130048   ;;  %s718_s1 = inlined_call_operand.vmem [shape: bf16[144,128], index: 1, kind: input, shape index: {}]   ;;  %s719_s0 = inlined_call_operand.vmem [shape: bf16[128,144], index: 0, kind: input, shape index: {}]   ;;  %s720_s2 = inlined_call_operand.vmem [shape: f32[1,128], index: 2, kind: input, shape index: {}]   ;;  %s721_s3 = inlined_call_operand.vmem [shape: bf16[128,128], index: 3, kind: output, shape index: {}]  }
   0x1   :  { %207 = vmatprep.subr.bf16.mxu0 %v569_v0  ;;  %517 = vmatprep.subr.bf16.mxu1 %v569_v0  ;;  %v536_v1 = vld [vmem:[%s718_s1 + $0x38] sm:$0xff]   ;;  %v537_v2 = vld [vmem:[%s718_s1 + $0x30] sm:$0xff]   ;;  %v538_v3 = vld [vmem:[%s718_s1 + $0x28] sm:$0xff]  }
   0x2   :  { %208 = vmatpush1.bf16.msra.mxu0 %v536_v1  ;;  %526 = vmatpush1.bf16.msra.mxu1 %v536_v1  ;;  %v539_v4 = vld [vmem:[%s718_s1 + $0x20] sm:$0xff]   ;;  %v540_v7 = vld [vmem:[%s718_s1 + $0x18] sm:$0xff]   ;;  %v541_v8 = vld [vmem:[%s718_s1 + $0x10] sm:$0xff]  }
   0x3   :  { %209 = vmatprep.subr.bf16.mxu0 %v569_v0  ;;  %518 = vmatprep.subr.bf16.mxu1 %v569_v0  ;;  %v547_v5 = vld [vmem:[%s719_s0 + $0x4] ss:$8 sps:$4 sm:$0xff]   ;;  %v545_v12 = vld [vmem:[%s719_s0] ss:$8 sps:$4 sm:$0xff]   ;;  %v551_v14 = vld [vmem:[%s719_s0 + $0x14] ss:$8 sps:$4 sm:$0xff]  }
   0x4   :  { %v550_v6 = vld [vmem:[%s719_s0 + $0x44] ss:$8 sps:$4 sm:$0xff]   ;;  %430 = vmatprep.mubr.msk.bf16.mxu0 %vm182_vm0, %v547_v5  ;;  %v548_v13 = vld [vmem:[%s719_s0 + $0x40] ss:$8 sps:$4 sm:$0xff]   ;;  %v553_v15 = vld [vmem:[%s719_s0 + $0x54] ss:$8 sps:$4 sm:$0xff]  }
   0x5   :  { %434 = vmatprep.mubr.msk.bf16.mxu1 %vm182_vm0, %v550_v6  ;;  %v542_v9 = vld [vmem:[%s718_s1 + $0x8] sm:$0xff]   ;;  %v543_v10 = vld [vmem:[%s718_s1] sm:$0xff]   ;;  %v555_v16 = vld [vmem:[%s719_s0 + $0x10] ss:$8 sps:$4 sm:$0xff]  }
   0x6   :  { %210 = vmatpush1.bf16.msra.mxu0 %v537_v2  ;;  %527 = vmatpush1.bf16.msra.mxu1 %v537_v2  ;;  %v544_v11 = vld [vmem:[%s718_s1 + $0x40] sm:$0xff]   ;;  %v556_v17 = vld [vmem:[%s719_s0 + $0x50] ss:$8 sps:$4 sm:$0xff]   ;;  %v563_v22 = vld [vmem:[%s719_s0 + $0x34] ss:$8 sps:$4 sm:$0xff]  }
   0x7   :  { %211 = vmatprep.subr.bf16.mxu0 %v569_v0  ;;  %519 = vmatprep.subr.bf16.mxu1 %v569_v0  ;;  %v557_v18 = vld [vmem:[%s719_s0 + $0x24] ss:$8 sps:$4 sm:$0xff]   ;;  %v561_v20 = vld [vmem:[%s719_s0 + $0x20] ss:$8 sps:$4 sm:$0xff]   ;;  %v565_v23 = vld [vmem:[%s719_s0 + $0x74] ss:$8 sps:$4 sm:$0xff]  }
   0x8   :  { %v559_v19 = vld [vmem:[%s719_s0 + $0x64] ss:$8 sps:$4 sm:$0xff]   ;;  %v562_v21 = vld [vmem:[%s719_s0 + $0x60] ss:$8 sps:$4 sm:$0xff]   ;;  %v567_v24 = vld [vmem:[%s719_s0 + $0x30] ss:$8 sps:$4 sm:$0xff]  }
   0x9   :  { %v568_v25 = vld [vmem:[%s719_s0 + $0x70] ss:$8 sps:$4 sm:$0xff]   ;;  %v676_v26 = vld [vmem:[%s720_s2] ss:$0 sm:$0xff] }
   0xa   :  { %212 = vmatpush1.bf16.msra.mxu0 %v538_v3  ;;  %528 = vmatpush1.bf16.msra.mxu1 %v538_v3 }
   0xb   :  { %213 = vmatprep.subr.bf16.mxu0 %v569_v0  ;;  %520 = vmatprep.subr.bf16.mxu1 %v569_v0 }
   0xe   :  { %214 = vmatpush1.bf16.msra.mxu0 %v539_v4  ;;  %529 = vmatpush1.bf16.msra.mxu1 %v539_v4 }
   0xf   :  { %215 = vmatprep.subr.bf16.mxu0 %v569_v0  ;;  %521 = vmatprep.subr.bf16.mxu1 %v569_v0 }
  0x12   :  { %216 = vmatpush1.bf16.msra.mxu0 %v540_v7  ;;  %530 = vmatpush1.bf16.msra.mxu1 %v540_v7 }
  0x13   :  { %217 = vmatprep.subr.bf16.mxu0 %v569_v0  ;;  %522 = vmatprep.subr.bf16.mxu1 %v569_v0 }
  0x16   :  { %218 = vmatpush1.bf16.msra.mxu0 %v541_v8  ;;  %531 = vmatpush1.bf16.msra.mxu1 %v541_v8 }
  0x17   :  { %219 = vmatprep.subr.bf16.mxu0 %v569_v0  ;;  %523 = vmatprep.subr.bf16.mxu1 %v569_v0 }
  0x1a   :  { %220 = vmatpush1.bf16.msra.mxu0 %v542_v9  ;;  %532 = vmatpush1.bf16.msra.mxu1 %v542_v9 }
  0x1b   :  { %221 = vmatprep.subr.bf16.mxu0 %v569_v0  ;;  %524 = vmatprep.subr.bf16.mxu1 %v569_v0 }
  0x1e   :  { %222 = vmatpush1.bf16.msra.mxu0 %v543_v10  ;;  %533 = vmatpush1.bf16.msra.mxu1 %v543_v10 }
  0x1f   :  { %237 = vmatprep.subr.bf16.mxu0 %v569_v0  ;;  %525 = vmatprep.subr.bf16.mxu1 %v569_v0 }
  0x22   :  { %238 = vmatpush2.bf16.msra.mxu0 %v544_v11  ;;  %534 = vmatpush2.bf16.msra.mxu1 %v544_v11 }
  0x25   :  { %240 = vmatmul.mubr.bf16.vlgmr.msra.gmra.mxu0 %v545_v12  ;;  %272 = vmatmul.mubr.bf16.vlgmr.msra.gmra.mxu1 %v548_v13 }
  0x26   :  { %431 = vmatprep.mubr.msk.bf16.mxu0 %vm182_vm0, %v551_v14  ;;  %435 = vmatprep.mubr.msk.bf16.mxu1 %vm182_vm0, %v553_v15 }
  0x2d   :  { %248 = vmatmul.mubr.bf16.gmra.mxu0 %v555_v16  ;;  %280 = vmatmul.mubr.bf16.gmra.mxu1 %v556_v17 }
  0x2e   :  { %432 = vmatprep.mubr.msk.bf16.mxu0 %vm182_vm0, %v557_v18  ;;  %436 = vmatprep.mubr.msk.bf16.mxu1 %vm182_vm0, %v559_v19 }
  0x35   :  { %256 = vmatmul.mubr.bf16.gmra.mxu0 %v561_v20  ;;  %288 = vmatmul.mubr.bf16.gmra.mxu1 %v562_v21 }
  0x36   :  { %433 = vmatprep.mubr.msk.bf16.mxu0 %vm182_vm0, %v563_v22  ;;  %437 = vmatprep.mubr.msk.bf16.mxu1 %vm182_vm0, %v565_v23 }
  0x3d   :  { %264 = vmatmul.mubr.bf16.gmra.mxu0 %v567_v24  ;;  %296 = vmatmul.mubr.bf16.gmra.mxu1 %v568_v25 }
  0xe5   :  { %v241_v27 = vpop.f32.mrf.mxu0  ;;  %v273_v28 = vpop.f32.mrf.mxu1 }
  0xe6   :  { %v242_v31 = vadd.f32 %v676_v26, %v241_v27  ;;  %v274_v32 = vadd.f32 %v676_v26, %v273_v28 }
  0xe7   :  { %v243_v29 = vpop.f32.mrf.mxu0  ;;  %v275_v30 = vpop.f32.mrf.mxu1 }
  0xe8   :  { %v304_v39 = vmax.f32 %v242_v31, 0.0  ;;  %v312_v40 = vmax.f32 %v274_v32, 0.0 }
  0xe9   :  { %v244_v33 = vpop.f32.mrf.mxu0  ;;  %v276_v34 = vpop.f32.mrf.mxu1 }
  0xea   :  { %v245_v35 = vadd.f32 %v676_v26, %v244_v33  ;;  %v277_v36 = vadd.f32 %v676_v26, %v276_v34 }
  0xeb   :  { %v246_v37 = vpop.f32.mrf.mxu0  ;;  %v278_v38 = vpop.f32.mrf.mxu1 }
  0xec   :  { %v305_v41 = vmax.f32 %v245_v35, 0.0  ;;  %v313_v42 = vmax.f32 %v277_v36, 0.0 }
  0xed   :  { %v249_v43 = vpop.f32.mrf.mxu0  ;;  %v281_v44 = vpop.f32.mrf.mxu1 }
  0xee   :  { %v473_v45 = vpack.c.bf16 %v305_v41, %v304_v39  ;;  %v493_v46 = vpack.c.bf16 %v313_v42, %v312_v40  ;;  %v250_v49 = vadd.f32 %v676_v26, %v249_v43  ;;  %v282_v50 = vadd.f32 %v676_v26, %v281_v44 }
  0xef   :  { %v251_v47 = vpop.f32.mrf.mxu0  ;;  %v283_v48 = vpop.f32.mrf.mxu1 }
  0xf0   :  { %474 = vst [vmem:[%s721_s3] sm:$0xff] %v473_v45   ;;  %513 = vst [vmem:[%s721_s3 + $0x20] sm:$0xff] %v493_v46   ;;  %v306_v57 = vmax.f32 %v250_v49, 0.0  ;;  %v314_v58 = vmax.f32 %v282_v50, 0.0 }
  0xf1   :  { %v252_v51 = vpop.f32.mrf.mxu0  ;;  %v284_v52 = vpop.f32.mrf.mxu1 }
  0xf2   :  { %v253_v53 = vadd.f32 %v676_v26, %v252_v51  ;;  %v285_v54 = vadd.f32 %v676_v26, %v284_v52 }
  0xf3   :  { %v254_v55 = vpop.f32.mrf.mxu0  ;;  %v286_v56 = vpop.f32.mrf.mxu1 }
  0xf4   :  { %v307_v59 = vmax.f32 %v253_v53, 0.0  ;;  %v315_v60 = vmax.f32 %v285_v54, 0.0 }
  0xf5   :  { %v257_v61 = vpop.f32.mrf.mxu0  ;;  %v289_v62 = vpop.f32.mrf.mxu1 }
  0xf6   :  { %v478_v63 = vpack.c.bf16 %v307_v59, %v306_v57  ;;  %v498_v0 = vpack.c.bf16 %v315_v60, %v314_v58  ;;  %v258_v3 = vadd.f32 %v676_v26, %v257_v61  ;;  %v290_v4 = vadd.f32 %v676_v26, %v289_v62 }
  0xf7   :  { %v259_v1 = vpop.f32.mrf.mxu0  ;;  %v291_v2 = vpop.f32.mrf.mxu1 }
  0xf8   :  { %510 = vst [vmem:[%s721_s3 + $0x8] sm:$0xff] %v478_v63   ;;  %514 = vst [vmem:[%s721_s3 + $0x28] sm:$0xff] %v498_v0   ;;  %v308_v11 = vmax.f32 %v258_v3, 0.0  ;;  %v316_v12 = vmax.f32 %v290_v4, 0.0 }
  0xf9   :  { %v260_v5 = vpop.f32.mrf.mxu0  ;;  %v292_v6 = vpop.f32.mrf.mxu1 }
  0xfa   :  { %v261_v7 = vadd.f32 %v676_v26, %v260_v5  ;;  %v293_v8 = vadd.f32 %v676_v26, %v292_v6 }
  0xfb   :  { %v262_v9 = vpop.f32.mrf.mxu0  ;;  %v294_v10 = vpop.f32.mrf.mxu1 }
  0xfc   :  { %v309_v13 = vmax.f32 %v261_v7, 0.0  ;;  %v317_v14 = vmax.f32 %v293_v8, 0.0 }
  0xfd   :  { %v265_v15 = vpop.f32.mrf.mxu0  ;;  %v297_v16 = vpop.f32.mrf.mxu1 }
  0xfe   :  { %v483_v17 = vpack.c.bf16 %v309_v13, %v308_v11  ;;  %v503_v18 = vpack.c.bf16 %v317_v14, %v316_v12  ;;  %v266_v21 = vadd.f32 %v676_v26, %v265_v15  ;;  %v298_v22 = vadd.f32 %v676_v26, %v297_v16 }
  0xff   :  { %v267_v19 = vpop.f32.mrf.mxu0  ;;  %v299_v20 = vpop.f32.mrf.mxu1 }
 0x100   :  { %511 = vst [vmem:[%s721_s3 + $0x10] sm:$0xff] %v483_v17   ;;  %515 = vst [vmem:[%s721_s3 + $0x30] sm:$0xff] %v503_v18   ;;  %v310_v30 = vmax.f32 %v266_v21, 0.0  ;;  %v318_v31 = vmax.f32 %v298_v22, 0.0 }
 0x101   :  { %v268_v23 = vpop.f32.mrf.mxu0  ;;  %v300_v24 = vpop.f32.mrf.mxu1 }
 0x102   :  { %v269_v25 = vadd.f32 %v676_v26, %v268_v23  ;;  %v301_v27 = vadd.f32 %v676_v26, %v300_v24 }
 0x103   :  { %v270_v28 = vpop.f32.mrf.mxu0  ;;  %v302_v29 = vpop.f32.mrf.mxu1 }
 0x104   :  { %v311_v32 = vmax.f32 %v269_v25, 0.0  ;;  %v319_v33 = vmax.f32 %v301_v27, 0.0 }
 0x106   :  { %v488_v34 = vpack.c.bf16 %v311_v32, %v310_v30  ;;  %v508_v35 = vpack.c.bf16 %v319_v33, %v318_v31 }
 0x108   :  { %512 = vst [vmem:[%s721_s3 + $0x18] sm:$0xff] %v488_v34   ;;  %516 = vst [vmem:[%s721_s3 + $0x38] sm:$0xff] %v508_v35  }

// kernel: segment_net_forward.19
= control target key start
LH: loop header
LB: loop body
LE: loop exit
PB: predicated region body
PF: predicated region fallthrough
CT: control target
= control target key end

     0   :  { %vm204_vm0 = vcmask 261120   ;;  %s550_s1 = inlined_call_operand.vmem [shape: bf16[288,128], index: 1, kind: input, shape index: {}]   ;;  %s551_s0 = inlined_call_operand.vmem [shape: bf16[32,288], index: 0, kind: input, shape index: {}]   ;;  %s552_s2 = inlined_call_operand.vmem [shape: f32[1,128], index: 2, kind: input, shape index: {}]   ;;  %s553_s3 = inlined_call_operand.vmem [shape: bf16[32,128], index: 3, kind: output, shape index: {}]  }
   0x1   :  { %v423_v0 = vld [vmem:[%s550_s1 + $0x78] sm:$0xff]   ;;  %v425_v2 = vld [vmem:[%s550_s1 + $0x70] sm:$0xff]   ;;  %v427_v4 = vld [vmem:[%s550_s1 + $0x68] sm:$0xff]  }
   0x2   :  { %v424_v1 = vld [vmem:[%s550_s1 + $0x38] sm:$0xff]   ;;  %383 = vmatprep.subr.bf16.mxu0 %v423_v0  ;;  %v426_v3 = vld [vmem:[%s550_s1 + $0x30] sm:$0xff]   ;;  %v428_v5 = vld [vmem:[%s550_s1 + $0x28] sm:$0xff]  }
   0x3   :  { %384 = vmatpush3.bf16.msra.mxu0 %v424_v1  ;;  %v429_v6 = vld [vmem:[%s550_s1 + $0x60] sm:$0xff]   ;;  %v431_v8 = vld [vmem:[%s550_s1 + $0x58] sm:$0xff]   ;;  %v438_v10 = vld [vmem:[%s550_s1 + $0x88] sm:$0xff]  }
   0x4   :  { %385 = vmatprep.subr.bf16.mxu0 %v425_v2  ;;  %v430_v7 = vld [vmem:[%s550_s1 + $0x20] sm:$0xff]   ;;  %v432_v9 = vld [vmem:[%s550_s1 + $0x18] sm:$0xff]   ;;  %v433_v11 = vld [vmem:[%s550_s1 + $0x50] sm:$0xff]   ;;  %415 = vmatprep.subr.bf16.mxu1 %v438_v10 }
   0x5   :  { %v434_v12 = vld [vmem:[%s550_s1 + $0x10] sm:$0xff]   ;;  %v435_v13 = vld [vmem:[%s550_s1 + $0x48] sm:$0xff]   ;;  %416 = vmatpush3.bf16.msra.mxu1 %v438_v10  ;;  %v443_v15 = vld [vmem:[%s550_s1 + $0x80] sm:$0xff]  }
   0x6   :  { %v442_v14 = vld [vmem:[%s551_s0 + $0x4] ss:$12 sps:$4 sm:$0xff]   ;;  %v444_v16 = vld [vmem:[%s551_s0 + $0x8] ss:$12 sps:$4 sm:$0xff]   ;;  %417 = vmatprep.subr.bf16.mxu1 %v443_v15  ;;  %v445_v17 = vld [vmem:[%s551_s0 + $0x20] ss:$12 sps:$4 sm:$0xff]  }
   0x7   :  { %386 = vmatpush3.bf16.msra.mxu0 %v426_v3  ;;  %243 = vmatprep.mubr.bf16.mxu0 %v442_v14  ;;  %v436_v18 = vld [vmem:[%s550_s1 + $0x8] sm:$0xff]   ;;  %v437_v19 = vld [vmem:[%s550_s1 + $0x40] sm:$0xff]  }
   0x8   :  { %387 = vmatprep.subr.bf16.mxu0 %v427_v4  ;;  %419 = vmatprep.mubr.msk.bf16.mxu1 %vm204_vm0, %v444_v16  ;;  %v439_v20 = vld [vmem:[%s550_s1] sm:$0xff]   ;;  %v446_v22 = vld [vmem:[%s551_s0 + $0x1c] ss:$12 sps:$4 sm:$0xff]  }
   0x9   :  { %418 = vmatpush3.bf16.msra.mxu1 %v443_v15  ;;  %v440_v21 = vld [vmem:[%s551_s0] ss:$12 sps:$4 sm:$0xff]   ;;  %v448_v23 = vld [vmem:[%s551_s0 + $0x18] ss:$12 sps:$4 sm:$0xff]  }
   0xa   :  { %v337_v28 = vld [vmem:[%s552_s2] ss:$0 sm:$0xff] }
   0xb   :  { %388 = vmatpush3.bf16.msra.mxu0 %v428_v5 }
   0xc   :  { %389 = vmatprep.subr.bf16.mxu0 %v429_v6  ;;  %420 = vmatmul.mubr.msk.bf16.vlgmr.msra.gmra.mxu1 %vm204_vm0, %v445_v17 }
   0xf   :  { %390 = vmatpush3.bf16.msra.mxu0 %v430_v7 }
  0x10   :  { %391 = vmatprep.subr.bf16.mxu0 %v431_v8 }
  0x13   :  { %392 = vmatpush3.bf16.msra.mxu0 %v432_v9 }
  0x14   :  { %393 = vmatprep.subr.bf16.mxu0 %v433_v11 }
  0x17   :  { %394 = vmatpush3.bf16.msra.mxu0 %v434_v12 }
  0x18   :  { %395 = vmatprep.subr.bf16.mxu0 %v435_v13 }
  0x1b   :  { %396 = vmatpush3.bf16.msra.mxu0 %v436_v18 }
  0x1c   :  { %397 = vmatprep.subr.bf16.mxu0 %v437_v19 }
  0x1f   :  { %398 = vmatpush3.bf16.msra.mxu0 %v439_v20 }
  0x22   :  { %244 = vmatmul.mubr.bf16.vlgmr.msra.gmra.mxu0 %v440_v21 }
  0x23   :  { %251 = vmatprep.mubr.bf16.mxu0 %v446_v22 }
  0x2a   :  { %252 = vmatmul.mubr.bf16.gmra.mxu0 %v448_v23 }
  0xcc   :  { %v421_v24 = vpop.f32.mrf.mxu1 }
  0xce   :  { %v294_v26 = vpop.f32.mrf.mxu1 }
  0xd0   :  { %v422_v31 = vpop.f32.mrf.mxu1 }
  0xd2   :  { %v297_v36 = vpop.f32.mrf.mxu1 }
  0xe2   :  { %v399_v25 = vpop.f32.mrf.mxu0 }
  0xe4   :  { %v400_v27 = vpop.f32.mrf.mxu0 }
  0xe5   :  { %v401_v29 = vadd.f32 %v400_v27, %v399_v25 }
  0xe6   :  { %v402_v30 = vpop.f32.mrf.mxu0 }
  0xe7   :  { %v246_v32 = vadd.f32 %v401_v29, %v337_v28 }
  0xe8   :  { %v403_v33 = vpop.f32.mrf.mxu0 }
  0xe9   :  { %v404_v34 = vadd.f32 %v403_v33, %v402_v30  ;;  %v295_v37 = vadd.f32 %v294_v26, %v246_v32 }
  0xea   :  { %v405_v35 = vpop.f32.mrf.mxu0 }
  0xeb   :  { %v249_v38 = vadd.f32 %v404_v34, %v337_v28  ;;  %v309_v43 = vmax.f32 %v295_v37, 0.0 }
  0xec   :  { %v406_v39 = vpop.f32.mrf.mxu0 }
  0xed   :  { %v407_v40 = vadd.f32 %v406_v39, %v405_v35  ;;  %v298_v41 = vadd.f32 %v297_v36, %v249_v38 }
  0xee   :  { %v408_v42 = vpop.f32.mrf.mxu0 }
  0xef   :  { %v254_v44 = vadd.f32 %v407_v40, %v337_v28  ;;  %v310_v45 = vmax.f32 %v298_v41, 0.0 }
  0xf0   :  { %v409_v46 = vpop.f32.mrf.mxu0 }
  0xf1   :  { %v375_v47 = vpack.c.bf16 %v310_v45, %v309_v43  ;;  %v410_v48 = vadd.f32 %v409_v46, %v408_v42  ;;  %v303_v49 = vadd.f32 %v421_v24, %v254_v44 }
  0xf3   :  { %376 = vst [vmem:[%s553_s3] sm:$0xff] %v375_v47   ;;  %v257_v50 = vadd.f32 %v410_v48, %v337_v28  ;;  %v311_v52 = vmax.f32 %v303_v49, 0.0 }
  0xf5   :  { %v306_v51 = vadd.f32 %v422_v31, %v257_v50 }
  0xf7   :  { %v312_v53 = vmax.f32 %v306_v51, 0.0 }
  0xf9   :  { %v380_v54 = vpack.c.bf16 %v312_v53, %v311_v52 }
  0xfb   :  { %382 = vst [vmem:[%s553_s3 + $0x8] sm:$0xff] %v380_v54  }

// kernel: segment_net_forward.20
= control target key start
LH: loop header
LB: loop body
LE: loop exit
PB: predicated region body
PF: predicated region fallthrough
CT: control target
= control target key end

     0   :  { %v608_v35 = vmov 0.0   ;;  %vm609_vm0 = vmmov 0   ;;  %vm330_vm1 = vcmask 523264   ;;  %s753_s1 = inlined_call_operand.vmem [shape: bf16[576,128], index: 1, kind: input, shape index: {}]   ;;  %s754_s0 = inlined_call_operand.vmem [shape: bf16[8,576], index: 0, kind: input, shape index: {}]   ;;  %s755_s2 = inlined_call_operand.vmem [shape: f32[1,128], index: 2, kind: input, shape index: {}]   ;;  %s756_s3 = inlined_call_operand.vmem [shape: bf16[8,128], index: 3, kind: output, shape index: {}]  }
   0x1   :  { %v567_v0 = vld [vmem:[%s753_s1 + $0x78] sm:$0xff]   ;;  %v571_v4 = vld [vmem:[%s753_s1 + $0x70] sm:$0xff]   ;;  %v575_v8 = vld [vmem:[%s753_s1 + $0x68] sm:$0xff]  }
   0x2   :  { %v568_v1 = vld [vmem:[%s753_s1 + $0x38] sm:$0xff]   ;;  %504 = vmatprep.subr.bf16.mxu0 %v567_v0  ;;  %v572_v5 = vld [vmem:[%s753_s1 + $0x30] sm:$0xff]   ;;  %v576_v9 = vld [vmem:[%s753_s1 + $0x28] sm:$0xff]  }
   0x3   :  { %v569_v2 = vld [vmem:[%s753_s1 + $0xf8] sm:$0xff]   ;;  %505 = vmatpush3.bf16.msra.mxu0 %v568_v1  ;;  %v573_v6 = vld [vmem:[%s753_s1 + $0xf0] sm:$0xff]   ;;  %v577_v10 = vld [vmem:[%s753_s1 + $0xe8] sm:$0xff]  }
   0x4   :  { %v570_v3 = vld [vmem:[%s753_s1 + $0xb8] sm:$0xff]   ;;  %526 = vmatprep.subr.bf16.mxu1 %v569_v2  ;;  %506 = vmatprep.subr.bf16.mxu0 %v571_v4  ;;  %v574_v7 = vld [vmem:[%s753_s1 + $0xb0] sm:$0xff]   ;;  %v578_v11 = vld [vmem:[%s753_s1 + $0xa8] sm:$0xff]  }
   0x5   :  { %527 = vmatpush3.bf16.msra.mxu1 %v570_v3  ;;  %v579_v12 = vld [vmem:[%s753_s1 + $0x60] sm:$0xff]   ;;  %v583_v16 = vld [vmem:[%s753_s1 + $0x58] sm:$0xff]   ;;  %v587_v20 = vld [vmem:[%s753_s1 + $0x50] sm:$0xff]  }
   0x6   :  { %528 = vmatprep.subr.bf16.mxu1 %v573_v6  ;;  %v580_v13 = vld [vmem:[%s753_s1 + $0x20] sm:$0xff]   ;;  %v584_v17 = vld [vmem:[%s753_s1 + $0x18] sm:$0xff]   ;;  %v588_v21 = vld [vmem:[%s753_s1 + $0x10] sm:$0xff]  }
   0x7   :  { %507 = vmatpush3.bf16.msra.mxu0 %v572_v5  ;;  %v581_v14 = vld [vmem:[%s753_s1 + $0xe0] sm:$0xff]   ;;  %v585_v18 = vld [vmem:[%s753_s1 + $0xd8] sm:$0xff]   ;;  %v589_v22 = vld [vmem:[%s753_s1 + $0xd0] sm:$0xff]  }
   0x8   :  { %508 = vmatprep.subr.bf16.mxu0 %v575_v8  ;;  %v582_v15 = vld [vmem:[%s753_s1 + $0xa0] sm:$0xff]   ;;  %v586_v19 = vld [vmem:[%s753_s1 + $0x98] sm:$0xff]   ;;  %v590_v23 = vld [vmem:[%s753_s1 + $0x90] sm:$0xff]  }
   0x9   :  { %529 = vmatpush3.bf16.msra.mxu1 %v574_v7  ;;  %v591_v24 = vld [vmem:[%s753_s1 + $0x48] sm:$0xff]   ;;  %v595_v28 = vld [vmem:[%s753_s1 + $0x40] sm:$0xff]   ;;  %v604_v39 = vld [vmem:[%s753_s1 + $0x118] sm:$0xff]  }
   0xa   :  { %530 = vmatprep.subr.bf16.mxu1 %v577_v10  ;;  %v592_v25 = vld [vmem:[%s753_s1 + $0x8] sm:$0xff]   ;;  %v596_v29 = vld [vmem:[%s753_s1] sm:$0xff]   ;;  %v605_v40 = vld [vmem:[%s753_s1 + $0x110] sm:$0xff]  }
   0xb   :  { %509 = vmatpush3.bf16.msra.mxu0 %v576_v9  ;;  %v593_v26 = vld [vmem:[%s753_s1 + $0xc8] sm:$0xff]   ;;  %v597_v30 = vld [vmem:[%s753_s1 + $0xc0] sm:$0xff]   ;;  %v600_v43 = vld [vmem:[%s754_s0 + $0x10] ss:$0 sps:$4 sm:$0xff]  }
   0xc   :  { %510 = vmatprep.subr.bf16.mxu0 %v579_v12  ;;  %v594_v27 = vld [vmem:[%s753_s1 + $0x88] sm:$0xff]   ;;  %v15_v31 = vld [vmem:[%s754_s0] sm:$0xff] }
   0xd   :  { %531 = vmatpush3.bf16.msra.mxu1 %v578_v11  ;;  %v462_v32 = vcombine.low %v15_v31, %v15_v31  ;;  %v463_v33 = vcombine.high %v15_v31, %v15_v31  ;;  %v601_v34 = vld [vmem:[%s753_s1 + $0x80] sm:$0xff]   ;;  %v16_v36 = vld [vmem:[%s754_s0 + $0x8] sm:$0xff] }
   0xe   :  { %532 = vmatprep.subr.bf16.mxu1 %v581_v14  ;;  %v464_v37 = vcombine.low %v16_v36, %v16_v36  ;;  %v465_v38 = vcombine.high %v16_v36, %v16_v36  ;;  %v606_v41 = vld [vmem:[%s753_s1 + $0x108] sm:$0xff]   ;;  %v607_v42 = vld [vmem:[%s753_s1 + $0x100] sm:$0xff]  }
   0xf   :  { %511 = vmatpush3.bf16.msra.mxu0 %v580_v13  ;;  %366 = vmatprep.mubr.bf16.mxu0 %v463_v33  ;;  %v461_v52 = vld [vmem:[%s755_s2] ss:$0 sm:$0xff] }
  0x10   :  { %512 = vmatprep.subr.bf16.mxu0 %v583_v16  ;;  %406 = vmatprep.mubr.bf16.mxu1 %v465_v38 }
  0x11   :  { %533 = vmatpush3.bf16.msra.mxu1 %v582_v15 }
  0x12   :  { %534 = vmatprep.subr.bf16.mxu1 %v585_v18 }
  0x13   :  { %513 = vmatpush3.bf16.msra.mxu0 %v584_v17 }
  0x14   :  { %514 = vmatprep.subr.bf16.mxu0 %v587_v20 }
  0x15   :  { %535 = vmatpush3.bf16.msra.mxu1 %v586_v19 }
  0x16   :  { %536 = vmatprep.subr.bf16.mxu1 %v589_v22 }
  0x17   :  { %515 = vmatpush3.bf16.msra.mxu0 %v588_v21 }
  0x18   :  { %516 = vmatprep.subr.bf16.mxu0 %v591_v24 }
  0x19   :  { %537 = vmatpush3.bf16.msra.mxu1 %v590_v23 }
  0x1a   :  { %538 = vmatprep.subr.bf16.mxu1 %v593_v26 }
  0x1b   :  { %517 = vmatpush3.bf16.msra.mxu0 %v592_v25 }
  0x1c   :  { %518 = vmatprep.subr.bf16.mxu0 %v595_v28 }
  0x1d   :  { %539 = vmatpush3.bf16.msra.mxu1 %v594_v27 }
  0x1e   :  { %540 = vmatprep.subr.bf16.mxu1 %v597_v30 }
  0x1f   :  { %519 = vmatpush3.bf16.msra.mxu0 %v596_v29 }
  0x20   :  { %553 = vmatprep.subr.bf16.mxu0 %v608_v35 }
  0x21   :  { %541 = vmatpush3.bf16.msra.mxu1 %v601_v34 }
  0x22   :  { %367 = vmatmul.mubr.bf16.vlgmr.msra.gmra.mxu0 %v462_v32 }
  0x23   :  { %554 = vmatpush3.bf16.msra.mxu0 %v604_v39  ;;  %561 = vmatprep.mubr.msk.bf16.mxu0 %vm609_vm0, %v608_v35 }
  0x24   :  { %407 = vmatmul.mubr.bf16.vlgmr.msra.gmra.mxu1 %v464_v37  ;;  %555 = vmatprep.subr.bf16.mxu0 %v608_v35 }
  0x27   :  { %556 = vmatpush3.bf16.msra.mxu0 %v605_v40 }
  0x28   :  { %557 = vmatprep.subr.bf16.mxu0 %v608_v35 }
  0x2b   :  { %558 = vmatpush3.bf16.msra.mxu0 %v606_v41 }
  0x2c   :  { %559 = vmatprep.subr.bf16.mxu0 %v608_v35 }
  0x2f   :  { %560 = vmatpush3.bf16.msra.mxu0 %v607_v42 }
  0x32   :  { %562 = vmatmul.mubr.msk.bf16.vlgmr.msra.gmra.mxu0 %vm330_vm1, %v600_v43 }
  0xe2   :  { %v520_v44 = vpop.f32.mrf.mxu0 }
  0xe4   :  { %v521_v45 = vpop.f32.mrf.mxu0  ;;  %v542_v46 = vpop.f32.mrf.mxu1 }
  0xe5   :  { %v522_v51 = vadd.f32 %v521_v45, %v520_v44 }
  0xe6   :  { %v523_v47 = vpop.f32.mrf.mxu0  ;;  %v543_v48 = vpop.f32.mrf.mxu1 }
  0xe7   :  { %v369_v54 = vadd.f32 %v522_v51, %v461_v52  ;;  %v544_v55 = vadd.f32 %v543_v48, %v542_v46 }
  0xe8   :  { %v524_v49 = vpop.f32.mrf.mxu0  ;;  %v545_v50 = vpop.f32.mrf.mxu1 }
  0xe9   :  { %v409_v56 = vadd.f32 %v544_v55, %v369_v54 }
  0xea   :  { %v546_v53 = vpop.f32.mrf.mxu1 }
  0xf2   :  { %v448_v57 = vpop.f32.mrf.mxu0 }
  0xf3   :  { %v449_v58 = vadd.f32 %v448_v57, %v409_v56 }
  0xf4   :  { %v563_v59 = vpop.f32.mrf.mxu0 }
  0xf5   :  { %v454_v60 = vmax.f32 %v449_v58, 0.0 }
  0xf6   :  { %v451_v61 = vpop.f32.mrf.mxu0 }
  0xf7   :  { %v455_v62 = vpack.c.bf16 %v454_v60, %v454_v60 }
  0xf8   :  { %v564_v63 = vpop.f32.mrf.mxu0 }
  0xf9   :  { %456 = vst [vmem:[%s756_s3] sm:$0xf] %v455_v62 }

// kernel: tile.22
= control target key start
LH: loop header
LB: loop body
LE: loop exit
PB: predicated region body
PF: predicated region fallthrough
CT: control target
= control target key end

     0   :  { %s22_s0 = inlined_call_operand.vmem [shape: f32[32], index: 0, kind: input, shape index: {}]   ;;  %s23_s1 = inlined_call_operand.vmem [shape: f32[4,1,1,32], index: 1, kind: output, shape index: {}]  }
   0x1   :  { %v4_v0 = vld [vmem:[%s22_s0] ss:$0 sm:$0xff] }
   0x2   :  { %5 = vst [vmem:[%s23_s1] sm:$0xf] %v4_v0 }

// kernel: tile.23
= control target key start
LH: loop header
LB: loop body
LE: loop exit
PB: predicated region body
PF: predicated region fallthrough
CT: control target
= control target key end

     0   :  { %vm8_vm0 = vcmask 261120   ;;  %s40_s8 = smov 32   ;;  %s41_s9 = smov 64   ;;  %vm14_vm1 = vcmask 1048320   ;;  %vm20_vm2 = vcmask 785920   ;;  %vm26_vm3 = vcmask 523520   ;;  %s58_s0 = inlined_call_operand.vmem [shape: f32[4,1,1,32], index: 0, kind: input, shape index: {}]   ;;  %s59_s1 = inlined_call_operand.vmem [shape: f32[1,128], index: 1, kind: output, shape index: {}]  }
   0x1   :  { %v5_v0 = vld [vmem:[%s58_s0] sm:$0xf]  ;;  %s39_s0 = smov 96  }
   0x2   :  { %6 = vst [vmem:[#allocation1] sm:$0xf] %v5_v0 }
   0x9   :  { %v11_v1 = vld [vmem:[#allocation1 + $0x3] sm:$0x1]   ;;  %v23_v2 = vld [vmem:[#allocation1 + $0x1] sm:$0x1]   ;;  %v7_v3 = vld [vmem:[#allocation1] sm:$0x1]  }
   0xa   :  { %12 = vrot.lane.b32.xlu0 %v11_v1, %s39_s0  ;;  %24 = vrot.lane.b32.xlu1 %v23_v2, %s40_s8  ;;  %v17_v4 = vld [vmem:[#allocation1 + $0x2] sm:$0x1]   ;;  %9 = vst.msk [vmem:[#allocation0] sm:$0x1] %vm8_vm0, %v7_v3  }
   0xe   :  { %18 = vrot.lane.b32.xlu0 %v17_v4, %s41_s9 }
  0x7c   :  { %v13_v5 = vpop.permute.xlu0 %12   ;;  %v25_v6 = vpop.permute.xlu1 %24  }
  0x7d   :  { %15 = vst.msk [vmem:[#allocation0] sm:$0x1] %vm14_vm1, %v13_v5  }
  0x80   :  { %v19_v7 = vpop.permute.xlu0 %18  }
  0x81   :  { %21 = vst.msk [vmem:[#allocation0] sm:$0x1] %vm20_vm2, %v19_v7  }
  0x82   :  { %27 = vst.msk [vmem:[#allocation0] sm:$0x1] %vm26_vm3, %v25_v6  }
  0x89   :  { %v32_v8 = vld [vmem:[#allocation0] sm:$0x1] }
  0x8a   :  { %35 = vst [vmem:[%s59_s1] sm:$0x1] %v32_v8 }

// kernel: segment_net_forward.21
= control target key start
LH: loop header
LB: loop body
LE: loop exit
PB: predicated region body
PF: predicated region fallthrough
CT: control target
= control target key end

     0   :  { %v868_v41 = vmov 0.0   ;;  %vm869_vm0 = vmmov 0   ;;  %vm482_vm1 = vcmask 785408   ;;  %s1070_s1 = inlined_call_operand.vmem [shape: bf16[864,128], index: 1, kind: input, shape index: {}]   ;;  %s1071_s0 = inlined_call_operand.vmem [shape: bf16[8,864], index: 0, kind: input, shape index: {}]   ;;  %s1072_s2 = inlined_call_operand.vmem [shape: f32[1,128], index: 2, kind: input, shape index: {}]   ;;  %s1073_s3 = inlined_call_operand.vmem [shape: bf16[8,128], index: 3, kind: output, shape index: {}]  }
   0x1   :  { %v807_v0 = vld [vmem:[%s1070_s1 + $0x78] sm:$0xff]   ;;  %v811_v4 = vld [vmem:[%s1070_s1 + $0x70] sm:$0xff]   ;;  %v815_v8 = vld [vmem:[%s1070_s1 + $0x68] sm:$0xff]  }
   0x2   :  { %v808_v1 = vld [vmem:[%s1070_s1 + $0x38] sm:$0xff]   ;;  %716 = vmatprep.subr.bf16.mxu0 %v807_v0  ;;  %v812_v5 = vld [vmem:[%s1070_s1 + $0x30] sm:$0xff]   ;;  %v816_v9 = vld [vmem:[%s1070_s1 + $0x28] sm:$0xff]  }
   0x3   :  { %v809_v2 = vld [vmem:[%s1070_s1 + $0xf8] sm:$0xff]   ;;  %717 = vmatpush3.bf16.msra.mxu0 %v808_v1  ;;  %v813_v6 = vld [vmem:[%s1070_s1 + $0xf0] sm:$0xff]   ;;  %v817_v10 = vld [vmem:[%s1070_s1 + $0xe8] sm:$0xff]  }
   0x4   :  { %v810_v3 = vld [vmem:[%s1070_s1 + $0xb8] sm:$0xff]   ;;  %738 = vmatprep.subr.bf16.mxu1 %v809_v2  ;;  %718 = vmatprep.subr.bf16.mxu0 %v811_v4  ;;  %v814_v7 = vld [vmem:[%s1070_s1 + $0xb0] sm:$0xff]   ;;  %v818_v11 = vld [vmem:[%s1070_s1 + $0xa8] sm:$0xff]  }
   0x5   :  { %739 = vmatpush3.bf16.msra.mxu1 %v810_v3  ;;  %v819_v12 = vld [vmem:[%s1070_s1 + $0x60] sm:$0xff]   ;;  %v823_v16 = vld [vmem:[%s1070_s1 + $0x58] sm:$0xff]   ;;  %v827_v20 = vld [vmem:[%s1070_s1 + $0x50] sm:$0xff]  }
   0x6   :  { %740 = vmatprep.subr.bf16.mxu1 %v813_v6  ;;  %v820_v13 = vld [vmem:[%s1070_s1 + $0x20] sm:$0xff]   ;;  %v824_v17 = vld [vmem:[%s1070_s1 + $0x18] sm:$0xff]   ;;  %v828_v21 = vld [vmem:[%s1070_s1 + $0x10] sm:$0xff]  }
   0x7   :  { %719 = vmatpush3.bf16.msra.mxu0 %v812_v5  ;;  %v821_v14 = vld [vmem:[%s1070_s1 + $0xe0] sm:$0xff]   ;;  %v825_v18 = vld [vmem:[%s1070_s1 + $0xd8] sm:$0xff]   ;;  %v829_v22 = vld [vmem:[%s1070_s1 + $0xd0] sm:$0xff]  }
   0x8   :  { %720 = vmatprep.subr.bf16.mxu0 %v815_v8  ;;  %v822_v15 = vld [vmem:[%s1070_s1 + $0xa0] sm:$0xff]   ;;  %v826_v19 = vld [vmem:[%s1070_s1 + $0x98] sm:$0xff]   ;;  %v830_v23 = vld [vmem:[%s1070_s1 + $0x90] sm:$0xff]  }
   0x9   :  { %741 = vmatpush3.bf16.msra.mxu1 %v814_v7  ;;  %v831_v24 = vld [vmem:[%s1070_s1 + $0x48] sm:$0xff]   ;;  %v835_v28 = vld [vmem:[%s1070_s1 + $0x40] sm:$0xff]   ;;  %v842_v35 = vld [vmem:[%s1070_s1 + $0x178] sm:$0xff]  }
   0xa   :  { %742 = vmatprep.subr.bf16.mxu1 %v817_v10  ;;  %v832_v25 = vld [vmem:[%s1070_s1 + $0x8] sm:$0xff]   ;;  %v836_v29 = vld [vmem:[%s1070_s1] sm:$0xff]   ;;  %v845_v39 = vld [vmem:[%s1070_s1 + $0x138] sm:$0xff]  }
   0xb   :  { %721 = vmatpush3.bf16.msra.mxu0 %v816_v9  ;;  %v833_v26 = vld [vmem:[%s1070_s1 + $0xc8] sm:$0xff]   ;;  %v837_v30 = vld [vmem:[%s1070_s1 + $0xc0] sm:$0xff]   ;;  %v846_v40 = vld [vmem:[%s1070_s1 + $0x170] sm:$0xff]  }
   0xc   :  { %722 = vmatprep.subr.bf16.mxu0 %v819_v12  ;;  %v834_v27 = vld [vmem:[%s1070_s1 + $0x88] sm:$0xff]   ;;  %v15_v31 = vld [vmem:[%s1071_s0] sm:$0xff]  ;;  %v847_v42 = vld [vmem:[%s1070_s1 + $0x130] sm:$0xff]  }
   0xd   :  { %743 = vmatpush3.bf16.msra.mxu1 %v818_v11  ;;  %v654_v32 = vcombine.low %v15_v31, %v15_v31  ;;  %v655_v33 = vcombine.high %v15_v31, %v15_v31  ;;  %v841_v34 = vld [vmem:[%s1070_s1 + $0x80] sm:$0xff]   ;;  %v16_v36 = vld [vmem:[%s1071_s0 + $0x8] sm:$0xff]  ;;  %v854_v49 = vld [vmem:[%s1070_s1 + $0x158] sm:$0xff]  }
   0xe   :  { %744 = vmatprep.subr.bf16.mxu1 %v821_v14  ;;  %v656_v37 = vcombine.low %v16_v36, %v16_v36  ;;  %v657_v38 = vcombine.high %v16_v36, %v16_v36  ;;  %v848_v43 = vld [vmem:[%s1070_s1 + $0x168] sm:$0xff]   ;;  %v851_v46 = vld [vmem:[%s1070_s1 + $0x160] sm:$0xff]   ;;  %v856_v50 = vld [vmem:[%s1070_s1 + $0x198] sm:$0xff]  }
   0xf   :  { %723 = vmatpush3.bf16.msra.mxu0 %v820_v13  ;;  %518 = vmatprep.mubr.bf16.mxu0 %v655_v33  ;;  %v850_v44 = vld [vmem:[%s1070_s1 + $0x1a8] sm:$0xff]   ;;  %v853_v47 = vld [vmem:[%s1070_s1 + $0x1a0] sm:$0xff]   ;;  %v855_v51 = vld [vmem:[%s1070_s1 + $0x118] sm:$0xff]  }
  0x10   :  { %724 = vmatprep.subr.bf16.mxu0 %v823_v16  ;;  %558 = vmatprep.mubr.bf16.mxu1 %v657_v38  ;;  %v849_v45 = vld [vmem:[%s1070_s1 + $0x128] sm:$0xff]   ;;  %v852_v48 = vld [vmem:[%s1070_s1 + $0x120] sm:$0xff]   ;;  %v857_v52 = vld [vmem:[%s1070_s1 + $0x150] sm:$0xff]  }
  0x11   :  { %745 = vmatpush3.bf16.msra.mxu1 %v822_v15  ;;  %v859_v53 = vld [vmem:[%s1070_s1 + $0x190] sm:$0xff]   ;;  %v860_v55 = vld [vmem:[%s1070_s1 + $0x148] sm:$0xff]   ;;  %v863_v60 = vld [vmem:[%s1070_s1 + $0x140] sm:$0xff]  }
  0x12   :  { %746 = vmatprep.subr.bf16.mxu1 %v825_v18  ;;  %v858_v54 = vld [vmem:[%s1070_s1 + $0x110] sm:$0xff]   ;;  %v862_v56 = vld [vmem:[%s1070_s1 + $0x188] sm:$0xff]   ;;  %v865_v61 = vld [vmem:[%s1070_s1 + $0x180] sm:$0xff]  }
  0x13   :  { %725 = vmatpush3.bf16.msra.mxu0 %v824_v17  ;;  %v17_v57 = vld [vmem:[%s1071_s0 + $0x10] sm:$0xff]  ;;  %v861_v59 = vld [vmem:[%s1070_s1 + $0x108] sm:$0xff]   ;;  %v840_v62 = vld [vmem:[%s1071_s0 + $0x18] ss:$0 sps:$4 sm:$0xff]  }
  0x14   :  { %726 = vmatprep.subr.bf16.mxu0 %v827_v20  ;;  %v659_v58 = vcombine.high %v17_v57, %v17_v57  ;;  %v864_v63 = vld [vmem:[%s1070_s1 + $0x100] sm:$0xff]   ;;  %v658_v0 = vcombine.low %v17_v57, %v17_v57 }
  0x15   :  { %747 = vmatpush3.bf16.msra.mxu1 %v826_v19  ;;  %v653_v10 = vld [vmem:[%s1072_s2] ss:$0 sm:$0xff] }
  0x16   :  { %748 = vmatprep.subr.bf16.mxu1 %v829_v22 }
  0x17   :  { %727 = vmatpush3.bf16.msra.mxu0 %v828_v21 }
  0x18   :  { %728 = vmatprep.subr.bf16.mxu0 %v831_v24 }
  0x19   :  { %749 = vmatpush3.bf16.msra.mxu1 %v830_v23 }
  0x1a   :  { %750 = vmatprep.subr.bf16.mxu1 %v833_v26 }
  0x1b   :  { %729 = vmatpush3.bf16.msra.mxu0 %v832_v25 }
  0x1c   :  { %730 = vmatprep.subr.bf16.mxu0 %v835_v28 }
  0x1d   :  { %751 = vmatpush3.bf16.msra.mxu1 %v834_v27 }
  0x1e   :  { %752 = vmatprep.subr.bf16.mxu1 %v837_v30 }
  0x1f   :  { %731 = vmatpush3.bf16.msra.mxu0 %v836_v29 }
  0x20   :  { %760 = vmatprep.subr.bf16.mxu0 %v842_v35 }
  0x21   :  { %753 = vmatpush3.bf16.msra.mxu1 %v841_v34 }
  0x22   :  { %519 = vmatmul.mubr.bf16.vlgmr.msra.gmra.mxu0 %v654_v32  ;;  %789 = vmatprep.subr.bf16.mxu1 %v868_v41 }
  0x23   :  { %761 = vmatpush3.bf16.msra.mxu0 %v845_v39  ;;  %598 = vmatprep.mubr.bf16.mxu0 %v659_v58 }
  0x24   :  { %559 = vmatmul.mubr.bf16.vlgmr.msra.gmra.mxu1 %v656_v37  ;;  %762 = vmatprep.subr.bf16.mxu0 %v846_v40 }
  0x25   :  { %801 = vmatprep.mubr.msk.bf16.mxu1 %vm869_vm0, %v868_v41  ;;  %790 = vmatpush3.bf16.msra.mxu1 %v850_v44 }
  0x26   :  { %791 = vmatprep.subr.bf16.mxu1 %v868_v41 }
  0x27   :  { %763 = vmatpush3.bf16.msra.mxu0 %v847_v42 }
  0x28   :  { %764 = vmatprep.subr.bf16.mxu0 %v848_v43 }
  0x29   :  { %792 = vmatpush3.bf16.msra.mxu1 %v853_v47 }
  0x2a   :  { %793 = vmatprep.subr.bf16.mxu1 %v868_v41 }
  0x2b   :  { %765 = vmatpush3.bf16.msra.mxu0 %v849_v45 }
  0x2c   :  { %766 = vmatprep.subr.bf16.mxu0 %v851_v46 }
  0x2d   :  { %794 = vmatpush3.bf16.msra.mxu1 %v856_v50 }
  0x2e   :  { %795 = vmatprep.subr.bf16.mxu1 %v868_v41 }
  0x2f   :  { %767 = vmatpush3.bf16.msra.mxu0 %v852_v48 }
  0x30   :  { %768 = vmatprep.subr.bf16.mxu0 %v854_v49 }
  0x31   :  { %796 = vmatpush3.bf16.msra.mxu1 %v859_v53 }
  0x32   :  { %797 = vmatprep.subr.bf16.mxu1 %v868_v41 }
  0x33   :  { %769 = vmatpush3.bf16.msra.mxu0 %v855_v51 }
  0x34   :  { %770 = vmatprep.subr.bf16.mxu0 %v857_v52 }
  0x35   :  { %798 = vmatpush3.bf16.msra.mxu1 %v862_v56 }
  0x36   :  { %799 = vmatprep.subr.bf16.mxu1 %v868_v41 }
  0x37   :  { %771 = vmatpush3.bf16.msra.mxu0 %v858_v54 }
  0x38   :  { %772 = vmatprep.subr.bf16.mxu0 %v860_v55 }
  0x39   :  { %800 = vmatpush3.bf16.msra.mxu1 %v865_v61 }
  0x3b   :  { %773 = vmatpush3.bf16.msra.mxu0 %v861_v59 }
  0x3c   :  { %774 = vmatprep.subr.bf16.mxu0 %v863_v60  ;;  %802 = vmatmul.mubr.msk.bf16.vlgmr.msra.gmra.mxu1 %vm482_vm1, %v840_v62 }
  0x3f   :  { %775 = vmatpush3.bf16.msra.mxu0 %v864_v63 }
  0x42   :  { %599 = vmatmul.mubr.bf16.vlgmr.msra.gmra.mxu0 %v658_v0 }
  0xe2   :  { %v732_v1 = vpop.f32.mrf.mxu0 }
  0xe4   :  { %v733_v2 = vpop.f32.mrf.mxu0  ;;  %v754_v3 = vpop.f32.mrf.mxu1 }
  0xe5   :  { %v734_v9 = vadd.f32 %v733_v2, %v732_v1 }
  0xe6   :  { %v735_v4 = vpop.f32.mrf.mxu0  ;;  %v755_v5 = vpop.f32.mrf.mxu1 }
  0xe7   :  { %v521_v12 = vadd.f32 %v734_v9, %v653_v10  ;;  %v756_v13 = vadd.f32 %v755_v5, %v754_v3 }
  0xe8   :  { %v736_v6 = vpop.f32.mrf.mxu0  ;;  %v757_v7 = vpop.f32.mrf.mxu1 }
  0xe9   :  { %v561_v18 = vadd.f32 %v756_v13, %v521_v12 }
  0xea   :  { %v758_v8 = vpop.f32.mrf.mxu1 }
  0xfc   :  { %v640_v11 = vpop.f32.mrf.mxu1 }
  0xfe   :  { %v803_v14 = vpop.f32.mrf.mxu1 }
 0x100   :  { %v643_v16 = vpop.f32.mrf.mxu1 }
 0x102   :  { %v776_v15 = vpop.f32.mrf.mxu0  ;;  %v804_v20 = vpop.f32.mrf.mxu1 }
 0x104   :  { %v777_v17 = vpop.f32.mrf.mxu0 }
 0x105   :  { %v778_v19 = vadd.f32 %v777_v17, %v776_v15 }
 0x106   :  { %v779_v21 = vpop.f32.mrf.mxu0 }
 0x107   :  { %v601_v22 = vadd.f32 %v778_v19, %v561_v18 }
 0x108   :  { %v780_v23 = vpop.f32.mrf.mxu0 }
 0x109   :  { %v641_v24 = vadd.f32 %v640_v11, %v601_v22 }
 0x10b   :  { %v646_v25 = vmax.f32 %v641_v24, 0.0 }
 0x10d   :  { %v647_v26 = vpack.c.bf16 %v646_v25, %v646_v25 }
 0x10f   :  { %648 = vst [vmem:[%s1073_s3] sm:$0xf] %v647_v26 }

// kernel: segment_net_forward.22
= control target key start
LH: loop header
LB: loop body
LE: loop exit
PB: predicated region body
PF: predicated region fallthrough
CT: control target
= control target key end

     0   :  { %vm415_vm0 = vcmask 523264   ;;  %vm707_vm1 = vcmask 261120   ;;  %s1384_s3 = inlined_call_operand.vmem [shape: bf16[576,128], index: 3, kind: input, shape index: {}]   ;;  %s1385_s2 = inlined_call_operand.vmem [shape: bf16[32,576], index: 2, kind: input, shape index: {}]   ;;  %s1386_s1 = inlined_call_operand.vmem [shape: bf16[288,128], index: 1, kind: input, shape index: {}]   ;;  %s1387_s0 = inlined_call_operand.vmem [shape: bf16[32,288], index: 0, kind: input, shape index: {}]   ;;  %s1388_s4 = inlined_call_operand.vmem [shape: f32[1,128], index: 4, kind: input, shape index: {}]   ;;  %s1389_s5 = inlined_call_operand.vmem [shape: bf16[32,128], index: 5, kind: output, shape index: {}]  }
   0x1   :  { %v1059_v0 = vld [vmem:[%s1384_s3 + $0x78] sm:$0xff]   ;;  %v1063_v4 = vld [vmem:[%s1384_s3 + $0x70] sm:$0xff]   ;;  %v1067_v8 = vld [vmem:[%s1384_s3 + $0x68] sm:$0xff]  }
   0x2   :  { %v1060_v1 = vld [vmem:[%s1384_s3 + $0xf8] sm:$0xff]   ;;  %945 = vmatprep.subr.bf16.mxu0 %v1059_v0  ;;  %v1064_v5 = vld [vmem:[%s1384_s3 + $0xf0] sm:$0xff]   ;;  %v1068_v9 = vld [vmem:[%s1384_s3 + $0xe8] sm:$0xff]  }
   0x3   :  { %v1061_v2 = vld [vmem:[%s1384_s3 + $0x38] sm:$0xff]   ;;  %973 = vmatprep.subr.bf16.mxu1 %v1060_v1  ;;  %v1065_v6 = vld [vmem:[%s1384_s3 + $0x30] sm:$0xff]   ;;  %v1069_v10 = vld [vmem:[%s1384_s3 + $0x28] sm:$0xff]  }
   0x4   :  { %v1062_v3 = vld [vmem:[%s1384_s3 + $0xb8] sm:$0xff]   ;;  %946 = vmatpush3.bf16.msra.mxu0 %v1061_v2  ;;  %v1066_v7 = vld [vmem:[%s1384_s3 + $0xb0] sm:$0xff]   ;;  %v1070_v11 = vld [vmem:[%s1384_s3 + $0xa8] sm:$0xff]  }
   0x5   :  { %974 = vmatpush3.bf16.msra.mxu1 %v1062_v3  ;;  %947 = vmatprep.subr.bf16.mxu0 %v1063_v4  ;;  %v1071_v12 = vld [vmem:[%s1384_s3 + $0x60] sm:$0xff]   ;;  %v1075_v16 = vld [vmem:[%s1384_s3 + $0x58] sm:$0xff]   ;;  %v1079_v20 = vld [vmem:[%s1384_s3 + $0x50] sm:$0xff]  }
   0x6   :  { %975 = vmatprep.subr.bf16.mxu1 %v1064_v5  ;;  %v1072_v13 = vld [vmem:[%s1384_s3 + $0xe0] sm:$0xff]   ;;  %v1076_v17 = vld [vmem:[%s1384_s3 + $0xd8] sm:$0xff]   ;;  %v1080_v21 = vld [vmem:[%s1384_s3 + $0xd0] sm:$0xff]  }
   0x7   :  { %v1073_v14 = vld [vmem:[%s1384_s3 + $0x20] sm:$0xff]   ;;  %v1077_v18 = vld [vmem:[%s1384_s3 + $0x18] sm:$0xff]   ;;  %v1081_v22 = vld [vmem:[%s1384_s3 + $0x10] sm:$0xff]  }
   0x8   :  { %948 = vmatpush3.bf16.msra.mxu0 %v1065_v6  ;;  %v1074_v15 = vld [vmem:[%s1384_s3 + $0xa0] sm:$0xff]   ;;  %v1078_v19 = vld [vmem:[%s1384_s3 + $0x98] sm:$0xff]   ;;  %v1082_v23 = vld [vmem:[%s1384_s3 + $0x90] sm:$0xff]  }
   0x9   :  { %976 = vmatpush3.bf16.msra.mxu1 %v1066_v7  ;;  %949 = vmatprep.subr.bf16.mxu0 %v1067_v8  ;;  %v1083_v24 = vld [vmem:[%s1384_s3 + $0x48] sm:$0xff]   ;;  %v1087_v28 = vld [vmem:[%s1384_s3 + $0x40] sm:$0xff]   ;;  %v1097_v36 = vld [vmem:[%s1384_s3 + $0x118] sm:$0xff]  }
   0xa   :  { %977 = vmatprep.subr.bf16.mxu1 %v1068_v9  ;;  %v1084_v25 = vld [vmem:[%s1384_s3 + $0xc8] sm:$0xff]   ;;  %v1088_v29 = vld [vmem:[%s1384_s3 + $0xc0] sm:$0xff]   ;;  %v1098_v37 = vld [vmem:[%s1386_s1 + $0x78] sm:$0xff]  }
   0xb   :  { %v1085_v26 = vld [vmem:[%s1384_s3 + $0x8] sm:$0xff]   ;;  %v1089_v30 = vld [vmem:[%s1384_s3] sm:$0xff]   ;;  %v1099_v38 = vld [vmem:[%s1386_s1 + $0x38] sm:$0xff]  }
   0xc   :  { %950 = vmatpush3.bf16.msra.mxu0 %v1069_v10  ;;  %v1086_v27 = vld [vmem:[%s1384_s3 + $0x88] sm:$0xff]   ;;  %v1090_v31 = vld [vmem:[%s1384_s3 + $0x80] sm:$0xff]   ;;  %v1100_v39 = vld [vmem:[%s1384_s3 + $0x110] sm:$0xff]  }
   0xd   :  { %978 = vmatpush3.bf16.msra.mxu1 %v1070_v11  ;;  %951 = vmatprep.subr.bf16.mxu0 %v1071_v12  ;;  %v1091_v32 = vld [vmem:[%s1385_s2] ss:$20 sps:$4 sm:$0xff]   ;;  %v1093_v33 = vld [vmem:[%s1385_s2 + $0x4] ss:$20 sps:$4 sm:$0xff]   ;;  %v1094_v34 = vld [vmem:[%s1385_s2 + $0x8] ss:$20 sps:$4 sm:$0xff]  }
   0xe   :  { %979 = vmatprep.subr.bf16.mxu1 %v1072_v13  ;;  %v1096_v35 = vld [vmem:[%s1385_s2 + $0xc] ss:$20 sps:$4 sm:$0xff]   ;;  %454 = vmatprep.mubr.bf16.mxu0 %v1093_v33  ;;  %v1101_v40 = vld [vmem:[%s1386_s1 + $0x70] sm:$0xff]   ;;  %v1105_v43 = vld [vmem:[%s1385_s2 + $0x28] ss:$20 sps:$4 sm:$0xff]  }
   0xf   :  { %503 = vmatprep.mubr.bf16.mxu1 %v1096_v35  ;;  %v1102_v41 = vld [vmem:[%s1386_s1 + $0x30] sm:$0xff]   ;;  %v1103_v42 = vld [vmem:[%s1385_s2 + $0x2c] ss:$20 sps:$4 sm:$0xff]   ;;  %v1114_v52 = vld [vmem:[%s1386_s1 + $0x58] sm:$0xff]  }
  0x10   :  { %952 = vmatpush3.bf16.msra.mxu0 %v1073_v14  ;;  %v1106_v44 = vld [vmem:[%s1384_s3 + $0x108] sm:$0xff]   ;;  %v1109_v47 = vld [vmem:[%s1384_s3 + $0x100] sm:$0xff]   ;;  %v1117_v54 = vld [vmem:[%s1386_s1 + $0x18] sm:$0xff]  }
  0x11   :  { %980 = vmatpush3.bf16.msra.mxu1 %v1074_v15  ;;  %953 = vmatprep.subr.bf16.mxu0 %v1075_v16  ;;  %v1107_v45 = vld [vmem:[%s1386_s1 + $0x68] sm:$0xff]   ;;  %v1110_v48 = vld [vmem:[%s1386_s1 + $0x60] sm:$0xff]   ;;  %v1119_v56 = vld [vmem:[%s1386_s1 + $0x50] sm:$0xff]  }
  0x12   :  { %981 = vmatprep.subr.bf16.mxu1 %v1076_v17  ;;  %v1108_v46 = vld [vmem:[%s1386_s1 + $0x28] sm:$0xff]   ;;  %v1111_v49 = vld [vmem:[%s1386_s1 + $0x20] sm:$0xff]   ;;  %v1120_v57 = vld [vmem:[%s1386_s1 + $0x10] sm:$0xff]  }
  0x13   :  { %v1112_v50 = vld [vmem:[%s1385_s2 + $0x10] ss:$20 sps:$4 sm:$0xff]   ;;  %v1113_v51 = vld [vmem:[%s1385_s2 + $0x38] ss:$20 sps:$4 sm:$0xff]   ;;  %v1115_v53 = vld [vmem:[%s1385_s2 + $0x34] ss:$20 sps:$4 sm:$0xff]  }
  0x14   :  { %954 = vmatpush3.bf16.msra.mxu0 %v1077_v18  ;;  %v1118_v55 = vld [vmem:[%s1385_s2 + $0x30] ss:$20 sps:$4 sm:$0xff]   ;;  %v1121_v58 = vld [vmem:[%s1386_s1 + $0x48] sm:$0xff]  }
  0x15   :  { %982 = vmatpush3.bf16.msra.mxu1 %v1078_v19  ;;  %955 = vmatprep.subr.bf16.mxu0 %v1079_v20  ;;  %v1122_v59 = vld [vmem:[%s1386_s1 + $0x8] sm:$0xff]   ;;  %v1123_v61 = vld [vmem:[%s1386_s1 + $0x40] sm:$0xff]  }
  0x16   :  { %983 = vmatprep.subr.bf16.mxu1 %v1080_v21  ;;  %v1124_v60 = vld [vmem:[%s1386_s1 + $0x88] sm:$0xff]   ;;  %v1125_v62 = vld [vmem:[%s1386_s1] sm:$0xff]  }
  0x17   :  { %v1128_v63 = vld [vmem:[%s1387_s0 + $0x4] ss:$12 sps:$4 sm:$0xff]   ;;  %v1130_v1 = vld [vmem:[%s1387_s0 + $0x8] ss:$12 sps:$4 sm:$0xff]   ;;  %v1131_v2 = vld [vmem:[%s1387_s0 + $0x20] ss:$12 sps:$4 sm:$0xff]  }
  0x18   :  { %956 = vmatpush3.bf16.msra.mxu0 %v1081_v22  ;;  %v1129_v0 = vld [vmem:[%s1386_s1 + $0x80] sm:$0xff]   ;;  %v1132_v4 = vld [vmem:[%s1387_s0 + $0x1c] ss:$12 sps:$4 sm:$0xff]  }
  0x19   :  { %984 = vmatpush3.bf16.msra.mxu1 %v1082_v23  ;;  %957 = vmatprep.subr.bf16.mxu0 %v1083_v24  ;;  %v1126_v3 = vld [vmem:[%s1387_s0] ss:$12 sps:$4 sm:$0xff]   ;;  %v1134_v5 = vld [vmem:[%s1387_s0 + $0x18] ss:$12 sps:$4 sm:$0xff]  }
  0x1a   :  { %985 = vmatprep.subr.bf16.mxu1 %v1084_v25 }
  0x1c   :  { %958 = vmatpush3.bf16.msra.mxu0 %v1085_v26 }
  0x1d   :  { %986 = vmatpush3.bf16.msra.mxu1 %v1086_v27  ;;  %959 = vmatprep.subr.bf16.mxu0 %v1087_v28 }
  0x1e   :  { %987 = vmatprep.subr.bf16.mxu1 %v1088_v29 }
  0x20   :  { %960 = vmatpush3.bf16.msra.mxu0 %v1089_v30 }
  0x21   :  { %988 = vmatpush3.bf16.msra.mxu1 %v1090_v31  ;;  %1039 = vmatprep.subr.bf16.mxu0 %v1097_v36 }
  0x22   :  { %1007 = vmatprep.subr.bf16.mxu1 %v1098_v37 }
  0x23   :  { %455 = vmatmul.mubr.bf16.vlgmr.msra.gmra.mxu0 %v1091_v32 }
  0x24   :  { %504 = vmatmul.mubr.bf16.vlgmr.msra.gmra.mxu1 %v1094_v34  ;;  %1040 = vmatpush3.bf16.msra.mxu0 %v1097_v36 }
  0x25   :  { %1008 = vmatpush3.bf16.msra.mxu1 %v1099_v38  ;;  %1041 = vmatprep.subr.bf16.mxu0 %v1100_v39 }
  0x26   :  { %1009 = vmatprep.subr.bf16.mxu1 %v1101_v40  ;;  %462 = vmatprep.mubr.bf16.mxu0 %v1103_v42 }
  0x27   :  { %511 = vmatprep.mubr.bf16.mxu1 %v1115_v53 }
  0x28   :  { %1042 = vmatpush3.bf16.msra.mxu0 %v1100_v39 }
  0x29   :  { %1010 = vmatpush3.bf16.msra.mxu1 %v1102_v41  ;;  %1043 = vmatprep.subr.bf16.mxu0 %v1106_v44 }
  0x2a   :  { %1011 = vmatprep.subr.bf16.mxu1 %v1107_v45 }
  0x2b   :  { %463 = vmatmul.mubr.bf16.gmra.mxu0 %v1105_v43 }
  0x2c   :  { %1044 = vmatpush3.bf16.msra.mxu0 %v1106_v44  ;;  %1047 = vmatprep.mubr.msk.bf16.mxu0 %vm415_vm0, %v1112_v50  ;;  %v925_v50 = vld [vmem:[%s1388_s4] ss:$0 sm:$0xff] }
  0x2d   :  { %1012 = vmatpush3.bf16.msra.mxu1 %v1108_v46  ;;  %1045 = vmatprep.subr.bf16.mxu0 %v1109_v47 }
  0x2e   :  { %1013 = vmatprep.subr.bf16.mxu1 %v1110_v48  ;;  %512 = vmatmul.mubr.bf16.gmra.mxu1 %v1118_v55 }
  0x2f   :  { %746 = vmatprep.mubr.bf16.mxu1 %v1128_v63 }
  0x30   :  { %1046 = vmatpush3.bf16.msra.mxu0 %v1109_v47 }
  0x31   :  { %1014 = vmatpush3.bf16.msra.mxu1 %v1111_v49  ;;  %1051 = vmatprep.subr.bf16.mxu0 %v1124_v60 }
  0x32   :  { %1015 = vmatprep.subr.bf16.mxu1 %v1114_v52 }
  0x33   :  { %1048 = vmatmul.mubr.msk.bf16.vlgmr.msra.gmra.mxu0 %vm415_vm0, %v1113_v51 }
  0x34   :  { %1052 = vmatpush3.bf16.msra.mxu0 %v1124_v60  ;;  %1055 = vmatprep.mubr.msk.bf16.mxu0 %vm707_vm1, %v1130_v1 }
  0x35   :  { %1016 = vmatpush3.bf16.msra.mxu1 %v1117_v54  ;;  %1053 = vmatprep.subr.bf16.mxu0 %v1129_v0 }
  0x36   :  { %1017 = vmatprep.subr.bf16.mxu1 %v1119_v56 }
  0x38   :  { %1054 = vmatpush3.bf16.msra.mxu0 %v1129_v0 }
  0x39   :  { %1018 = vmatpush3.bf16.msra.mxu1 %v1120_v57 }
  0x3a   :  { %1019 = vmatprep.subr.bf16.mxu1 %v1121_v58 }
  0x3b   :  { %1056 = vmatmul.mubr.msk.bf16.vlgmr.msra.gmra.mxu0 %vm707_vm1, %v1131_v2 }
  0x3d   :  { %1020 = vmatpush3.bf16.msra.mxu1 %v1122_v59 }
  0x3e   :  { %1021 = vmatprep.subr.bf16.mxu1 %v1123_v61 }
  0x41   :  { %1022 = vmatpush3.bf16.msra.mxu1 %v1125_v62 }
  0x44   :  { %747 = vmatmul.mubr.bf16.vlgmr.msra.gmra.mxu1 %v1126_v3 }
  0x45   :  { %754 = vmatprep.mubr.bf16.mxu1 %v1132_v4 }
  0x4c   :  { %755 = vmatmul.mubr.bf16.gmra.mxu1 %v1134_v5 }
  0xe3   :  { %v961_v6 = vpop.f32.mrf.mxu0 }
  0xe4   :  { %v989_v9 = vpop.f32.mrf.mxu1 }
  0xe5   :  { %v962_v7 = vpop.f32.mrf.mxu0 }
  0xe6   :  { %v990_v12 = vpop.f32.mrf.mxu1  ;;  %v963_v24 = vadd.f32 %v962_v7, %v961_v6 }
  0xe7   :  { %v964_v8 = vpop.f32.mrf.mxu0  ;;  %v991_v25 = vadd.f32 %v990_v12, %v989_v9 }
  0xe8   :  { %v992_v15 = vpop.f32.mrf.mxu1 }
  0xe9   :  { %v965_v10 = vpop.f32.mrf.mxu0  ;;  %v506_v32 = vadd.f32 %v991_v25, %v963_v24 }
  0xea   :  { %v993_v17 = vpop.f32.mrf.mxu1  ;;  %v966_v30 = vadd.f32 %v965_v10, %v964_v8 }
  0xeb   :  { %v967_v11 = vpop.f32.mrf.mxu0  ;;  %v994_v31 = vadd.f32 %v993_v17, %v992_v15 }
  0xed   :  { %v968_v13 = vpop.f32.mrf.mxu0  ;;  %v509_v41 = vadd.f32 %v994_v31, %v966_v30 }
  0xee   :  { %v995_v19 = vpop.f32.mrf.mxu1  ;;  %v969_v35 = vadd.f32 %v968_v13, %v967_v11 }
  0xef   :  { %v970_v14 = vpop.f32.mrf.mxu0 }
  0xf0   :  { %v996_v21 = vpop.f32.mrf.mxu1 }
  0xf1   :  { %v971_v16 = vpop.f32.mrf.mxu0  ;;  %v997_v37 = vadd.f32 %v996_v21, %v995_v19 }
  0xf2   :  { %v998_v23 = vpop.f32.mrf.mxu1  ;;  %v972_v43 = vadd.f32 %v971_v16, %v970_v14 }
  0xf3   :  { %v1049_v18 = vpop.f32.mrf.mxu0  ;;  %v514_v46 = vadd.f32 %v997_v37, %v969_v35 }
  0xf4   :  { %v999_v27 = vpop.f32.mrf.mxu1 }
  0xf5   :  { %v554_v20 = vpop.f32.mrf.mxu0  ;;  %v1000_v44 = vadd.f32 %v999_v27, %v998_v23  ;;  %v563_v57 = vadd.f32 %v1049_v18, %v514_v46 }
  0xf6   :  { %v555_v36 = vadd.f32 %v554_v20, %v506_v32 }
  0xf7   :  { %v1050_v22 = vpop.f32.mrf.mxu0  ;;  %v517_v54 = vadd.f32 %v1000_v44, %v972_v43 }
  0xf9   :  { %v557_v26 = vpop.f32.mrf.mxu0  ;;  %v566_v63 = vadd.f32 %v1050_v22, %v517_v54 }
  0xfa   :  { %v558_v47 = vadd.f32 %v557_v26, %v509_v41 }
  0xfb   :  { %v1057_v28 = vpop.f32.mrf.mxu0 }
  0xfd   :  { %v797_v33 = vpop.f32.mrf.mxu0 }
  0xff   :  { %v1058_v40 = vpop.f32.mrf.mxu0 }
 0x101   :  { %v800_v52 = vpop.f32.mrf.mxu0 }
 0x104   :  { %v1023_v29 = vpop.f32.mrf.mxu1 }
 0x106   :  { %v1024_v34 = vpop.f32.mrf.mxu1 }
 0x107   :  { %v1025_v38 = vadd.f32 %v1024_v34, %v1023_v29 }
 0x108   :  { %v1026_v39 = vpop.f32.mrf.mxu1 }
 0x109   :  { %v749_v42 = vadd.f32 %v1025_v38, %v555_v36 }
 0x10a   :  { %v1027_v45 = vpop.f32.mrf.mxu1 }
 0x10b   :  { %v1028_v48 = vadd.f32 %v1027_v45, %v1026_v39  ;;  %v798_v49 = vadd.f32 %v797_v33, %v749_v42 }
 0x10c   :  { %v1029_v51 = vpop.f32.mrf.mxu1 }
 0x10d   :  { %v752_v53 = vadd.f32 %v1028_v48, %v558_v47  ;;  %v819_v56 = vadd.f32 %v925_v50, %v798_v49 }
 0x10e   :  { %v1030_v55 = vpop.f32.mrf.mxu1 }
 0x10f   :  { %v1031_v58 = vadd.f32 %v1030_v55, %v1029_v51  ;;  %v801_v59 = vadd.f32 %v800_v52, %v752_v53  ;;  %v823_v1 = vmax.f32 %v819_v56, 0.0 }
 0x110   :  { %v1032_v60 = vpop.f32.mrf.mxu1 }
 0x111   :  { %v757_v61 = vadd.f32 %v1031_v58, %v563_v57  ;;  %v820_v62 = vadd.f32 %v925_v50, %v801_v59 }
 0x112   :  { %v1033_v0 = vpop.f32.mrf.mxu1 }
 0x113   :  { %v806_v2 = vadd.f32 %v1057_v28, %v757_v61  ;;  %v824_v3 = vmax.f32 %v820_v62, 0.0  ;;  %v1034_v4 = vadd.f32 %v1033_v0, %v1032_v60 }
 0x115   :  { %v937_v5 = vpack.c.bf16 %v824_v3, %v823_v1  ;;  %v760_v6 = vadd.f32 %v1034_v4, %v566_v63  ;;  %v821_v7 = vadd.f32 %v925_v50, %v806_v2 }
 0x117   :  { %938 = vst [vmem:[%s1389_s5] sm:$0xff] %v937_v5   ;;  %v809_v8 = vadd.f32 %v1058_v40, %v760_v6  ;;  %v825_v10 = vmax.f32 %v821_v7, 0.0 }
 0x119   :  { %v822_v9 = vadd.f32 %v925_v50, %v809_v8 }
 0x11b   :  { %v826_v11 = vmax.f32 %v822_v9, 0.0 }
 0x11d   :  { %v942_v12 = vpack.c.bf16 %v826_v11, %v825_v10 }
 0x11f   :  { %944 = vst [vmem:[%s1389_s5 + $0x8] sm:$0xff] %v942_v12  }

// kernel: tile.26
= control target key start
LH: loop header
LB: loop body
LE: loop exit
PB: predicated region body
PF: predicated region fallthrough
CT: control target
= control target key end

     0   :  { %s22_s0 = inlined_call_operand.vmem [shape: f32[16], index: 0, kind: input, shape index: {}]   ;;  %s23_s1 = inlined_call_operand.vmem [shape: f32[4,1,1,16], index: 1, kind: output, shape index: {}]  }
   0x1   :  { %v4_v0 = vld [vmem:[%s22_s0] ss:$0 sm:$0xff] }
   0x2   :  { %5 = vst [vmem:[%s23_s1] sm:$0xf] %v4_v0 }

// kernel: tile.27
= control target key start
LH: loop header
LB: loop body
LE: loop exit
PB: predicated region body
PF: predicated region fallthrough
CT: control target
= control target key end

     0   :  { %vm8_vm0 = vcmask 130048   ;;  %s40_s8 = smov 16   ;;  %s41_s9 = smov 32   ;;  %vm14_vm1 = vcmask 523648   ;;  %vm20_vm2 = vcmask 392448   ;;  %vm26_vm3 = vcmask 261248   ;;  %s58_s0 = inlined_call_operand.vmem [shape: f32[4,1,1,16], index: 0, kind: input, shape index: {}]   ;;  %s59_s1 = inlined_call_operand.vmem [shape: f32[64], index: 1, kind: output, shape index: {}]  }
   0x1   :  { %v5_v0 = vld [vmem:[%s58_s0] sm:$0xf]  ;;  %s39_s0 = smov 48  }
   0x2   :  { %6 = vst [vmem:[#allocation1] sm:$0xf] %v5_v0 }
   0x9   :  { %v11_v1 = vld [vmem:[#allocation1 + $0x3] sm:$0x1]   ;;  %v23_v2 = vld [vmem:[#allocation1 + $0x1] sm:$0x1]   ;;  %v7_v3 = vld [vmem:[#allocation1] sm:$0x1]  }
   0xa   :  { %12 = vrot.lane.b32.xlu0 %v11_v1, %s39_s0  ;;  %24 = vrot.lane.b32.xlu1 %v23_v2, %s40_s8  ;;  %v17_v4 = vld [vmem:[#allocation1 + $0x2] sm:$0x1]   ;;  %9 = vst.msk [vmem:[#allocation0] sm:$0x1] %vm8_vm0, %v7_v3  }
   0xe   :  { %18 = vrot.lane.b32.xlu0 %v17_v4, %s41_s9 }
  0x7c   :  { %v13_v5 = vpop.permute.xlu0 %12   ;;  %v25_v6 = vpop.permute.xlu1 %24  }
  0x7d   :  { %15 = vst.msk [vmem:[#allocation0] sm:$0x1] %vm14_vm1, %v13_v5  }
  0x80   :  { %v19_v7 = vpop.permute.xlu0 %18  }
  0x81   :  { %21 = vst.msk [vmem:[#allocation0] sm:$0x1] %vm20_vm2, %v19_v7  }
  0x82   :  { %27 = vst.msk [vmem:[#allocation0] sm:$0x1] %vm26_vm3, %v25_v6  }
  0x89   :  { %v32_v8 = vld [vmem:[#allocation0] sm:$0x1] }
  0x8a   :  { %35 = vst [vmem:[%s59_s1] sm:$0x1] %v32_v8 }

// kernel: segment_net_forward.24
= control target key start
LH: loop header
LB: loop body
LE: loop exit
PB: predicated region body
PF: predicated region fallthrough
CT: control target
= control target key end

     0   :  { %vm351_vm0 = vcmask 261120   ;;  %v1282_v10 = vmov 0   ;;  %vm696_vm1 = vcmask 130048   ;;  %s1617_s3 = inlined_call_operand.vmem [shape: bf16[288,128], index: 3, kind: input, shape index: {}]   ;;  %s1618_s2 = inlined_call_operand.vmem [shape: bf16[128,288], index: 2, kind: input, shape index: {}]   ;;  %s1619_s1 = inlined_call_operand.vmem [shape: bf16[144,128], index: 1, kind: input, shape index: {}]   ;;  %s1620_s0 = inlined_call_operand.vmem [shape: bf16[128,144], index: 0, kind: input, shape index: {}]   ;;  %s1621_s4 = inlined_call_operand.vmem [shape: f32[1,128], index: 4, kind: input, shape index: {}]   ;;  %s1622_s5 = inlined_call_operand.vmem [shape: bf16[128,128], index: 5, kind: output, shape index: {}]  }
   0x1   :  { %v1199_v0 = vld [vmem:[%s1617_s3 + $0x78] sm:$0xff]   ;;  %v1200_v1 = vld [vmem:[%s1617_s3 + $0x88] sm:$0xff]   ;;  %v1202_v3 = vld [vmem:[%s1617_s3 + $0x70] sm:$0xff]  }
   0x2   :  { %1104 = vmatprep.subr.bf16.mxu0 %v1199_v0  ;;  %v1201_v2 = vld [vmem:[%s1617_s3 + $0x38] sm:$0xff]   ;;  %1178 = vmatprep.subr.bf16.mxu1 %v1200_v1  ;;  %v1203_v4 = vld [vmem:[%s1617_s3 + $0x80] sm:$0xff]   ;;  %v1204_v5 = vld [vmem:[%s1617_s3 + $0x30] sm:$0xff]  }
   0x3   :  { %1105 = vmatpush3.bf16.msra.mxu0 %v1201_v2  ;;  %1179 = vmatpush3.bf16.msra.mxu1 %v1200_v1  ;;  %v1205_v6 = vld [vmem:[%s1618_s2 + $0x8] ss:$12 sps:$4 sm:$0xff]   ;;  %v1207_v8 = vld [vmem:[%s1618_s2 + $0x20] ss:$12 sps:$4 sm:$0xff]   ;;  %v1209_v11 = vld [vmem:[%s1619_s1 + $0x38] sm:$0xff]  }
   0x4   :  { %1106 = vmatprep.subr.bf16.mxu0 %v1202_v3  ;;  %1180 = vmatprep.subr.bf16.mxu1 %v1203_v4  ;;  %v1206_v7 = vld [vmem:[%s1617_s3 + $0x68] sm:$0xff]   ;;  %v1210_v12 = vld [vmem:[%s1617_s3 + $0x60] sm:$0xff]   ;;  %v1212_v14 = vld [vmem:[%s1619_s1 + $0x30] sm:$0xff]  }
   0x5   :  { %1182 = vmatprep.mubr.msk.bf16.mxu1 %vm351_vm0, %v1205_v6  ;;  %v1208_v9 = vld [vmem:[%s1617_s3 + $0x28] sm:$0xff]   ;;  %v1211_v13 = vld [vmem:[%s1617_s3 + $0x20] sm:$0xff]   ;;  %v1214_v16 = vld [vmem:[%s1617_s3 + $0x58] sm:$0xff]  }
   0x6   :  { %v1213_v15 = vld [vmem:[%s1618_s2 + $0x38] ss:$12 sps:$4 sm:$0xff]   ;;  %v1215_v17 = vld [vmem:[%s1618_s2 + $0x50] ss:$12 sps:$4 sm:$0xff]   ;;  %v1217_v19 = vld [vmem:[%s1619_s1 + $0x28] sm:$0xff]  }
   0x7   :  { %1107 = vmatpush3.bf16.msra.mxu0 %v1204_v5  ;;  %1181 = vmatpush3.bf16.msra.mxu1 %v1203_v4  ;;  %v1216_v18 = vld [vmem:[%s1617_s3 + $0x18] sm:$0xff]   ;;  %v1218_v20 = vld [vmem:[%s1617_s3 + $0x50] sm:$0xff]   ;;  %v1220_v22 = vld [vmem:[%s1619_s1 + $0x20] sm:$0xff]  }
   0x8   :  { %1108 = vmatprep.subr.bf16.mxu0 %v1206_v7  ;;  %721 = vmatprep.subr.bf16.mxu1 %v1282_v10  ;;  %v1219_v21 = vld [vmem:[%s1617_s3 + $0x10] sm:$0xff]   ;;  %v1222_v24 = vld [vmem:[%s1617_s3 + $0x48] sm:$0xff]   ;;  %v1225_v27 = vld [vmem:[%s1619_s1 + $0x18] sm:$0xff]  }
   0x9   :  { %v1221_v23 = vld [vmem:[%s1618_s2 + $0x68] ss:$12 sps:$4 sm:$0xff]   ;;  %v1223_v25 = vld [vmem:[%s1618_s2 + $0x80] ss:$12 sps:$4 sm:$0xff]   ;;  %v1231_v32 = vld [vmem:[%s1618_s2 + $0x4] ss:$12 sps:$4 sm:$0xff]  }
   0xa   :  { %1183 = vmatmul.mubr.msk.bf16.vlgmr.msra.gmra.mxu1 %vm351_vm0, %v1207_v8  ;;  %v1224_v26 = vld [vmem:[%s1617_s3 + $0x8] sm:$0xff]   ;;  %v1226_v28 = vld [vmem:[%s1617_s3 + $0x40] sm:$0xff]   ;;  %v1228_v30 = vld [vmem:[%s1619_s1 + $0x10] sm:$0xff]   ;;  %408 = vmatprep.mubr.bf16.mxu0 %v1231_v32 }
   0xb   :  { %1109 = vmatpush3.bf16.msra.mxu0 %v1208_v9  ;;  %722 = vmatpush1.bf16.msra.mxu1 %v1209_v11  ;;  %v1227_v29 = vld [vmem:[%s1617_s3] sm:$0xff]   ;;  %v1233_v34 = vld [vmem:[%s1618_s2 + $0xb0] ss:$12 sps:$4 sm:$0xff]   ;;  %v1234_v35 = vld [vmem:[%s1619_s1 + $0x8] sm:$0xff]  }
   0xc   :  { %1110 = vmatprep.subr.bf16.mxu0 %v1210_v12  ;;  %723 = vmatprep.subr.bf16.mxu1 %v1282_v10  ;;  %v1229_v31 = vld [vmem:[%s1618_s2] ss:$12 sps:$4 sm:$0xff]   ;;  %v1232_v33 = vld [vmem:[%s1618_s2 + $0x98] ss:$12 sps:$4 sm:$0xff]   ;;  %v1236_v37 = vld [vmem:[%s1618_s2 + $0x1c] ss:$12 sps:$4 sm:$0xff]  }
   0xd   :  { %1186 = vmatprep.mubr.msk.bf16.mxu1 %vm351_vm0, %v1213_v15  ;;  %v1235_v36 = vld [vmem:[%s1619_s1] sm:$0xff]   ;;  %v1246_v43 = vld [vmem:[%s1620_s0 + $0x14] ss:$8 sps:$4 sm:$0xff]   ;;  %v1249_v45 = vld [vmem:[%s1618_s2 + $0x4c] ss:$12 sps:$4 sm:$0xff]  }
   0xe   :  { %v1238_v38 = vld [vmem:[%s1618_s2 + $0x18] ss:$12 sps:$4 sm:$0xff]   ;;  %v1243_v41 = vld [vmem:[%s1618_s2 + $0x34] ss:$12 sps:$4 sm:$0xff]   ;;  %v1245_v44 = vld [vmem:[%s1618_s2 + $0x30] ss:$12 sps:$4 sm:$0xff]  }
   0xf   :  { %1111 = vmatpush3.bf16.msra.mxu0 %v1211_v13  ;;  %724 = vmatpush1.bf16.msra.mxu1 %v1212_v14  ;;  %v1242_v39 = vld [vmem:[%s1620_s0 + $0x4] ss:$8 sps:$4 sm:$0xff]   ;;  %v1240_v42 = vld [vmem:[%s1620_s0] ss:$8 sps:$4 sm:$0xff]   ;;  %v1248_v46 = vld [vmem:[%s1620_s0 + $0x10] ss:$8 sps:$4 sm:$0xff]  }
  0x10   :  { %1112 = vmatprep.subr.bf16.mxu0 %v1214_v16  ;;  %725 = vmatprep.subr.bf16.mxu1 %v1282_v10  ;;  %v1239_v40 = vld [vmem:[%s1619_s1 + $0x40] sm:$0xff]   ;;  %v1251_v48 = vld [vmem:[%s1618_s2 + $0x48] ss:$12 sps:$4 sm:$0xff]   ;;  %v1260_v54 = vld [vmem:[%s1620_s0 + $0x30] ss:$8 sps:$4 sm:$0xff]  }
  0x11   :  { %v1252_v47 = vld [vmem:[%s1620_s0 + $0x24] ss:$8 sps:$4 sm:$0xff]   ;;  %v1254_v50 = vld [vmem:[%s1620_s0 + $0x20] ss:$8 sps:$4 sm:$0xff]   ;;  %v1258_v51 = vld [vmem:[%s1620_s0 + $0x34] ss:$8 sps:$4 sm:$0xff]  }
  0x12   :  { %1187 = vmatmul.mubr.msk.bf16.gmra.mxu1 %vm351_vm0, %v1215_v17  ;;  %v1255_v49 = vld [vmem:[%s1618_s2 + $0x64] ss:$12 sps:$4 sm:$0xff]   ;;  %v1257_v52 = vld [vmem:[%s1618_s2 + $0x60] ss:$12 sps:$4 sm:$0xff]   ;;  %v1261_v53 = vld [vmem:[%s1618_s2 + $0x7c] ss:$12 sps:$4 sm:$0xff]  }
  0x13   :  { %1113 = vmatpush3.bf16.msra.mxu0 %v1216_v18  ;;  %726 = vmatpush1.bf16.msra.mxu1 %v1217_v19  ;;  %v1264_v55 = vld [vmem:[%s1620_s0 + $0x44] ss:$8 sps:$4 sm:$0xff]   ;;  %v1267_v57 = vld [vmem:[%s1618_s2 + $0x94] ss:$12 sps:$4 sm:$0xff]   ;;  %v1269_v60 = vld [vmem:[%s1618_s2 + $0x90] ss:$12 sps:$4 sm:$0xff]  }
  0x14   :  { %1114 = vmatprep.subr.bf16.mxu0 %v1218_v20  ;;  %727 = vmatprep.subr.bf16.mxu1 %v1282_v10  ;;  %v1263_v56 = vld [vmem:[%s1618_s2 + $0x78] ss:$12 sps:$4 sm:$0xff]   ;;  %v1266_v58 = vld [vmem:[%s1620_s0 + $0x40] ss:$8 sps:$4 sm:$0xff]   ;;  %v1270_v59 = vld [vmem:[%s1620_s0 + $0x54] ss:$8 sps:$4 sm:$0xff]  }
  0x15   :  { %1190 = vmatprep.mubr.msk.bf16.mxu1 %vm351_vm0, %v1221_v23  ;;  %v1273_v61 = vld [vmem:[%s1618_s2 + $0xac] ss:$12 sps:$4 sm:$0xff]   ;;  %v1275_v0 = vld [vmem:[%s1618_s2 + $0xa8] ss:$12 sps:$4 sm:$0xff]   ;;  %v1564_v32 = vld [vmem:[%s1621_s4] ss:$0 sm:$0xff] }
  0x16   :  { %v1272_v62 = vld [vmem:[%s1620_s0 + $0x50] ss:$8 sps:$4 sm:$0xff]   ;;  %v1276_v63 = vld [vmem:[%s1620_s0 + $0x64] ss:$8 sps:$4 sm:$0xff]   ;;  %v1278_v1 = vld [vmem:[%s1620_s0 + $0x60] ss:$8 sps:$4 sm:$0xff]  }
  0x17   :  { %1115 = vmatpush3.bf16.msra.mxu0 %v1219_v21  ;;  %728 = vmatpush1.bf16.msra.mxu1 %v1220_v22  ;;  %v1279_v2 = vld [vmem:[%s1620_s0 + $0x74] ss:$8 sps:$4 sm:$0xff]   ;;  %v1281_v3 = vld [vmem:[%s1620_s0 + $0x70] ss:$8 sps:$4 sm:$0xff]  }
  0x18   :  { %1116 = vmatprep.subr.bf16.mxu0 %v1222_v24  ;;  %729 = vmatprep.subr.bf16.mxu1 %v1282_v10 }
  0x1a   :  { %1191 = vmatmul.mubr.msk.bf16.gmra.mxu1 %vm351_vm0, %v1223_v25 }
  0x1b   :  { %1117 = vmatpush3.bf16.msra.mxu0 %v1224_v26  ;;  %730 = vmatpush1.bf16.msra.mxu1 %v1225_v27 }
  0x1c   :  { %1118 = vmatprep.subr.bf16.mxu0 %v1226_v28  ;;  %731 = vmatprep.subr.bf16.mxu1 %v1282_v10 }
  0x1d   :  { %1194 = vmatprep.mubr.msk.bf16.mxu1 %vm351_vm0, %v1232_v33 }
  0x1f   :  { %1119 = vmatpush3.bf16.msra.mxu0 %v1227_v29  ;;  %732 = vmatpush1.bf16.msra.mxu1 %v1228_v30 }
  0x20   :  { %733 = vmatprep.subr.bf16.mxu1 %v1282_v10 }
  0x22   :  { %409 = vmatmul.mubr.bf16.vlgmr.msra.gmra.mxu0 %v1229_v31  ;;  %1195 = vmatmul.mubr.msk.bf16.gmra.mxu1 %vm351_vm0, %v1233_v34 }
  0x23   :  { %734 = vmatpush1.bf16.msra.mxu1 %v1234_v35  ;;  %416 = vmatprep.mubr.bf16.mxu0 %v1236_v37 }
  0x24   :  { %735 = vmatprep.subr.bf16.mxu1 %v1282_v10  ;;  %1016 = vmatprep.mubr.msk.bf16.mxu1 %vm696_vm1, %v1242_v39 }
  0x27   :  { %736 = vmatpush1.bf16.msra.mxu1 %v1235_v36 }
  0x28   :  { %751 = vmatprep.subr.bf16.mxu1 %v1282_v10 }
  0x2a   :  { %417 = vmatmul.mubr.bf16.gmra.mxu0 %v1238_v38 }
  0x2b   :  { %752 = vmatpush2.bf16.msra.mxu1 %v1239_v40  ;;  %424 = vmatprep.mubr.bf16.mxu0 %v1243_v41 }
  0x2e   :  { %754 = vmatmul.mubr.bf16.vlgmr.msra.gmra.mxu1 %v1240_v42 }
  0x2f   :  { %1017 = vmatprep.mubr.msk.bf16.mxu1 %vm696_vm1, %v1246_v43 }
  0x32   :  { %425 = vmatmul.mubr.bf16.gmra.mxu0 %v1245_v44 }
  0x33   :  { %432 = vmatprep.mubr.bf16.mxu0 %v1249_v45 }
  0x36   :  { %762 = vmatmul.mubr.bf16.gmra.mxu1 %v1248_v46 }
  0x37   :  { %1018 = vmatprep.mubr.msk.bf16.mxu1 %vm696_vm1, %v1252_v47 }
  0x3a   :  { %433 = vmatmul.mubr.bf16.gmra.mxu0 %v1251_v48 }
  0x3b   :  { %440 = vmatprep.mubr.bf16.mxu0 %v1255_v49 }
  0x3e   :  { %770 = vmatmul.mubr.bf16.gmra.mxu1 %v1254_v50 }
  0x3f   :  { %1019 = vmatprep.mubr.msk.bf16.mxu1 %vm696_vm1, %v1258_v51 }
  0x42   :  { %441 = vmatmul.mubr.bf16.gmra.mxu0 %v1257_v52 }
  0x43   :  { %448 = vmatprep.mubr.bf16.mxu0 %v1261_v53 }
  0x46   :  { %778 = vmatmul.mubr.bf16.gmra.mxu1 %v1260_v54 }
  0x47   :  { %1020 = vmatprep.mubr.msk.bf16.mxu1 %vm696_vm1, %v1264_v55 }
  0x4a   :  { %449 = vmatmul.mubr.bf16.gmra.mxu0 %v1263_v56 }
  0x4b   :  { %456 = vmatprep.mubr.bf16.mxu0 %v1267_v57 }
  0x4e   :  { %786 = vmatmul.mubr.bf16.gmra.mxu1 %v1266_v58 }
  0x4f   :  { %1021 = vmatprep.mubr.msk.bf16.mxu1 %vm696_vm1, %v1270_v59 }
  0x52   :  { %457 = vmatmul.mubr.bf16.gmra.mxu0 %v1269_v60 }
  0x53   :  { %464 = vmatprep.mubr.bf16.mxu0 %v1273_v61 }
  0x56   :  { %794 = vmatmul.mubr.bf16.gmra.mxu1 %v1272_v62 }
  0x57   :  { %1022 = vmatprep.mubr.msk.bf16.mxu1 %vm696_vm1, %v1276_v63 }
  0x5a   :  { %465 = vmatmul.mubr.bf16.gmra.mxu0 %v1275_v0 }
  0x5e   :  { %802 = vmatmul.mubr.bf16.gmra.mxu1 %v1278_v1 }
  0x5f   :  { %1023 = vmatprep.mubr.msk.bf16.mxu1 %vm696_vm1, %v1279_v2 }
  0x66   :  { %810 = vmatmul.mubr.bf16.gmra.mxu1 %v1281_v3 }
  0xca   :  { %v1184_v4 = vpop.f32.mrf.mxu1 }
  0xcc   :  { %v507_v5 = vpop.f32.mrf.mxu1 }
  0xce   :  { %v1185_v6 = vpop.f32.mrf.mxu1 }
  0xd0   :  { %v510_v7 = vpop.f32.mrf.mxu1 }
  0xd2   :  { %v1539_v8 = vpop.f32.mrf.mxu1 }
  0xd4   :  { %v523_v9 = vpop.f32.mrf.mxu1 }
  0xd6   :  { %v1541_v10 = vpop.f32.mrf.mxu1 }
  0xd8   :  { %v1543_v11 = vpop.f32.mrf.mxu1 }
  0xda   :  { %v1545_v12 = vpop.f32.mrf.mxu1 }
  0xdc   :  { %v1547_v13 = vpop.f32.mrf.mxu1 }
  0xde   :  { %v1549_v14 = vpop.f32.mrf.mxu1 }
  0xe0   :  { %v1551_v15 = vpop.f32.mrf.mxu1 }
  0xe2   :  { %v1120_v16 = vpop.f32.mrf.mxu0  ;;  %v1553_v17 = vpop.f32.mrf.mxu1 }
  0xe4   :  { %v1121_v18 = vpop.f32.mrf.mxu0  ;;  %v1555_v19 = vpop.f32.mrf.mxu1 }
  0xe5   :  { %v1122_v23 = vadd.f32 %v1121_v18, %v1120_v16 }
  0xe6   :  { %v1123_v20 = vpop.f32.mrf.mxu0  ;;  %v1557_v21 = vpop.f32.mrf.mxu1 }
  0xe7   :  { %v508_v28 = vadd.f32 %v1122_v23, %v507_v5 }
  0xe8   :  { %v1124_v22 = vpop.f32.mrf.mxu0  ;;  %v1559_v25 = vpop.f32.mrf.mxu1 }
  0xe9   :  { %v1125_v27 = vadd.f32 %v1124_v22, %v1123_v20 }
  0xea   :  { %v1126_v24 = vpop.f32.mrf.mxu0 }
  0xeb   :  { %v511_v36 = vadd.f32 %v1125_v27, %v510_v7 }
  0xec   :  { %v1127_v26 = vpop.f32.mrf.mxu0 }
  0xed   :  { %v1128_v35 = vadd.f32 %v1127_v26, %v1126_v24 }
  0xee   :  { %v1129_v29 = vpop.f32.mrf.mxu0  ;;  %v755_v30 = vpop.f32.mrf.mxu1 }
  0xef   :  { %v756_v31 = vadd.f32 %v755_v30, %v508_v28  ;;  %v516_v45 = vadd.f32 %v1184_v4, %v1128_v35 }
  0xf0   :  { %v1130_v33 = vpop.f32.mrf.mxu0  ;;  %v757_v34 = vpop.f32.mrf.mxu1 }
  0xf1   :  { %v825_v39 = vadd.f32 %v1564_v32, %v756_v31  ;;  %v1131_v43 = vadd.f32 %v1130_v33, %v1129_v29 }
  0xf2   :  { %v1132_v37 = vpop.f32.mrf.mxu0  ;;  %v758_v38 = vpop.f32.mrf.mxu1 }
  0xf3   :  { %v759_v40 = vadd.f32 %v758_v38, %v511_v36  ;;  %v841_v48 = vmax.f32 %v825_v39, 0.0  ;;  %v519_v55 = vadd.f32 %v1185_v6, %v1131_v43 }
  0xf4   :  { %v1133_v41 = vpop.f32.mrf.mxu0  ;;  %v760_v42 = vpop.f32.mrf.mxu1 }
  0xf5   :  { %v826_v44 = vadd.f32 %v1564_v32, %v759_v40  ;;  %v1134_v54 = vadd.f32 %v1133_v41, %v1132_v37 }
  0xf6   :  { %v1135_v46 = vpop.f32.mrf.mxu0  ;;  %v763_v47 = vpop.f32.mrf.mxu1 }
  0xf7   :  { %v842_v49 = vmax.f32 %v826_v44, 0.0  ;;  %v764_v50 = vadd.f32 %v763_v47, %v516_v45  ;;  %v524_v0 = vadd.f32 %v1134_v54, %v523_v9 }
  0xf8   :  { %v1136_v51 = vpop.f32.mrf.mxu0  ;;  %v765_v52 = vpop.f32.mrf.mxu1 }
  0xf9   :  { %v1060_v53 = vpack.c.bf16 %v842_v49, %v841_v48  ;;  %v827_v58 = vadd.f32 %v1564_v32, %v764_v50  ;;  %v1137_v62 = vadd.f32 %v1136_v51, %v1135_v46 }
  0xfa   :  { %v1138_v56 = vpop.f32.mrf.mxu0  ;;  %v766_v57 = vpop.f32.mrf.mxu1 }
  0xfb   :  { %1061 = vst [vmem:[%s1622_s5] sm:$0xff] %v1060_v53   ;;  %v767_v59 = vadd.f32 %v766_v57, %v519_v55  ;;  %v843_v3 = vmax.f32 %v827_v58, 0.0  ;;  %v527_v20 = vadd.f32 %v1137_v62, %v1543_v11 }
  0xfc   :  { %v1139_v60 = vpop.f32.mrf.mxu0  ;;  %v768_v61 = vpop.f32.mrf.mxu1 }
  0xfd   :  { %v828_v63 = vadd.f32 %v1564_v32, %v767_v59  ;;  %v1140_v18 = vadd.f32 %v1139_v60, %v1138_v56 }
  0xfe   :  { %v1141_v1 = vpop.f32.mrf.mxu0  ;;  %v771_v2 = vpop.f32.mrf.mxu1 }
  0xff   :  { %v844_v4 = vmax.f32 %v828_v63, 0.0  ;;  %v772_v5 = vadd.f32 %v771_v2, %v524_v0  ;;  %v532_v30 = vadd.f32 %v1539_v8, %v1140_v18 }
 0x100   :  { %v1142_v6 = vpop.f32.mrf.mxu0  ;;  %v773_v7 = vpop.f32.mrf.mxu1 }
 0x101   :  { %v1065_v16 = vpack.c.bf16 %v844_v4, %v843_v3  ;;  %v829_v24 = vadd.f32 %v1564_v32, %v772_v5  ;;  %v1143_v28 = vadd.f32 %v1142_v6, %v1141_v1 }
 0x102   :  { %v1144_v22 = vpop.f32.mrf.mxu0  ;;  %v774_v23 = vpop.f32.mrf.mxu1 }
 0x103   :  { %1097 = vst [vmem:[%s1622_s5 + $0x8] sm:$0xff] %v1065_v16   ;;  %v775_v9 = vadd.f32 %v774_v23, %v527_v20  ;;  %v845_v34 = vmax.f32 %v829_v24, 0.0  ;;  %v535_v40 = vadd.f32 %v1541_v10, %v1143_v28 }
 0x104   :  { %v1145_v26 = vpop.f32.mrf.mxu0  ;;  %v776_v27 = vpop.f32.mrf.mxu1 }
 0x105   :  { %v830_v29 = vadd.f32 %v1564_v32, %v775_v9  ;;  %v1146_v39 = vadd.f32 %v1145_v26, %v1144_v22 }
 0x106   :  { %v1147_v31 = vpop.f32.mrf.mxu0  ;;  %v779_v33 = vpop.f32.mrf.mxu1 }
 0x107   :  { %v846_v11 = vmax.f32 %v830_v29, 0.0  ;;  %v780_v35 = vadd.f32 %v779_v33, %v532_v30  ;;  %v540_v48 = vadd.f32 %v1146_v39, %v1547_v13 }
 0x108   :  { %v1148_v36 = vpop.f32.mrf.mxu0  ;;  %v781_v37 = vpop.f32.mrf.mxu1 }
 0x109   :  { %v1070_v38 = vpack.c.bf16 %v846_v11, %v845_v34  ;;  %v831_v43 = vadd.f32 %v1564_v32, %v780_v35  ;;  %v1149_v46 = vadd.f32 %v1148_v36, %v1147_v31 }
 0x10a   :  { %v1150_v41 = vpop.f32.mrf.mxu0  ;;  %v782_v42 = vpop.f32.mrf.mxu1 }
 0x10b   :  { %1098 = vst [vmem:[%s1622_s5 + $0x10] sm:$0xff] %v1070_v38   ;;  %v783_v8 = vadd.f32 %v782_v42, %v535_v40  ;;  %v847_v51 = vmax.f32 %v831_v43, 0.0  ;;  %v543_v57 = vadd.f32 %v1149_v46, %v1551_v15 }
 0x10c   :  { %v1151_v44 = vpop.f32.mrf.mxu0  ;;  %v784_v45 = vpop.f32.mrf.mxu1 }
 0x10d   :  { %v832_v47 = vadd.f32 %v1564_v32, %v783_v8  ;;  %v1152_v56 = vadd.f32 %v1151_v44, %v1150_v41 }
 0x10e   :  { %v1153_v49 = vpop.f32.mrf.mxu0  ;;  %v787_v50 = vpop.f32.mrf.mxu1 }
 0x10f   :  { %v848_v10 = vmax.f32 %v832_v47, 0.0  ;;  %v788_v52 = vadd.f32 %v787_v50, %v540_v48  ;;  %v548_v1 = vadd.f32 %v1545_v12, %v1152_v56 }
 0x110   :  { %v1154_v53 = vpop.f32.mrf.mxu0  ;;  %v789_v54 = vpop.f32.mrf.mxu1 }
 0x111   :  { %v1075_v55 = vpack.c.bf16 %v848_v10, %v847_v51  ;;  %v833_v60 = vadd.f32 %v1564_v32, %v788_v52  ;;  %v1155_v63 = vadd.f32 %v1154_v53, %v1153_v49 }
 0x112   :  { %v1156_v58 = vpop.f32.mrf.mxu0  ;;  %v790_v59 = vpop.f32.mrf.mxu1 }
 0x113   :  { %1099 = vst [vmem:[%s1622_s5 + $0x18] sm:$0xff] %v1075_v55   ;;  %v791_v13 = vadd.f32 %v790_v59, %v543_v57  ;;  %v849_v4 = vmax.f32 %v833_v60, 0.0  ;;  %v551_v20 = vadd.f32 %v1549_v14, %v1155_v63 }
 0x114   :  { %v1157_v61 = vpop.f32.mrf.mxu0  ;;  %v792_v62 = vpop.f32.mrf.mxu1 }
 0x115   :  { %v834_v0 = vadd.f32 %v1564_v32, %v791_v13  ;;  %v1158_v18 = vadd.f32 %v1157_v61, %v1156_v58 }
 0x116   :  { %v1159_v2 = vpop.f32.mrf.mxu0  ;;  %v795_v3 = vpop.f32.mrf.mxu1 }
 0x117   :  { %v850_v15 = vmax.f32 %v834_v0, 0.0  ;;  %v796_v5 = vadd.f32 %v795_v3, %v548_v1  ;;  %v556_v29 = vadd.f32 %v1158_v18, %v1555_v19 }
 0x118   :  { %v1160_v6 = vpop.f32.mrf.mxu0  ;;  %v797_v7 = vpop.f32.mrf.mxu1 }
 0x119   :  { %v1080_v16 = vpack.c.bf16 %v850_v15, %v849_v4  ;;  %v835_v24 = vadd.f32 %v1564_v32, %v796_v5  ;;  %v1161_v27 = vadd.f32 %v1160_v6, %v1159_v2 }
 0x11a   :  { %v1162_v22 = vpop.f32.mrf.mxu0  ;;  %v798_v23 = vpop.f32.mrf.mxu1 }
 0x11b   :  { %1100 = vst [vmem:[%s1622_s5 + $0x20] sm:$0xff] %v1080_v16   ;;  %v799_v12 = vadd.f32 %v798_v23, %v551_v20  ;;  %v851_v33 = vmax.f32 %v835_v24, 0.0  ;;  %v559_v37 = vadd.f32 %v1161_v27, %v1559_v25 }
 0x11c   :  { %v1163_v9 = vpop.f32.mrf.mxu0  ;;  %v800_v26 = vpop.f32.mrf.mxu1 }
 0x11d   :  { %v836_v28 = vadd.f32 %v1564_v32, %v799_v12  ;;  %v1164_v36 = vadd.f32 %v1163_v9, %v1162_v22 }
 0x11e   :  { %v1165_v30 = vpop.f32.mrf.mxu0  ;;  %v803_v31 = vpop.f32.mrf.mxu1 }
 0x11f   :  { %v852_v14 = vmax.f32 %v836_v28, 0.0  ;;  %v804_v34 = vadd.f32 %v803_v31, %v556_v29  ;;  %v564_v8 = vadd.f32 %v1553_v17, %v1164_v36 }
 0x120   :  { %v805_v11 = vpop.f32.mrf.mxu1  ;;  %v1166_v38 = vpop.f32.mrf.mxu0 }
 0x121   :  { %v1085_v35 = vpack.c.bf16 %v852_v14, %v851_v33  ;;  %v837_v40 = vadd.f32 %v1564_v32, %v804_v34  ;;  %v1167_v42 = vadd.f32 %v1166_v38, %v1165_v30 }
 0x122   :  { %v806_v39 = vpop.f32.mrf.mxu1 }
 0x123   :  { %1101 = vst [vmem:[%s1622_s5 + $0x28] sm:$0xff] %v1085_v35   ;;  %v807_v41 = vadd.f32 %v806_v39, %v559_v37  ;;  %v853_v45 = vmax.f32 %v837_v40, 0.0  ;;  %v567_v49 = vadd.f32 %v1557_v21, %v1167_v42 }
 0x124   :  { %v808_v19 = vpop.f32.mrf.mxu1 }
 0x125   :  { %v838_v43 = vadd.f32 %v1564_v32, %v807_v41 }
 0x126   :  { %v811_v44 = vpop.f32.mrf.mxu1 }
 0x127   :  { %v854_v46 = vmax.f32 %v838_v43, 0.0  ;;  %v812_v47 = vadd.f32 %v811_v44, %v564_v8 }
 0x128   :  { %v813_v25 = vpop.f32.mrf.mxu1 }
 0x129   :  { %v1090_v48 = vpack.c.bf16 %v854_v46, %v853_v45  ;;  %v839_v51 = vadd.f32 %v1564_v32, %v812_v47 }
 0x12a   :  { %v814_v50 = vpop.f32.mrf.mxu1 }
 0x12b   :  { %1102 = vst [vmem:[%s1622_s5 + $0x30] sm:$0xff] %v1090_v48   ;;  %v815_v10 = vadd.f32 %v814_v50, %v567_v49  ;;  %v855_v17 = vmax.f32 %v839_v51, 0.0 }
 0x12c   :  { %v816_v52 = vpop.f32.mrf.mxu1 }
 0x12d   :  { %v840_v53 = vadd.f32 %v1564_v32, %v815_v10 }
 0x12f   :  { %v856_v54 = vmax.f32 %v840_v53, 0.0 }
 0x131   :  { %v1095_v55 = vpack.c.bf16 %v856_v54, %v855_v17 }
 0x133   :  { %1103 = vst [vmem:[%s1622_s5 + $0x38] sm:$0xff] %v1095_v55  }

// kernel: tile.34
= control target key start
LH: loop header
LB: loop body
LE: loop exit
PB: predicated region body
PF: predicated region fallthrough
CT: control target
= control target key end

     0   :  { %s22_s0 = inlined_call_operand.vmem [shape: f32[8], index: 0, kind: input, shape index: {}]   ;;  %s23_s1 = inlined_call_operand.vmem [shape: f32[4,1,1,8], index: 1, kind: output, shape index: {}]  }
   0x1   :  { %v4_v0 = vld [vmem:[%s22_s0] ss:$0 sm:$0xff] }
   0x2   :  { %5 = vst [vmem:[%s23_s1] sm:$0xf] %v4_v0 }

// kernel: tile.35
= control target key start
LH: loop header
LB: loop body
LE: loop exit
PB: predicated region body
PF: predicated region fallthrough
CT: control target
= control target key end

     0   :  { %vm8_vm0 = vcmask 64512   ;;  %s40_s8 = smov 8   ;;  %s41_s9 = smov 16   ;;  %vm14_vm1 = vcmask 261312   ;;  %vm20_vm2 = vcmask 195712   ;;  %vm26_vm3 = vcmask 130112   ;;  %s58_s0 = inlined_call_operand.vmem [shape: f32[4,1,1,8], index: 0, kind: input, shape index: {}]   ;;  %s59_s1 = inlined_call_operand.vmem [shape: f32[32], index: 1, kind: output, shape index: {}]  }
   0x1   :  { %v5_v0 = vld [vmem:[%s58_s0] sm:$0xf]  ;;  %s39_s0 = smov 24  }
   0x2   :  { %6 = vst [vmem:[#allocation1] sm:$0xf] %v5_v0 }
   0x9   :  { %v11_v1 = vld [vmem:[#allocation1 + $0x3] sm:$0x1]   ;;  %v23_v2 = vld [vmem:[#allocation1 + $0x1] sm:$0x1]   ;;  %v7_v3 = vld [vmem:[#allocation1] sm:$0x1]  }
   0xa   :  { %12 = vrot.lane.b32.xlu0 %v11_v1, %s39_s0  ;;  %24 = vrot.lane.b32.xlu1 %v23_v2, %s40_s8  ;;  %v17_v4 = vld [vmem:[#allocation1 + $0x2] sm:$0x1]   ;;  %9 = vst.msk [vmem:[#allocation0] sm:$0x1] %vm8_vm0, %v7_v3  }
   0xe   :  { %18 = vrot.lane.b32.xlu0 %v17_v4, %s41_s9 }
  0x7c   :  { %v13_v5 = vpop.permute.xlu0 %12   ;;  %v25_v6 = vpop.permute.xlu1 %24  }
  0x7d   :  { %15 = vst.msk [vmem:[#allocation0] sm:$0x1] %vm14_vm1, %v13_v5  }
  0x80   :  { %v19_v7 = vpop.permute.xlu0 %18  }
  0x81   :  { %21 = vst.msk [vmem:[#allocation0] sm:$0x1] %vm20_vm2, %v19_v7  }
  0x82   :  { %27 = vst.msk [vmem:[#allocation0] sm:$0x1] %vm26_vm3, %v25_v6  }
  0x89   :  { %v32_v8 = vld [vmem:[#allocation0] sm:$0x1] }
  0x8a   :  { %35 = vst [vmem:[%s59_s1] sm:$0x1] %v32_v8 }

// kernel: segment_net_forward.26
= control target key start
LH: loop header
LB: loop body
LE: loop exit
PB: predicated region body
PF: predicated region fallthrough
CT: control target
= control target key end

     0   :  { %s1924_s18 = smov 0   ;;  %s2157_s0 = inlined_call_operand.vmem [shape: bf16[512,144], index: 0, kind: input, shape index: {}]   ;;  %s2158_s1 = inlined_call_operand.vmem [shape: bf16[144,128], index: 1, kind: input, shape index: {}]   ;;  %s2159_s2 = inlined_call_operand.vmem [shape: bf16[512,144], index: 2, kind: input, shape index: {}]   ;;  %s2160_s3 = inlined_call_operand.vmem [shape: bf16[144,128], index: 3, kind: input, shape index: {}]   ;;  %s2161_s4 = inlined_call_operand.vmem [shape: f32[1,128], index: 4, kind: input, shape index: {}]   ;;  %s2162_s5 = inlined_call_operand.vmem [shape: bf16[512,128], index: 5, kind: output, shape index: {}]  }
   0x1 LB: > { %s1471_s19 = sadd.s32 4294967295, %s1891_s18   ;;  %p1475_p0 = scmp.ge.s32.totalorder %s1891_s18, 1  ;;  %s1891_s18 = sphi %s1924_s18, %s15_s18  }
   0x2   : > { %p201_p1 = scmp.lt.s32.totalorder %s1891_s18, 3 }
   0x4   : > { %p202_p2 = pnand %p1475_p0, %p201_p1 }
   0x5   : > { %s1476_s26 = sshll.u32 (!%p202_p2), %s1471_s19, 5 }
   0x6   : > { %205 = sbr.rel (%p202_p2) target bundleno = 374 (0x176), region = 40  ;;  %p237_p3 = scmp.lt.s32.totalorder (!%p202_p2), %s1476_s26, 63 }
   0xb   : > { %v1771_v0 = vld [vmem:[%s2160_s3 + $0x38] sm:$0xff]   ;;  %v1893_v1 = vmov 0   ;;  %v1773_v3 = vld [vmem:[%s2160_s3 + $0x30] sm:$0xff]   ;;  %v1775_v5 = vld [vmem:[%s2160_s3 + $0x28] sm:$0xff]   ;;  %s2164_s26 = smov (!%p237_p3, %s1476_s26), 63  ;;  %vm555_vm0 = vcmask 130048  }
   0xc   : > { %604 = vmatprep.subr.bf16.mxu0 %v1893_v1  ;;  %1011 = vmatprep.subr.bf16.mxu1 %v1893_v1  ;;  %v1772_v2 = vld [vmem:[%s2158_s1 + $0x38] sm:$0xff]   ;;  %v1774_v4 = vld [vmem:[%s2158_s1 + $0x30] sm:$0xff]   ;;  %v1776_v6 = vld [vmem:[%s2158_s1 + $0x28] sm:$0xff]   ;;  %s1633_s12 = sshll.u32 %s2164_s26, 3  ;;  %s1483_s19 = sshll.u32 %s2164_s26, 2 }
   0xd   : > { %605 = vmatpush1.bf16.msra.mxu0 %v1771_v0  ;;  %1012 = vmatpush1.bf16.msra.mxu1 %v1772_v2  ;;  %v1777_v7 = vld [vmem:[%s2160_s3 + $0x20] sm:$0xff]   ;;  %v1779_v9 = vld [vmem:[%s2160_s3 + $0x18] sm:$0xff]   ;;  %s1968_s20 = scalar_lea.vmem %s2159_s2, %s1633_s12  ;;  %v1781_v11 = vld [vmem:[%s2160_s3 + $0x10] sm:$0xff]   ;;  %s1976_s25 = scalar_lea.vmem %s2157_s0, %s1633_s12 }
   0xe   : > { %606 = vmatprep.subr.bf16.mxu0 %v1893_v1  ;;  %1013 = vmatprep.subr.bf16.mxu1 %v1893_v1  ;;  %v1778_v8 = vld [vmem:[%s2158_s1 + $0x20] sm:$0xff]   ;;  %v1780_v10 = vld [vmem:[%s2158_s1 + $0x18] sm:$0xff]   ;;  %v1782_v12 = vld [vmem:[%s2158_s1 + $0x10] sm:$0xff]   ;;  %s2106_s22 = scalar_lea.vmem %s2162_s5, %s1483_s19 }
   0xf   : > { %v1791_v13 = vld [vmem:[%s1968_s20 + $0x4] ss:$8 sps:$4 sm:$0xff]   ;;  %v1789_v21 = vld [vmem:[%s1968_s20] ss:$8 sps:$4 sm:$0xff]   ;;  %v1795_v23 = vld [vmem:[%s1968_s20 + $0x14] ss:$8 sps:$4 sm:$0xff]  }
  0x10   : > { %v1794_v14 = vld [vmem:[%s1976_s25 + $0x4] ss:$8 sps:$4 sm:$0xff]   ;;  %1525 = vmatprep.mubr.msk.bf16.mxu0 %vm555_vm0, %v1791_v13  ;;  %v1792_v22 = vld [vmem:[%s1976_s25] ss:$8 sps:$4 sm:$0xff]   ;;  %v1797_v24 = vld [vmem:[%s1976_s25 + $0x14] ss:$8 sps:$4 sm:$0xff]  }
  0x11   : > { %607 = vmatpush1.bf16.msra.mxu0 %v1773_v3  ;;  %1014 = vmatpush1.bf16.msra.mxu1 %v1774_v4  ;;  %v1783_v15 = vld [vmem:[%s2160_s3 + $0x8] sm:$0xff]   ;;  %v1785_v17 = vld [vmem:[%s2160_s3] sm:$0xff]   ;;  %v1799_v25 = vld [vmem:[%s1968_s20 + $0x10] ss:$8 sps:$4 sm:$0xff]  }
  0x12   : > { %608 = vmatprep.subr.bf16.mxu0 %v1893_v1  ;;  %1015 = vmatprep.subr.bf16.mxu1 %v1893_v1  ;;  %v1784_v16 = vld [vmem:[%s2158_s1 + $0x8] sm:$0xff]   ;;  %v1786_v18 = vld [vmem:[%s2158_s1] sm:$0xff]   ;;  %v1800_v26 = vld [vmem:[%s1976_s25 + $0x10] ss:$8 sps:$4 sm:$0xff]  }
  0x13   : > { %1582 = vmatprep.mubr.msk.bf16.mxu1 %vm555_vm0, %v1794_v14  ;;  %v1787_v19 = vld [vmem:[%s2160_s3 + $0x40] sm:$0xff]   ;;  %v1807_v31 = vld [vmem:[%s1968_s20 + $0x34] ss:$8 sps:$4 sm:$0xff]   ;;  %v1811_v33 = vld [vmem:[%s1968_s20 + $0x30] ss:$8 sps:$4 sm:$0xff]  }
  0x14   : > { %v1788_v20 = vld [vmem:[%s2158_s1 + $0x40] sm:$0xff]   ;;  %v1809_v32 = vld [vmem:[%s1976_s25 + $0x34] ss:$8 sps:$4 sm:$0xff]   ;;  %v1812_v34 = vld [vmem:[%s1976_s25 + $0x30] ss:$8 sps:$4 sm:$0xff]  }
  0x15   : > { %609 = vmatpush1.bf16.msra.mxu0 %v1775_v5  ;;  %1016 = vmatpush1.bf16.msra.mxu1 %v1776_v6  ;;  %v1801_v27 = vld [vmem:[%s1968_s20 + $0x24] ss:$8 sps:$4 sm:$0xff]   ;;  %v1805_v29 = vld [vmem:[%s1968_s20 + $0x20] ss:$8 sps:$4 sm:$0xff]   ;;  %v1819_v39 = vld [vmem:[%s1968_s20 + $0x54] ss:$8 sps:$4 sm:$0xff]  }
  0x16   : > { %610 = vmatprep.subr.bf16.mxu0 %v1893_v1  ;;  %1017 = vmatprep.subr.bf16.mxu1 %v1893_v1  ;;  %v1803_v28 = vld [vmem:[%s1976_s25 + $0x24] ss:$8 sps:$4 sm:$0xff]   ;;  %v1806_v30 = vld [vmem:[%s1976_s25 + $0x20] ss:$8 sps:$4 sm:$0xff]   ;;  %v1821_v40 = vld [vmem:[%s1976_s25 + $0x54] ss:$8 sps:$4 sm:$0xff]  }
  0x17   : > { %v1813_v35 = vld [vmem:[%s1968_s20 + $0x44] ss:$8 sps:$4 sm:$0xff]   ;;  %v1817_v37 = vld [vmem:[%s1968_s20 + $0x40] ss:$8 sps:$4 sm:$0xff]   ;;  %v1823_v41 = vld [vmem:[%s1968_s20 + $0x50] ss:$8 sps:$4 sm:$0xff]  }
  0x18   : > { %v1815_v36 = vld [vmem:[%s1976_s25 + $0x44] ss:$8 sps:$4 sm:$0xff]   ;;  %v1818_v38 = vld [vmem:[%s1976_s25 + $0x40] ss:$8 sps:$4 sm:$0xff]   ;;  %v1824_v42 = vld [vmem:[%s1976_s25 + $0x50] ss:$8 sps:$4 sm:$0xff]  }
  0x19   : > { %611 = vmatpush1.bf16.msra.mxu0 %v1777_v7  ;;  %1018 = vmatpush1.bf16.msra.mxu1 %v1778_v8  ;;  %v1825_v43 = vld [vmem:[%s1968_s20 + $0x64] ss:$8 sps:$4 sm:$0xff]   ;;  %v1829_v45 = vld [vmem:[%s1968_s20 + $0x60] ss:$8 sps:$4 sm:$0xff]   ;;  %v1831_v47 = vld [vmem:[%s1968_s20 + $0x74] ss:$8 sps:$4 sm:$0xff]  }
  0x1a   : > { %612 = vmatprep.subr.bf16.mxu0 %v1893_v1  ;;  %1019 = vmatprep.subr.bf16.mxu1 %v1893_v1  ;;  %v1827_v44 = vld [vmem:[%s1976_s25 + $0x64] ss:$8 sps:$4 sm:$0xff]   ;;  %v1830_v46 = vld [vmem:[%s1976_s25 + $0x60] ss:$8 sps:$4 sm:$0xff]   ;;  %v1833_v48 = vld [vmem:[%s1976_s25 + $0x74] ss:$8 sps:$4 sm:$0xff]  }
  0x1b   : > { %v1835_v49 = vld [vmem:[%s1968_s20 + $0x70] ss:$8 sps:$4 sm:$0xff]   ;;  %v1837_v51 = vld [vmem:[%s1968_s20 + $0x84] ss:$8 sps:$4 sm:$0xff]   ;;  %v1841_v53 = vld [vmem:[%s1968_s20 + $0x80] ss:$8 sps:$4 sm:$0xff]  }
  0x1c   : > { %v1836_v50 = vld [vmem:[%s1976_s25 + $0x70] ss:$8 sps:$4 sm:$0xff]   ;;  %v1839_v52 = vld [vmem:[%s1976_s25 + $0x84] ss:$8 sps:$4 sm:$0xff]   ;;  %v1842_v54 = vld [vmem:[%s1976_s25 + $0x80] ss:$8 sps:$4 sm:$0xff]  }
  0x1d   : > { %613 = vmatpush1.bf16.msra.mxu0 %v1779_v9  ;;  %1020 = vmatpush1.bf16.msra.mxu1 %v1780_v10  ;;  %v1843_v55 = vld [vmem:[%s1968_s20 + $0x94] ss:$8 sps:$4 sm:$0xff]   ;;  %v1847_v57 = vld [vmem:[%s1968_s20 + $0x90] ss:$8 sps:$4 sm:$0xff]   ;;  %v1849_v59 = vld [vmem:[%s1968_s20 + $0xa4] ss:$8 sps:$4 sm:$0xff]  }
  0x1e   : > { %614 = vmatprep.subr.bf16.mxu0 %v1893_v1  ;;  %1021 = vmatprep.subr.bf16.mxu1 %v1893_v1  ;;  %v1845_v56 = vld [vmem:[%s1976_s25 + $0x94] ss:$8 sps:$4 sm:$0xff]   ;;  %v1848_v58 = vld [vmem:[%s1976_s25 + $0x90] ss:$8 sps:$4 sm:$0xff]   ;;  %v1851_v60 = vld [vmem:[%s1976_s25 + $0xa4] ss:$8 sps:$4 sm:$0xff]  }
  0x1f   : > { %v1853_v61 = vld [vmem:[%s1968_s20 + $0xa0] ss:$8 sps:$4 sm:$0xff]   ;;  %v1855_v63 = vld [vmem:[%s1968_s20 + $0xb4] ss:$8 sps:$4 sm:$0xff]   ;;  %v1860_v2 = vld [vmem:[%s1976_s25 + $0xb0] ss:$8 sps:$4 sm:$0xff]  }
  0x20   : > { %v1854_v62 = vld [vmem:[%s1976_s25 + $0xa0] ss:$8 sps:$4 sm:$0xff]   ;;  %v1857_v0 = vld [vmem:[%s1976_s25 + $0xb4] ss:$8 sps:$4 sm:$0xff]   ;;  %v1861_v3 = vld [vmem:[%s1968_s20 + $0xc4] ss:$8 sps:$4 sm:$0xff]  }
  0x21   : > { %615 = vmatpush1.bf16.msra.mxu0 %v1781_v11  ;;  %1022 = vmatpush1.bf16.msra.mxu1 %v1782_v12  ;;  %v1863_v4 = vld [vmem:[%s1976_s25 + $0xc4] ss:$8 sps:$4 sm:$0xff]   ;;  %v1865_v5 = vld [vmem:[%s1968_s20 + $0xc0] ss:$8 sps:$4 sm:$0xff]   ;;  %v1867_v7 = vld [vmem:[%s1968_s20 + $0xd4] ss:$8 sps:$4 sm:$0xff]  }
  0x22   : > { %616 = vmatprep.subr.bf16.mxu0 %v1893_v1  ;;  %1023 = vmatprep.subr.bf16.mxu1 %v1893_v1  ;;  %v1866_v6 = vld [vmem:[%s1976_s25 + $0xc0] ss:$8 sps:$4 sm:$0xff]   ;;  %v1869_v8 = vld [vmem:[%s1976_s25 + $0xd4] ss:$8 sps:$4 sm:$0xff]   ;;  %v1871_v9 = vld [vmem:[%s1968_s20 + $0xd0] ss:$8 sps:$4 sm:$0xff]  }
  0x23   : > { %v1872_v10 = vld [vmem:[%s1976_s25 + $0xd0] ss:$8 sps:$4 sm:$0xff]   ;;  %v1873_v11 = vld [vmem:[%s1968_s20 + $0xe4] ss:$8 sps:$4 sm:$0xff]   ;;  %v1877_v13 = vld [vmem:[%s1968_s20 + $0xe0] ss:$8 sps:$4 sm:$0xff]  }
  0x24   : > { %v1875_v12 = vld [vmem:[%s1976_s25 + $0xe4] ss:$8 sps:$4 sm:$0xff]   ;;  %v1878_v14 = vld [vmem:[%s1976_s25 + $0xe0] ss:$8 sps:$4 sm:$0xff]  }
  0x25   : > { %617 = vmatpush1.bf16.msra.mxu0 %v1783_v15  ;;  %1024 = vmatpush1.bf16.msra.mxu1 %v1784_v16  ;;  %v1879_v15 = vld [vmem:[%s1968_s20 + $0xf4] ss:$8 sps:$4 sm:$0xff]  }
  0x26   : > { %618 = vmatprep.subr.bf16.mxu0 %v1893_v1  ;;  %1025 = vmatprep.subr.bf16.mxu1 %v1893_v1  ;;  %v1881_v16 = vld [vmem:[%s1976_s25 + $0xf4] ss:$8 sps:$4 sm:$0xff]  }
  0x29   : > { %619 = vmatpush1.bf16.msra.mxu0 %v1785_v17  ;;  %1026 = vmatpush1.bf16.msra.mxu1 %v1786_v18  ;;  %v1883_v17 = vld [vmem:[%s1968_s20 + $0xf0] ss:$8 sps:$4 sm:$0xff]  }
  0x2a   : > { %634 = vmatprep.subr.bf16.mxu0 %v1893_v1  ;;  %1041 = vmatprep.subr.bf16.mxu1 %v1893_v1  ;;  %v1859_v1 = vld [vmem:[%s1968_s20 + $0xb0] ss:$8 sps:$4 sm:$0xff]  }
  0x2b   : > { %v1884_v18 = vld [vmem:[%s1976_s25 + $0xf0] ss:$8 sps:$4 sm:$0xff]  }
  0x2d   : > { %635 = vmatpush2.bf16.msra.mxu0 %v1787_v19  ;;  %1042 = vmatpush2.bf16.msra.mxu1 %v1788_v20 }
  0x30   : > { %637 = vmatmul.mubr.bf16.vlgmr.msra.gmra.mxu0 %v1789_v21  ;;  %1044 = vmatmul.mubr.bf16.vlgmr.msra.gmra.mxu1 %v1792_v22 }
  0x31   : > { %1526 = vmatprep.mubr.msk.bf16.mxu0 %vm555_vm0, %v1795_v23  ;;  %1583 = vmatprep.mubr.msk.bf16.mxu1 %vm555_vm0, %v1797_v24  ;;  %v2098_v23 = vld [vmem:[%s2161_s4] ss:$0 sm:$0xff] }
  0x38   : > { %645 = vmatmul.mubr.bf16.gmra.mxu0 %v1799_v25  ;;  %1052 = vmatmul.mubr.bf16.gmra.mxu1 %v1800_v26 }
  0x39   : > { %1527 = vmatprep.mubr.msk.bf16.mxu0 %vm555_vm0, %v1801_v27  ;;  %1584 = vmatprep.mubr.msk.bf16.mxu1 %vm555_vm0, %v1803_v28 }
  0x40   : > { %653 = vmatmul.mubr.bf16.gmra.mxu0 %v1805_v29  ;;  %1060 = vmatmul.mubr.bf16.gmra.mxu1 %v1806_v30 }
  0x41   : > { %1528 = vmatprep.mubr.msk.bf16.mxu0 %vm555_vm0, %v1807_v31  ;;  %1585 = vmatprep.mubr.msk.bf16.mxu1 %vm555_vm0, %v1809_v32 }
  0x48   : > { %661 = vmatmul.mubr.bf16.gmra.mxu0 %v1811_v33  ;;  %1068 = vmatmul.mubr.bf16.gmra.mxu1 %v1812_v34 }
  0x49   : > { %1529 = vmatprep.mubr.msk.bf16.mxu0 %vm555_vm0, %v1813_v35  ;;  %1586 = vmatprep.mubr.msk.bf16.mxu1 %vm555_vm0, %v1815_v36 }
  0x50   : > { %669 = vmatmul.mubr.bf16.gmra.mxu0 %v1817_v37  ;;  %1076 = vmatmul.mubr.bf16.gmra.mxu1 %v1818_v38 }
  0x51   : > { %1530 = vmatprep.mubr.msk.bf16.mxu0 %vm555_vm0, %v1819_v39  ;;  %1587 = vmatprep.mubr.msk.bf16.mxu1 %vm555_vm0, %v1821_v40 }
  0x58   : > { %677 = vmatmul.mubr.bf16.gmra.mxu0 %v1823_v41  ;;  %1084 = vmatmul.mubr.bf16.gmra.mxu1 %v1824_v42 }
  0x59   : > { %1531 = vmatprep.mubr.msk.bf16.mxu0 %vm555_vm0, %v1825_v43  ;;  %1588 = vmatprep.mubr.msk.bf16.mxu1 %vm555_vm0, %v1827_v44 }
  0x60   : > { %685 = vmatmul.mubr.bf16.gmra.mxu0 %v1829_v45  ;;  %1092 = vmatmul.mubr.bf16.gmra.mxu1 %v1830_v46 }
  0x61   : > { %1532 = vmatprep.mubr.msk.bf16.mxu0 %vm555_vm0, %v1831_v47  ;;  %1589 = vmatprep.mubr.msk.bf16.mxu1 %vm555_vm0, %v1833_v48 }
  0x68   : > { %693 = vmatmul.mubr.bf16.gmra.mxu0 %v1835_v49  ;;  %1100 = vmatmul.mubr.bf16.gmra.mxu1 %v1836_v50 }
  0x69   : > { %1533 = vmatprep.mubr.msk.bf16.mxu0 %vm555_vm0, %v1837_v51  ;;  %1590 = vmatprep.mubr.msk.bf16.mxu1 %vm555_vm0, %v1839_v52 }
  0x70   : > { %701 = vmatmul.mubr.bf16.gmra.mxu0 %v1841_v53  ;;  %1108 = vmatmul.mubr.bf16.gmra.mxu1 %v1842_v54 }
  0x71   : > { %1534 = vmatprep.mubr.msk.bf16.mxu0 %vm555_vm0, %v1843_v55  ;;  %1591 = vmatprep.mubr.msk.bf16.mxu1 %vm555_vm0, %v1845_v56 }
  0x78   : > { %709 = vmatmul.mubr.bf16.gmra.mxu0 %v1847_v57  ;;  %1116 = vmatmul.mubr.bf16.gmra.mxu1 %v1848_v58 }
  0x79   : > { %1535 = vmatprep.mubr.msk.bf16.mxu0 %vm555_vm0, %v1849_v59  ;;  %1592 = vmatprep.mubr.msk.bf16.mxu1 %vm555_vm0, %v1851_v60 }
  0x80   : > { %717 = vmatmul.mubr.bf16.gmra.mxu0 %v1853_v61  ;;  %1124 = vmatmul.mubr.bf16.gmra.mxu1 %v1854_v62 }
  0x81   : > { %1536 = vmatprep.mubr.msk.bf16.mxu0 %vm555_vm0, %v1855_v63  ;;  %1593 = vmatprep.mubr.msk.bf16.mxu1 %vm555_vm0, %v1857_v0 }
  0x88   : > { %725 = vmatmul.mubr.bf16.gmra.mxu0 %v1859_v1  ;;  %1132 = vmatmul.mubr.bf16.gmra.mxu1 %v1860_v2 }
  0x89   : > { %1537 = vmatprep.mubr.msk.bf16.mxu0 %vm555_vm0, %v1861_v3  ;;  %1594 = vmatprep.mubr.msk.bf16.mxu1 %vm555_vm0, %v1863_v4 }
  0x90   : > { %733 = vmatmul.mubr.bf16.gmra.mxu0 %v1865_v5  ;;  %1140 = vmatmul.mubr.bf16.gmra.mxu1 %v1866_v6 }
  0x91   : > { %1538 = vmatprep.mubr.msk.bf16.mxu0 %vm555_vm0, %v1867_v7  ;;  %1595 = vmatprep.mubr.msk.bf16.mxu1 %vm555_vm0, %v1869_v8 }
  0x98   : > { %741 = vmatmul.mubr.bf16.gmra.mxu0 %v1871_v9  ;;  %1148 = vmatmul.mubr.bf16.gmra.mxu1 %v1872_v10 }
  0x99   : > { %1539 = vmatprep.mubr.msk.bf16.mxu0 %vm555_vm0, %v1873_v11  ;;  %1596 = vmatprep.mubr.msk.bf16.mxu1 %vm555_vm0, %v1875_v12 }
  0xa0   : > { %749 = vmatmul.mubr.bf16.gmra.mxu0 %v1877_v13  ;;  %1156 = vmatmul.mubr.bf16.gmra.mxu1 %v1878_v14 }
  0xa1   : > { %1540 = vmatprep.mubr.msk.bf16.mxu0 %vm555_vm0, %v1879_v15  ;;  %1597 = vmatprep.mubr.msk.bf16.mxu1 %vm555_vm0, %v1881_v16 }
  0xa8   : > { %757 = vmatmul.mubr.bf16.gmra.mxu0 %v1883_v17  ;;  %1164 = vmatmul.mubr.bf16.gmra.mxu1 %v1884_v18 }
  0xf0   : > { %v638_v19 = vpop.f32.mrf.mxu0  ;;  %v1045_v20 = vpop.f32.mrf.mxu1 }
  0xf1   : > { %v1046_v21 = vadd.f32 %v1045_v20, %v638_v19 }
  0xf2   : > { %v640_v22 = vpop.f32.mrf.mxu0  ;;  %v1047_v24 = vpop.f32.mrf.mxu1 }
  0xf3   : > { %v1179_v27 = vadd.f32 %v2098_v23, %v1046_v21 }
  0xf4   : > { %v641_v25 = vpop.f32.mrf.mxu0  ;;  %v1048_v26 = vpop.f32.mrf.mxu1 }
  0xf5   : > { %v1049_v28 = vadd.f32 %v1048_v26, %v641_v25  ;;  %v1211_v34 = vmax.f32 %v1179_v27, 0.0 }
  0xf6   : > { %v643_v29 = vpop.f32.mrf.mxu0  ;;  %v1050_v30 = vpop.f32.mrf.mxu1 }
  0xf7   : > { %v1180_v31 = vadd.f32 %v2098_v23, %v1049_v28 }
  0xf8   : > { %v646_v32 = vpop.f32.mrf.mxu0  ;;  %v1053_v33 = vpop.f32.mrf.mxu1 }
  0xf9   : > { %v1212_v35 = vmax.f32 %v1180_v31, 0.0  ;;  %v1054_v36 = vadd.f32 %v1053_v33, %v646_v32 }
  0xfa   : > { %v648_v37 = vpop.f32.mrf.mxu0  ;;  %v1055_v38 = vpop.f32.mrf.mxu1 }
  0xfb   : > { %v1670_v39 = vpack.c.bf16 %v1212_v35, %v1211_v34  ;;  %v1181_v42 = vadd.f32 %v2098_v23, %v1054_v36 }
  0xfc   : > { %v649_v40 = vpop.f32.mrf.mxu0  ;;  %v1056_v41 = vpop.f32.mrf.mxu1 }
  0xfd   : > { %1671 = vst [vmem:[%s2106_s22] sm:$0xff] %v1670_v39   ;;  %v1057_v43 = vadd.f32 %v1056_v41, %v649_v40  ;;  %v1213_v49 = vmax.f32 %v1181_v42, 0.0 }
  0xfe   : > { %v651_v44 = vpop.f32.mrf.mxu0  ;;  %v1058_v45 = vpop.f32.mrf.mxu1 }
  0xff   : > { %v1182_v46 = vadd.f32 %v2098_v23, %v1057_v43 }
 0x100   : > { %v654_v47 = vpop.f32.mrf.mxu0  ;;  %v1061_v48 = vpop.f32.mrf.mxu1 }
 0x101   : > { %v1214_v50 = vmax.f32 %v1182_v46, 0.0  ;;  %v1062_v51 = vadd.f32 %v1061_v48, %v654_v47 }
 0x102   : > { %v656_v52 = vpop.f32.mrf.mxu0  ;;  %v1063_v53 = vpop.f32.mrf.mxu1 }
 0x103   : > { %v1675_v54 = vpack.c.bf16 %v1214_v50, %v1213_v49  ;;  %v1183_v57 = vadd.f32 %v2098_v23, %v1062_v51 }
 0x104   : > { %v657_v55 = vpop.f32.mrf.mxu0  ;;  %v1064_v56 = vpop.f32.mrf.mxu1 }
 0x105   : > { %1747 = vst [vmem:[%s2106_s22 + $0x8] sm:$0xff] %v1675_v54   ;;  %v1065_v58 = vadd.f32 %v1064_v56, %v657_v55  ;;  %v1215_v0 = vmax.f32 %v1183_v57, 0.0 }
 0x106   : > { %v659_v59 = vpop.f32.mrf.mxu0  ;;  %v1066_v60 = vpop.f32.mrf.mxu1 }
 0x107   : > { %v1184_v61 = vadd.f32 %v2098_v23, %v1065_v58 }
 0x108   : > { %v662_v62 = vpop.f32.mrf.mxu0  ;;  %v1069_v63 = vpop.f32.mrf.mxu1 }
 0x109   : > { %v1216_v1 = vmax.f32 %v1184_v61, 0.0  ;;  %v1070_v2 = vadd.f32 %v1069_v63, %v662_v62 }
 0x10a   : > { %v664_v3 = vpop.f32.mrf.mxu0  ;;  %v1071_v4 = vpop.f32.mrf.mxu1 }
 0x10b   : > { %v1680_v5 = vpack.c.bf16 %v1216_v1, %v1215_v0  ;;  %v1185_v8 = vadd.f32 %v2098_v23, %v1070_v2 }
 0x10c   : > { %v665_v6 = vpop.f32.mrf.mxu0  ;;  %v1072_v7 = vpop.f32.mrf.mxu1 }
 0x10d   : > { %1748 = vst [vmem:[%s2106_s22 + $0x10] sm:$0xff] %v1680_v5   ;;  %v1073_v9 = vadd.f32 %v1072_v7, %v665_v6  ;;  %v1217_v15 = vmax.f32 %v1185_v8, 0.0 }
 0x10e   : > { %v667_v10 = vpop.f32.mrf.mxu0  ;;  %v1074_v11 = vpop.f32.mrf.mxu1 }
 0x10f   : > { %v1186_v12 = vadd.f32 %v2098_v23, %v1073_v9 }
 0x110   : > { %v670_v13 = vpop.f32.mrf.mxu0  ;;  %v1077_v14 = vpop.f32.mrf.mxu1 }
 0x111   : > { %v1218_v16 = vmax.f32 %v1186_v12, 0.0  ;;  %v1078_v17 = vadd.f32 %v1077_v14, %v670_v13 }
 0x112   : > { %v672_v18 = vpop.f32.mrf.mxu0  ;;  %v1079_v19 = vpop.f32.mrf.mxu1 }
 0x113   : > { %v1685_v20 = vpack.c.bf16 %v1218_v16, %v1217_v15  ;;  %v1187_v24 = vadd.f32 %v2098_v23, %v1078_v17 }
 0x114   : > { %v673_v21 = vpop.f32.mrf.mxu0  ;;  %v1080_v22 = vpop.f32.mrf.mxu1 }
 0x115   : > { %1749 = vst [vmem:[%s2106_s22 + $0x18] sm:$0xff] %v1685_v20   ;;  %v1081_v25 = vadd.f32 %v1080_v22, %v673_v21  ;;  %v1219_v31 = vmax.f32 %v1187_v24, 0.0 }
 0x116   : > { %v675_v26 = vpop.f32.mrf.mxu0  ;;  %v1082_v27 = vpop.f32.mrf.mxu1 }
 0x117   : > { %v1188_v28 = vadd.f32 %v2098_v23, %v1081_v25 }
 0x118   : > { %v678_v29 = vpop.f32.mrf.mxu0  ;;  %v1085_v30 = vpop.f32.mrf.mxu1 }
 0x119   : > { %v1220_v32 = vmax.f32 %v1188_v28, 0.0  ;;  %v1086_v33 = vadd.f32 %v1085_v30, %v678_v29 }
 0x11a   : > { %v680_v34 = vpop.f32.mrf.mxu0  ;;  %v1087_v35 = vpop.f32.mrf.mxu1 }
 0x11b   : > { %v1690_v36 = vpack.c.bf16 %v1220_v32, %v1219_v31  ;;  %v1189_v39 = vadd.f32 %v2098_v23, %v1086_v33 }
 0x11c   : > { %v681_v37 = vpop.f32.mrf.mxu0  ;;  %v1088_v38 = vpop.f32.mrf.mxu1 }
 0x11d   : > { %1750 = vst [vmem:[%s2106_s22 + $0x20] sm:$0xff] %v1690_v36   ;;  %v1089_v40 = vadd.f32 %v1088_v38, %v681_v37  ;;  %v1221_v46 = vmax.f32 %v1189_v39, 0.0 }
 0x11e   : > { %v683_v41 = vpop.f32.mrf.mxu0  ;;  %v1090_v42 = vpop.f32.mrf.mxu1 }
 0x11f   : > { %v1190_v43 = vadd.f32 %v2098_v23, %v1089_v40 }
 0x120   : > { %v686_v44 = vpop.f32.mrf.mxu0  ;;  %v1093_v45 = vpop.f32.mrf.mxu1 }
 0x121   : > { %v1222_v47 = vmax.f32 %v1190_v43, 0.0  ;;  %v1094_v48 = vadd.f32 %v1093_v45, %v686_v44 }
 0x122   : > { %v688_v49 = vpop.f32.mrf.mxu0  ;;  %v1095_v50 = vpop.f32.mrf.mxu1 }
 0x123   : > { %v1695_v51 = vpack.c.bf16 %v1222_v47, %v1221_v46  ;;  %v1191_v54 = vadd.f32 %v2098_v23, %v1094_v48 }
 0x124   : > { %v689_v52 = vpop.f32.mrf.mxu0  ;;  %v1096_v53 = vpop.f32.mrf.mxu1 }
 0x125   : > { %1751 = vst [vmem:[%s2106_s22 + $0x28] sm:$0xff] %v1695_v51   ;;  %v1097_v55 = vadd.f32 %v1096_v53, %v689_v52  ;;  %v1223_v61 = vmax.f32 %v1191_v54, 0.0 }
 0x126   : > { %v691_v56 = vpop.f32.mrf.mxu0  ;;  %v1098_v57 = vpop.f32.mrf.mxu1 }
 0x127   : > { %v1192_v58 = vadd.f32 %v2098_v23, %v1097_v55 }
 0x128   : > { %v694_v59 = vpop.f32.mrf.mxu0  ;;  %v1101_v60 = vpop.f32.mrf.mxu1 }
 0x129   : > { %v1224_v62 = vmax.f32 %v1192_v58, 0.0  ;;  %v1102_v63 = vadd.f32 %v1101_v60, %v694_v59 }
 0x12a   : > { %v696_v0 = vpop.f32.mrf.mxu0  ;;  %v1103_v1 = vpop.f32.mrf.mxu1 }
 0x12b   : > { %v1700_v2 = vpack.c.bf16 %v1224_v62, %v1223_v61  ;;  %v1193_v5 = vadd.f32 %v2098_v23, %v1102_v63 }
 0x12c   : > { %v697_v3 = vpop.f32.mrf.mxu0  ;;  %v1104_v4 = vpop.f32.mrf.mxu1 }
 0x12d   : > { %1752 = vst [vmem:[%s2106_s22 + $0x30] sm:$0xff] %v1700_v2   ;;  %v1105_v6 = vadd.f32 %v1104_v4, %v697_v3  ;;  %v1225_v12 = vmax.f32 %v1193_v5, 0.0 }
 0x12e   : > { %v699_v7 = vpop.f32.mrf.mxu0  ;;  %v1106_v8 = vpop.f32.mrf.mxu1 }
 0x12f   : > { %v1194_v9 = vadd.f32 %v2098_v23, %v1105_v6 }
 0x130   : > { %v702_v10 = vpop.f32.mrf.mxu0  ;;  %v1109_v11 = vpop.f32.mrf.mxu1 }
 0x131   : > { %v1226_v13 = vmax.f32 %v1194_v9, 0.0  ;;  %v1110_v14 = vadd.f32 %v1109_v11, %v702_v10 }
 0x132   : > { %v704_v15 = vpop.f32.mrf.mxu0  ;;  %v1111_v16 = vpop.f32.mrf.mxu1 }
 0x133   : > { %v1705_v17 = vpack.c.bf16 %v1226_v13, %v1225_v12  ;;  %v1195_v20 = vadd.f32 %v2098_v23, %v1110_v14 }
 0x134   : > { %v705_v18 = vpop.f32.mrf.mxu0  ;;  %v1112_v19 = vpop.f32.mrf.mxu1 }
 0x135   : > { %1753 = vst [vmem:[%s2106_s22 + $0x38] sm:$0xff] %v1705_v17   ;;  %v1113_v21 = vadd.f32 %v1112_v19, %v705_v18  ;;  %v1227_v28 = vmax.f32 %v1195_v20, 0.0 }
 0x136   : > { %v707_v22 = vpop.f32.mrf.mxu0  ;;  %v1114_v24 = vpop.f32.mrf.mxu1 }
 0x137   : > { %v1196_v25 = vadd.f32 %v2098_v23, %v1113_v21 }
 0x138   : > { %v710_v26 = vpop.f32.mrf.mxu0  ;;  %v1117_v27 = vpop.f32.mrf.mxu1 }
 0x139   : > { %v1228_v29 = vmax.f32 %v1196_v25, 0.0  ;;  %v1118_v30 = vadd.f32 %v1117_v27, %v710_v26 }
 0x13a   : > { %v712_v31 = vpop.f32.mrf.mxu0  ;;  %v1119_v32 = vpop.f32.mrf.mxu1 }
 0x13b   : > { %v1710_v33 = vpack.c.bf16 %v1228_v29, %v1227_v28  ;;  %v1197_v36 = vadd.f32 %v2098_v23, %v1118_v30 }
 0x13c   : > { %v713_v34 = vpop.f32.mrf.mxu0  ;;  %v1120_v35 = vpop.f32.mrf.mxu1 }
 0x13d   : > { %1754 = vst [vmem:[%s2106_s22 + $0x40] sm:$0xff] %v1710_v33   ;;  %v1121_v37 = vadd.f32 %v1120_v35, %v713_v34  ;;  %v1229_v43 = vmax.f32 %v1197_v36, 0.0 }
 0x13e   : > { %v715_v38 = vpop.f32.mrf.mxu0  ;;  %v1122_v39 = vpop.f32.mrf.mxu1 }
 0x13f   : > { %v1198_v40 = vadd.f32 %v2098_v23, %v1121_v37 }
 0x140   : > { %v718_v41 = vpop.f32.mrf.mxu0  ;;  %v1125_v42 = vpop.f32.mrf.mxu1 }
 0x141   : > { %v1230_v44 = vmax.f32 %v1198_v40, 0.0  ;;  %v1126_v45 = vadd.f32 %v1125_v42, %v718_v41 }
 0x142   : > { %v720_v46 = vpop.f32.mrf.mxu0  ;;  %v1127_v47 = vpop.f32.mrf.mxu1 }
 0x143   : > { %v1715_v48 = vpack.c.bf16 %v1230_v44, %v1229_v43  ;;  %v1199_v51 = vadd.f32 %v2098_v23, %v1126_v45 }
 0x144   : > { %v721_v49 = vpop.f32.mrf.mxu0  ;;  %v1128_v50 = vpop.f32.mrf.mxu1 }
 0x145   : > { %1755 = vst [vmem:[%s2106_s22 + $0x48] sm:$0xff] %v1715_v48   ;;  %v1129_v52 = vadd.f32 %v1128_v50, %v721_v49  ;;  %v1231_v58 = vmax.f32 %v1199_v51, 0.0 }
 0x146   : > { %v723_v53 = vpop.f32.mrf.mxu0  ;;  %v1130_v54 = vpop.f32.mrf.mxu1 }
 0x147   : > { %v1200_v55 = vadd.f32 %v2098_v23, %v1129_v52 }
 0x148   : > { %v726_v56 = vpop.f32.mrf.mxu0  ;;  %v1133_v57 = vpop.f32.mrf.mxu1 }
 0x149   : > { %v1232_v59 = vmax.f32 %v1200_v55, 0.0  ;;  %v1134_v60 = vadd.f32 %v1133_v57, %v726_v56 }
 0x14a   : > { %v728_v61 = vpop.f32.mrf.mxu0  ;;  %v1135_v62 = vpop.f32.mrf.mxu1 }
 0x14b   : > { %v1720_v63 = vpack.c.bf16 %v1232_v59, %v1231_v58  ;;  %v1201_v2 = vadd.f32 %v2098_v23, %v1134_v60 }
 0x14c   : > { %v729_v0 = vpop.f32.mrf.mxu0  ;;  %v1136_v1 = vpop.f32.mrf.mxu1 }
 0x14d   : > { %1756 = vst [vmem:[%s2106_s22 + $0x50] sm:$0xff] %v1720_v63   ;;  %v1137_v3 = vadd.f32 %v1136_v1, %v729_v0  ;;  %v1233_v9 = vmax.f32 %v1201_v2, 0.0 }
 0x14e   : > { %v731_v4 = vpop.f32.mrf.mxu0  ;;  %v1138_v5 = vpop.f32.mrf.mxu1 }
 0x14f   : > { %v1202_v6 = vadd.f32 %v2098_v23, %v1137_v3 }
 0x150   : > { %v734_v7 = vpop.f32.mrf.mxu0  ;;  %v1141_v8 = vpop.f32.mrf.mxu1 }
 0x151   : > { %v1234_v10 = vmax.f32 %v1202_v6, 0.0  ;;  %v1142_v11 = vadd.f32 %v1141_v8, %v734_v7 }
 0x152   : > { %v736_v12 = vpop.f32.mrf.mxu0  ;;  %v1143_v13 = vpop.f32.mrf.mxu1 }
 0x153   : > { %v1725_v14 = vpack.c.bf16 %v1234_v10, %v1233_v9  ;;  %v1203_v17 = vadd.f32 %v2098_v23, %v1142_v11 }
 0x154   : > { %v737_v15 = vpop.f32.mrf.mxu0  ;;  %v1144_v16 = vpop.f32.mrf.mxu1 }
 0x155   : > { %1757 = vst [vmem:[%s2106_s22 + $0x58] sm:$0xff] %v1725_v14   ;;  %v1145_v18 = vadd.f32 %v1144_v16, %v737_v15  ;;  %v1235_v25 = vmax.f32 %v1203_v17, 0.0 }
 0x156   : > { %v739_v19 = vpop.f32.mrf.mxu0  ;;  %v1146_v20 = vpop.f32.mrf.mxu1 }
 0x157   : > { %v1204_v21 = vadd.f32 %v2098_v23, %v1145_v18 }
 0x158   : > { %v742_v22 = vpop.f32.mrf.mxu0  ;;  %v1149_v24 = vpop.f32.mrf.mxu1 }
 0x159   : > { %v1236_v26 = vmax.f32 %v1204_v21, 0.0  ;;  %v1150_v27 = vadd.f32 %v1149_v24, %v742_v22 }
 0x15a   : > { %v744_v28 = vpop.f32.mrf.mxu0  ;;  %v1151_v29 = vpop.f32.mrf.mxu1 }
 0x15b   : > { %v1730_v30 = vpack.c.bf16 %v1236_v26, %v1235_v25  ;;  %v1205_v33 = vadd.f32 %v2098_v23, %v1150_v27 }
 0x15c   : > { %v745_v31 = vpop.f32.mrf.mxu0  ;;  %v1152_v32 = vpop.f32.mrf.mxu1 }
 0x15d   : > { %1758 = vst [vmem:[%s2106_s22 + $0x60] sm:$0xff] %v1730_v30   ;;  %v1153_v34 = vadd.f32 %v1152_v32, %v745_v31  ;;  %v1237_v40 = vmax.f32 %v1205_v33, 0.0 }
 0x15e   : > { %v747_v35 = vpop.f32.mrf.mxu0  ;;  %v1154_v36 = vpop.f32.mrf.mxu1 }
 0x15f   : > { %v1206_v37 = vadd.f32 %v2098_v23, %v1153_v34 }
 0x160   : > { %v750_v38 = vpop.f32.mrf.mxu0  ;;  %v1157_v39 = vpop.f32.mrf.mxu1 }
 0x161   : > { %v1238_v41 = vmax.f32 %v1206_v37, 0.0  ;;  %v1158_v42 = vadd.f32 %v1157_v39, %v750_v38 }
 0x162   : > { %v752_v43 = vpop.f32.mrf.mxu0  ;;  %v1159_v44 = vpop.f32.mrf.mxu1 }
 0x163   : > { %v1735_v45 = vpack.c.bf16 %v1238_v41, %v1237_v40  ;;  %v1207_v48 = vadd.f32 %v2098_v23, %v1158_v42 }
 0x164   : > { %v753_v46 = vpop.f32.mrf.mxu0  ;;  %v1160_v47 = vpop.f32.mrf.mxu1 }
 0x165   : > { %1759 = vst [vmem:[%s2106_s22 + $0x68] sm:$0xff] %v1735_v45   ;;  %v1161_v49 = vadd.f32 %v1160_v47, %v753_v46  ;;  %v1239_v55 = vmax.f32 %v1207_v48, 0.0 }
 0x166   : > { %v755_v50 = vpop.f32.mrf.mxu0  ;;  %v1162_v51 = vpop.f32.mrf.mxu1 }
 0x167   : > { %v1208_v52 = vadd.f32 %v2098_v23, %v1161_v49 }
 0x168   : > { %v758_v53 = vpop.f32.mrf.mxu0  ;;  %v1165_v54 = vpop.f32.mrf.mxu1 }
 0x169   : > { %v1240_v56 = vmax.f32 %v1208_v52, 0.0  ;;  %v1166_v57 = vadd.f32 %v1165_v54, %v758_v53 }
 0x16a   : > { %v760_v58 = vpop.f32.mrf.mxu0  ;;  %v1167_v59 = vpop.f32.mrf.mxu1 }
 0x16b   : > { %v1740_v60 = vpack.c.bf16 %v1240_v56, %v1239_v55  ;;  %v1209_v63 = vadd.f32 %v2098_v23, %v1166_v57 }
 0x16c   : > { %v761_v61 = vpop.f32.mrf.mxu0  ;;  %v1168_v62 = vpop.f32.mrf.mxu1 }
 0x16d   : > { %1760 = vst [vmem:[%s2106_s22 + $0x70] sm:$0xff] %v1740_v60   ;;  %v1169_v0 = vadd.f32 %v1168_v62, %v761_v61  ;;  %v1241_v4 = vmax.f32 %v1209_v63, 0.0 }
 0x16e   : > { %v763_v1 = vpop.f32.mrf.mxu0  ;;  %v1170_v2 = vpop.f32.mrf.mxu1 }
 0x16f   : > { %v1210_v3 = vadd.f32 %v2098_v23, %v1169_v0 }
 0x171   : > { %v1242_v5 = vmax.f32 %v1210_v3, 0.0 }
 0x173   : > { %v1745_v6 = vpack.c.bf16 %v1242_v5, %v1241_v4 }
 0x175   : > { %1761 = vst [vmem:[%s2106_s22 + $0x78] sm:$0xff] %v1745_v6  }
 0x176 PF: > { %s15_s18 = sadd.s32 1, %s1891_s18  }
 0x177   : > { %p12_p4 = scmp.ge.s32.totalorder %s15_s18, 4  }
 0x179   :  { %14 = sbr.rel (!%p12_p4) target bundleno = 1 (0x1), region = 73 }

// kernel: segment_net_forward.27
= control target key start
LH: loop header
LB: loop body
LE: loop exit
PB: predicated region body
PF: predicated region fallthrough
CT: control target
= control target key end

     0   :  { %s1234_s12 = smov 0   ;;  %s1387_s0 = inlined_call_operand.vmem [shape: bf16[512,144], index: 0, kind: input, shape index: {}]   ;;  %s1388_s1 = inlined_call_operand.vmem [shape: bf16[144,128], index: 1, kind: input, shape index: {}]   ;;  %s1389_s2 = inlined_call_operand.vmem [shape: f32[1,128], index: 2, kind: input, shape index: {}]   ;;  %s1390_s3 = inlined_call_operand.vmem [shape: bf16[512,128], index: 3, kind: output, shape index: {}]  }
   0x1 LB: > { %s891_s13 = sadd.s32 4294967295, %s1211_s12   ;;  %p895_p0 = scmp.ge.s32.totalorder %s1211_s12, 1  ;;  %s1211_s12 = sphi %s1234_s12, %s13_s12  }
   0x2   : > { %p139_p1 = scmp.lt.s32.totalorder %s1211_s12, 3 }
   0x4   : > { %p140_p2 = pnand %p895_p0, %p139_p1 }
   0x5   : > { %s896_s16 = sshll.u32 (!%p140_p2), %s891_s13, 5 }
   0x6   : > { %143 = sbr.rel (%p140_p2) target bundleno = 308 (0x134), region = 32  ;;  %p165_p3 = scmp.lt.s32.totalorder (!%p140_p2), %s896_s16, 63 }
   0xb   : > { %v1148_v0 = vld [vmem:[%s1388_s1 + $0x38] sm:$0xff]   ;;  %v1213_v1 = vmov 0   ;;  %v1149_v2 = vld [vmem:[%s1388_s1 + $0x30] sm:$0xff]   ;;  %s1392_s16 = smov (!%p165_p3, %s896_s16), 63  ;;  %v1150_v3 = vld [vmem:[%s1388_s1 + $0x28] sm:$0xff]   ;;  %vm433_vm0 = vcmask 130048  }
   0xc   : > { %482 = vmatprep.subr.bf16.mxu0 %v1213_v1  ;;  %1121 = vmatprep.subr.bf16.mxu1 %v1213_v1  ;;  %s993_s21 = sshll.u32 %s1392_s16, 3  ;;  %v1151_v4 = vld [vmem:[%s1388_s1 + $0x20] sm:$0xff]   ;;  %v1152_v7 = vld [vmem:[%s1388_s1 + $0x18] sm:$0xff]   ;;  %v1153_v8 = vld [vmem:[%s1388_s1 + $0x10] sm:$0xff]   ;;  %s900_s13 = sshll.u32 %s1392_s16, 2 }
   0xd   : > { %483 = vmatpush1.bf16.msra.mxu0 %v1148_v0  ;;  %1130 = vmatpush1.bf16.msra.mxu1 %v1148_v0  ;;  %s1257_s24 = scalar_lea.vmem %s1387_s0, %s993_s21  ;;  %v1154_v9 = vld [vmem:[%s1388_s1 + $0x8] sm:$0xff]   ;;  %v1155_v10 = vld [vmem:[%s1388_s1] sm:$0xff]   ;;  %s1338_s17 = scalar_lea.vmem %s1390_s3, %s900_s13 }
   0xe   : > { %484 = vmatprep.subr.bf16.mxu0 %v1213_v1  ;;  %1122 = vmatprep.subr.bf16.mxu1 %v1213_v1  ;;  %v1159_v5 = vld [vmem:[%s1257_s24 + $0x4] ss:$8 sps:$4 sm:$0xff]   ;;  %v1157_v12 = vld [vmem:[%s1257_s24] ss:$8 sps:$4 sm:$0xff]   ;;  %v1163_v14 = vld [vmem:[%s1257_s24 + $0x14] ss:$8 sps:$4 sm:$0xff]  }
   0xf   : > { %v1162_v6 = vld [vmem:[%s1257_s24 + $0x84] ss:$8 sps:$4 sm:$0xff]   ;;  %943 = vmatprep.mubr.msk.bf16.mxu0 %vm433_vm0, %v1159_v5  ;;  %v1160_v13 = vld [vmem:[%s1257_s24 + $0x80] ss:$8 sps:$4 sm:$0xff]   ;;  %v1165_v15 = vld [vmem:[%s1257_s24 + $0x94] ss:$8 sps:$4 sm:$0xff]  }
  0x10   : > { %951 = vmatprep.mubr.msk.bf16.mxu1 %vm433_vm0, %v1162_v6  ;;  %v1156_v11 = vld [vmem:[%s1388_s1 + $0x40] sm:$0xff]   ;;  %v1167_v16 = vld [vmem:[%s1257_s24 + $0x10] ss:$8 sps:$4 sm:$0xff]   ;;  %v1175_v22 = vld [vmem:[%s1257_s24 + $0x34] ss:$8 sps:$4 sm:$0xff]  }
  0x11   : > { %485 = vmatpush1.bf16.msra.mxu0 %v1149_v2  ;;  %1131 = vmatpush1.bf16.msra.mxu1 %v1149_v2  ;;  %v1168_v17 = vld [vmem:[%s1257_s24 + $0x90] ss:$8 sps:$4 sm:$0xff]   ;;  %v1169_v18 = vld [vmem:[%s1257_s24 + $0x24] ss:$8 sps:$4 sm:$0xff]   ;;  %v1173_v20 = vld [vmem:[%s1257_s24 + $0x20] ss:$8 sps:$4 sm:$0xff]  }
  0x12   : > { %486 = vmatprep.subr.bf16.mxu0 %v1213_v1  ;;  %1123 = vmatprep.subr.bf16.mxu1 %v1213_v1  ;;  %v1171_v19 = vld [vmem:[%s1257_s24 + $0xa4] ss:$8 sps:$4 sm:$0xff]   ;;  %v1174_v21 = vld [vmem:[%s1257_s24 + $0xa0] ss:$8 sps:$4 sm:$0xff]   ;;  %v1177_v23 = vld [vmem:[%s1257_s24 + $0xb4] ss:$8 sps:$4 sm:$0xff]  }
  0x13   : > { %v1179_v24 = vld [vmem:[%s1257_s24 + $0x30] ss:$8 sps:$4 sm:$0xff]   ;;  %v1181_v26 = vld [vmem:[%s1257_s24 + $0x44] ss:$8 sps:$4 sm:$0xff]   ;;  %v1185_v28 = vld [vmem:[%s1257_s24 + $0x40] ss:$8 sps:$4 sm:$0xff]  }
  0x14   : > { %v1180_v25 = vld [vmem:[%s1257_s24 + $0xb0] ss:$8 sps:$4 sm:$0xff]   ;;  %v1183_v27 = vld [vmem:[%s1257_s24 + $0xc4] ss:$8 sps:$4 sm:$0xff]   ;;  %v1186_v29 = vld [vmem:[%s1257_s24 + $0xc0] ss:$8 sps:$4 sm:$0xff]  }
  0x15   : > { %487 = vmatpush1.bf16.msra.mxu0 %v1150_v3  ;;  %1132 = vmatpush1.bf16.msra.mxu1 %v1150_v3  ;;  %v1187_v30 = vld [vmem:[%s1257_s24 + $0x54] ss:$8 sps:$4 sm:$0xff]   ;;  %v1191_v32 = vld [vmem:[%s1257_s24 + $0x50] ss:$8 sps:$4 sm:$0xff]   ;;  %v1193_v34 = vld [vmem:[%s1257_s24 + $0x64] ss:$8 sps:$4 sm:$0xff]  }
  0x16   : > { %488 = vmatprep.subr.bf16.mxu0 %v1213_v1  ;;  %1124 = vmatprep.subr.bf16.mxu1 %v1213_v1  ;;  %v1189_v31 = vld [vmem:[%s1257_s24 + $0xd4] ss:$8 sps:$4 sm:$0xff]   ;;  %v1192_v33 = vld [vmem:[%s1257_s24 + $0xd0] ss:$8 sps:$4 sm:$0xff]   ;;  %v1195_v35 = vld [vmem:[%s1257_s24 + $0xe4] ss:$8 sps:$4 sm:$0xff]  }
  0x17   : > { %v1197_v36 = vld [vmem:[%s1257_s24 + $0x60] ss:$8 sps:$4 sm:$0xff]   ;;  %v1199_v38 = vld [vmem:[%s1257_s24 + $0x74] ss:$8 sps:$4 sm:$0xff]   ;;  %v1203_v40 = vld [vmem:[%s1257_s24 + $0x70] ss:$8 sps:$4 sm:$0xff]  }
  0x18   : > { %v1198_v37 = vld [vmem:[%s1257_s24 + $0xe0] ss:$8 sps:$4 sm:$0xff]   ;;  %v1201_v39 = vld [vmem:[%s1257_s24 + $0xf4] ss:$8 sps:$4 sm:$0xff]   ;;  %v1204_v41 = vld [vmem:[%s1257_s24 + $0xf0] ss:$8 sps:$4 sm:$0xff]  }
  0x19   : > { %489 = vmatpush1.bf16.msra.mxu0 %v1151_v4  ;;  %1133 = vmatpush1.bf16.msra.mxu1 %v1151_v4  ;;  %v1328_v42 = vld [vmem:[%s1389_s2] ss:$0 sm:$0xff] }
  0x1a   : > { %490 = vmatprep.subr.bf16.mxu0 %v1213_v1  ;;  %1125 = vmatprep.subr.bf16.mxu1 %v1213_v1 }
  0x1d   : > { %491 = vmatpush1.bf16.msra.mxu0 %v1152_v7  ;;  %1134 = vmatpush1.bf16.msra.mxu1 %v1152_v7 }
  0x1e   : > { %492 = vmatprep.subr.bf16.mxu0 %v1213_v1  ;;  %1126 = vmatprep.subr.bf16.mxu1 %v1213_v1 }
  0x21   : > { %493 = vmatpush1.bf16.msra.mxu0 %v1153_v8  ;;  %1135 = vmatpush1.bf16.msra.mxu1 %v1153_v8 }
  0x22   : > { %494 = vmatprep.subr.bf16.mxu0 %v1213_v1  ;;  %1127 = vmatprep.subr.bf16.mxu1 %v1213_v1 }
  0x25   : > { %495 = vmatpush1.bf16.msra.mxu0 %v1154_v9  ;;  %1136 = vmatpush1.bf16.msra.mxu1 %v1154_v9 }
  0x26   : > { %496 = vmatprep.subr.bf16.mxu0 %v1213_v1  ;;  %1128 = vmatprep.subr.bf16.mxu1 %v1213_v1 }
  0x29   : > { %497 = vmatpush1.bf16.msra.mxu0 %v1155_v10  ;;  %1137 = vmatpush1.bf16.msra.mxu1 %v1155_v10 }
  0x2a   : > { %512 = vmatprep.subr.bf16.mxu0 %v1213_v1  ;;  %1129 = vmatprep.subr.bf16.mxu1 %v1213_v1 }
  0x2d   : > { %513 = vmatpush2.bf16.msra.mxu0 %v1156_v11  ;;  %1138 = vmatpush2.bf16.msra.mxu1 %v1156_v11 }
  0x30   : > { %515 = vmatmul.mubr.bf16.vlgmr.msra.gmra.mxu0 %v1157_v12  ;;  %579 = vmatmul.mubr.bf16.vlgmr.msra.gmra.mxu1 %v1160_v13 }
  0x31   : > { %944 = vmatprep.mubr.msk.bf16.mxu0 %vm433_vm0, %v1163_v14  ;;  %952 = vmatprep.mubr.msk.bf16.mxu1 %vm433_vm0, %v1165_v15 }
  0x38   : > { %523 = vmatmul.mubr.bf16.gmra.mxu0 %v1167_v16  ;;  %587 = vmatmul.mubr.bf16.gmra.mxu1 %v1168_v17 }
  0x39   : > { %945 = vmatprep.mubr.msk.bf16.mxu0 %vm433_vm0, %v1169_v18  ;;  %953 = vmatprep.mubr.msk.bf16.mxu1 %vm433_vm0, %v1171_v19 }
  0x40   : > { %531 = vmatmul.mubr.bf16.gmra.mxu0 %v1173_v20  ;;  %595 = vmatmul.mubr.bf16.gmra.mxu1 %v1174_v21 }
  0x41   : > { %946 = vmatprep.mubr.msk.bf16.mxu0 %vm433_vm0, %v1175_v22  ;;  %954 = vmatprep.mubr.msk.bf16.mxu1 %vm433_vm0, %v1177_v23 }
  0x48   : > { %539 = vmatmul.mubr.bf16.gmra.mxu0 %v1179_v24  ;;  %603 = vmatmul.mubr.bf16.gmra.mxu1 %v1180_v25 }
  0x49   : > { %947 = vmatprep.mubr.msk.bf16.mxu0 %vm433_vm0, %v1181_v26  ;;  %955 = vmatprep.mubr.msk.bf16.mxu1 %vm433_vm0, %v1183_v27 }
  0x50   : > { %547 = vmatmul.mubr.bf16.gmra.mxu0 %v1185_v28  ;;  %611 = vmatmul.mubr.bf16.gmra.mxu1 %v1186_v29 }
  0x51   : > { %948 = vmatprep.mubr.msk.bf16.mxu0 %vm433_vm0, %v1187_v30  ;;  %956 = vmatprep.mubr.msk.bf16.mxu1 %vm433_vm0, %v1189_v31 }
  0x58   : > { %555 = vmatmul.mubr.bf16.gmra.mxu0 %v1191_v32  ;;  %619 = vmatmul.mubr.bf16.gmra.mxu1 %v1192_v33 }
  0x59   : > { %949 = vmatprep.mubr.msk.bf16.mxu0 %vm433_vm0, %v1193_v34  ;;  %957 = vmatprep.mubr.msk.bf16.mxu1 %vm433_vm0, %v1195_v35 }
  0x60   : > { %563 = vmatmul.mubr.bf16.gmra.mxu0 %v1197_v36  ;;  %627 = vmatmul.mubr.bf16.gmra.mxu1 %v1198_v37 }
  0x61   : > { %950 = vmatprep.mubr.msk.bf16.mxu0 %vm433_vm0, %v1199_v38  ;;  %958 = vmatprep.mubr.msk.bf16.mxu1 %vm433_vm0, %v1201_v39 }
  0x68   : > { %571 = vmatmul.mubr.bf16.gmra.mxu0 %v1203_v40  ;;  %635 = vmatmul.mubr.bf16.gmra.mxu1 %v1204_v41 }
  0xf0   : > { %v516_v43 = vpop.f32.mrf.mxu0  ;;  %v580_v44 = vpop.f32.mrf.mxu1 }
  0xf1   : > { %v517_v47 = vadd.f32 %v1328_v42, %v516_v43  ;;  %v581_v48 = vadd.f32 %v1328_v42, %v580_v44 }
  0xf2   : > { %v518_v45 = vpop.f32.mrf.mxu0  ;;  %v582_v46 = vpop.f32.mrf.mxu1 }
  0xf3   : > { %v643_v55 = vmax.f32 %v517_v47, 0.0  ;;  %v659_v56 = vmax.f32 %v581_v48, 0.0 }
  0xf4   : > { %v519_v49 = vpop.f32.mrf.mxu0  ;;  %v583_v50 = vpop.f32.mrf.mxu1 }
  0xf5   : > { %v520_v51 = vadd.f32 %v1328_v42, %v519_v49  ;;  %v584_v52 = vadd.f32 %v1328_v42, %v583_v50 }
  0xf6   : > { %v521_v53 = vpop.f32.mrf.mxu0  ;;  %v585_v54 = vpop.f32.mrf.mxu1 }
  0xf7   : > { %v644_v57 = vmax.f32 %v520_v51, 0.0  ;;  %v660_v58 = vmax.f32 %v584_v52, 0.0 }
  0xf8   : > { %v524_v59 = vpop.f32.mrf.mxu0  ;;  %v588_v60 = vpop.f32.mrf.mxu1 }
  0xf9   : > { %v1029_v61 = vpack.c.bf16 %v644_v57, %v643_v55  ;;  %v1069_v62 = vpack.c.bf16 %v660_v58, %v659_v56  ;;  %v525_v1 = vadd.f32 %v1328_v42, %v524_v59  ;;  %v589_v2 = vadd.f32 %v1328_v42, %v588_v60 }
  0xfa   : > { %v526_v63 = vpop.f32.mrf.mxu0  ;;  %v590_v0 = vpop.f32.mrf.mxu1 }
  0xfb   : > { %1030 = vst [vmem:[%s1338_s17] sm:$0xff] %v1029_v61   ;;  %1113 = vst [vmem:[%s1338_s17 + $0x40] sm:$0xff] %v1069_v62   ;;  %v645_v9 = vmax.f32 %v525_v1, 0.0  ;;  %v661_v10 = vmax.f32 %v589_v2, 0.0 }
  0xfc   : > { %v527_v3 = vpop.f32.mrf.mxu0  ;;  %v591_v4 = vpop.f32.mrf.mxu1 }
  0xfd   : > { %v528_v5 = vadd.f32 %v1328_v42, %v527_v3  ;;  %v592_v6 = vadd.f32 %v1328_v42, %v591_v4 }
  0xfe   : > { %v529_v7 = vpop.f32.mrf.mxu0  ;;  %v593_v8 = vpop.f32.mrf.mxu1 }
  0xff   : > { %v646_v11 = vmax.f32 %v528_v5, 0.0  ;;  %v662_v12 = vmax.f32 %v592_v6, 0.0 }
 0x100   : > { %v532_v13 = vpop.f32.mrf.mxu0  ;;  %v596_v14 = vpop.f32.mrf.mxu1 }
 0x101   : > { %v1034_v15 = vpack.c.bf16 %v646_v11, %v645_v9  ;;  %v1074_v16 = vpack.c.bf16 %v662_v12, %v661_v10  ;;  %v533_v19 = vadd.f32 %v1328_v42, %v532_v13  ;;  %v597_v20 = vadd.f32 %v1328_v42, %v596_v14 }
 0x102   : > { %v534_v17 = vpop.f32.mrf.mxu0  ;;  %v598_v18 = vpop.f32.mrf.mxu1 }
 0x103   : > { %1106 = vst [vmem:[%s1338_s17 + $0x8] sm:$0xff] %v1034_v15   ;;  %1114 = vst [vmem:[%s1338_s17 + $0x48] sm:$0xff] %v1074_v16   ;;  %v647_v27 = vmax.f32 %v533_v19, 0.0  ;;  %v663_v28 = vmax.f32 %v597_v20, 0.0 }
 0x104   : > { %v535_v21 = vpop.f32.mrf.mxu0  ;;  %v599_v22 = vpop.f32.mrf.mxu1 }
 0x105   : > { %v536_v23 = vadd.f32 %v1328_v42, %v535_v21  ;;  %v600_v24 = vadd.f32 %v1328_v42, %v599_v22 }
 0x106   : > { %v537_v25 = vpop.f32.mrf.mxu0  ;;  %v601_v26 = vpop.f32.mrf.mxu1 }
 0x107   : > { %v648_v29 = vmax.f32 %v536_v23, 0.0  ;;  %v664_v30 = vmax.f32 %v600_v24, 0.0 }
 0x108   : > { %v540_v31 = vpop.f32.mrf.mxu0  ;;  %v604_v32 = vpop.f32.mrf.mxu1 }
 0x109   : > { %v1039_v33 = vpack.c.bf16 %v648_v29, %v647_v27  ;;  %v1079_v34 = vpack.c.bf16 %v664_v30, %v663_v28  ;;  %v541_v37 = vadd.f32 %v1328_v42, %v540_v31  ;;  %v605_v38 = vadd.f32 %v1328_v42, %v604_v32 }
 0x10a   : > { %v542_v35 = vpop.f32.mrf.mxu0  ;;  %v606_v36 = vpop.f32.mrf.mxu1 }
 0x10b   : > { %1107 = vst [vmem:[%s1338_s17 + $0x10] sm:$0xff] %v1039_v33   ;;  %1115 = vst [vmem:[%s1338_s17 + $0x50] sm:$0xff] %v1079_v34   ;;  %v649_v46 = vmax.f32 %v541_v37, 0.0  ;;  %v665_v47 = vmax.f32 %v605_v38, 0.0 }
 0x10c   : > { %v543_v39 = vpop.f32.mrf.mxu0  ;;  %v607_v40 = vpop.f32.mrf.mxu1 }
 0x10d   : > { %v544_v41 = vadd.f32 %v1328_v42, %v543_v39  ;;  %v608_v43 = vadd.f32 %v1328_v42, %v607_v40 }
 0x10e   : > { %v545_v44 = vpop.f32.mrf.mxu0  ;;  %v609_v45 = vpop.f32.mrf.mxu1 }
 0x10f   : > { %v650_v48 = vmax.f32 %v544_v41, 0.0  ;;  %v666_v49 = vmax.f32 %v608_v43, 0.0 }
 0x110   : > { %v548_v50 = vpop.f32.mrf.mxu0  ;;  %v612_v51 = vpop.f32.mrf.mxu1 }
 0x111   : > { %v1044_v52 = vpack.c.bf16 %v650_v48, %v649_v46  ;;  %v1084_v53 = vpack.c.bf16 %v666_v49, %v665_v47  ;;  %v549_v56 = vadd.f32 %v1328_v42, %v548_v50  ;;  %v613_v57 = vadd.f32 %v1328_v42, %v612_v51 }
 0x112   : > { %v550_v54 = vpop.f32.mrf.mxu0  ;;  %v614_v55 = vpop.f32.mrf.mxu1 }
 0x113   : > { %1108 = vst [vmem:[%s1338_s17 + $0x18] sm:$0xff] %v1044_v52   ;;  %1116 = vst [vmem:[%s1338_s17 + $0x58] sm:$0xff] %v1084_v53   ;;  %v651_v0 = vmax.f32 %v549_v56, 0.0  ;;  %v667_v1 = vmax.f32 %v613_v57, 0.0 }
 0x114   : > { %v551_v58 = vpop.f32.mrf.mxu0  ;;  %v615_v59 = vpop.f32.mrf.mxu1 }
 0x115   : > { %v552_v60 = vadd.f32 %v1328_v42, %v551_v58  ;;  %v616_v61 = vadd.f32 %v1328_v42, %v615_v59 }
 0x116   : > { %v553_v62 = vpop.f32.mrf.mxu0  ;;  %v617_v63 = vpop.f32.mrf.mxu1 }
 0x117   : > { %v652_v2 = vmax.f32 %v552_v60, 0.0  ;;  %v668_v3 = vmax.f32 %v616_v61, 0.0 }
 0x118   : > { %v556_v4 = vpop.f32.mrf.mxu0  ;;  %v620_v5 = vpop.f32.mrf.mxu1 }
 0x119   : > { %v1049_v6 = vpack.c.bf16 %v652_v2, %v651_v0  ;;  %v1089_v7 = vpack.c.bf16 %v668_v3, %v667_v1  ;;  %v557_v10 = vadd.f32 %v1328_v42, %v556_v4  ;;  %v621_v11 = vadd.f32 %v1328_v42, %v620_v5 }
 0x11a   : > { %v558_v8 = vpop.f32.mrf.mxu0  ;;  %v622_v9 = vpop.f32.mrf.mxu1 }
 0x11b   : > { %1109 = vst [vmem:[%s1338_s17 + $0x20] sm:$0xff] %v1049_v6   ;;  %1117 = vst [vmem:[%s1338_s17 + $0x60] sm:$0xff] %v1089_v7   ;;  %v653_v18 = vmax.f32 %v557_v10, 0.0  ;;  %v669_v19 = vmax.f32 %v621_v11, 0.0 }
 0x11c   : > { %v559_v12 = vpop.f32.mrf.mxu0  ;;  %v623_v13 = vpop.f32.mrf.mxu1 }
 0x11d   : > { %v560_v14 = vadd.f32 %v1328_v42, %v559_v12  ;;  %v624_v15 = vadd.f32 %v1328_v42, %v623_v13 }
 0x11e   : > { %v561_v16 = vpop.f32.mrf.mxu0  ;;  %v625_v17 = vpop.f32.mrf.mxu1 }
 0x11f   : > { %v654_v20 = vmax.f32 %v560_v14, 0.0  ;;  %v670_v21 = vmax.f32 %v624_v15, 0.0 }
 0x120   : > { %v564_v22 = vpop.f32.mrf.mxu0  ;;  %v628_v23 = vpop.f32.mrf.mxu1 }
 0x121   : > { %v1054_v24 = vpack.c.bf16 %v654_v20, %v653_v18  ;;  %v1094_v25 = vpack.c.bf16 %v670_v21, %v669_v19  ;;  %v565_v28 = vadd.f32 %v1328_v42, %v564_v22  ;;  %v629_v29 = vadd.f32 %v1328_v42, %v628_v23 }
 0x122   : > { %v566_v26 = vpop.f32.mrf.mxu0  ;;  %v630_v27 = vpop.f32.mrf.mxu1 }
 0x123   : > { %1110 = vst [vmem:[%s1338_s17 + $0x28] sm:$0xff] %v1054_v24   ;;  %1118 = vst [vmem:[%s1338_s17 + $0x68] sm:$0xff] %v1094_v25   ;;  %v655_v36 = vmax.f32 %v565_v28, 0.0  ;;  %v671_v37 = vmax.f32 %v629_v29, 0.0 }
 0x124   : > { %v567_v30 = vpop.f32.mrf.mxu0  ;;  %v631_v31 = vpop.f32.mrf.mxu1 }
 0x125   : > { %v568_v32 = vadd.f32 %v1328_v42, %v567_v30  ;;  %v632_v33 = vadd.f32 %v1328_v42, %v631_v31 }
 0x126   : > { %v569_v34 = vpop.f32.mrf.mxu0  ;;  %v633_v35 = vpop.f32.mrf.mxu1 }
 0x127   : > { %v656_v38 = vmax.f32 %v568_v32, 0.0  ;;  %v672_v39 = vmax.f32 %v632_v33, 0.0 }
 0x128   : > { %v572_v40 = vpop.f32.mrf.mxu0  ;;  %v636_v41 = vpop.f32.mrf.mxu1 }
 0x129   : > { %v1059_v43 = vpack.c.bf16 %v656_v38, %v655_v36  ;;  %v1099_v44 = vpack.c.bf16 %v672_v39, %v671_v37  ;;  %v573_v47 = vadd.f32 %v1328_v42, %v572_v40  ;;  %v637_v48 = vadd.f32 %v1328_v42, %v636_v41 }
 0x12a   : > { %v574_v45 = vpop.f32.mrf.mxu0  ;;  %v638_v46 = vpop.f32.mrf.mxu1 }
 0x12b   : > { %1111 = vst [vmem:[%s1338_s17 + $0x30] sm:$0xff] %v1059_v43   ;;  %1119 = vst [vmem:[%s1338_s17 + $0x70] sm:$0xff] %v1099_v44   ;;  %v657_v55 = vmax.f32 %v573_v47, 0.0  ;;  %v673_v56 = vmax.f32 %v637_v48, 0.0 }
 0x12c   : > { %v575_v49 = vpop.f32.mrf.mxu0  ;;  %v639_v50 = vpop.f32.mrf.mxu1 }
 0x12d   : > { %v576_v51 = vadd.f32 %v1328_v42, %v575_v49  ;;  %v640_v52 = vadd.f32 %v1328_v42, %v639_v50 }
 0x12e   : > { %v577_v53 = vpop.f32.mrf.mxu0  ;;  %v641_v54 = vpop.f32.mrf.mxu1 }
 0x12f   : > { %v658_v57 = vmax.f32 %v576_v51, 0.0  ;;  %v674_v58 = vmax.f32 %v640_v52, 0.0 }
 0x131   : > { %v1064_v59 = vpack.c.bf16 %v658_v57, %v657_v55  ;;  %v1104_v60 = vpack.c.bf16 %v674_v58, %v673_v56 }
 0x133   : > { %1112 = vst [vmem:[%s1338_s17 + $0x38] sm:$0xff] %v1064_v59   ;;  %1120 = vst [vmem:[%s1338_s17 + $0x78] sm:$0xff] %v1104_v60  }
 0x134 PF: > { %s13_s12 = sadd.s32 1, %s1211_s12  }
 0x135   : > { %p10_p4 = scmp.ge.s32.totalorder %s13_s12, 4  }
 0x137   :  { %12 = sbr.rel (!%p10_p4) target bundleno = 1 (0x1), region = 62 }

// kernel: segment_net_forward.28
= control target key start
LH: loop header
LB: loop body
LE: loop exit
PB: predicated region body
PF: predicated region fallthrough
CT: control target
= control target key end

     0   :  { %s2887_s18 = smov 0   ;;  %s3177_s0 = inlined_call_operand.vmem [shape: bf16[2048,72], index: 0, kind: input, shape index: {}]   ;;  %s3178_s1 = inlined_call_operand.vmem [shape: bf16[72,128], index: 1, kind: input, shape index: {}]   ;;  %s3179_s2 = inlined_call_operand.vmem [shape: bf16[2048,72], index: 2, kind: input, shape index: {}]   ;;  %s3180_s3 = inlined_call_operand.vmem [shape: bf16[72,128], index: 3, kind: input, shape index: {}]   ;;  %s3181_s4 = inlined_call_operand.vmem [shape: f32[1,128], index: 4, kind: input, shape index: {}]   ;;  %s3182_s5 = inlined_call_operand.vmem [shape: bf16[2048,128], index: 5, kind: output, shape index: {}]  }
   0x1 LB: > { %s2072_s19 = sadd.s32 4294967295, %s2855_s18   ;;  %p2076_p0 = scmp.ge.s32.totalorder %s2855_s18, 1  ;;  %s2855_s18 = sphi %s2887_s18, %s15_s18  }
   0x2   : > { %p199_p1 = scmp.lt.s32.totalorder %s2855_s18, 5 }
   0x4   : > { %p200_p2 = pnand %p2076_p0, %p199_p1 }
   0x5   : > { %s2077_s7 = sshll.u32 (!%p200_p2), %s2072_s19, 6 }
   0x6   : > { %203 = sbr.rel (%p200_p2) target bundleno = 361 (0x169), region = 40  ;;  %p233_p3 = scmp.lt.s32.totalorder (!%p200_p2), %s2077_s7, 255 }
   0xb   : > { %v2775_v0 = vld [vmem:[%s3180_s3 + $0x20] ss:$0 sps:$4 sm:$0xff]   ;;  %vm681_vm0 = vcmask 1043456   ;;  %v2777_v1 = vld [vmem:[%s3180_s3 + $0x18] sm:$0xff]   ;;  %v2779_v6 = vld [vmem:[%s3180_s3 + $0x10] sm:$0xff]   ;;  %s3184_s7 = smov (!%p233_p3, %s2077_s7), 255 }
   0xc   : > { %v2776_v2 = vld [vmem:[%s3178_s1 + $0x20] ss:$0 sps:$4 sm:$0xff]   ;;  %2765 = vmatprep.subr.msk.bf16.mxu0 %vm681_vm0, %v2775_v0  ;;  %v683_v3 = vsel %vm681_vm0, %v2775_v0, 0  ;;  %v2778_v4 = vld [vmem:[%s3178_s1 + $0x18] sm:$0xff]   ;;  %v2780_v7 = vld [vmem:[%s3178_s1 + $0x10] sm:$0xff]   ;;  %s2919_s12 = sshll.u32 %s3184_s7, 2 }
   0xd   : > { %2766 = vmatprep.subr.msk.bf16.mxu1 %vm681_vm0, %v2776_v2  ;;  %2618 = vmatpush3.bf16.msra.mxu0 %v683_v3  ;;  %v1258_v5 = vsel %vm681_vm0, %v2776_v2, 0  ;;  %v2781_v8 = vld [vmem:[%s3180_s3 + $0x8] sm:$0xff]   ;;  %v2783_v10 = vld [vmem:[%s3180_s3] sm:$0xff]   ;;  %s2931_s20 = scalar_lea.vmem %s3179_s2, %s2919_s12  ;;  %vm584_vm1 = vcmask 588800   ;;  %s2937_s23 = scalar_lea.vmem %s3177_s0, %s2919_s12 }
   0xe   : > { %2692 = vmatpush3.bf16.msra.mxu1 %v1258_v5  ;;  %2619 = vmatprep.subr.bf16.mxu0 %v2777_v1  ;;  %v2782_v9 = vld [vmem:[%s3178_s1 + $0x8] sm:$0xff]   ;;  %v2784_v11 = vld [vmem:[%s3178_s1] sm:$0xff]   ;;  %v2789_v16 = vld [vmem:[%s2931_s20 + $0x10] sm:$0xff]   ;;  %s3080_s28 = scalar_lea.vmem %s3182_s5, %s2919_s12 }
   0xf   : > { %2693 = vmatprep.subr.bf16.mxu1 %v2778_v4  ;;  %v2785_v12 = vld [vmem:[%s2931_s20] sm:$0xff]   ;;  %v2787_v14 = vld [vmem:[%s2931_s20 + $0x8] sm:$0xff]   ;;  %v2790_v17 = vld [vmem:[%s2937_s23 + $0x10] sm:$0xff]  }
  0x10   : > { %v2786_v13 = vld [vmem:[%s2937_s23] sm:$0xff]   ;;  %2627 = vmatprep.mubr.msk.bf16.mxu0 %vm584_vm1, %v2785_v12  ;;  %v2788_v15 = vld [vmem:[%s2937_s23 + $0x8] sm:$0xff]   ;;  %v2791_v18 = vld [vmem:[%s2931_s20 + $0x18] sm:$0xff]  }
  0x11   : > { %2620 = vmatpush3.bf16.msra.mxu0 %v2777_v1  ;;  %2701 = vmatprep.mubr.msk.bf16.mxu1 %vm584_vm1, %v2786_v13  ;;  %v2792_v19 = vld [vmem:[%s2937_s23 + $0x18] sm:$0xff]   ;;  %v2793_v20 = vld [vmem:[%s2931_s20 + $0x20] sm:$0xff]   ;;  %v2795_v22 = vld [vmem:[%s2931_s20 + $0x28] sm:$0xff]  }
  0x12   : > { %2694 = vmatpush3.bf16.msra.mxu1 %v2778_v4  ;;  %2621 = vmatprep.subr.bf16.mxu0 %v2779_v6  ;;  %v2794_v21 = vld [vmem:[%s2937_s23 + $0x20] sm:$0xff]   ;;  %v2796_v23 = vld [vmem:[%s2937_s23 + $0x28] sm:$0xff]   ;;  %v2797_v24 = vld [vmem:[%s2931_s20 + $0x30] sm:$0xff]  }
  0x13   : > { %2695 = vmatprep.subr.bf16.mxu1 %v2780_v7  ;;  %v2798_v25 = vld [vmem:[%s2937_s23 + $0x30] sm:$0xff]   ;;  %v2799_v26 = vld [vmem:[%s2931_s20 + $0x38] sm:$0xff]   ;;  %v2801_v28 = vld [vmem:[%s2931_s20 + $0x40] sm:$0xff]  }
  0x14   : > { %v2800_v27 = vld [vmem:[%s2937_s23 + $0x38] sm:$0xff]   ;;  %v2802_v29 = vld [vmem:[%s2937_s23 + $0x40] sm:$0xff]   ;;  %v2803_v30 = vld [vmem:[%s2931_s20 + $0x48] sm:$0xff]  }
  0x15   : > { %2622 = vmatpush3.bf16.msra.mxu0 %v2779_v6  ;;  %v2804_v31 = vld [vmem:[%s2937_s23 + $0x48] sm:$0xff]   ;;  %v2805_v32 = vld [vmem:[%s2931_s20 + $0x50] sm:$0xff]   ;;  %v2807_v34 = vld [vmem:[%s2931_s20 + $0x58] sm:$0xff]  }
  0x16   : > { %2696 = vmatpush3.bf16.msra.mxu1 %v2780_v7  ;;  %2623 = vmatprep.subr.bf16.mxu0 %v2781_v8  ;;  %v2806_v33 = vld [vmem:[%s2937_s23 + $0x50] sm:$0xff]   ;;  %v2808_v35 = vld [vmem:[%s2937_s23 + $0x58] sm:$0xff]   ;;  %v2809_v36 = vld [vmem:[%s2931_s20 + $0x60] sm:$0xff]  }
  0x17   : > { %2697 = vmatprep.subr.bf16.mxu1 %v2782_v9  ;;  %v2810_v37 = vld [vmem:[%s2937_s23 + $0x60] sm:$0xff]   ;;  %v2811_v38 = vld [vmem:[%s2931_s20 + $0x68] sm:$0xff]   ;;  %v2813_v40 = vld [vmem:[%s2931_s20 + $0x70] sm:$0xff]  }
  0x18   : > { %v2812_v39 = vld [vmem:[%s2937_s23 + $0x68] sm:$0xff]   ;;  %v2814_v41 = vld [vmem:[%s2937_s23 + $0x70] sm:$0xff]   ;;  %v2815_v42 = vld [vmem:[%s2931_s20 + $0x78] sm:$0xff]  }
  0x19   : > { %2624 = vmatpush3.bf16.msra.mxu0 %v2781_v8  ;;  %v2816_v43 = vld [vmem:[%s2937_s23 + $0x78] sm:$0xff]   ;;  %v2817_v44 = vld [vmem:[%s2931_s20 + $0x80] sm:$0xff]   ;;  %v2819_v46 = vld [vmem:[%s2931_s20 + $0x88] sm:$0xff]  }
  0x1a   : > { %2698 = vmatpush3.bf16.msra.mxu1 %v2782_v9  ;;  %2625 = vmatprep.subr.bf16.mxu0 %v2783_v10  ;;  %v2818_v45 = vld [vmem:[%s2937_s23 + $0x80] sm:$0xff]   ;;  %v2820_v47 = vld [vmem:[%s2937_s23 + $0x88] sm:$0xff]   ;;  %v2821_v48 = vld [vmem:[%s2931_s20 + $0x90] sm:$0xff]  }
  0x1b   : > { %2699 = vmatprep.subr.bf16.mxu1 %v2784_v11  ;;  %v2822_v49 = vld [vmem:[%s2937_s23 + $0x90] sm:$0xff]   ;;  %v2823_v50 = vld [vmem:[%s2931_s20 + $0x98] sm:$0xff]   ;;  %v2825_v52 = vld [vmem:[%s2931_s20 + $0xa0] sm:$0xff]  }
  0x1c   : > { %v2824_v51 = vld [vmem:[%s2937_s23 + $0x98] sm:$0xff]   ;;  %v2826_v53 = vld [vmem:[%s2937_s23 + $0xa0] sm:$0xff]   ;;  %v2827_v54 = vld [vmem:[%s2931_s20 + $0xa8] sm:$0xff]  }
  0x1d   : > { %2626 = vmatpush3.bf16.msra.mxu0 %v2783_v10  ;;  %v2828_v55 = vld [vmem:[%s2937_s23 + $0xa8] sm:$0xff]   ;;  %v2829_v56 = vld [vmem:[%s2931_s20 + $0xb0] sm:$0xff]   ;;  %v2831_v58 = vld [vmem:[%s2931_s20 + $0xb8] sm:$0xff]  }
  0x1e   : > { %2700 = vmatpush3.bf16.msra.mxu1 %v2784_v11  ;;  %v2830_v57 = vld [vmem:[%s2937_s23 + $0xb0] sm:$0xff]   ;;  %v2832_v59 = vld [vmem:[%s2937_s23 + $0xb8] sm:$0xff]   ;;  %v2833_v60 = vld [vmem:[%s2931_s20 + $0xc0] sm:$0xff]  }
  0x1f   : > { %v2834_v61 = vld [vmem:[%s2937_s23 + $0xc0] sm:$0xff]   ;;  %v2835_v62 = vld [vmem:[%s2931_s20 + $0xc8] sm:$0xff]   ;;  %v2837_v0 = vld [vmem:[%s2931_s20 + $0xd0] sm:$0xff]  }
  0x20   : > { %2628 = vmatmul.mubr.msk.bf16.vlgmr.msra.gmra.mxu0 %vm584_vm1, %v2787_v14  ;;  %v2836_v63 = vld [vmem:[%s2937_s23 + $0xc8] sm:$0xff]   ;;  %v2838_v1 = vld [vmem:[%s2937_s23 + $0xd0] sm:$0xff]   ;;  %v2839_v2 = vld [vmem:[%s2931_s20 + $0xd8] sm:$0xff]  }
  0x21   : > { %2702 = vmatmul.mubr.msk.bf16.vlgmr.msra.gmra.mxu1 %vm584_vm1, %v2788_v15  ;;  %2631 = vmatprep.mubr.msk.bf16.mxu0 %vm584_vm1, %v2789_v16  ;;  %v2840_v3 = vld [vmem:[%s2937_s23 + $0xd8] sm:$0xff]   ;;  %v2841_v4 = vld [vmem:[%s2931_s20 + $0xe0] sm:$0xff]   ;;  %v2843_v6 = vld [vmem:[%s2931_s20 + $0xe8] sm:$0xff]  }
  0x22   : > { %2705 = vmatprep.mubr.msk.bf16.mxu1 %vm584_vm1, %v2790_v17  ;;  %v2842_v5 = vld [vmem:[%s2937_s23 + $0xe0] sm:$0xff]   ;;  %v2844_v7 = vld [vmem:[%s2937_s23 + $0xe8] sm:$0xff]   ;;  %v2845_v8 = vld [vmem:[%s2931_s20 + $0xf0] sm:$0xff]  }
  0x23   : > { %v2846_v9 = vld [vmem:[%s2937_s23 + $0xf0] sm:$0xff]   ;;  %v2847_v10 = vld [vmem:[%s2931_s20 + $0xf8] sm:$0xff]   ;;  %v3070_v16 = vld [vmem:[%s3181_s4] ss:$0 sm:$0xff] }
  0x24   : > { %v2848_v11 = vld [vmem:[%s2937_s23 + $0xf8] sm:$0xff]  }
  0x28   : > { %2632 = vmatmul.mubr.msk.bf16.gmra.mxu0 %vm584_vm1, %v2791_v18 }
  0x29   : > { %2706 = vmatmul.mubr.msk.bf16.gmra.mxu1 %vm584_vm1, %v2792_v19  ;;  %2635 = vmatprep.mubr.msk.bf16.mxu0 %vm584_vm1, %v2793_v20 }
  0x2a   : > { %2709 = vmatprep.mubr.msk.bf16.mxu1 %vm584_vm1, %v2794_v21 }
  0x30   : > { %2636 = vmatmul.mubr.msk.bf16.gmra.mxu0 %vm584_vm1, %v2795_v22 }
  0x31   : > { %2710 = vmatmul.mubr.msk.bf16.gmra.mxu1 %vm584_vm1, %v2796_v23  ;;  %2639 = vmatprep.mubr.msk.bf16.mxu0 %vm584_vm1, %v2797_v24 }
  0x32   : > { %2713 = vmatprep.mubr.msk.bf16.mxu1 %vm584_vm1, %v2798_v25 }
  0x38   : > { %2640 = vmatmul.mubr.msk.bf16.gmra.mxu0 %vm584_vm1, %v2799_v26 }
  0x39   : > { %2714 = vmatmul.mubr.msk.bf16.gmra.mxu1 %vm584_vm1, %v2800_v27  ;;  %2643 = vmatprep.mubr.msk.bf16.mxu0 %vm584_vm1, %v2801_v28 }
  0x3a   : > { %2717 = vmatprep.mubr.msk.bf16.mxu1 %vm584_vm1, %v2802_v29 }
  0x40   : > { %2644 = vmatmul.mubr.msk.bf16.gmra.mxu0 %vm584_vm1, %v2803_v30 }
  0x41   : > { %2718 = vmatmul.mubr.msk.bf16.gmra.mxu1 %vm584_vm1, %v2804_v31  ;;  %2647 = vmatprep.mubr.msk.bf16.mxu0 %vm584_vm1, %v2805_v32 }
  0x42   : > { %2721 = vmatprep.mubr.msk.bf16.mxu1 %vm584_vm1, %v2806_v33 }
  0x48   : > { %2648 = vmatmul.mubr.msk.bf16.gmra.mxu0 %vm584_vm1, %v2807_v34 }
  0x49   : > { %2722 = vmatmul.mubr.msk.bf16.gmra.mxu1 %vm584_vm1, %v2808_v35  ;;  %2651 = vmatprep.mubr.msk.bf16.mxu0 %vm584_vm1, %v2809_v36 }
  0x4a   : > { %2725 = vmatprep.mubr.msk.bf16.mxu1 %vm584_vm1, %v2810_v37 }
  0x50   : > { %2652 = vmatmul.mubr.msk.bf16.gmra.mxu0 %vm584_vm1, %v2811_v38 }
  0x51   : > { %2726 = vmatmul.mubr.msk.bf16.gmra.mxu1 %vm584_vm1, %v2812_v39  ;;  %2655 = vmatprep.mubr.msk.bf16.mxu0 %vm584_vm1, %v2813_v40 }
  0x52   : > { %2729 = vmatprep.mubr.msk.bf16.mxu1 %vm584_vm1, %v2814_v41 }
  0x58   : > { %2656 = vmatmul.mubr.msk.bf16.gmra.mxu0 %vm584_vm1, %v2815_v42 }
  0x59   : > { %2730 = vmatmul.mubr.msk.bf16.gmra.mxu1 %vm584_vm1, %v2816_v43  ;;  %2659 = vmatprep.mubr.msk.bf16.mxu0 %vm584_vm1, %v2817_v44 }
  0x5a   : > { %2733 = vmatprep.mubr.msk.bf16.mxu1 %vm584_vm1, %v2818_v45 }
  0x60   : > { %2660 = vmatmul.mubr.msk.bf16.gmra.mxu0 %vm584_vm1, %v2819_v46 }
  0x61   : > { %2734 = vmatmul.mubr.msk.bf16.gmra.mxu1 %vm584_vm1, %v2820_v47  ;;  %2663 = vmatprep.mubr.msk.bf16.mxu0 %vm584_vm1, %v2821_v48 }
  0x62   : > { %2737 = vmatprep.mubr.msk.bf16.mxu1 %vm584_vm1, %v2822_v49 }
  0x68   : > { %2664 = vmatmul.mubr.msk.bf16.gmra.mxu0 %vm584_vm1, %v2823_v50 }
  0x69   : > { %2738 = vmatmul.mubr.msk.bf16.gmra.mxu1 %vm584_vm1, %v2824_v51  ;;  %2667 = vmatprep.mubr.msk.bf16.mxu0 %vm584_vm1, %v2825_v52 }
  0x6a   : > { %2741 = vmatprep.mubr.msk.bf16.mxu1 %vm584_vm1, %v2826_v53 }
  0x70   : > { %2668 = vmatmul.mubr.msk.bf16.gmra.mxu0 %vm584_vm1, %v2827_v54 }
  0x71   : > { %2742 = vmatmul.mubr.msk.bf16.gmra.mxu1 %vm584_vm1, %v2828_v55  ;;  %2671 = vmatprep.mubr.msk.bf16.mxu0 %vm584_vm1, %v2829_v56 }
  0x72   : > { %2745 = vmatprep.mubr.msk.bf16.mxu1 %vm584_vm1, %v2830_v57 }
  0x78   : > { %2672 = vmatmul.mubr.msk.bf16.gmra.mxu0 %vm584_vm1, %v2831_v58 }
  0x79   : > { %2746 = vmatmul.mubr.msk.bf16.gmra.mxu1 %vm584_vm1, %v2832_v59  ;;  %2675 = vmatprep.mubr.msk.bf16.mxu0 %vm584_vm1, %v2833_v60 }
  0x7a   : > { %2749 = vmatprep.mubr.msk.bf16.mxu1 %vm584_vm1, %v2834_v61 }
  0x80   : > { %2676 = vmatmul.mubr.msk.bf16.gmra.mxu0 %vm584_vm1, %v2835_v62 }
  0x81   : > { %2750 = vmatmul.mubr.msk.bf16.gmra.mxu1 %vm584_vm1, %v2836_v63  ;;  %2679 = vmatprep.mubr.msk.bf16.mxu0 %vm584_vm1, %v2837_v0 }
  0x82   : > { %2753 = vmatprep.mubr.msk.bf16.mxu1 %vm584_vm1, %v2838_v1 }
  0x88   : > { %2680 = vmatmul.mubr.msk.bf16.gmra.mxu0 %vm584_vm1, %v2839_v2 }
  0x89   : > { %2754 = vmatmul.mubr.msk.bf16.gmra.mxu1 %vm584_vm1, %v2840_v3  ;;  %2683 = vmatprep.mubr.msk.bf16.mxu0 %vm584_vm1, %v2841_v4 }
  0x8a   : > { %2757 = vmatprep.mubr.msk.bf16.mxu1 %vm584_vm1, %v2842_v5 }
  0x90   : > { %2684 = vmatmul.mubr.msk.bf16.gmra.mxu0 %vm584_vm1, %v2843_v6 }
  0x91   : > { %2758 = vmatmul.mubr.msk.bf16.gmra.mxu1 %vm584_vm1, %v2844_v7  ;;  %2687 = vmatprep.mubr.msk.bf16.mxu0 %vm584_vm1, %v2845_v8 }
  0x92   : > { %2761 = vmatprep.mubr.msk.bf16.mxu1 %vm584_vm1, %v2846_v9 }
  0x98   : > { %2688 = vmatmul.mubr.msk.bf16.gmra.mxu0 %vm584_vm1, %v2847_v10 }
  0x99   : > { %2762 = vmatmul.mubr.msk.bf16.gmra.mxu1 %vm584_vm1, %v2848_v11 }
  0xe0   : > { %v2629_v12 = vpop.f32.mrf.mxu0 }
  0xe1   : > { %v2703_v13 = vpop.f32.mrf.mxu1 }
  0xe2   : > { %v1303_v14 = vadd.f32 %v2703_v13, %v2629_v12  ;;  %v719_v15 = vpop.f32.mrf.mxu0 }
  0xe3   : > { %v1294_v17 = vpop.f32.mrf.mxu1 }
  0xe4   : > { %v1295_v18 = vadd.f32 %v1294_v17, %v719_v15  ;;  %v2630_v19 = vpop.f32.mrf.mxu0  ;;  %v1558_v21 = vadd.f32 %v3070_v16, %v1303_v14 }
  0xe5   : > { %v2704_v20 = vpop.f32.mrf.mxu1 }
  0xe6   : > { %v1306_v22 = vadd.f32 %v2704_v20, %v2630_v19  ;;  %v722_v23 = vpop.f32.mrf.mxu0  ;;  %v1556_v25 = vadd.f32 %v3070_v16, %v1295_v18  ;;  %v1622_v30 = vmax.f32 %v1558_v21, 0.0 }
  0xe7   : > { %v1297_v24 = vpop.f32.mrf.mxu1 }
  0xe8   : > { %v1559_v26 = vadd.f32 %v3070_v16, %v1306_v22  ;;  %v1298_v27 = vadd.f32 %v1297_v24, %v722_v23  ;;  %v2633_v28 = vpop.f32.mrf.mxu0  ;;  %v1620_v36 = vmax.f32 %v1556_v25, 0.0 }
  0xe9   : > { %v2707_v29 = vpop.f32.mrf.mxu1 }
  0xea   : > { %v1623_v31 = vmax.f32 %v1559_v26, 0.0  ;;  %v1557_v32 = vadd.f32 %v3070_v16, %v1298_v27  ;;  %v1319_v33 = vadd.f32 %v2707_v29, %v2633_v28  ;;  %v735_v34 = vpop.f32.mrf.mxu0 }
  0xeb   : > { %v1310_v35 = vpop.f32.mrf.mxu1 }
  0xec   : > { %v2360_v37 = vpack.c.bf16 %v1623_v31, %v1622_v30  ;;  %v1621_v38 = vmax.f32 %v1557_v32, 0.0  ;;  %v1311_v39 = vadd.f32 %v1310_v35, %v735_v34  ;;  %v2634_v40 = vpop.f32.mrf.mxu0  ;;  %v1562_v43 = vadd.f32 %v3070_v16, %v1319_v33 }
  0xed   : > { %v2708_v41 = vpop.f32.mrf.mxu1 }
  0xee   : > { %2512 = vst [vmem:[%s3080_s28 + $0x8] sm:$0xff] %v2360_v37   ;;  %v2355_v42 = vpack.c.bf16 %v1621_v38, %v1620_v36  ;;  %v1322_v44 = vadd.f32 %v2708_v41, %v2634_v40  ;;  %v738_v45 = vpop.f32.mrf.mxu0  ;;  %v1560_v47 = vadd.f32 %v3070_v16, %v1311_v39  ;;  %v1626_v52 = vmax.f32 %v1562_v43, 0.0 }
  0xef   : > { %v1313_v46 = vpop.f32.mrf.mxu1 }
  0xf0   : > { %2356 = vst [vmem:[%s3080_s28] sm:$0xff] %v2355_v42   ;;  %v1563_v48 = vadd.f32 %v3070_v16, %v1322_v44  ;;  %v1314_v49 = vadd.f32 %v1313_v46, %v738_v45  ;;  %v2637_v50 = vpop.f32.mrf.mxu0  ;;  %v1624_v58 = vmax.f32 %v1560_v47, 0.0 }
  0xf1   : > { %v2711_v51 = vpop.f32.mrf.mxu1 }
  0xf2   : > { %v1627_v53 = vmax.f32 %v1563_v48, 0.0  ;;  %v1561_v54 = vadd.f32 %v3070_v16, %v1314_v49  ;;  %v1335_v55 = vadd.f32 %v2711_v51, %v2637_v50  ;;  %v751_v56 = vpop.f32.mrf.mxu0 }
  0xf3   : > { %v1326_v57 = vpop.f32.mrf.mxu1 }
  0xf4   : > { %v2370_v59 = vpack.c.bf16 %v1627_v53, %v1626_v52  ;;  %v1625_v60 = vmax.f32 %v1561_v54, 0.0  ;;  %v1327_v61 = vadd.f32 %v1326_v57, %v751_v56  ;;  %v2638_v62 = vpop.f32.mrf.mxu0  ;;  %v1566_v1 = vadd.f32 %v3070_v16, %v1335_v55 }
  0xf5   : > { %v2712_v63 = vpop.f32.mrf.mxu1 }
  0xf6   : > { %2514 = vst [vmem:[%s3080_s28 + $0x18] sm:$0xff] %v2370_v59   ;;  %v2365_v0 = vpack.c.bf16 %v1625_v60, %v1624_v58  ;;  %v1338_v2 = vadd.f32 %v2712_v63, %v2638_v62  ;;  %v754_v3 = vpop.f32.mrf.mxu0  ;;  %v1564_v5 = vadd.f32 %v3070_v16, %v1327_v61  ;;  %v1630_v10 = vmax.f32 %v1566_v1, 0.0 }
  0xf7   : > { %v1329_v4 = vpop.f32.mrf.mxu1 }
  0xf8   : > { %2513 = vst [vmem:[%s3080_s28 + $0x10] sm:$0xff] %v2365_v0   ;;  %v1567_v6 = vadd.f32 %v3070_v16, %v1338_v2  ;;  %v1330_v7 = vadd.f32 %v1329_v4, %v754_v3  ;;  %v2641_v8 = vpop.f32.mrf.mxu0  ;;  %v1628_v17 = vmax.f32 %v1564_v5, 0.0 }
  0xf9   : > { %v2715_v9 = vpop.f32.mrf.mxu1 }
  0xfa   : > { %v1631_v11 = vmax.f32 %v1567_v6, 0.0  ;;  %v1565_v12 = vadd.f32 %v3070_v16, %v1330_v7  ;;  %v1351_v13 = vadd.f32 %v2715_v9, %v2641_v8  ;;  %v767_v14 = vpop.f32.mrf.mxu0 }
  0xfb   : > { %v1342_v15 = vpop.f32.mrf.mxu1 }
  0xfc   : > { %v2380_v18 = vpack.c.bf16 %v1631_v11, %v1630_v10  ;;  %v1629_v19 = vmax.f32 %v1565_v12, 0.0  ;;  %v1343_v20 = vadd.f32 %v1342_v15, %v767_v14  ;;  %v2642_v21 = vpop.f32.mrf.mxu0  ;;  %v1570_v24 = vadd.f32 %v3070_v16, %v1351_v13 }
  0xfd   : > { %v2716_v22 = vpop.f32.mrf.mxu1 }
  0xfe   : > { %2516 = vst [vmem:[%s3080_s28 + $0x28] sm:$0xff] %v2380_v18   ;;  %v2375_v23 = vpack.c.bf16 %v1629_v19, %v1628_v17  ;;  %v1354_v25 = vadd.f32 %v2716_v22, %v2642_v21  ;;  %v770_v26 = vpop.f32.mrf.mxu0  ;;  %v1568_v28 = vadd.f32 %v3070_v16, %v1343_v20  ;;  %v1634_v33 = vmax.f32 %v1570_v24, 0.0 }
  0xff   : > { %v1345_v27 = vpop.f32.mrf.mxu1 }
 0x100   : > { %2515 = vst [vmem:[%s3080_s28 + $0x20] sm:$0xff] %v2375_v23   ;;  %v1571_v29 = vadd.f32 %v3070_v16, %v1354_v25  ;;  %v1346_v30 = vadd.f32 %v1345_v27, %v770_v26  ;;  %v2645_v31 = vpop.f32.mrf.mxu0  ;;  %v1632_v39 = vmax.f32 %v1568_v28, 0.0 }
 0x101   : > { %v2719_v32 = vpop.f32.mrf.mxu1 }
 0x102   : > { %v1635_v34 = vmax.f32 %v1571_v29, 0.0  ;;  %v1569_v35 = vadd.f32 %v3070_v16, %v1346_v30  ;;  %v1367_v36 = vadd.f32 %v2719_v32, %v2645_v31  ;;  %v783_v37 = vpop.f32.mrf.mxu0 }
 0x103   : > { %v1358_v38 = vpop.f32.mrf.mxu1 }
 0x104   : > { %v2390_v40 = vpack.c.bf16 %v1635_v34, %v1634_v33  ;;  %v1633_v41 = vmax.f32 %v1569_v35, 0.0  ;;  %v1359_v42 = vadd.f32 %v1358_v38, %v783_v37  ;;  %v2646_v43 = vpop.f32.mrf.mxu0  ;;  %v1574_v46 = vadd.f32 %v3070_v16, %v1367_v36 }
 0x105   : > { %v2720_v44 = vpop.f32.mrf.mxu1 }
 0x106   : > { %2518 = vst [vmem:[%s3080_s28 + $0x38] sm:$0xff] %v2390_v40   ;;  %v2385_v45 = vpack.c.bf16 %v1633_v41, %v1632_v39  ;;  %v1370_v47 = vadd.f32 %v2720_v44, %v2646_v43  ;;  %v786_v48 = vpop.f32.mrf.mxu0  ;;  %v1572_v50 = vadd.f32 %v3070_v16, %v1359_v42  ;;  %v1638_v55 = vmax.f32 %v1574_v46, 0.0 }
 0x107   : > { %v1361_v49 = vpop.f32.mrf.mxu1 }
 0x108   : > { %2517 = vst [vmem:[%s3080_s28 + $0x30] sm:$0xff] %v2385_v45   ;;  %v1575_v51 = vadd.f32 %v3070_v16, %v1370_v47  ;;  %v1362_v52 = vadd.f32 %v1361_v49, %v786_v48  ;;  %v2649_v53 = vpop.f32.mrf.mxu0  ;;  %v1636_v61 = vmax.f32 %v1572_v50, 0.0 }
 0x109   : > { %v2723_v54 = vpop.f32.mrf.mxu1 }
 0x10a   : > { %v1639_v56 = vmax.f32 %v1575_v51, 0.0  ;;  %v1573_v57 = vadd.f32 %v3070_v16, %v1362_v52  ;;  %v1383_v58 = vadd.f32 %v2723_v54, %v2649_v53  ;;  %v799_v59 = vpop.f32.mrf.mxu0 }
 0x10b   : > { %v1374_v60 = vpop.f32.mrf.mxu1 }
 0x10c   : > { %v2400_v62 = vpack.c.bf16 %v1639_v56, %v1638_v55  ;;  %v1637_v63 = vmax.f32 %v1573_v57, 0.0  ;;  %v1375_v0 = vadd.f32 %v1374_v60, %v799_v59  ;;  %v2650_v1 = vpop.f32.mrf.mxu0  ;;  %v1578_v4 = vadd.f32 %v3070_v16, %v1383_v58 }
 0x10d   : > { %v2724_v2 = vpop.f32.mrf.mxu1 }
 0x10e   : > { %2520 = vst [vmem:[%s3080_s28 + $0x48] sm:$0xff] %v2400_v62   ;;  %v2395_v3 = vpack.c.bf16 %v1637_v63, %v1636_v61  ;;  %v1386_v5 = vadd.f32 %v2724_v2, %v2650_v1  ;;  %v802_v6 = vpop.f32.mrf.mxu0  ;;  %v1576_v8 = vadd.f32 %v3070_v16, %v1375_v0  ;;  %v1642_v13 = vmax.f32 %v1578_v4, 0.0 }
 0x10f   : > { %v1377_v7 = vpop.f32.mrf.mxu1 }
 0x110   : > { %2519 = vst [vmem:[%s3080_s28 + $0x40] sm:$0xff] %v2395_v3   ;;  %v1579_v9 = vadd.f32 %v3070_v16, %v1386_v5  ;;  %v1378_v10 = vadd.f32 %v1377_v7, %v802_v6  ;;  %v2653_v11 = vpop.f32.mrf.mxu0  ;;  %v1640_v20 = vmax.f32 %v1576_v8, 0.0 }
 0x111   : > { %v2727_v12 = vpop.f32.mrf.mxu1 }
 0x112   : > { %v1643_v14 = vmax.f32 %v1579_v9, 0.0  ;;  %v1577_v15 = vadd.f32 %v3070_v16, %v1378_v10  ;;  %v1399_v17 = vadd.f32 %v2727_v12, %v2653_v11  ;;  %v815_v18 = vpop.f32.mrf.mxu0 }
 0x113   : > { %v1390_v19 = vpop.f32.mrf.mxu1 }
 0x114   : > { %v2410_v21 = vpack.c.bf16 %v1643_v14, %v1642_v13  ;;  %v1641_v22 = vmax.f32 %v1577_v15, 0.0  ;;  %v1391_v23 = vadd.f32 %v1390_v19, %v815_v18  ;;  %v2654_v24 = vpop.f32.mrf.mxu0  ;;  %v1582_v27 = vadd.f32 %v3070_v16, %v1399_v17 }
 0x115   : > { %v2728_v25 = vpop.f32.mrf.mxu1 }
 0x116   : > { %2522 = vst [vmem:[%s3080_s28 + $0x58] sm:$0xff] %v2410_v21   ;;  %v2405_v26 = vpack.c.bf16 %v1641_v22, %v1640_v20  ;;  %v1402_v28 = vadd.f32 %v2728_v25, %v2654_v24  ;;  %v818_v29 = vpop.f32.mrf.mxu0  ;;  %v1580_v31 = vadd.f32 %v3070_v16, %v1391_v23  ;;  %v1646_v36 = vmax.f32 %v1582_v27, 0.0 }
 0x117   : > { %v1393_v30 = vpop.f32.mrf.mxu1 }
 0x118   : > { %2521 = vst [vmem:[%s3080_s28 + $0x50] sm:$0xff] %v2405_v26   ;;  %v1583_v32 = vadd.f32 %v3070_v16, %v1402_v28  ;;  %v1394_v33 = vadd.f32 %v1393_v30, %v818_v29  ;;  %v2657_v34 = vpop.f32.mrf.mxu0  ;;  %v1644_v42 = vmax.f32 %v1580_v31, 0.0 }
 0x119   : > { %v2731_v35 = vpop.f32.mrf.mxu1 }
 0x11a   : > { %v1647_v37 = vmax.f32 %v1583_v32, 0.0  ;;  %v1581_v38 = vadd.f32 %v3070_v16, %v1394_v33  ;;  %v1415_v39 = vadd.f32 %v2731_v35, %v2657_v34  ;;  %v831_v40 = vpop.f32.mrf.mxu0 }
 0x11b   : > { %v1406_v41 = vpop.f32.mrf.mxu1 }
 0x11c   : > { %v2420_v43 = vpack.c.bf16 %v1647_v37, %v1646_v36  ;;  %v1645_v44 = vmax.f32 %v1581_v38, 0.0  ;;  %v1407_v45 = vadd.f32 %v1406_v41, %v831_v40  ;;  %v2658_v46 = vpop.f32.mrf.mxu0  ;;  %v1586_v49 = vadd.f32 %v3070_v16, %v1415_v39 }
 0x11d   : > { %v2732_v47 = vpop.f32.mrf.mxu1 }
 0x11e   : > { %2524 = vst [vmem:[%s3080_s28 + $0x68] sm:$0xff] %v2420_v43   ;;  %v2415_v48 = vpack.c.bf16 %v1645_v44, %v1644_v42  ;;  %v1418_v50 = vadd.f32 %v2732_v47, %v2658_v46  ;;  %v834_v51 = vpop.f32.mrf.mxu0  ;;  %v1584_v53 = vadd.f32 %v3070_v16, %v1407_v45  ;;  %v1650_v58 = vmax.f32 %v1586_v49, 0.0 }
 0x11f   : > { %v1409_v52 = vpop.f32.mrf.mxu1 }
 0x120   : > { %2523 = vst [vmem:[%s3080_s28 + $0x60] sm:$0xff] %v2415_v48   ;;  %v1587_v54 = vadd.f32 %v3070_v16, %v1418_v50  ;;  %v1410_v55 = vadd.f32 %v1409_v52, %v834_v51  ;;  %v2661_v56 = vpop.f32.mrf.mxu0  ;;  %v1648_v0 = vmax.f32 %v1584_v53, 0.0 }
 0x121   : > { %v2735_v57 = vpop.f32.mrf.mxu1 }
 0x122   : > { %v1651_v59 = vmax.f32 %v1587_v54, 0.0  ;;  %v1585_v60 = vadd.f32 %v3070_v16, %v1410_v55  ;;  %v1431_v61 = vadd.f32 %v2735_v57, %v2661_v56  ;;  %v847_v62 = vpop.f32.mrf.mxu0 }
 0x123   : > { %v1422_v63 = vpop.f32.mrf.mxu1 }
 0x124   : > { %v2430_v1 = vpack.c.bf16 %v1651_v59, %v1650_v58  ;;  %v1649_v2 = vmax.f32 %v1585_v60, 0.0  ;;  %v1423_v3 = vadd.f32 %v1422_v63, %v847_v62  ;;  %v2662_v4 = vpop.f32.mrf.mxu0  ;;  %v1590_v7 = vadd.f32 %v3070_v16, %v1431_v61 }
 0x125   : > { %v2736_v5 = vpop.f32.mrf.mxu1 }
 0x126   : > { %2526 = vst [vmem:[%s3080_s28 + $0x78] sm:$0xff] %v2430_v1   ;;  %v2425_v6 = vpack.c.bf16 %v1649_v2, %v1648_v0  ;;  %v1434_v8 = vadd.f32 %v2736_v5, %v2662_v4  ;;  %v850_v9 = vpop.f32.mrf.mxu0  ;;  %v1588_v11 = vadd.f32 %v3070_v16, %v1423_v3  ;;  %v1654_v17 = vmax.f32 %v1590_v7, 0.0 }
 0x127   : > { %v1425_v10 = vpop.f32.mrf.mxu1 }
 0x128   : > { %2525 = vst [vmem:[%s3080_s28 + $0x70] sm:$0xff] %v2425_v6   ;;  %v1591_v12 = vadd.f32 %v3070_v16, %v1434_v8  ;;  %v1426_v13 = vadd.f32 %v1425_v10, %v850_v9  ;;  %v2665_v14 = vpop.f32.mrf.mxu0  ;;  %v1652_v23 = vmax.f32 %v1588_v11, 0.0 }
 0x129   : > { %v2739_v15 = vpop.f32.mrf.mxu1 }
 0x12a   : > { %v1655_v18 = vmax.f32 %v1591_v12, 0.0  ;;  %v1589_v19 = vadd.f32 %v3070_v16, %v1426_v13  ;;  %v1447_v20 = vadd.f32 %v2739_v15, %v2665_v14  ;;  %v863_v21 = vpop.f32.mrf.mxu0 }
 0x12b   : > { %v1438_v22 = vpop.f32.mrf.mxu1 }
 0x12c   : > { %v2440_v24 = vpack.c.bf16 %v1655_v18, %v1654_v17  ;;  %v1653_v25 = vmax.f32 %v1589_v19, 0.0  ;;  %v1439_v26 = vadd.f32 %v1438_v22, %v863_v21  ;;  %v2666_v27 = vpop.f32.mrf.mxu0  ;;  %v1594_v30 = vadd.f32 %v3070_v16, %v1447_v20 }
 0x12d   : > { %v2740_v28 = vpop.f32.mrf.mxu1 }
 0x12e   : > { %2528 = vst [vmem:[%s3080_s28 + $0x88] sm:$0xff] %v2440_v24   ;;  %v2435_v29 = vpack.c.bf16 %v1653_v25, %v1652_v23  ;;  %v1450_v31 = vadd.f32 %v2740_v28, %v2666_v27  ;;  %v866_v32 = vpop.f32.mrf.mxu0  ;;  %v1592_v34 = vadd.f32 %v3070_v16, %v1439_v26  ;;  %v1658_v39 = vmax.f32 %v1594_v30, 0.0 }
 0x12f   : > { %v1441_v33 = vpop.f32.mrf.mxu1 }
 0x130   : > { %2527 = vst [vmem:[%s3080_s28 + $0x80] sm:$0xff] %v2435_v29   ;;  %v1595_v35 = vadd.f32 %v3070_v16, %v1450_v31  ;;  %v1442_v36 = vadd.f32 %v1441_v33, %v866_v32  ;;  %v2669_v37 = vpop.f32.mrf.mxu0  ;;  %v1656_v45 = vmax.f32 %v1592_v34, 0.0 }
 0x131   : > { %v2743_v38 = vpop.f32.mrf.mxu1 }
 0x132   : > { %v1659_v40 = vmax.f32 %v1595_v35, 0.0  ;;  %v1593_v41 = vadd.f32 %v3070_v16, %v1442_v36  ;;  %v1463_v42 = vadd.f32 %v2743_v38, %v2669_v37  ;;  %v879_v43 = vpop.f32.mrf.mxu0 }
 0x133   : > { %v1454_v44 = vpop.f32.mrf.mxu1 }
 0x134   : > { %v2450_v46 = vpack.c.bf16 %v1659_v40, %v1658_v39  ;;  %v1657_v47 = vmax.f32 %v1593_v41, 0.0  ;;  %v1455_v48 = vadd.f32 %v1454_v44, %v879_v43  ;;  %v2670_v49 = vpop.f32.mrf.mxu0  ;;  %v1598_v52 = vadd.f32 %v3070_v16, %v1463_v42 }
 0x135   : > { %v2744_v50 = vpop.f32.mrf.mxu1 }
 0x136   : > { %2530 = vst [vmem:[%s3080_s28 + $0x98] sm:$0xff] %v2450_v46   ;;  %v2445_v51 = vpack.c.bf16 %v1657_v47, %v1656_v45  ;;  %v1466_v53 = vadd.f32 %v2744_v50, %v2670_v49  ;;  %v882_v54 = vpop.f32.mrf.mxu0  ;;  %v1596_v56 = vadd.f32 %v3070_v16, %v1455_v48  ;;  %v1662_v61 = vmax.f32 %v1598_v52, 0.0 }
 0x137   : > { %v1457_v55 = vpop.f32.mrf.mxu1 }
 0x138   : > { %2529 = vst [vmem:[%s3080_s28 + $0x90] sm:$0xff] %v2445_v51   ;;  %v1599_v57 = vadd.f32 %v3070_v16, %v1466_v53  ;;  %v1458_v58 = vadd.f32 %v1457_v55, %v882_v54  ;;  %v2673_v59 = vpop.f32.mrf.mxu0  ;;  %v1660_v3 = vmax.f32 %v1596_v56, 0.0 }
 0x139   : > { %v2747_v60 = vpop.f32.mrf.mxu1 }
 0x13a   : > { %v1663_v62 = vmax.f32 %v1599_v57, 0.0  ;;  %v1597_v63 = vadd.f32 %v3070_v16, %v1458_v58  ;;  %v1479_v0 = vadd.f32 %v2747_v60, %v2673_v59  ;;  %v895_v1 = vpop.f32.mrf.mxu0 }
 0x13b   : > { %v1470_v2 = vpop.f32.mrf.mxu1 }
 0x13c   : > { %v2460_v4 = vpack.c.bf16 %v1663_v62, %v1662_v61  ;;  %v1661_v5 = vmax.f32 %v1597_v63, 0.0  ;;  %v1471_v6 = vadd.f32 %v1470_v2, %v895_v1  ;;  %v2674_v7 = vpop.f32.mrf.mxu0  ;;  %v1602_v10 = vadd.f32 %v3070_v16, %v1479_v0 }
 0x13d   : > { %v2748_v8 = vpop.f32.mrf.mxu1 }
 0x13e   : > { %2532 = vst [vmem:[%s3080_s28 + $0xa8] sm:$0xff] %v2460_v4   ;;  %v2455_v9 = vpack.c.bf16 %v1661_v5, %v1660_v3  ;;  %v1482_v11 = vadd.f32 %v2748_v8, %v2674_v7  ;;  %v898_v12 = vpop.f32.mrf.mxu0  ;;  %v1600_v14 = vadd.f32 %v3070_v16, %v1471_v6  ;;  %v1666_v20 = vmax.f32 %v1602_v10, 0.0 }
 0x13f   : > { %v1473_v13 = vpop.f32.mrf.mxu1 }
 0x140   : > { %2531 = vst [vmem:[%s3080_s28 + $0xa0] sm:$0xff] %v2455_v9   ;;  %v1603_v15 = vadd.f32 %v3070_v16, %v1482_v11  ;;  %v1474_v17 = vadd.f32 %v1473_v13, %v898_v12  ;;  %v2677_v18 = vpop.f32.mrf.mxu0  ;;  %v1664_v26 = vmax.f32 %v1600_v14, 0.0 }
 0x141   : > { %v2751_v19 = vpop.f32.mrf.mxu1 }
 0x142   : > { %v1667_v21 = vmax.f32 %v1603_v15, 0.0  ;;  %v1601_v22 = vadd.f32 %v3070_v16, %v1474_v17  ;;  %v1495_v23 = vadd.f32 %v2751_v19, %v2677_v18  ;;  %v911_v24 = vpop.f32.mrf.mxu0 }
 0x143   : > { %v1486_v25 = vpop.f32.mrf.mxu1 }
 0x144   : > { %v2470_v27 = vpack.c.bf16 %v1667_v21, %v1666_v20  ;;  %v1665_v28 = vmax.f32 %v1601_v22, 0.0  ;;  %v1487_v29 = vadd.f32 %v1486_v25, %v911_v24  ;;  %v2678_v30 = vpop.f32.mrf.mxu0  ;;  %v1606_v33 = vadd.f32 %v3070_v16, %v1495_v23 }
 0x145   : > { %v2752_v31 = vpop.f32.mrf.mxu1 }
 0x146   : > { %2534 = vst [vmem:[%s3080_s28 + $0xb8] sm:$0xff] %v2470_v27   ;;  %v2465_v32 = vpack.c.bf16 %v1665_v28, %v1664_v26  ;;  %v1498_v34 = vadd.f32 %v2752_v31, %v2678_v30  ;;  %v914_v35 = vpop.f32.mrf.mxu0  ;;  %v1604_v37 = vadd.f32 %v3070_v16, %v1487_v29  ;;  %v1670_v42 = vmax.f32 %v1606_v33, 0.0 }
 0x147   : > { %v1489_v36 = vpop.f32.mrf.mxu1 }
 0x148   : > { %2533 = vst [vmem:[%s3080_s28 + $0xb0] sm:$0xff] %v2465_v32   ;;  %v1607_v38 = vadd.f32 %v3070_v16, %v1498_v34  ;;  %v1490_v39 = vadd.f32 %v1489_v36, %v914_v35  ;;  %v2681_v40 = vpop.f32.mrf.mxu0  ;;  %v1668_v48 = vmax.f32 %v1604_v37, 0.0 }
 0x149   : > { %v2755_v41 = vpop.f32.mrf.mxu1 }
 0x14a   : > { %v1671_v43 = vmax.f32 %v1607_v38, 0.0  ;;  %v1605_v44 = vadd.f32 %v3070_v16, %v1490_v39  ;;  %v1511_v45 = vadd.f32 %v2755_v41, %v2681_v40  ;;  %v927_v46 = vpop.f32.mrf.mxu0 }
 0x14b   : > { %v1502_v47 = vpop.f32.mrf.mxu1 }
 0x14c   : > { %v2480_v49 = vpack.c.bf16 %v1671_v43, %v1670_v42  ;;  %v1669_v50 = vmax.f32 %v1605_v44, 0.0  ;;  %v1503_v51 = vadd.f32 %v1502_v47, %v927_v46  ;;  %v2682_v52 = vpop.f32.mrf.mxu0  ;;  %v1610_v55 = vadd.f32 %v3070_v16, %v1511_v45 }
 0x14d   : > { %v2756_v53 = vpop.f32.mrf.mxu1 }
 0x14e   : > { %2536 = vst [vmem:[%s3080_s28 + $0xc8] sm:$0xff] %v2480_v49   ;;  %v2475_v54 = vpack.c.bf16 %v1669_v50, %v1668_v48  ;;  %v1514_v56 = vadd.f32 %v2756_v53, %v2682_v52  ;;  %v930_v57 = vpop.f32.mrf.mxu0  ;;  %v1608_v59 = vadd.f32 %v3070_v16, %v1503_v51  ;;  %v1674_v0 = vmax.f32 %v1610_v55, 0.0 }
 0x14f   : > { %v1505_v58 = vpop.f32.mrf.mxu1 }
 0x150   : > { %2535 = vst [vmem:[%s3080_s28 + $0xc0] sm:$0xff] %v2475_v54   ;;  %v1611_v60 = vadd.f32 %v3070_v16, %v1514_v56  ;;  %v1506_v61 = vadd.f32 %v1505_v58, %v930_v57  ;;  %v2685_v62 = vpop.f32.mrf.mxu0  ;;  %v1672_v6 = vmax.f32 %v1608_v59, 0.0 }
 0x151   : > { %v2759_v63 = vpop.f32.mrf.mxu1 }
 0x152   : > { %v1675_v1 = vmax.f32 %v1611_v60, 0.0  ;;  %v1609_v2 = vadd.f32 %v3070_v16, %v1506_v61  ;;  %v1527_v3 = vadd.f32 %v2759_v63, %v2685_v62  ;;  %v943_v4 = vpop.f32.mrf.mxu0 }
 0x153   : > { %v1518_v5 = vpop.f32.mrf.mxu1 }
 0x154   : > { %v2490_v7 = vpack.c.bf16 %v1675_v1, %v1674_v0  ;;  %v1673_v8 = vmax.f32 %v1609_v2, 0.0  ;;  %v1519_v9 = vadd.f32 %v1518_v5, %v943_v4  ;;  %v2686_v10 = vpop.f32.mrf.mxu0  ;;  %v1614_v13 = vadd.f32 %v3070_v16, %v1527_v3 }
 0x155   : > { %v2760_v11 = vpop.f32.mrf.mxu1 }
 0x156   : > { %2538 = vst [vmem:[%s3080_s28 + $0xd8] sm:$0xff] %v2490_v7   ;;  %v2485_v12 = vpack.c.bf16 %v1673_v8, %v1672_v6  ;;  %v1530_v14 = vadd.f32 %v2760_v11, %v2686_v10  ;;  %v946_v15 = vpop.f32.mrf.mxu0  ;;  %v1612_v18 = vadd.f32 %v3070_v16, %v1519_v9  ;;  %v1678_v23 = vmax.f32 %v1614_v13, 0.0 }
 0x157   : > { %v1521_v17 = vpop.f32.mrf.mxu1 }
 0x158   : > { %2537 = vst [vmem:[%s3080_s28 + $0xd0] sm:$0xff] %v2485_v12   ;;  %v1615_v19 = vadd.f32 %v3070_v16, %v1530_v14  ;;  %v1522_v20 = vadd.f32 %v1521_v17, %v946_v15  ;;  %v2689_v21 = vpop.f32.mrf.mxu0  ;;  %v1676_v29 = vmax.f32 %v1612_v18, 0.0 }
 0x159   : > { %v2763_v22 = vpop.f32.mrf.mxu1 }
 0x15a   : > { %v1679_v24 = vmax.f32 %v1615_v19, 0.0  ;;  %v1613_v25 = vadd.f32 %v3070_v16, %v1522_v20  ;;  %v1543_v26 = vadd.f32 %v2763_v22, %v2689_v21  ;;  %v959_v27 = vpop.f32.mrf.mxu0 }
 0x15b   : > { %v1534_v28 = vpop.f32.mrf.mxu1 }
 0x15c   : > { %v2500_v30 = vpack.c.bf16 %v1679_v24, %v1678_v23  ;;  %v1677_v31 = vmax.f32 %v1613_v25, 0.0  ;;  %v1535_v32 = vadd.f32 %v1534_v28, %v959_v27  ;;  %v2690_v33 = vpop.f32.mrf.mxu0  ;;  %v1618_v36 = vadd.f32 %v3070_v16, %v1543_v26 }
 0x15d   : > { %v2764_v34 = vpop.f32.mrf.mxu1 }
 0x15e   : > { %2540 = vst [vmem:[%s3080_s28 + $0xe8] sm:$0xff] %v2500_v30   ;;  %v2495_v35 = vpack.c.bf16 %v1677_v31, %v1676_v29  ;;  %v1546_v37 = vadd.f32 %v2764_v34, %v2690_v33  ;;  %v962_v38 = vpop.f32.mrf.mxu0  ;;  %v1616_v40 = vadd.f32 %v3070_v16, %v1535_v32  ;;  %v1682_v43 = vmax.f32 %v1618_v36, 0.0 }
 0x15f   : > { %v1537_v39 = vpop.f32.mrf.mxu1 }
 0x160   : > { %2539 = vst [vmem:[%s3080_s28 + $0xe0] sm:$0xff] %v2495_v35   ;;  %v1619_v41 = vadd.f32 %v3070_v16, %v1546_v37  ;;  %v1538_v42 = vadd.f32 %v1537_v39, %v962_v38  ;;  %v1680_v46 = vmax.f32 %v1616_v40, 0.0 }
 0x162   : > { %v1683_v44 = vmax.f32 %v1619_v41, 0.0  ;;  %v1617_v45 = vadd.f32 %v3070_v16, %v1538_v42 }
 0x164   : > { %v2510_v47 = vpack.c.bf16 %v1683_v44, %v1682_v43  ;;  %v1681_v48 = vmax.f32 %v1617_v45, 0.0 }
 0x166   : > { %2542 = vst [vmem:[%s3080_s28 + $0xf8] sm:$0xff] %v2510_v47   ;;  %v2505_v49 = vpack.c.bf16 %v1681_v48, %v1680_v46 }
 0x168   : > { %2541 = vst [vmem:[%s3080_s28 + $0xf0] sm:$0xff] %v2505_v49  }
 0x169 PF: > { %s15_s18 = sadd.s32 1, %s2855_s18  }
 0x16a   : > { %p12_p4 = scmp.ge.s32.totalorder %s15_s18, 6  }
 0x16c   :  { %14 = sbr.rel (!%p12_p4) target bundleno = 1 (0x1), region = 73 }

// kernel: segment_net_forward.29
= control target key start
LH: loop header
LB: loop body
LE: loop exit
PB: predicated region body
PF: predicated region fallthrough
CT: control target
= control target key end

     0   :  { %s1868_s12 = smov 0   ;;  %s2076_s0 = inlined_call_operand.vmem [shape: bf16[2048,72], index: 0, kind: input, shape index: {}]   ;;  %s2077_s1 = inlined_call_operand.vmem [shape: bf16[72,128], index: 1, kind: input, shape index: {}]   ;;  %s2078_s2 = inlined_call_operand.vmem [shape: f32[1,128], index: 2, kind: input, shape index: {}]   ;;  %s2079_s3 = inlined_call_operand.vmem [shape: bf16[2048,128], index: 3, kind: output, shape index: {}]  }
   0x1 LB: > { %s1272_s13 = sadd.s32 4294967295, %s1846_s12   ;;  %p1276_p0 = scmp.ge.s32.totalorder %s1846_s12, 1  ;;  %s1846_s12 = sphi %s1868_s12, %s13_s12  }
   0x2   : > { %p138_p1 = scmp.lt.s32.totalorder %s1846_s12, 5 }
   0x4   : > { %p139_p2 = pnand %p1276_p0, %p138_p1 }
   0x5   : > { %s1277_s18 = sshll.u32 (!%p139_p2), %s1272_s13, 6 }
   0x6   : > { %142 = sbr.rel (%p139_p2) target bundleno = 294 (0x126), region = 32  ;;  %p163_p3 = scmp.lt.s32.totalorder (!%p139_p2), %s1277_s18, 255 }
   0xb   : > { %v1803_v0 = vld [vmem:[%s2077_s1 + $0x20] ss:$0 sps:$4 sm:$0xff]   ;;  %vm539_vm0 = vcmask 1043456   ;;  %v1804_v1 = vld [vmem:[%s2077_s1 + $0x18] sm:$0xff]   ;;  %v1805_v3 = vld [vmem:[%s2077_s1 + $0x10] sm:$0xff]   ;;  %s2081_s18 = smov (!%p163_p3, %s1277_s18), 255 }
   0xc   : > { %1793 = vmatprep.subr.msk.bf16.mxu0 %vm539_vm0, %v1803_v0  ;;  %1794 = vmatprep.subr.msk.bf16.mxu1 %vm539_vm0, %v1803_v0  ;;  %v541_v2 = vsel %vm539_vm0, %v1803_v0, 0  ;;  %v1806_v4 = vld [vmem:[%s2077_s1 + $0x8] sm:$0xff]   ;;  %s1278_s23 = sshll.u32 %s2081_s18, 2  ;;  %vm442_vm1 = vcmask 588800   ;;  %v1807_v7 = vld [vmem:[%s2077_s1] sm:$0xff]  }
   0xd   : > { %1710 = vmatpush3.bf16.msra.mxu0 %v541_v2  ;;  %1788 = vmatpush3.bf16.msra.mxu1 %v541_v2  ;;  %s1896_s26 = scalar_lea.vmem %s2076_s0, %s1278_s23  ;;  %v1968_v38 = vld [vmem:[%s2078_s2] ss:$0 sm:$0xff]  ;;  %s1983_s6 = scalar_lea.vmem %s2079_s3, %s1278_s23 }
   0xe   : > { %1711 = vmatprep.subr.bf16.mxu0 %v1804_v1  ;;  %1784 = vmatprep.subr.bf16.mxu1 %v1804_v1  ;;  %v1808_v5 = vld [vmem:[%s1896_s26] sm:$0xff]   ;;  %v1810_v8 = vld [vmem:[%s1896_s26 + $0x8] sm:$0xff]   ;;  %v1812_v10 = vld [vmem:[%s1896_s26 + $0x10] sm:$0xff]  }
   0xf   : > { %v1809_v6 = vld [vmem:[%s1896_s26 + $0x80] sm:$0xff]   ;;  %1719 = vmatprep.mubr.msk.bf16.mxu0 %vm442_vm1, %v1808_v5  ;;  %v1811_v9 = vld [vmem:[%s1896_s26 + $0x88] sm:$0xff]   ;;  %v1813_v11 = vld [vmem:[%s1896_s26 + $0x90] sm:$0xff]  }
  0x10   : > { %1751 = vmatprep.mubr.msk.bf16.mxu1 %vm442_vm1, %v1809_v6  ;;  %v1814_v12 = vld [vmem:[%s1896_s26 + $0x18] sm:$0xff]   ;;  %v1816_v14 = vld [vmem:[%s1896_s26 + $0x20] sm:$0xff]   ;;  %v1818_v16 = vld [vmem:[%s1896_s26 + $0x28] sm:$0xff]  }
  0x11   : > { %1712 = vmatpush3.bf16.msra.mxu0 %v1804_v1  ;;  %1789 = vmatpush3.bf16.msra.mxu1 %v1804_v1  ;;  %v1815_v13 = vld [vmem:[%s1896_s26 + $0x98] sm:$0xff]   ;;  %v1817_v15 = vld [vmem:[%s1896_s26 + $0xa0] sm:$0xff]   ;;  %v1819_v17 = vld [vmem:[%s1896_s26 + $0xa8] sm:$0xff]  }
  0x12   : > { %1713 = vmatprep.subr.bf16.mxu0 %v1805_v3  ;;  %1785 = vmatprep.subr.bf16.mxu1 %v1805_v3  ;;  %v1820_v18 = vld [vmem:[%s1896_s26 + $0x30] sm:$0xff]   ;;  %v1822_v20 = vld [vmem:[%s1896_s26 + $0x38] sm:$0xff]   ;;  %v1824_v22 = vld [vmem:[%s1896_s26 + $0x40] sm:$0xff]  }
  0x13   : > { %v1821_v19 = vld [vmem:[%s1896_s26 + $0xb0] sm:$0xff]   ;;  %v1823_v21 = vld [vmem:[%s1896_s26 + $0xb8] sm:$0xff]   ;;  %v1825_v23 = vld [vmem:[%s1896_s26 + $0xc0] sm:$0xff]  }
  0x14   : > { %v1826_v24 = vld [vmem:[%s1896_s26 + $0x48] sm:$0xff]   ;;  %v1828_v26 = vld [vmem:[%s1896_s26 + $0x50] sm:$0xff]   ;;  %v1830_v28 = vld [vmem:[%s1896_s26 + $0x58] sm:$0xff]  }
  0x15   : > { %1714 = vmatpush3.bf16.msra.mxu0 %v1805_v3  ;;  %1790 = vmatpush3.bf16.msra.mxu1 %v1805_v3  ;;  %v1827_v25 = vld [vmem:[%s1896_s26 + $0xc8] sm:$0xff]   ;;  %v1829_v27 = vld [vmem:[%s1896_s26 + $0xd0] sm:$0xff]   ;;  %v1831_v29 = vld [vmem:[%s1896_s26 + $0xd8] sm:$0xff]  }
  0x16   : > { %1715 = vmatprep.subr.bf16.mxu0 %v1806_v4  ;;  %1786 = vmatprep.subr.bf16.mxu1 %v1806_v4  ;;  %v1832_v30 = vld [vmem:[%s1896_s26 + $0x60] sm:$0xff]   ;;  %v1834_v32 = vld [vmem:[%s1896_s26 + $0x68] sm:$0xff]   ;;  %v1836_v34 = vld [vmem:[%s1896_s26 + $0x70] sm:$0xff]  }
  0x17   : > { %v1833_v31 = vld [vmem:[%s1896_s26 + $0xe0] sm:$0xff]   ;;  %v1835_v33 = vld [vmem:[%s1896_s26 + $0xe8] sm:$0xff]   ;;  %v1837_v35 = vld [vmem:[%s1896_s26 + $0xf0] sm:$0xff]  }
  0x18   : > { %v1838_v36 = vld [vmem:[%s1896_s26 + $0x78] sm:$0xff]  }
  0x19   : > { %1716 = vmatpush3.bf16.msra.mxu0 %v1806_v4  ;;  %1791 = vmatpush3.bf16.msra.mxu1 %v1806_v4  ;;  %v1839_v37 = vld [vmem:[%s1896_s26 + $0xf8] sm:$0xff]  }
  0x1a   : > { %1717 = vmatprep.subr.bf16.mxu0 %v1807_v7  ;;  %1787 = vmatprep.subr.bf16.mxu1 %v1807_v7 }
  0x1d   : > { %1718 = vmatpush3.bf16.msra.mxu0 %v1807_v7  ;;  %1792 = vmatpush3.bf16.msra.mxu1 %v1807_v7 }
  0x20   : > { %1720 = vmatmul.mubr.msk.bf16.vlgmr.msra.gmra.mxu0 %vm442_vm1, %v1810_v8  ;;  %1752 = vmatmul.mubr.msk.bf16.vlgmr.msra.gmra.mxu1 %vm442_vm1, %v1811_v9 }
  0x21   : > { %1723 = vmatprep.mubr.msk.bf16.mxu0 %vm442_vm1, %v1812_v10  ;;  %1755 = vmatprep.mubr.msk.bf16.mxu1 %vm442_vm1, %v1813_v11 }
  0x28   : > { %1724 = vmatmul.mubr.msk.bf16.gmra.mxu0 %vm442_vm1, %v1814_v12  ;;  %1756 = vmatmul.mubr.msk.bf16.gmra.mxu1 %vm442_vm1, %v1815_v13 }
  0x29   : > { %1727 = vmatprep.mubr.msk.bf16.mxu0 %vm442_vm1, %v1816_v14  ;;  %1759 = vmatprep.mubr.msk.bf16.mxu1 %vm442_vm1, %v1817_v15 }
  0x30   : > { %1728 = vmatmul.mubr.msk.bf16.gmra.mxu0 %vm442_vm1, %v1818_v16  ;;  %1760 = vmatmul.mubr.msk.bf16.gmra.mxu1 %vm442_vm1, %v1819_v17 }
  0x31   : > { %1731 = vmatprep.mubr.msk.bf16.mxu0 %vm442_vm1, %v1820_v18  ;;  %1763 = vmatprep.mubr.msk.bf16.mxu1 %vm442_vm1, %v1821_v19 }
  0x38   : > { %1732 = vmatmul.mubr.msk.bf16.gmra.mxu0 %vm442_vm1, %v1822_v20  ;;  %1764 = vmatmul.mubr.msk.bf16.gmra.mxu1 %vm442_vm1, %v1823_v21 }
  0x39   : > { %1735 = vmatprep.mubr.msk.bf16.mxu0 %vm442_vm1, %v1824_v22  ;;  %1767 = vmatprep.mubr.msk.bf16.mxu1 %vm442_vm1, %v1825_v23 }
  0x40   : > { %1736 = vmatmul.mubr.msk.bf16.gmra.mxu0 %vm442_vm1, %v1826_v24  ;;  %1768 = vmatmul.mubr.msk.bf16.gmra.mxu1 %vm442_vm1, %v1827_v25 }
  0x41   : > { %1739 = vmatprep.mubr.msk.bf16.mxu0 %vm442_vm1, %v1828_v26  ;;  %1771 = vmatprep.mubr.msk.bf16.mxu1 %vm442_vm1, %v1829_v27 }
  0x48   : > { %1740 = vmatmul.mubr.msk.bf16.gmra.mxu0 %vm442_vm1, %v1830_v28  ;;  %1772 = vmatmul.mubr.msk.bf16.gmra.mxu1 %vm442_vm1, %v1831_v29 }
  0x49   : > { %1743 = vmatprep.mubr.msk.bf16.mxu0 %vm442_vm1, %v1832_v30  ;;  %1775 = vmatprep.mubr.msk.bf16.mxu1 %vm442_vm1, %v1833_v31 }
  0x50   : > { %1744 = vmatmul.mubr.msk.bf16.gmra.mxu0 %vm442_vm1, %v1834_v32  ;;  %1776 = vmatmul.mubr.msk.bf16.gmra.mxu1 %vm442_vm1, %v1835_v33 }
  0x51   : > { %1747 = vmatprep.mubr.msk.bf16.mxu0 %vm442_vm1, %v1836_v34  ;;  %1779 = vmatprep.mubr.msk.bf16.mxu1 %vm442_vm1, %v1837_v35 }
  0x58   : > { %1748 = vmatmul.mubr.msk.bf16.gmra.mxu0 %vm442_vm1, %v1838_v36  ;;  %1780 = vmatmul.mubr.msk.bf16.gmra.mxu1 %vm442_vm1, %v1839_v37 }
  0xe0   : > { %v1721_v39 = vpop.f32.mrf.mxu0  ;;  %v1753_v40 = vpop.f32.mrf.mxu1 }
  0xe1   : > { %v586_v41 = vadd.f32 %v1721_v39, %v1968_v38  ;;  %v714_v42 = vadd.f32 %v1753_v40, %v1968_v38 }
  0xe2   : > { %v577_v43 = vpop.f32.mrf.mxu0  ;;  %v705_v44 = vpop.f32.mrf.mxu1 }
  0xe3   : > { %v578_v45 = vadd.f32 %v1968_v38, %v577_v43  ;;  %v706_v46 = vadd.f32 %v1968_v38, %v705_v44  ;;  %v834_v51 = vmax.f32 %v586_v41, 0.0  ;;  %v866_v52 = vmax.f32 %v714_v42, 0.0 }
  0xe4   : > { %v1722_v47 = vpop.f32.mrf.mxu0  ;;  %v1754_v48 = vpop.f32.mrf.mxu1 }
  0xe5   : > { %v589_v49 = vadd.f32 %v1722_v47, %v1968_v38  ;;  %v717_v50 = vadd.f32 %v1754_v48, %v1968_v38  ;;  %v832_v59 = vmax.f32 %v578_v45, 0.0  ;;  %v864_v60 = vmax.f32 %v706_v46, 0.0 }
  0xe6   : > { %v580_v53 = vpop.f32.mrf.mxu0  ;;  %v708_v54 = vpop.f32.mrf.mxu1 }
  0xe7   : > { %v835_v55 = vmax.f32 %v589_v49, 0.0  ;;  %v867_v56 = vmax.f32 %v717_v50, 0.0  ;;  %v581_v57 = vadd.f32 %v1968_v38, %v580_v53  ;;  %v709_v58 = vadd.f32 %v1968_v38, %v708_v54 }
  0xe8   : > { %v1725_v61 = vpop.f32.mrf.mxu0  ;;  %v1757_v62 = vpop.f32.mrf.mxu1 }
  0xe9   : > { %v1489_v63 = vpack.c.bf16 %v835_v55, %v834_v51  ;;  %v1569_v0 = vpack.c.bf16 %v867_v56, %v866_v52  ;;  %v833_v1 = vmax.f32 %v581_v57, 0.0  ;;  %v865_v2 = vmax.f32 %v709_v58, 0.0 }
  0xea   : > { %v602_v3 = vadd.f32 %v1725_v61, %v1968_v38  ;;  %v730_v4 = vadd.f32 %v1757_v62, %v1968_v38  ;;  %v593_v5 = vpop.f32.mrf.mxu0  ;;  %v721_v6 = vpop.f32.mrf.mxu1 }
  0xeb   : > { %1641 = vst [vmem:[%s1983_s6 + $0x8] sm:$0xff] %v1489_v63   ;;  %1657 = vst [vmem:[%s1983_s6 + $0x88] sm:$0xff] %v1569_v0   ;;  %v1484_v7 = vpack.c.bf16 %v833_v1, %v832_v59  ;;  %v1564_v8 = vpack.c.bf16 %v865_v2, %v864_v60  ;;  %v594_v9 = vadd.f32 %v1968_v38, %v593_v5 }
  0xec   : > { %v722_v10 = vadd.f32 %v1968_v38, %v721_v6  ;;  %v1726_v11 = vpop.f32.mrf.mxu0  ;;  %v1758_v12 = vpop.f32.mrf.mxu1  ;;  %v838_v15 = vmax.f32 %v602_v3, 0.0  ;;  %v870_v16 = vmax.f32 %v730_v4, 0.0 }
  0xed   : > { %1485 = vst [vmem:[%s1983_s6] sm:$0xff] %v1484_v7   ;;  %1656 = vst [vmem:[%s1983_s6 + $0x80] sm:$0xff] %v1564_v8   ;;  %v605_v13 = vadd.f32 %v1726_v11, %v1968_v38  ;;  %v733_v14 = vadd.f32 %v1758_v12, %v1968_v38  ;;  %v836_v23 = vmax.f32 %v594_v9, 0.0 }
  0xee   : > { %v596_v17 = vpop.f32.mrf.mxu0  ;;  %v724_v18 = vpop.f32.mrf.mxu1  ;;  %v868_v24 = vmax.f32 %v722_v10, 0.0 }
  0xef   : > { %v839_v19 = vmax.f32 %v605_v13, 0.0  ;;  %v871_v20 = vmax.f32 %v733_v14, 0.0  ;;  %v597_v21 = vadd.f32 %v1968_v38, %v596_v17  ;;  %v725_v22 = vadd.f32 %v1968_v38, %v724_v18 }
  0xf0   : > { %v1729_v25 = vpop.f32.mrf.mxu0  ;;  %v1761_v26 = vpop.f32.mrf.mxu1 }
  0xf1   : > { %v1499_v27 = vpack.c.bf16 %v839_v19, %v838_v15  ;;  %v1579_v28 = vpack.c.bf16 %v871_v20, %v870_v16  ;;  %v837_v29 = vmax.f32 %v597_v21, 0.0  ;;  %v869_v30 = vmax.f32 %v725_v22, 0.0 }
  0xf2   : > { %v618_v31 = vadd.f32 %v1729_v25, %v1968_v38  ;;  %v746_v32 = vadd.f32 %v1761_v26, %v1968_v38  ;;  %v609_v33 = vpop.f32.mrf.mxu0  ;;  %v737_v34 = vpop.f32.mrf.mxu1 }
  0xf3   : > { %1643 = vst [vmem:[%s1983_s6 + $0x18] sm:$0xff] %v1499_v27   ;;  %1659 = vst [vmem:[%s1983_s6 + $0x98] sm:$0xff] %v1579_v28   ;;  %v1494_v35 = vpack.c.bf16 %v837_v29, %v836_v23  ;;  %v1574_v36 = vpack.c.bf16 %v869_v30, %v868_v24  ;;  %v610_v37 = vadd.f32 %v1968_v38, %v609_v33 }
  0xf4   : > { %v738_v39 = vadd.f32 %v1968_v38, %v737_v34  ;;  %v1730_v40 = vpop.f32.mrf.mxu0  ;;  %v1762_v41 = vpop.f32.mrf.mxu1  ;;  %v842_v44 = vmax.f32 %v618_v31, 0.0  ;;  %v874_v45 = vmax.f32 %v746_v32, 0.0 }
  0xf5   : > { %1642 = vst [vmem:[%s1983_s6 + $0x10] sm:$0xff] %v1494_v35   ;;  %1658 = vst [vmem:[%s1983_s6 + $0x90] sm:$0xff] %v1574_v36   ;;  %v621_v42 = vadd.f32 %v1730_v40, %v1968_v38  ;;  %v749_v43 = vadd.f32 %v1762_v41, %v1968_v38  ;;  %v840_v52 = vmax.f32 %v610_v37, 0.0 }
  0xf6   : > { %v612_v46 = vpop.f32.mrf.mxu0  ;;  %v740_v47 = vpop.f32.mrf.mxu1  ;;  %v872_v53 = vmax.f32 %v738_v39, 0.0 }
  0xf7   : > { %v843_v48 = vmax.f32 %v621_v42, 0.0  ;;  %v875_v49 = vmax.f32 %v749_v43, 0.0  ;;  %v613_v50 = vadd.f32 %v1968_v38, %v612_v46  ;;  %v741_v51 = vadd.f32 %v1968_v38, %v740_v47 }
  0xf8   : > { %v1733_v54 = vpop.f32.mrf.mxu0  ;;  %v1765_v55 = vpop.f32.mrf.mxu1 }
  0xf9   : > { %v1509_v56 = vpack.c.bf16 %v843_v48, %v842_v44  ;;  %v1589_v57 = vpack.c.bf16 %v875_v49, %v874_v45  ;;  %v841_v58 = vmax.f32 %v613_v50, 0.0  ;;  %v873_v59 = vmax.f32 %v741_v51, 0.0 }
  0xfa   : > { %v634_v60 = vadd.f32 %v1733_v54, %v1968_v38  ;;  %v762_v61 = vadd.f32 %v1765_v55, %v1968_v38  ;;  %v625_v62 = vpop.f32.mrf.mxu0  ;;  %v753_v63 = vpop.f32.mrf.mxu1 }
  0xfb   : > { %1645 = vst [vmem:[%s1983_s6 + $0x28] sm:$0xff] %v1509_v56   ;;  %1661 = vst [vmem:[%s1983_s6 + $0xa8] sm:$0xff] %v1589_v57   ;;  %v1504_v0 = vpack.c.bf16 %v841_v58, %v840_v52  ;;  %v1584_v1 = vpack.c.bf16 %v873_v59, %v872_v53  ;;  %v626_v2 = vadd.f32 %v1968_v38, %v625_v62 }
  0xfc   : > { %v754_v3 = vadd.f32 %v1968_v38, %v753_v63  ;;  %v1734_v4 = vpop.f32.mrf.mxu0  ;;  %v1766_v5 = vpop.f32.mrf.mxu1  ;;  %v846_v8 = vmax.f32 %v634_v60, 0.0  ;;  %v878_v9 = vmax.f32 %v762_v61, 0.0 }
  0xfd   : > { %1644 = vst [vmem:[%s1983_s6 + $0x20] sm:$0xff] %v1504_v0   ;;  %1660 = vst [vmem:[%s1983_s6 + $0xa0] sm:$0xff] %v1584_v1   ;;  %v637_v6 = vadd.f32 %v1734_v4, %v1968_v38  ;;  %v765_v7 = vadd.f32 %v1766_v5, %v1968_v38  ;;  %v844_v16 = vmax.f32 %v626_v2, 0.0 }
  0xfe   : > { %v628_v10 = vpop.f32.mrf.mxu0  ;;  %v756_v11 = vpop.f32.mrf.mxu1  ;;  %v876_v17 = vmax.f32 %v754_v3, 0.0 }
  0xff   : > { %v847_v12 = vmax.f32 %v637_v6, 0.0  ;;  %v879_v13 = vmax.f32 %v765_v7, 0.0  ;;  %v629_v14 = vadd.f32 %v1968_v38, %v628_v10  ;;  %v757_v15 = vadd.f32 %v1968_v38, %v756_v11 }
 0x100   : > { %v1737_v18 = vpop.f32.mrf.mxu0  ;;  %v1769_v19 = vpop.f32.mrf.mxu1 }
 0x101   : > { %v1519_v20 = vpack.c.bf16 %v847_v12, %v846_v8  ;;  %v1599_v21 = vpack.c.bf16 %v879_v13, %v878_v9  ;;  %v845_v22 = vmax.f32 %v629_v14, 0.0  ;;  %v877_v23 = vmax.f32 %v757_v15, 0.0 }
 0x102   : > { %v650_v24 = vadd.f32 %v1737_v18, %v1968_v38  ;;  %v778_v25 = vadd.f32 %v1769_v19, %v1968_v38  ;;  %v641_v26 = vpop.f32.mrf.mxu0  ;;  %v769_v27 = vpop.f32.mrf.mxu1 }
 0x103   : > { %1647 = vst [vmem:[%s1983_s6 + $0x38] sm:$0xff] %v1519_v20   ;;  %1663 = vst [vmem:[%s1983_s6 + $0xb8] sm:$0xff] %v1599_v21   ;;  %v1514_v28 = vpack.c.bf16 %v845_v22, %v844_v16  ;;  %v1594_v29 = vpack.c.bf16 %v877_v23, %v876_v17  ;;  %v642_v30 = vadd.f32 %v1968_v38, %v641_v26 }
 0x104   : > { %v770_v31 = vadd.f32 %v1968_v38, %v769_v27  ;;  %v1738_v32 = vpop.f32.mrf.mxu0  ;;  %v1770_v33 = vpop.f32.mrf.mxu1  ;;  %v850_v36 = vmax.f32 %v650_v24, 0.0  ;;  %v882_v37 = vmax.f32 %v778_v25, 0.0 }
 0x105   : > { %1646 = vst [vmem:[%s1983_s6 + $0x30] sm:$0xff] %v1514_v28   ;;  %1662 = vst [vmem:[%s1983_s6 + $0xb0] sm:$0xff] %v1594_v29   ;;  %v653_v34 = vadd.f32 %v1738_v32, %v1968_v38  ;;  %v781_v35 = vadd.f32 %v1770_v33, %v1968_v38  ;;  %v848_v45 = vmax.f32 %v642_v30, 0.0 }
 0x106   : > { %v644_v39 = vpop.f32.mrf.mxu0  ;;  %v772_v40 = vpop.f32.mrf.mxu1  ;;  %v880_v46 = vmax.f32 %v770_v31, 0.0 }
 0x107   : > { %v851_v41 = vmax.f32 %v653_v34, 0.0  ;;  %v883_v42 = vmax.f32 %v781_v35, 0.0  ;;  %v645_v43 = vadd.f32 %v1968_v38, %v644_v39  ;;  %v773_v44 = vadd.f32 %v1968_v38, %v772_v40 }
 0x108   : > { %v1741_v47 = vpop.f32.mrf.mxu0  ;;  %v1773_v48 = vpop.f32.mrf.mxu1 }
 0x109   : > { %v1529_v49 = vpack.c.bf16 %v851_v41, %v850_v36  ;;  %v1609_v50 = vpack.c.bf16 %v883_v42, %v882_v37  ;;  %v849_v51 = vmax.f32 %v645_v43, 0.0  ;;  %v881_v52 = vmax.f32 %v773_v44, 0.0 }
 0x10a   : > { %v666_v53 = vadd.f32 %v1741_v47, %v1968_v38  ;;  %v794_v54 = vadd.f32 %v1773_v48, %v1968_v38  ;;  %v657_v55 = vpop.f32.mrf.mxu0  ;;  %v785_v56 = vpop.f32.mrf.mxu1 }
 0x10b   : > { %1649 = vst [vmem:[%s1983_s6 + $0x48] sm:$0xff] %v1529_v49   ;;  %1665 = vst [vmem:[%s1983_s6 + $0xc8] sm:$0xff] %v1609_v50   ;;  %v1524_v57 = vpack.c.bf16 %v849_v51, %v848_v45  ;;  %v1604_v58 = vpack.c.bf16 %v881_v52, %v880_v46  ;;  %v658_v59 = vadd.f32 %v1968_v38, %v657_v55 }
 0x10c   : > { %v786_v60 = vadd.f32 %v1968_v38, %v785_v56  ;;  %v1742_v61 = vpop.f32.mrf.mxu0  ;;  %v1774_v62 = vpop.f32.mrf.mxu1  ;;  %v854_v1 = vmax.f32 %v666_v53, 0.0  ;;  %v886_v2 = vmax.f32 %v794_v54, 0.0 }
 0x10d   : > { %1648 = vst [vmem:[%s1983_s6 + $0x40] sm:$0xff] %v1524_v57   ;;  %1664 = vst [vmem:[%s1983_s6 + $0xc0] sm:$0xff] %v1604_v58   ;;  %v669_v63 = vadd.f32 %v1742_v61, %v1968_v38  ;;  %v797_v0 = vadd.f32 %v1774_v62, %v1968_v38  ;;  %v852_v9 = vmax.f32 %v658_v59, 0.0 }
 0x10e   : > { %v660_v3 = vpop.f32.mrf.mxu0  ;;  %v788_v4 = vpop.f32.mrf.mxu1  ;;  %v884_v10 = vmax.f32 %v786_v60, 0.0 }
 0x10f   : > { %v855_v5 = vmax.f32 %v669_v63, 0.0  ;;  %v887_v6 = vmax.f32 %v797_v0, 0.0  ;;  %v661_v7 = vadd.f32 %v1968_v38, %v660_v3  ;;  %v789_v8 = vadd.f32 %v1968_v38, %v788_v4 }
 0x110   : > { %v1745_v11 = vpop.f32.mrf.mxu0  ;;  %v1777_v12 = vpop.f32.mrf.mxu1 }
 0x111   : > { %v1539_v13 = vpack.c.bf16 %v855_v5, %v854_v1  ;;  %v1619_v14 = vpack.c.bf16 %v887_v6, %v886_v2  ;;  %v853_v15 = vmax.f32 %v661_v7, 0.0  ;;  %v885_v16 = vmax.f32 %v789_v8, 0.0 }
 0x112   : > { %v682_v17 = vadd.f32 %v1745_v11, %v1968_v38  ;;  %v810_v18 = vadd.f32 %v1777_v12, %v1968_v38  ;;  %v673_v19 = vpop.f32.mrf.mxu0  ;;  %v801_v20 = vpop.f32.mrf.mxu1 }
 0x113   : > { %1651 = vst [vmem:[%s1983_s6 + $0x58] sm:$0xff] %v1539_v13   ;;  %1667 = vst [vmem:[%s1983_s6 + $0xd8] sm:$0xff] %v1619_v14   ;;  %v1534_v21 = vpack.c.bf16 %v853_v15, %v852_v9  ;;  %v1614_v22 = vpack.c.bf16 %v885_v16, %v884_v10  ;;  %v674_v23 = vadd.f32 %v1968_v38, %v673_v19 }
 0x114   : > { %v802_v24 = vadd.f32 %v1968_v38, %v801_v20  ;;  %v1746_v25 = vpop.f32.mrf.mxu0  ;;  %v1778_v26 = vpop.f32.mrf.mxu1  ;;  %v858_v29 = vmax.f32 %v682_v17, 0.0  ;;  %v890_v30 = vmax.f32 %v810_v18, 0.0 }
 0x115   : > { %1650 = vst [vmem:[%s1983_s6 + $0x50] sm:$0xff] %v1534_v21   ;;  %1666 = vst [vmem:[%s1983_s6 + $0xd0] sm:$0xff] %v1614_v22   ;;  %v685_v27 = vadd.f32 %v1746_v25, %v1968_v38  ;;  %v813_v28 = vadd.f32 %v1778_v26, %v1968_v38  ;;  %v856_v37 = vmax.f32 %v674_v23, 0.0 }
 0x116   : > { %v676_v31 = vpop.f32.mrf.mxu0  ;;  %v804_v32 = vpop.f32.mrf.mxu1  ;;  %v888_v39 = vmax.f32 %v802_v24, 0.0 }
 0x117   : > { %v859_v33 = vmax.f32 %v685_v27, 0.0  ;;  %v891_v34 = vmax.f32 %v813_v28, 0.0  ;;  %v677_v35 = vadd.f32 %v1968_v38, %v676_v31  ;;  %v805_v36 = vadd.f32 %v1968_v38, %v804_v32 }
 0x118   : > { %v1749_v40 = vpop.f32.mrf.mxu0  ;;  %v1781_v41 = vpop.f32.mrf.mxu1 }
 0x119   : > { %v1549_v42 = vpack.c.bf16 %v859_v33, %v858_v29  ;;  %v1629_v43 = vpack.c.bf16 %v891_v34, %v890_v30  ;;  %v857_v44 = vmax.f32 %v677_v35, 0.0  ;;  %v889_v45 = vmax.f32 %v805_v36, 0.0 }
 0x11a   : > { %v698_v46 = vadd.f32 %v1749_v40, %v1968_v38  ;;  %v826_v47 = vadd.f32 %v1781_v41, %v1968_v38  ;;  %v689_v48 = vpop.f32.mrf.mxu0  ;;  %v817_v49 = vpop.f32.mrf.mxu1 }
 0x11b   : > { %1653 = vst [vmem:[%s1983_s6 + $0x68] sm:$0xff] %v1549_v42   ;;  %1669 = vst [vmem:[%s1983_s6 + $0xe8] sm:$0xff] %v1629_v43   ;;  %v1544_v50 = vpack.c.bf16 %v857_v44, %v856_v37  ;;  %v1624_v51 = vpack.c.bf16 %v889_v45, %v888_v39  ;;  %v690_v52 = vadd.f32 %v1968_v38, %v689_v48 }
 0x11c   : > { %v818_v53 = vadd.f32 %v1968_v38, %v817_v49  ;;  %v1750_v54 = vpop.f32.mrf.mxu0  ;;  %v1782_v55 = vpop.f32.mrf.mxu1  ;;  %v862_v58 = vmax.f32 %v698_v46, 0.0  ;;  %v894_v59 = vmax.f32 %v826_v47, 0.0 }
 0x11d   : > { %1652 = vst [vmem:[%s1983_s6 + $0x60] sm:$0xff] %v1544_v50   ;;  %1668 = vst [vmem:[%s1983_s6 + $0xe0] sm:$0xff] %v1624_v51   ;;  %v701_v56 = vadd.f32 %v1750_v54, %v1968_v38  ;;  %v829_v57 = vadd.f32 %v1782_v55, %v1968_v38  ;;  %v860_v2 = vmax.f32 %v690_v52, 0.0 }
 0x11e   : > { %v692_v60 = vpop.f32.mrf.mxu0  ;;  %v820_v61 = vpop.f32.mrf.mxu1  ;;  %v892_v3 = vmax.f32 %v818_v53, 0.0 }
 0x11f   : > { %v863_v62 = vmax.f32 %v701_v56, 0.0  ;;  %v895_v63 = vmax.f32 %v829_v57, 0.0  ;;  %v693_v0 = vadd.f32 %v1968_v38, %v692_v60  ;;  %v821_v1 = vadd.f32 %v1968_v38, %v820_v61 }
 0x121   : > { %v1559_v4 = vpack.c.bf16 %v863_v62, %v862_v58  ;;  %v1639_v5 = vpack.c.bf16 %v895_v63, %v894_v59  ;;  %v861_v6 = vmax.f32 %v693_v0, 0.0  ;;  %v893_v7 = vmax.f32 %v821_v1, 0.0 }
 0x123   : > { %1655 = vst [vmem:[%s1983_s6 + $0x78] sm:$0xff] %v1559_v4   ;;  %1671 = vst [vmem:[%s1983_s6 + $0xf8] sm:$0xff] %v1639_v5   ;;  %v1554_v8 = vpack.c.bf16 %v861_v6, %v860_v2  ;;  %v1634_v9 = vpack.c.bf16 %v893_v7, %v892_v3 }
 0x125   : > { %1654 = vst [vmem:[%s1983_s6 + $0x70] sm:$0xff] %v1554_v8   ;;  %1670 = vst [vmem:[%s1983_s6 + $0xf0] sm:$0xff] %v1634_v9  }
 0x126 PF: > { %s13_s12 = sadd.s32 1, %s1846_s12  }
 0x127   : > { %p10_p4 = scmp.ge.s32.totalorder %s13_s12, 6  }
 0x129   :  { %12 = sbr.rel (!%p10_p4) target bundleno = 1 (0x1), region = 62 }

// kernel: segment_net_forward.30
= control target key start
LH: loop header
LB: loop body
LE: loop exit
PB: predicated region body
PF: predicated region fallthrough
CT: control target
= control target key end

     0   :  { %s1868_s12 = smov 0   ;;  %s2076_s0 = inlined_call_operand.vmem [shape: bf16[8192,72], index: 0, kind: input, shape index: {}]   ;;  %s2077_s1 = inlined_call_operand.vmem [shape: bf16[72,128], index: 1, kind: input, shape index: {}]   ;;  %s2078_s2 = inlined_call_operand.vmem [shape: f32[1,128], index: 2, kind: input, shape index: {}]   ;;  %s2079_s3 = inlined_call_operand.vmem [shape: bf16[8192,128], index: 3, kind: output, shape index: {}]  }
   0x1 LB: > { %s1272_s13 = sadd.s32 4294967295, %s1846_s12   ;;  %p1276_p0 = scmp.ge.s32.totalorder %s1846_s12, 1  ;;  %s1846_s12 = sphi %s1868_s12, %s13_s12  }
   0x2   : > { %p138_p1 = scmp.lt.s32.totalorder %s1846_s12, 17 }
   0x4   : > { %p139_p2 = pnand %p1276_p0, %p138_p1 }
   0x5   : > { %s1277_s18 = sshll.u32 (!%p139_p2), %s1272_s13, 6 }
   0x6   : > { %142 = sbr.rel (%p139_p2) target bundleno = 294 (0x126), region = 32  ;;  %p163_p3 = scmp.lt.s32.totalorder (!%p139_p2), %s1277_s18, 1023 }
   0xb   : > { %v1803_v0 = vld [vmem:[%s2077_s1 + $0x20] ss:$0 sps:$4 sm:$0xff]   ;;  %vm539_vm0 = vcmask 1043456   ;;  %v1804_v1 = vld [vmem:[%s2077_s1 + $0x18] sm:$0xff]   ;;  %v1805_v3 = vld [vmem:[%s2077_s1 + $0x10] sm:$0xff]   ;;  %s2081_s18 = smov (!%p163_p3, %s1277_s18), 1023 }
   0xc   : > { %1793 = vmatprep.subr.msk.bf16.mxu0 %vm539_vm0, %v1803_v0  ;;  %1794 = vmatprep.subr.msk.bf16.mxu1 %vm539_vm0, %v1803_v0  ;;  %v541_v2 = vsel %vm539_vm0, %v1803_v0, 0  ;;  %v1806_v4 = vld [vmem:[%s2077_s1 + $0x8] sm:$0xff]   ;;  %s1278_s23 = sshll.u32 %s2081_s18, 2  ;;  %vm442_vm1 = vcmask 588800   ;;  %v1807_v7 = vld [vmem:[%s2077_s1] sm:$0xff]  }
   0xd   : > { %1710 = vmatpush3.bf16.msra.mxu0 %v541_v2  ;;  %1788 = vmatpush3.bf16.msra.mxu1 %v541_v2  ;;  %s1896_s26 = scalar_lea.vmem %s2076_s0, %s1278_s23  ;;  %v1968_v38 = vld [vmem:[%s2078_s2] ss:$0 sm:$0xff]  ;;  %s1983_s6 = scalar_lea.vmem %s2079_s3, %s1278_s23 }
   0xe   : > { %1711 = vmatprep.subr.bf16.mxu0 %v1804_v1  ;;  %1784 = vmatprep.subr.bf16.mxu1 %v1804_v1  ;;  %v1808_v5 = vld [vmem:[%s1896_s26] sm:$0xff]   ;;  %v1810_v8 = vld [vmem:[%s1896_s26 + $0x8] sm:$0xff]   ;;  %v1812_v10 = vld [vmem:[%s1896_s26 + $0x10] sm:$0xff]  }
   0xf   : > { %v1809_v6 = vld [vmem:[%s1896_s26 + $0x80] sm:$0xff]   ;;  %1719 = vmatprep.mubr.msk.bf16.mxu0 %vm442_vm1, %v1808_v5  ;;  %v1811_v9 = vld [vmem:[%s1896_s26 + $0x88] sm:$0xff]   ;;  %v1813_v11 = vld [vmem:[%s1896_s26 + $0x90] sm:$0xff]  }
  0x10   : > { %1751 = vmatprep.mubr.msk.bf16.mxu1 %vm442_vm1, %v1809_v6  ;;  %v1814_v12 = vld [vmem:[%s1896_s26 + $0x18] sm:$0xff]   ;;  %v1816_v14 = vld [vmem:[%s1896_s26 + $0x20] sm:$0xff]   ;;  %v1818_v16 = vld [vmem:[%s1896_s26 + $0x28] sm:$0xff]  }
  0x11   : > { %1712 = vmatpush3.bf16.msra.mxu0 %v1804_v1  ;;  %1789 = vmatpush3.bf16.msra.mxu1 %v1804_v1  ;;  %v1815_v13 = vld [vmem:[%s1896_s26 + $0x98] sm:$0xff]   ;;  %v1817_v15 = vld [vmem:[%s1896_s26 + $0xa0] sm:$0xff]   ;;  %v1819_v17 = vld [vmem:[%s1896_s26 + $0xa8] sm:$0xff]  }
  0x12   : > { %1713 = vmatprep.subr.bf16.mxu0 %v1805_v3  ;;  %1785 = vmatprep.subr.bf16.mxu1 %v1805_v3  ;;  %v1820_v18 = vld [vmem:[%s1896_s26 + $0x30] sm:$0xff]   ;;  %v1822_v20 = vld [vmem:[%s1896_s26 + $0x38] sm:$0xff]   ;;  %v1824_v22 = vld [vmem:[%s1896_s26 + $0x40] sm:$0xff]  }
  0x13   : > { %v1821_v19 = vld [vmem:[%s1896_s26 + $0xb0] sm:$0xff]   ;;  %v1823_v21 = vld [vmem:[%s1896_s26 + $0xb8] sm:$0xff]   ;;  %v1825_v23 = vld [vmem:[%s1896_s26 + $0xc0] sm:$0xff]  }
  0x14   : > { %v1826_v24 = vld [vmem:[%s1896_s26 + $0x48] sm:$0xff]   ;;  %v1828_v26 = vld [vmem:[%s1896_s26 + $0x50] sm:$0xff]   ;;  %v1830_v28 = vld [vmem:[%s1896_s26 + $0x58] sm:$0xff]  }
  0x15   : > { %1714 = vmatpush3.bf16.msra.mxu0 %v1805_v3  ;;  %1790 = vmatpush3.bf16.msra.mxu1 %v1805_v3  ;;  %v1827_v25 = vld [vmem:[%s1896_s26 + $0xc8] sm:$0xff]   ;;  %v1829_v27 = vld [vmem:[%s1896_s26 + $0xd0] sm:$0xff]   ;;  %v1831_v29 = vld [vmem:[%s1896_s26 + $0xd8] sm:$0xff]  }
  0x16   : > { %1715 = vmatprep.subr.bf16.mxu0 %v1806_v4  ;;  %1786 = vmatprep.subr.bf16.mxu1 %v1806_v4  ;;  %v1832_v30 = vld [vmem:[%s1896_s26 + $0x60] sm:$0xff]   ;;  %v1834_v32 = vld [vmem:[%s1896_s26 + $0x68] sm:$0xff]   ;;  %v1836_v34 = vld [vmem:[%s1896_s26 + $0x70] sm:$0xff]  }
  0x17   : > { %v1833_v31 = vld [vmem:[%s1896_s26 + $0xe0] sm:$0xff]   ;;  %v1835_v33 = vld [vmem:[%s1896_s26 + $0xe8] sm:$0xff]   ;;  %v1837_v35 = vld [vmem:[%s1896_s26 + $0xf0] sm:$0xff]  }
  0x18   : > { %v1838_v36 = vld [vmem:[%s1896_s26 + $0x78] sm:$0xff]  }
  0x19   : > { %1716 = vmatpush3.bf16.msra.mxu0 %v1806_v4  ;;  %1791 = vmatpush3.bf16.msra.mxu1 %v1806_v4  ;;  %v1839_v37 = vld [vmem:[%s1896_s26 + $0xf8] sm:$0xff]  }
  0x1a   : > { %1717 = vmatprep.subr.bf16.mxu0 %v1807_v7  ;;  %1787 = vmatprep.subr.bf16.mxu1 %v1807_v7 }
  0x1d   : > { %1718 = vmatpush3.bf16.msra.mxu0 %v1807_v7  ;;  %1792 = vmatpush3.bf16.msra.mxu1 %v1807_v7 }
  0x20   : > { %1720 = vmatmul.mubr.msk.bf16.vlgmr.msra.gmra.mxu0 %vm442_vm1, %v1810_v8  ;;  %1752 = vmatmul.mubr.msk.bf16.vlgmr.msra.gmra.mxu1 %vm442_vm1, %v1811_v9 }
  0x21   : > { %1723 = vmatprep.mubr.msk.bf16.mxu0 %vm442_vm1, %v1812_v10  ;;  %1755 = vmatprep.mubr.msk.bf16.mxu1 %vm442_vm1, %v1813_v11 }
  0x28   : > { %1724 = vmatmul.mubr.msk.bf16.gmra.mxu0 %vm442_vm1, %v1814_v12  ;;  %1756 = vmatmul.mubr.msk.bf16.gmra.mxu1 %vm442_vm1, %v1815_v13 }
  0x29   : > { %1727 = vmatprep.mubr.msk.bf16.mxu0 %vm442_vm1, %v1816_v14  ;;  %1759 = vmatprep.mubr.msk.bf16.mxu1 %vm442_vm1, %v1817_v15 }
  0x30   : > { %1728 = vmatmul.mubr.msk.bf16.gmra.mxu0 %vm442_vm1, %v1818_v16  ;;  %1760 = vmatmul.mubr.msk.bf16.gmra.mxu1 %vm442_vm1, %v1819_v17 }
  0x31   : > { %1731 = vmatprep.mubr.msk.bf16.mxu0 %vm442_vm1, %v1820_v18  ;;  %1763 = vmatprep.mubr.msk.bf16.mxu1 %vm442_vm1, %v1821_v19 }
  0x38   : > { %1732 = vmatmul.mubr.msk.bf16.gmra.mxu0 %vm442_vm1, %v1822_v20  ;;  %1764 = vmatmul.mubr.msk.bf16.gmra.mxu1 %vm442_vm1, %v1823_v21 }
  0x39   : > { %1735 = vmatprep.mubr.msk.bf16.mxu0 %vm442_vm1, %v1824_v22  ;;  %1767 = vmatprep.mubr.msk.bf16.mxu1 %vm442_vm1, %v1825_v23 }
  0x40   : > { %1736 = vmatmul.mubr.msk.bf16.gmra.mxu0 %vm442_vm1, %v1826_v24  ;;  %1768 = vmatmul.mubr.msk.bf16.gmra.mxu1 %vm442_vm1, %v1827_v25 }
  0x41   : > { %1739 = vmatprep.mubr.msk.bf16.mxu0 %vm442_vm1, %v1828_v26  ;;  %1771 = vmatprep.mubr.msk.bf16.mxu1 %vm442_vm1, %v1829_v27 }
  0x48   : > { %1740 = vmatmul.mubr.msk.bf16.gmra.mxu0 %vm442_vm1, %v1830_v28  ;;  %1772 = vmatmul.mubr.msk.bf16.gmra.mxu1 %vm442_vm1, %v1831_v29 }
  0x49   : > { %1743 = vmatprep.mubr.msk.bf16.mxu0 %vm442_vm1, %v1832_v30  ;;  %1775 = vmatprep.mubr.msk.bf16.mxu1 %vm442_vm1, %v1833_v31 }
  0x50   : > { %1744 = vmatmul.mubr.msk.bf16.gmra.mxu0 %vm442_vm1, %v1834_v32  ;;  %1776 = vmatmul.mubr.msk.bf16.gmra.mxu1 %vm442_vm1, %v1835_v33 }
  0x51   : > { %1747 = vmatprep.mubr.msk.bf16.mxu0 %vm442_vm1, %v1836_v34  ;;  %1779 = vmatprep.mubr.msk.bf16.mxu1 %vm442_vm1, %v1837_v35 }
  0x58   : > { %1748 = vmatmul.mubr.msk.bf16.gmra.mxu0 %vm442_vm1, %v1838_v36  ;;  %1780 = vmatmul.mubr.msk.bf16.gmra.mxu1 %vm442_vm1, %v1839_v37 }
  0xe0   : > { %v1721_v39 = vpop.f32.mrf.mxu0  ;;  %v1753_v40 = vpop.f32.mrf.mxu1 }
  0xe1   : > { %v586_v41 = vadd.f32 %v1721_v39, %v1968_v38  ;;  %v714_v42 = vadd.f32 %v1753_v40, %v1968_v38 }
  0xe2   : > { %v577_v43 = vpop.f32.mrf.mxu0  ;;  %v705_v44 = vpop.f32.mrf.mxu1 }
  0xe3   : > { %v578_v45 = vadd.f32 %v1968_v38, %v577_v43  ;;  %v706_v46 = vadd.f32 %v1968_v38, %v705_v44  ;;  %v834_v51 = vmax.f32 %v586_v41, 0.0  ;;  %v866_v52 = vmax.f32 %v714_v42, 0.0 }
  0xe4   : > { %v1722_v47 = vpop.f32.mrf.mxu0  ;;  %v1754_v48 = vpop.f32.mrf.mxu1 }
  0xe5   : > { %v589_v49 = vadd.f32 %v1722_v47, %v1968_v38  ;;  %v717_v50 = vadd.f32 %v1754_v48, %v1968_v38  ;;  %v832_v59 = vmax.f32 %v578_v45, 0.0  ;;  %v864_v60 = vmax.f32 %v706_v46, 0.0 }
  0xe6   : > { %v580_v53 = vpop.f32.mrf.mxu0  ;;  %v708_v54 = vpop.f32.mrf.mxu1 }
  0xe7   : > { %v835_v55 = vmax.f32 %v589_v49, 0.0  ;;  %v867_v56 = vmax.f32 %v717_v50, 0.0  ;;  %v581_v57 = vadd.f32 %v1968_v38, %v580_v53  ;;  %v709_v58 = vadd.f32 %v1968_v38, %v708_v54 }
  0xe8   : > { %v1725_v61 = vpop.f32.mrf.mxu0  ;;  %v1757_v62 = vpop.f32.mrf.mxu1 }
  0xe9   : > { %v1489_v63 = vpack.c.bf16 %v835_v55, %v834_v51  ;;  %v1569_v0 = vpack.c.bf16 %v867_v56, %v866_v52  ;;  %v833_v1 = vmax.f32 %v581_v57, 0.0  ;;  %v865_v2 = vmax.f32 %v709_v58, 0.0 }
  0xea   : > { %v602_v3 = vadd.f32 %v1725_v61, %v1968_v38  ;;  %v730_v4 = vadd.f32 %v1757_v62, %v1968_v38  ;;  %v593_v5 = vpop.f32.mrf.mxu0  ;;  %v721_v6 = vpop.f32.mrf.mxu1 }
  0xeb   : > { %1641 = vst [vmem:[%s1983_s6 + $0x8] sm:$0xff] %v1489_v63   ;;  %1657 = vst [vmem:[%s1983_s6 + $0x88] sm:$0xff] %v1569_v0   ;;  %v1484_v7 = vpack.c.bf16 %v833_v1, %v832_v59  ;;  %v1564_v8 = vpack.c.bf16 %v865_v2, %v864_v60  ;;  %v594_v9 = vadd.f32 %v1968_v38, %v593_v5 }
  0xec   : > { %v722_v10 = vadd.f32 %v1968_v38, %v721_v6  ;;  %v1726_v11 = vpop.f32.mrf.mxu0  ;;  %v1758_v12 = vpop.f32.mrf.mxu1  ;;  %v838_v15 = vmax.f32 %v602_v3, 0.0  ;;  %v870_v16 = vmax.f32 %v730_v4, 0.0 }
  0xed   : > { %1485 = vst [vmem:[%s1983_s6] sm:$0xff] %v1484_v7   ;;  %1656 = vst [vmem:[%s1983_s6 + $0x80] sm:$0xff] %v1564_v8   ;;  %v605_v13 = vadd.f32 %v1726_v11, %v1968_v38  ;;  %v733_v14 = vadd.f32 %v1758_v12, %v1968_v38  ;;  %v836_v23 = vmax.f32 %v594_v9, 0.0 }
  0xee   : > { %v596_v17 = vpop.f32.mrf.mxu0  ;;  %v724_v18 = vpop.f32.mrf.mxu1  ;;  %v868_v24 = vmax.f32 %v722_v10, 0.0 }
  0xef   : > { %v839_v19 = vmax.f32 %v605_v13, 0.0  ;;  %v871_v20 = vmax.f32 %v733_v14, 0.0  ;;  %v597_v21 = vadd.f32 %v1968_v38, %v596_v17  ;;  %v725_v22 = vadd.f32 %v1968_v38, %v724_v18 }
  0xf0   : > { %v1729_v25 = vpop.f32.mrf.mxu0  ;;  %v1761_v26 = vpop.f32.mrf.mxu1 }
  0xf1   : > { %v1499_v27 = vpack.c.bf16 %v839_v19, %v838_v15  ;;  %v1579_v28 = vpack.c.bf16 %v871_v20, %v870_v16  ;;  %v837_v29 = vmax.f32 %v597_v21, 0.0  ;;  %v869_v30 = vmax.f32 %v725_v22, 0.0 }
  0xf2   : > { %v618_v31 = vadd.f32 %v1729_v25, %v1968_v38  ;;  %v746_v32 = vadd.f32 %v1761_v26, %v1968_v38  ;;  %v609_v33 = vpop.f32.mrf.mxu0  ;;  %v737_v34 = vpop.f32.mrf.mxu1 }
  0xf3   : > { %1643 = vst [vmem:[%s1983_s6 + $0x18] sm:$0xff] %v1499_v27   ;;  %1659 = vst [vmem:[%s1983_s6 + $0x98] sm:$0xff] %v1579_v28   ;;  %v1494_v35 = vpack.c.bf16 %v837_v29, %v836_v23  ;;  %v1574_v36 = vpack.c.bf16 %v869_v30, %v868_v24  ;;  %v610_v37 = vadd.f32 %v1968_v38, %v609_v33 }
  0xf4   : > { %v738_v39 = vadd.f32 %v1968_v38, %v737_v34  ;;  %v1730_v40 = vpop.f32.mrf.mxu0  ;;  %v1762_v41 = vpop.f32.mrf.mxu1  ;;  %v842_v44 = vmax.f32 %v618_v31, 0.0  ;;  %v874_v45 = vmax.f32 %v746_v32, 0.0 }
  0xf5   : > { %1642 = vst [vmem:[%s1983_s6 + $0x10] sm:$0xff] %v1494_v35   ;;  %1658 = vst [vmem:[%s1983_s6 + $0x90] sm:$0xff] %v1574_v36   ;;  %v621_v42 = vadd.f32 %v1730_v40, %v1968_v38  ;;  %v749_v43 = vadd.f32 %v1762_v41, %v1968_v38  ;;  %v840_v52 = vmax.f32 %v610_v37, 0.0 }
  0xf6   : > { %v612_v46 = vpop.f32.mrf.mxu0  ;;  %v740_v47 = vpop.f32.mrf.mxu1  ;;  %v872_v53 = vmax.f32 %v738_v39, 0.0 }
  0xf7   : > { %v843_v48 = vmax.f32 %v621_v42, 0.0  ;;  %v875_v49 = vmax.f32 %v749_v43, 0.0  ;;  %v613_v50 = vadd.f32 %v1968_v38, %v612_v46  ;;  %v741_v51 = vadd.f32 %v1968_v38, %v740_v47 }
  0xf8   : > { %v1733_v54 = vpop.f32.mrf.mxu0  ;;  %v1765_v55 = vpop.f32.mrf.mxu1 }
  0xf9   : > { %v1509_v56 = vpack.c.bf16 %v843_v48, %v842_v44  ;;  %v1589_v57 = vpack.c.bf16 %v875_v49, %v874_v45  ;;  %v841_v58 = vmax.f32 %v613_v50, 0.0  ;;  %v873_v59 = vmax.f32 %v741_v51, 0.0 }
  0xfa   : > { %v634_v60 = vadd.f32 %v1733_v54, %v1968_v38  ;;  %v762_v61 = vadd.f32 %v1765_v55, %v1968_v38  ;;  %v625_v62 = vpop.f32.mrf.mxu0  ;;  %v753_v63 = vpop.f32.mrf.mxu1 }
  0xfb   : > { %1645 = vst [vmem:[%s1983_s6 + $0x28] sm:$0xff] %v1509_v56   ;;  %1661 = vst [vmem:[%s1983_s6 + $0xa8] sm:$0xff] %v1589_v57   ;;  %v1504_v0 = vpack.c.bf16 %v841_v58, %v840_v52  ;;  %v1584_v1 = vpack.c.bf16 %v873_v59, %v872_v53  ;;  %v626_v2 = vadd.f32 %v1968_v38, %v625_v62 }
  0xfc   : > { %v754_v3 = vadd.f32 %v1968_v38, %v753_v63  ;;  %v1734_v4 = vpop.f32.mrf.mxu0  ;;  %v1766_v5 = vpop.f32.mrf.mxu1  ;;  %v846_v8 = vmax.f32 %v634_v60, 0.0  ;;  %v878_v9 = vmax.f32 %v762_v61, 0.0 }
  0xfd   : > { %1644 = vst [vmem:[%s1983_s6 + $0x20] sm:$0xff] %v1504_v0   ;;  %1660 = vst [vmem:[%s1983_s6 + $0xa0] sm:$0xff] %v1584_v1   ;;  %v637_v6 = vadd.f32 %v1734_v4, %v1968_v38  ;;  %v765_v7 = vadd.f32 %v1766_v5, %v1968_v38  ;;  %v844_v16 = vmax.f32 %v626_v2, 0.0 }
  0xfe   : > { %v628_v10 = vpop.f32.mrf.mxu0  ;;  %v756_v11 = vpop.f32.mrf.mxu1  ;;  %v876_v17 = vmax.f32 %v754_v3, 0.0 }
  0xff   : > { %v847_v12 = vmax.f32 %v637_v6, 0.0  ;;  %v879_v13 = vmax.f32 %v765_v7, 0.0  ;;  %v629_v14 = vadd.f32 %v1968_v38, %v628_v10  ;;  %v757_v15 = vadd.f32 %v1968_v38, %v756_v11 }
 0x100   : > { %v1737_v18 = vpop.f32.mrf.mxu0  ;;  %v1769_v19 = vpop.f32.mrf.mxu1 }
 0x101   : > { %v1519_v20 = vpack.c.bf16 %v847_v12, %v846_v8  ;;  %v1599_v21 = vpack.c.bf16 %v879_v13, %v878_v9  ;;  %v845_v22 = vmax.f32 %v629_v14, 0.0  ;;  %v877_v23 = vmax.f32 %v757_v15, 0.0 }
 0x102   : > { %v650_v24 = vadd.f32 %v1737_v18, %v1968_v38  ;;  %v778_v25 = vadd.f32 %v1769_v19, %v1968_v38  ;;  %v641_v26 = vpop.f32.mrf.mxu0  ;;  %v769_v27 = vpop.f32.mrf.mxu1 }
 0x103   : > { %1647 = vst [vmem:[%s1983_s6 + $0x38] sm:$0xff] %v1519_v20   ;;  %1663 = vst [vmem:[%s1983_s6 + $0xb8] sm:$0xff] %v1599_v21   ;;  %v1514_v28 = vpack.c.bf16 %v845_v22, %v844_v16  ;;  %v1594_v29 = vpack.c.bf16 %v877_v23, %v876_v17  ;;  %v642_v30 = vadd.f32 %v1968_v38, %v641_v26 }
 0x104   : > { %v770_v31 = vadd.f32 %v1968_v38, %v769_v27  ;;  %v1738_v32 = vpop.f32.mrf.mxu0  ;;  %v1770_v33 = vpop.f32.mrf.mxu1  ;;  %v850_v36 = vmax.f32 %v650_v24, 0.0  ;;  %v882_v37 = vmax.f32 %v778_v25, 0.0 }
 0x105   : > { %1646 = vst [vmem:[%s1983_s6 + $0x30] sm:$0xff] %v1514_v28   ;;  %1662 = vst [vmem:[%s1983_s6 + $0xb0] sm:$0xff] %v1594_v29   ;;  %v653_v34 = vadd.f32 %v1738_v32, %v1968_v38  ;;  %v781_v35 = vadd.f32 %v1770_v33, %v1968_v38  ;;  %v848_v45 = vmax.f32 %v642_v30, 0.0 }
 0x106   : > { %v644_v39 = vpop.f32.mrf.mxu0  ;;  %v772_v40 = vpop.f32.mrf.mxu1  ;;  %v880_v46 = vmax.f32 %v770_v31, 0.0 }
 0x107   : > { %v851_v41 = vmax.f32 %v653_v34, 0.0  ;;  %v883_v42 = vmax.f32 %v781_v35, 0.0  ;;  %v645_v43 = vadd.f32 %v1968_v38, %v644_v39  ;;  %v773_v44 = vadd.f32 %v1968_v38, %v772_v40 }
 0x108   : > { %v1741_v47 = vpop.f32.mrf.mxu0  ;;  %v1773_v48 = vpop.f32.mrf.mxu1 }
 0x109   : > { %v1529_v49 = vpack.c.bf16 %v851_v41, %v850_v36  ;;  %v1609_v50 = vpack.c.bf16 %v883_v42, %v882_v37  ;;  %v849_v51 = vmax.f32 %v645_v43, 0.0  ;;  %v881_v52 = vmax.f32 %v773_v44, 0.0 }
 0x10a   : > { %v666_v53 = vadd.f32 %v1741_v47, %v1968_v38  ;;  %v794_v54 = vadd.f32 %v1773_v48, %v1968_v38  ;;  %v657_v55 = vpop.f32.mrf.mxu0  ;;  %v785_v56 = vpop.f32.mrf.mxu1 }
 0x10b   : > { %1649 = vst [vmem:[%s1983_s6 + $0x48] sm:$0xff] %v1529_v49   ;;  %1665 = vst [vmem:[%s1983_s6 + $0xc8] sm:$0xff] %v1609_v50   ;;  %v1524_v57 = vpack.c.bf16 %v849_v51, %v848_v45  ;;  %v1604_v58 = vpack.c.bf16 %v881_v52, %v880_v46  ;;  %v658_v59 = vadd.f32 %v1968_v38, %v657_v55 }
 0x10c   : > { %v786_v60 = vadd.f32 %v1968_v38, %v785_v56  ;;  %v1742_v61 = vpop.f32.mrf.mxu0  ;;  %v1774_v62 = vpop.f32.mrf.mxu1  ;;  %v854_v1 = vmax.f32 %v666_v53, 0.0  ;;  %v886_v2 = vmax.f32 %v794_v54, 0.0 }
 0x10d   : > { %1648 = vst [vmem:[%s1983_s6 + $0x40] sm:$0xff] %v1524_v57   ;;  %1664 = vst [vmem:[%s1983_s6 + $0xc0] sm:$0xff] %v1604_v58   ;;  %v669_v63 = vadd.f32 %v1742_v61, %v1968_v38  ;;  %v797_v0 = vadd.f32 %v1774_v62, %v1968_v38  ;;  %v852_v9 = vmax.f32 %v658_v59, 0.0 }
 0x10e   : > { %v660_v3 = vpop.f32.mrf.mxu0  ;;  %v788_v4 = vpop.f32.mrf.mxu1  ;;  %v884_v10 = vmax.f32 %v786_v60, 0.0 }
 0x10f   : > { %v855_v5 = vmax.f32 %v669_v63, 0.0  ;;  %v887_v6 = vmax.f32 %v797_v0, 0.0  ;;  %v661_v7 = vadd.f32 %v1968_v38, %v660_v3  ;;  %v789_v8 = vadd.f32 %v1968_v38, %v788_v4 }
 0x110   : > { %v1745_v11 = vpop.f32.mrf.mxu0  ;;  %v1777_v12 = vpop.f32.mrf.mxu1 }
 0x111   : > { %v1539_v13 = vpack.c.bf16 %v855_v5, %v854_v1  ;;  %v1619_v14 = vpack.c.bf16 %v887_v6, %v886_v2  ;;  %v853_v15 = vmax.f32 %v661_v7, 0.0  ;;  %v885_v16 = vmax.f32 %v789_v8, 0.0 }
 0x112   : > { %v682_v17 = vadd.f32 %v1745_v11, %v1968_v38  ;;  %v810_v18 = vadd.f32 %v1777_v12, %v1968_v38  ;;  %v673_v19 = vpop.f32.mrf.mxu0  ;;  %v801_v20 = vpop.f32.mrf.mxu1 }
 0x113   : > { %1651 = vst [vmem:[%s1983_s6 + $0x58] sm:$0xff] %v1539_v13   ;;  %1667 = vst [vmem:[%s1983_s6 + $0xd8] sm:$0xff] %v1619_v14   ;;  %v1534_v21 = vpack.c.bf16 %v853_v15, %v852_v9  ;;  %v1614_v22 = vpack.c.bf16 %v885_v16, %v884_v10  ;;  %v674_v23 = vadd.f32 %v1968_v38, %v673_v19 }
 0x114   : > { %v802_v24 = vadd.f32 %v1968_v38, %v801_v20  ;;  %v1746_v25 = vpop.f32.mrf.mxu0  ;;  %v1778_v26 = vpop.f32.mrf.mxu1  ;;  %v858_v29 = vmax.f32 %v682_v17, 0.0  ;;  %v890_v30 = vmax.f32 %v810_v18, 0.0 }
 0x115   : > { %1650 = vst [vmem:[%s1983_s6 + $0x50] sm:$0xff] %v1534_v21   ;;  %1666 = vst [vmem:[%s1983_s6 + $0xd0] sm:$0xff] %v1614_v22   ;;  %v685_v27 = vadd.f32 %v1746_v25, %v1968_v38  ;;  %v813_v28 = vadd.f32 %v1778_v26, %v1968_v38  ;;  %v856_v37 = vmax.f32 %v674_v23, 0.0 }
 0x116   : > { %v676_v31 = vpop.f32.mrf.mxu0  ;;  %v804_v32 = vpop.f32.mrf.mxu1  ;;  %v888_v39 = vmax.f32 %v802_v24, 0.0 }
 0x117   : > { %v859_v33 = vmax.f32 %v685_v27, 0.0  ;;  %v891_v34 = vmax.f32 %v813_v28, 0.0  ;;  %v677_v35 = vadd.f32 %v1968_v38, %v676_v31  ;;  %v805_v36 = vadd.f32 %v1968_v38, %v804_v32 }
 0x118   : > { %v1749_v40 = vpop.f32.mrf.mxu0  ;;  %v1781_v41 = vpop.f32.mrf.mxu1 }
 0x119   : > { %v1549_v42 = vpack.c.bf16 %v859_v33, %v858_v29  ;;  %v1629_v43 = vpack.c.bf16 %v891_v34, %v890_v30  ;;  %v857_v44 = vmax.f32 %v677_v35, 0.0  ;;  %v889_v45 = vmax.f32 %v805_v36, 0.0 }
 0x11a   : > { %v698_v46 = vadd.f32 %v1749_v40, %v1968_v38  ;;  %v826_v47 = vadd.f32 %v1781_v41, %v1968_v38  ;;  %v689_v48 = vpop.f32.mrf.mxu0  ;;  %v817_v49 = vpop.f32.mrf.mxu1 }
 0x11b   : > { %1653 = vst [vmem:[%s1983_s6 + $0x68] sm:$0xff] %v1549_v42   ;;  %1669 = vst [vmem:[%s1983_s6 + $0xe8] sm:$0xff] %v1629_v43   ;;  %v1544_v50 = vpack.c.bf16 %v857_v44, %v856_v37  ;;  %v1624_v51 = vpack.c.bf16 %v889_v45, %v888_v39  ;;  %v690_v52 = vadd.f32 %v1968_v38, %v689_v48 }
 0x11c   : > { %v818_v53 = vadd.f32 %v1968_v38, %v817_v49  ;;  %v1750_v54 = vpop.f32.mrf.mxu0  ;;  %v1782_v55 = vpop.f32.mrf.mxu1  ;;  %v862_v58 = vmax.f32 %v698_v46, 0.0  ;;  %v894_v59 = vmax.f32 %v826_v47, 0.0 }
 0x11d   : > { %1652 = vst [vmem:[%s1983_s6 + $0x60] sm:$0xff] %v1544_v50   ;;  %1668 = vst [vmem:[%s1983_s6 + $0xe0] sm:$0xff] %v1624_v51   ;;  %v701_v56 = vadd.f32 %v1750_v54, %v1968_v38  ;;  %v829_v57 = vadd.f32 %v1782_v55, %v1968_v38  ;;  %v860_v2 = vmax.f32 %v690_v52, 0.0 }
 0x11e   : > { %v692_v60 = vpop.f32.mrf.mxu0  ;;  %v820_v61 = vpop.f32.mrf.mxu1  ;;  %v892_v3 = vmax.f32 %v818_v53, 0.0 }
 0x11f   : > { %v863_v62 = vmax.f32 %v701_v56, 0.0  ;;  %v895_v63 = vmax.f32 %v829_v57, 0.0  ;;  %v693_v0 = vadd.f32 %v1968_v38, %v692_v60  ;;  %v821_v1 = vadd.f32 %v1968_v38, %v820_v61 }
 0x121   : > { %v1559_v4 = vpack.c.bf16 %v863_v62, %v862_v58  ;;  %v1639_v5 = vpack.c.bf16 %v895_v63, %v894_v59  ;;  %v861_v6 = vmax.f32 %v693_v0, 0.0  ;;  %v893_v7 = vmax.f32 %v821_v1, 0.0 }
 0x123   : > { %1655 = vst [vmem:[%s1983_s6 + $0x78] sm:$0xff] %v1559_v4   ;;  %1671 = vst [vmem:[%s1983_s6 + $0xf8] sm:$0xff] %v1639_v5   ;;  %v1554_v8 = vpack.c.bf16 %v861_v6, %v860_v2  ;;  %v1634_v9 = vpack.c.bf16 %v893_v7, %v892_v3 }
 0x125   : > { %1654 = vst [vmem:[%s1983_s6 + $0x70] sm:$0xff] %v1554_v8   ;;  %1670 = vst [vmem:[%s1983_s6 + $0xf0] sm:$0xff] %v1634_v9  }
 0x126 PF: > { %s13_s12 = sadd.s32 1, %s1846_s12  }
 0x127   : > { %p10_p4 = scmp.ge.s32.totalorder %s13_s12, 18  }
 0x129   :  { %12 = sbr.rel (!%p10_p4) target bundleno = 1 (0x1), region = 62 }

// kernel: segment_net_forward.31
= control target key start
LH: loop header
LB: loop body
LE: loop exit
PB: predicated region body
PF: predicated region fallthrough
CT: control target
= control target key end

     0   :  { %s1164_s12 = smov 0   ;;  %s1389_s0 = inlined_call_operand.vmem [shape: bf16[8192,8], index: 0, kind: input, shape index: {}]   ;;  %s1390_s1 = inlined_call_operand.vmem [shape: bf16[8,128], index: 1, kind: input, shape index: {}]   ;;  %s1391_s2 = inlined_call_operand.vmem [shape: f32[1,128], index: 2, kind: input, shape index: {}]   ;;  %s1392_s3 = inlined_call_operand.vmem [shape: f32[8192,128], index: 3, kind: output, shape index: {}]  }
   0x1 LB: > { %s917_s13 = sadd.s32 4294967295, %s1142_s12   ;;  %p921_p0 = scmp.ge.s32.totalorder %s1142_s12, 1  ;;  %s1142_s12 = sphi %s1164_s12, %s13_s12  }
   0x2   : > { %p138_p1 = scmp.lt.s32.totalorder %s1142_s12, 17 }
   0x4   : > { %p139_p2 = pnand %p921_p0, %p138_p1 }
   0x5   : > { %s922_s16 = sshll.u32 (!%p139_p2), %s917_s13, 6 }
   0x6   : > { %142 = sbr.rel (%p139_p2) target bundleno = 275 (0x113), region = 32  ;;  %p163_p3 = scmp.lt.s32.totalorder (!%p139_p2), %s922_s16, 1023 }
   0xb   : > { %v239_v0 = vld [vmem:[%s1390_s1] sm:$0xf]  ;;  %vm504_vm0 = vcmask 1043456   ;;  %s1394_s16 = smov (!%p163_p3, %s922_s16), 1023  ;;  %vm407_vm1 = vcmask 64512  }
   0xc   : > { %1094 = vmatprep.subr.msk.bf16.mxu0 %vm504_vm0, %v239_v0  ;;  %1095 = vmatprep.subr.msk.bf16.mxu1 %vm504_vm0, %v239_v0  ;;  %v506_v1 = vsel %vm504_vm0, %v239_v0, 0  ;;  %s923_s17 = sshll.u32 %s1394_s16, 2  ;;  %s925_s21 = sshll.u32 %s1394_s16, 3  ;;  %v1251_v34 = vld [vmem:[%s1391_s2] ss:$0 sm:$0xff] }
   0xd   : > { %1027 = vmatpush3.bf16.msra.mxu0 %v506_v1  ;;  %1093 = vmatpush3.bf16.msra.mxu1 %v506_v1  ;;  %s1181_s20 = scalar_lea.vmem %s1389_s0, %s923_s17  ;;  %s1256_s26 = scalar_lea.vmem %s1392_s3, %s925_s21 }
   0xe   : > { %v1104_v2 = vld [vmem:[%s1181_s20] sm:$0xff]   ;;  %v1106_v4 = vld [vmem:[%s1181_s20 + $0x8] sm:$0xff]   ;;  %v1108_v6 = vld [vmem:[%s1181_s20 + $0x10] sm:$0xff]  }
   0xf   : > { %v1105_v3 = vld [vmem:[%s1181_s20 + $0x80] sm:$0xff]   ;;  %1028 = vmatprep.mubr.msk.bf16.mxu0 %vm407_vm1, %v1104_v2  ;;  %v1107_v5 = vld [vmem:[%s1181_s20 + $0x88] sm:$0xff]   ;;  %v1109_v7 = vld [vmem:[%s1181_s20 + $0x90] sm:$0xff]  }
  0x10   : > { %1060 = vmatprep.mubr.msk.bf16.mxu1 %vm407_vm1, %v1105_v3  ;;  %1029 = vmatmul.mubr.msk.bf16.vlgmr.msra.gmra.mxu0 %vm407_vm1, %v1106_v4  ;;  %v1110_v8 = vld [vmem:[%s1181_s20 + $0x18] sm:$0xff]   ;;  %v1112_v10 = vld [vmem:[%s1181_s20 + $0x20] sm:$0xff]   ;;  %v1114_v12 = vld [vmem:[%s1181_s20 + $0x28] sm:$0xff]  }
  0x11   : > { %1061 = vmatmul.mubr.msk.bf16.vlgmr.msra.gmra.mxu1 %vm407_vm1, %v1107_v5  ;;  %1032 = vmatprep.mubr.msk.bf16.mxu0 %vm407_vm1, %v1108_v6  ;;  %v1111_v9 = vld [vmem:[%s1181_s20 + $0x98] sm:$0xff]   ;;  %v1113_v11 = vld [vmem:[%s1181_s20 + $0xa0] sm:$0xff]   ;;  %v1115_v13 = vld [vmem:[%s1181_s20 + $0xa8] sm:$0xff]  }
  0x12   : > { %1064 = vmatprep.mubr.msk.bf16.mxu1 %vm407_vm1, %v1109_v7  ;;  %v1116_v14 = vld [vmem:[%s1181_s20 + $0x30] sm:$0xff]   ;;  %v1118_v16 = vld [vmem:[%s1181_s20 + $0x38] sm:$0xff]   ;;  %v1120_v18 = vld [vmem:[%s1181_s20 + $0x40] sm:$0xff]  }
  0x13   : > { %v1117_v15 = vld [vmem:[%s1181_s20 + $0xb0] sm:$0xff]   ;;  %v1119_v17 = vld [vmem:[%s1181_s20 + $0xb8] sm:$0xff]   ;;  %v1121_v19 = vld [vmem:[%s1181_s20 + $0xc0] sm:$0xff]  }
  0x14   : > { %v1122_v20 = vld [vmem:[%s1181_s20 + $0x48] sm:$0xff]   ;;  %v1124_v22 = vld [vmem:[%s1181_s20 + $0x50] sm:$0xff]   ;;  %v1126_v24 = vld [vmem:[%s1181_s20 + $0x58] sm:$0xff]  }
  0x15   : > { %v1123_v21 = vld [vmem:[%s1181_s20 + $0xc8] sm:$0xff]   ;;  %v1125_v23 = vld [vmem:[%s1181_s20 + $0xd0] sm:$0xff]   ;;  %v1127_v25 = vld [vmem:[%s1181_s20 + $0xd8] sm:$0xff]  }
  0x16   : > { %v1128_v26 = vld [vmem:[%s1181_s20 + $0x60] sm:$0xff]   ;;  %v1130_v28 = vld [vmem:[%s1181_s20 + $0x68] sm:$0xff]   ;;  %v1132_v30 = vld [vmem:[%s1181_s20 + $0x70] sm:$0xff]  }
  0x17   : > { %v1129_v27 = vld [vmem:[%s1181_s20 + $0xe0] sm:$0xff]   ;;  %v1131_v29 = vld [vmem:[%s1181_s20 + $0xe8] sm:$0xff]   ;;  %v1133_v31 = vld [vmem:[%s1181_s20 + $0xf0] sm:$0xff]  }
  0x18   : > { %1033 = vmatmul.mubr.msk.bf16.gmra.mxu0 %vm407_vm1, %v1110_v8  ;;  %v1134_v32 = vld [vmem:[%s1181_s20 + $0x78] sm:$0xff]  }
  0x19   : > { %1065 = vmatmul.mubr.msk.bf16.gmra.mxu1 %vm407_vm1, %v1111_v9  ;;  %1036 = vmatprep.mubr.msk.bf16.mxu0 %vm407_vm1, %v1112_v10  ;;  %v1135_v33 = vld [vmem:[%s1181_s20 + $0xf8] sm:$0xff]  }
  0x1a   : > { %1068 = vmatprep.mubr.msk.bf16.mxu1 %vm407_vm1, %v1113_v11 }
  0x20   : > { %1037 = vmatmul.mubr.msk.bf16.gmra.mxu0 %vm407_vm1, %v1114_v12 }
  0x21   : > { %1069 = vmatmul.mubr.msk.bf16.gmra.mxu1 %vm407_vm1, %v1115_v13  ;;  %1040 = vmatprep.mubr.msk.bf16.mxu0 %vm407_vm1, %v1116_v14 }
  0x22   : > { %1072 = vmatprep.mubr.msk.bf16.mxu1 %vm407_vm1, %v1117_v15 }
  0x28   : > { %1041 = vmatmul.mubr.msk.bf16.gmra.mxu0 %vm407_vm1, %v1118_v16 }
  0x29   : > { %1073 = vmatmul.mubr.msk.bf16.gmra.mxu1 %vm407_vm1, %v1119_v17  ;;  %1044 = vmatprep.mubr.msk.bf16.mxu0 %vm407_vm1, %v1120_v18 }
  0x2a   : > { %1076 = vmatprep.mubr.msk.bf16.mxu1 %vm407_vm1, %v1121_v19 }
  0x30   : > { %1045 = vmatmul.mubr.msk.bf16.gmra.mxu0 %vm407_vm1, %v1122_v20 }
  0x31   : > { %1077 = vmatmul.mubr.msk.bf16.gmra.mxu1 %vm407_vm1, %v1123_v21  ;;  %1048 = vmatprep.mubr.msk.bf16.mxu0 %vm407_vm1, %v1124_v22 }
  0x32   : > { %1080 = vmatprep.mubr.msk.bf16.mxu1 %vm407_vm1, %v1125_v23 }
  0x38   : > { %1049 = vmatmul.mubr.msk.bf16.gmra.mxu0 %vm407_vm1, %v1126_v24 }
  0x39   : > { %1081 = vmatmul.mubr.msk.bf16.gmra.mxu1 %vm407_vm1, %v1127_v25  ;;  %1052 = vmatprep.mubr.msk.bf16.mxu0 %vm407_vm1, %v1128_v26 }
  0x3a   : > { %1084 = vmatprep.mubr.msk.bf16.mxu1 %vm407_vm1, %v1129_v27 }
  0x40   : > { %1053 = vmatmul.mubr.msk.bf16.gmra.mxu0 %vm407_vm1, %v1130_v28 }
  0x41   : > { %1085 = vmatmul.mubr.msk.bf16.gmra.mxu1 %vm407_vm1, %v1131_v29  ;;  %1056 = vmatprep.mubr.msk.bf16.mxu0 %vm407_vm1, %v1132_v30 }
  0x42   : > { %1088 = vmatprep.mubr.msk.bf16.mxu1 %vm407_vm1, %v1133_v31 }
  0x48   : > { %1057 = vmatmul.mubr.msk.bf16.gmra.mxu0 %vm407_vm1, %v1134_v32 }
  0x49   : > { %1089 = vmatmul.mubr.msk.bf16.gmra.mxu1 %vm407_vm1, %v1135_v33 }
  0xd0   : > { %v1030_v35 = vpop.f32.mrf.mxu0 }
  0xd1   : > { %v551_v36 = vadd.f32 %v1030_v35, %v1251_v34  ;;  %v1062_v37 = vpop.f32.mrf.mxu1 }
  0xd2   : > { %v679_v38 = vadd.f32 %v1062_v37, %v1251_v34  ;;  %v542_v39 = vpop.f32.mrf.mxu0 }
  0xd3   : > { %799 = vst [vmem:[%s1256_s26 + $0x10] sm:$0xff] %v551_v36  ;;  %v543_v40 = vadd.f32 %v1251_v34, %v542_v39  ;;  %v670_v41 = vpop.f32.mrf.mxu1 }
  0xd4   : > { %831 = vst [vmem:[%s1256_s26 + $0x110] sm:$0xff] %v679_v38  ;;  %v671_v42 = vadd.f32 %v1251_v34, %v670_v41  ;;  %v1031_v43 = vpop.f32.mrf.mxu0 }
  0xd5   : > { %797 = vst [vmem:[%s1256_s26] sm:$0xff] %v543_v40  ;;  %v554_v44 = vadd.f32 %v1031_v43, %v1251_v34  ;;  %v1063_v45 = vpop.f32.mrf.mxu1 }
  0xd6   : > { %829 = vst [vmem:[%s1256_s26 + $0x100] sm:$0xff] %v671_v42  ;;  %v682_v46 = vadd.f32 %v1063_v45, %v1251_v34  ;;  %v545_v47 = vpop.f32.mrf.mxu0 }
  0xd7   : > { %800 = vst [vmem:[%s1256_s26 + $0x18] sm:$0xff] %v554_v44  ;;  %v546_v48 = vadd.f32 %v1251_v34, %v545_v47  ;;  %v673_v49 = vpop.f32.mrf.mxu1 }
  0xd8   : > { %832 = vst [vmem:[%s1256_s26 + $0x118] sm:$0xff] %v682_v46  ;;  %v674_v50 = vadd.f32 %v1251_v34, %v673_v49  ;;  %v1034_v51 = vpop.f32.mrf.mxu0 }
  0xd9   : > { %798 = vst [vmem:[%s1256_s26 + $0x8] sm:$0xff] %v546_v48  ;;  %v567_v52 = vadd.f32 %v1034_v51, %v1251_v34  ;;  %v1066_v53 = vpop.f32.mrf.mxu1 }
  0xda   : > { %830 = vst [vmem:[%s1256_s26 + $0x108] sm:$0xff] %v674_v50  ;;  %v695_v54 = vadd.f32 %v1066_v53, %v1251_v34  ;;  %v558_v55 = vpop.f32.mrf.mxu0 }
  0xdb   : > { %803 = vst [vmem:[%s1256_s26 + $0x30] sm:$0xff] %v567_v52  ;;  %v559_v56 = vadd.f32 %v1251_v34, %v558_v55  ;;  %v686_v57 = vpop.f32.mrf.mxu1 }
  0xdc   : > { %835 = vst [vmem:[%s1256_s26 + $0x130] sm:$0xff] %v695_v54  ;;  %v687_v58 = vadd.f32 %v1251_v34, %v686_v57  ;;  %v1035_v59 = vpop.f32.mrf.mxu0 }
  0xdd   : > { %801 = vst [vmem:[%s1256_s26 + $0x20] sm:$0xff] %v559_v56  ;;  %v570_v60 = vadd.f32 %v1035_v59, %v1251_v34  ;;  %v1067_v61 = vpop.f32.mrf.mxu1 }
  0xde   : > { %833 = vst [vmem:[%s1256_s26 + $0x120] sm:$0xff] %v687_v58  ;;  %v698_v62 = vadd.f32 %v1067_v61, %v1251_v34  ;;  %v561_v63 = vpop.f32.mrf.mxu0 }
  0xdf   : > { %804 = vst [vmem:[%s1256_s26 + $0x38] sm:$0xff] %v570_v60  ;;  %v562_v0 = vadd.f32 %v1251_v34, %v561_v63  ;;  %v689_v1 = vpop.f32.mrf.mxu1 }
  0xe0   : > { %836 = vst [vmem:[%s1256_s26 + $0x138] sm:$0xff] %v698_v62  ;;  %v690_v2 = vadd.f32 %v1251_v34, %v689_v1  ;;  %v1038_v3 = vpop.f32.mrf.mxu0 }
  0xe1   : > { %802 = vst [vmem:[%s1256_s26 + $0x28] sm:$0xff] %v562_v0  ;;  %v583_v4 = vadd.f32 %v1038_v3, %v1251_v34  ;;  %v1070_v5 = vpop.f32.mrf.mxu1 }
  0xe2   : > { %834 = vst [vmem:[%s1256_s26 + $0x128] sm:$0xff] %v690_v2  ;;  %v711_v6 = vadd.f32 %v1070_v5, %v1251_v34  ;;  %v574_v7 = vpop.f32.mrf.mxu0 }
  0xe3   : > { %807 = vst [vmem:[%s1256_s26 + $0x50] sm:$0xff] %v583_v4  ;;  %v575_v8 = vadd.f32 %v1251_v34, %v574_v7  ;;  %v702_v9 = vpop.f32.mrf.mxu1 }
  0xe4   : > { %839 = vst [vmem:[%s1256_s26 + $0x150] sm:$0xff] %v711_v6  ;;  %v703_v10 = vadd.f32 %v1251_v34, %v702_v9  ;;  %v1039_v11 = vpop.f32.mrf.mxu0 }
  0xe5   : > { %805 = vst [vmem:[%s1256_s26 + $0x40] sm:$0xff] %v575_v8  ;;  %v586_v12 = vadd.f32 %v1039_v11, %v1251_v34  ;;  %v1071_v13 = vpop.f32.mrf.mxu1 }
  0xe6   : > { %837 = vst [vmem:[%s1256_s26 + $0x140] sm:$0xff] %v703_v10  ;;  %v714_v14 = vadd.f32 %v1071_v13, %v1251_v34  ;;  %v577_v15 = vpop.f32.mrf.mxu0 }
  0xe7   : > { %808 = vst [vmem:[%s1256_s26 + $0x58] sm:$0xff] %v586_v12  ;;  %v578_v16 = vadd.f32 %v1251_v34, %v577_v15  ;;  %v705_v17 = vpop.f32.mrf.mxu1 }
  0xe8   : > { %840 = vst [vmem:[%s1256_s26 + $0x158] sm:$0xff] %v714_v14  ;;  %v706_v18 = vadd.f32 %v1251_v34, %v705_v17  ;;  %v1042_v19 = vpop.f32.mrf.mxu0 }
  0xe9   : > { %806 = vst [vmem:[%s1256_s26 + $0x48] sm:$0xff] %v578_v16  ;;  %v599_v20 = vadd.f32 %v1042_v19, %v1251_v34  ;;  %v1074_v21 = vpop.f32.mrf.mxu1 }
  0xea   : > { %838 = vst [vmem:[%s1256_s26 + $0x148] sm:$0xff] %v706_v18  ;;  %v727_v22 = vadd.f32 %v1074_v21, %v1251_v34  ;;  %v590_v23 = vpop.f32.mrf.mxu0 }
  0xeb   : > { %811 = vst [vmem:[%s1256_s26 + $0x70] sm:$0xff] %v599_v20  ;;  %v591_v24 = vadd.f32 %v1251_v34, %v590_v23  ;;  %v718_v25 = vpop.f32.mrf.mxu1 }
  0xec   : > { %843 = vst [vmem:[%s1256_s26 + $0x170] sm:$0xff] %v727_v22  ;;  %v719_v26 = vadd.f32 %v1251_v34, %v718_v25  ;;  %v1043_v27 = vpop.f32.mrf.mxu0 }
  0xed   : > { %809 = vst [vmem:[%s1256_s26 + $0x60] sm:$0xff] %v591_v24  ;;  %v602_v28 = vadd.f32 %v1043_v27, %v1251_v34  ;;  %v1075_v29 = vpop.f32.mrf.mxu1 }
  0xee   : > { %841 = vst [vmem:[%s1256_s26 + $0x160] sm:$0xff] %v719_v26  ;;  %v730_v30 = vadd.f32 %v1075_v29, %v1251_v34  ;;  %v593_v31 = vpop.f32.mrf.mxu0 }
  0xef   : > { %812 = vst [vmem:[%s1256_s26 + $0x78] sm:$0xff] %v602_v28  ;;  %v594_v32 = vadd.f32 %v1251_v34, %v593_v31  ;;  %v721_v33 = vpop.f32.mrf.mxu1 }
  0xf0   : > { %844 = vst [vmem:[%s1256_s26 + $0x178] sm:$0xff] %v730_v30  ;;  %v722_v35 = vadd.f32 %v1251_v34, %v721_v33  ;;  %v1046_v36 = vpop.f32.mrf.mxu0 }
  0xf1   : > { %810 = vst [vmem:[%s1256_s26 + $0x68] sm:$0xff] %v594_v32  ;;  %v615_v37 = vadd.f32 %v1046_v36, %v1251_v34  ;;  %v1078_v38 = vpop.f32.mrf.mxu1 }
  0xf2   : > { %842 = vst [vmem:[%s1256_s26 + $0x168] sm:$0xff] %v722_v35  ;;  %v743_v39 = vadd.f32 %v1078_v38, %v1251_v34  ;;  %v606_v40 = vpop.f32.mrf.mxu0 }
  0xf3   : > { %815 = vst [vmem:[%s1256_s26 + $0x90] sm:$0xff] %v615_v37  ;;  %v607_v41 = vadd.f32 %v1251_v34, %v606_v40  ;;  %v734_v42 = vpop.f32.mrf.mxu1 }
  0xf4   : > { %847 = vst [vmem:[%s1256_s26 + $0x190] sm:$0xff] %v743_v39  ;;  %v735_v43 = vadd.f32 %v1251_v34, %v734_v42  ;;  %v1047_v44 = vpop.f32.mrf.mxu0 }
  0xf5   : > { %813 = vst [vmem:[%s1256_s26 + $0x80] sm:$0xff] %v607_v41  ;;  %v618_v45 = vadd.f32 %v1047_v44, %v1251_v34  ;;  %v1079_v46 = vpop.f32.mrf.mxu1 }
  0xf6   : > { %845 = vst [vmem:[%s1256_s26 + $0x180] sm:$0xff] %v735_v43  ;;  %v746_v47 = vadd.f32 %v1079_v46, %v1251_v34  ;;  %v609_v48 = vpop.f32.mrf.mxu0 }
  0xf7   : > { %816 = vst [vmem:[%s1256_s26 + $0x98] sm:$0xff] %v618_v45  ;;  %v610_v49 = vadd.f32 %v1251_v34, %v609_v48  ;;  %v737_v50 = vpop.f32.mrf.mxu1 }
  0xf8   : > { %848 = vst [vmem:[%s1256_s26 + $0x198] sm:$0xff] %v746_v47  ;;  %v738_v51 = vadd.f32 %v1251_v34, %v737_v50  ;;  %v1050_v52 = vpop.f32.mrf.mxu0 }
  0xf9   : > { %814 = vst [vmem:[%s1256_s26 + $0x88] sm:$0xff] %v610_v49  ;;  %v631_v53 = vadd.f32 %v1050_v52, %v1251_v34  ;;  %v1082_v54 = vpop.f32.mrf.mxu1 }
  0xfa   : > { %846 = vst [vmem:[%s1256_s26 + $0x188] sm:$0xff] %v738_v51  ;;  %v759_v55 = vadd.f32 %v1082_v54, %v1251_v34  ;;  %v622_v56 = vpop.f32.mrf.mxu0 }
  0xfb   : > { %819 = vst [vmem:[%s1256_s26 + $0xb0] sm:$0xff] %v631_v53  ;;  %v623_v57 = vadd.f32 %v1251_v34, %v622_v56  ;;  %v750_v58 = vpop.f32.mrf.mxu1 }
  0xfc   : > { %851 = vst [vmem:[%s1256_s26 + $0x1b0] sm:$0xff] %v759_v55  ;;  %v751_v59 = vadd.f32 %v1251_v34, %v750_v58  ;;  %v1051_v60 = vpop.f32.mrf.mxu0 }
  0xfd   : > { %817 = vst [vmem:[%s1256_s26 + $0xa0] sm:$0xff] %v623_v57  ;;  %v634_v61 = vadd.f32 %v1051_v60, %v1251_v34  ;;  %v1083_v62 = vpop.f32.mrf.mxu1 }
  0xfe   : > { %849 = vst [vmem:[%s1256_s26 + $0x1a0] sm:$0xff] %v751_v59  ;;  %v762_v63 = vadd.f32 %v1083_v62, %v1251_v34  ;;  %v625_v0 = vpop.f32.mrf.mxu0 }
  0xff   : > { %820 = vst [vmem:[%s1256_s26 + $0xb8] sm:$0xff] %v634_v61  ;;  %v626_v1 = vadd.f32 %v1251_v34, %v625_v0  ;;  %v753_v2 = vpop.f32.mrf.mxu1 }
 0x100   : > { %852 = vst [vmem:[%s1256_s26 + $0x1b8] sm:$0xff] %v762_v63  ;;  %v754_v3 = vadd.f32 %v1251_v34, %v753_v2  ;;  %v1054_v4 = vpop.f32.mrf.mxu0 }
 0x101   : > { %818 = vst [vmem:[%s1256_s26 + $0xa8] sm:$0xff] %v626_v1  ;;  %v647_v5 = vadd.f32 %v1054_v4, %v1251_v34  ;;  %v1086_v6 = vpop.f32.mrf.mxu1 }
 0x102   : > { %850 = vst [vmem:[%s1256_s26 + $0x1a8] sm:$0xff] %v754_v3  ;;  %v775_v7 = vadd.f32 %v1086_v6, %v1251_v34  ;;  %v638_v8 = vpop.f32.mrf.mxu0 }
 0x103   : > { %823 = vst [vmem:[%s1256_s26 + $0xd0] sm:$0xff] %v647_v5  ;;  %v639_v9 = vadd.f32 %v1251_v34, %v638_v8  ;;  %v766_v10 = vpop.f32.mrf.mxu1 }
 0x104   : > { %855 = vst [vmem:[%s1256_s26 + $0x1d0] sm:$0xff] %v775_v7  ;;  %v767_v11 = vadd.f32 %v1251_v34, %v766_v10  ;;  %v1055_v12 = vpop.f32.mrf.mxu0 }
 0x105   : > { %821 = vst [vmem:[%s1256_s26 + $0xc0] sm:$0xff] %v639_v9  ;;  %v650_v13 = vadd.f32 %v1055_v12, %v1251_v34  ;;  %v1087_v14 = vpop.f32.mrf.mxu1 }
 0x106   : > { %853 = vst [vmem:[%s1256_s26 + $0x1c0] sm:$0xff] %v767_v11  ;;  %v778_v15 = vadd.f32 %v1087_v14, %v1251_v34  ;;  %v641_v16 = vpop.f32.mrf.mxu0 }
 0x107   : > { %824 = vst [vmem:[%s1256_s26 + $0xd8] sm:$0xff] %v650_v13  ;;  %v642_v17 = vadd.f32 %v1251_v34, %v641_v16  ;;  %v769_v18 = vpop.f32.mrf.mxu1 }
 0x108   : > { %856 = vst [vmem:[%s1256_s26 + $0x1d8] sm:$0xff] %v778_v15  ;;  %v770_v19 = vadd.f32 %v1251_v34, %v769_v18  ;;  %v1058_v20 = vpop.f32.mrf.mxu0 }
 0x109   : > { %822 = vst [vmem:[%s1256_s26 + $0xc8] sm:$0xff] %v642_v17  ;;  %v663_v21 = vadd.f32 %v1058_v20, %v1251_v34  ;;  %v1090_v22 = vpop.f32.mrf.mxu1 }
 0x10a   : > { %854 = vst [vmem:[%s1256_s26 + $0x1c8] sm:$0xff] %v770_v19  ;;  %v791_v23 = vadd.f32 %v1090_v22, %v1251_v34  ;;  %v654_v24 = vpop.f32.mrf.mxu0 }
 0x10b   : > { %827 = vst [vmem:[%s1256_s26 + $0xf0] sm:$0xff] %v663_v21  ;;  %v655_v25 = vadd.f32 %v1251_v34, %v654_v24  ;;  %v782_v26 = vpop.f32.mrf.mxu1 }
 0x10c   : > { %859 = vst [vmem:[%s1256_s26 + $0x1f0] sm:$0xff] %v791_v23  ;;  %v783_v27 = vadd.f32 %v1251_v34, %v782_v26  ;;  %v1059_v28 = vpop.f32.mrf.mxu0 }
 0x10d   : > { %825 = vst [vmem:[%s1256_s26 + $0xe0] sm:$0xff] %v655_v25  ;;  %v666_v29 = vadd.f32 %v1059_v28, %v1251_v34  ;;  %v1091_v30 = vpop.f32.mrf.mxu1 }
 0x10e   : > { %857 = vst [vmem:[%s1256_s26 + $0x1e0] sm:$0xff] %v783_v27  ;;  %v794_v31 = vadd.f32 %v1091_v30, %v1251_v34  ;;  %v657_v32 = vpop.f32.mrf.mxu0 }
 0x10f   : > { %828 = vst [vmem:[%s1256_s26 + $0xf8] sm:$0xff] %v666_v29  ;;  %v658_v33 = vadd.f32 %v1251_v34, %v657_v32  ;;  %v785_v35 = vpop.f32.mrf.mxu1 }
 0x110   : > { %860 = vst [vmem:[%s1256_s26 + $0x1f8] sm:$0xff] %v794_v31  ;;  %v786_v36 = vadd.f32 %v1251_v34, %v785_v35 }
 0x111   : > { %826 = vst [vmem:[%s1256_s26 + $0xe8] sm:$0xff] %v658_v33 }
 0x112   : > { %858 = vst [vmem:[%s1256_s26 + $0x1e8] sm:$0xff] %v786_v36 }
 0x113 PF: > { %s13_s12 = sadd.s32 1, %s1142_s12  }
 0x114   : > { %p10_p4 = scmp.ge.s32.totalorder %s13_s12, 18  }
 0x116   :  { %12 = sbr.rel (!%p10_p4) target bundleno = 1 (0x1), region = 62 }

</bundles_post_ra>
